<compile_context>
chip_gen: v5e
topology: v5e:2x2
jax: 0.10.0
libtpu: 0.0.40
codegen_flags: <defaults>
</compile_context>

<pallas_src>
import functools

import jax
import jax.numpy as jnp
from jax.experimental import pallas as pl
from jax.experimental.pallas import tpu as pltpu

EPS = 1e-5
LRELU_SLOPE = 0.2


# ----------------------------- fused Pallas kernel --------------------------

def _disc_fused_kernel(x_ref, w0_ref, w1_ref, w2_ref, w3_ref, wl1_ref,
                       wl2h_ref, wl2y_ref, bl2_ref, y_ref,
                       g0_ref, bt0_ref, g1_ref, bt1_ref, g2_ref, bt2_ref,
                       g3_ref, bt3_ref, g1d_ref, bt1d_ref,
                       fm_ref, logit_ref, *, batch, h_in, kh):
    """Whole discriminator forward.  Rows are time-major: row = t*batch + b."""

    def bn_lrelu(y, g_ref, bt_ref):
        # Training-mode batch-norm (batch stats, biased variance) + LeakyReLU.
        mean = jnp.mean(y, axis=0, keepdims=True)
        var = jnp.mean(jnp.square(y - mean), axis=0, keepdims=True)
        z = (y - mean) * jax.lax.rsqrt(var + EPS) * g_ref[...] + bt_ref[...]
        return jnp.maximum(z, LRELU_SLOPE * z)      # slope < 1 => LeakyReLU

    def conv_time(h_prev, w_ref, l_in):
        # (kh,1) temporal conv = kh shifted-slice matmuls over time-major rows.
        l_out = l_in - kh + 1
        rows = l_out * batch
        acc = jnp.dot(h_prev[0:rows, :], w_ref[0],
                      preferred_element_type=jnp.float32)
        for tau in range(1, kh):
            acc = acc + jnp.dot(h_prev[tau * batch:tau * batch + rows, :],
                                w_ref[tau],
                                preferred_element_type=jnp.float32)
        return acc, l_out

    # ---- conv stack (biases dropped: cancelled by BN mean subtraction) ----
    h0_pre, l0 = conv_time(x_ref[...], w0_ref, h_in)     # (l0*B, 32)
    h0 = bn_lrelu(h0_pre, g0_ref, bt0_ref)
    fm_ref[...] = h0                                      # feature-map output

    h1_pre, l1 = conv_time(h0, w1_ref, l0)                # (l1*B, 64)
    h1 = bn_lrelu(h1_pre, g1_ref, bt1_ref)
    h2_pre, l2 = conv_time(h1, w2_ref, l1)                # (l2*B, 128)
    h2 = bn_lrelu(h2_pre, g2_ref, bt2_ref)
    h3_pre, l3 = conv_time(h2, w3_ref, l2)                # (l3*B, 256)
    h3 = bn_lrelu(h3_pre, g3_ref, bt3_ref)

    # ---- linear1 over NCHW channel-major flatten:
    #      h3_flat[b, c*l3 + t] == h3[t*batch + b, c]
    #      decomposed into l3 matmuls against the repacked bf16 weight. ----
    acc = jnp.dot(h3[0:batch, :].astype(wl1_ref.dtype), wl1_ref[0],
                  preferred_element_type=jnp.float32)
    for t in range(1, l3):
        acc = acc + jnp.dot(
            h3[t * batch:(t + 1) * batch, :].astype(wl1_ref.dtype),
            wl1_ref[t], preferred_element_type=jnp.float32)
    h4 = bn_lrelu(acc, g1d_ref, bt1d_ref)                 # (B, 1000)

    # ---- linear2 on concat([h4, y]) split into two matmuls.  Weights are
    #      zero-padded to 128 output lanes => lane-dense store (logit = lane 0).
    logits = (jnp.dot(h4, wl2h_ref[...], preferred_element_type=jnp.float32)
              + jnp.dot(y_ref[...], wl2y_ref[...],
                        preferred_element_type=jnp.float32)
              + bl2_ref[...])
    logit_ref[...] = logits                               # (B, 128)


# --------------------------------- wrapper -----------------------------------

def discriminator_forward(x, y_idx, params):
    """x: (B, 1, H, pitch_range) NCHW ; y_idx: (B,) int32 in [0, 25)."""
    B, _, H, P = x.shape
    kh = 4
    l0 = H - kh + 1
    l3 = l0 - 3 * (kh - 1)
    assert 256 * l3 == params["wl1"].shape[1], "linear1 input size mismatch"

    # Embedding lookup (tiny gather -- plain JAX glue before the fused kernel).
    y = params["emb"][y_idx].reshape(-1, 100).astype(jnp.float32)

    # Input repack: time-major rows (row = h*B + b), channels/pitch on lanes.
    x_tm = jnp.transpose(x[:, 0, :, :], (1, 0, 2)).reshape(H * B, P)
    x_tm = x_tm.astype(jnp.float32)

    # One-time weight repacking (tiny XLA ops, done once per call / per jit).
    # w0: (32,1,4,P) -> (4, P, 32) ; w1..w3: (Co,Ci,4,1) -> (4, Ci, Co)
    w0r = jnp.transpose(params["w0"][:, 0], (1, 2, 0)).astype(jnp.float32)
    w1r = jnp.transpose(params["w1"][:, :, :, 0], (2, 1, 0)).astype(jnp.float32)
    w2r = jnp.transpose(params["w2"][:, :, :, 0], (2, 1, 0)).astype(jnp.float32)
    w3r = jnp.transpose(params["w3"][:, :, :, 0], (2, 1, 0)).astype(jnp.float32)
    # wl1: (1000, 1024) -> (l3, 256, 1000) with wl1r[t, c, n] = wl1[n, c*l3+t]
    wl1r = (params["wl1"].T.reshape(256, l3, 1000)
            .transpose(1, 0, 2).astype(jnp.bfloat16))
    # wl2: (1, 1100) split into h-part / y-part, zero-padded to 128 lanes.
    wl2 = params["wl2"].astype(jnp.float32)
    wl2h = jnp.zeros((1000, 128), jnp.float32).at[:, 0].set(wl2[0, :1000])
    wl2y = jnp.zeros((100, 128), jnp.float32).at[:, 0].set(wl2[0, 1000:])
    bl2 = jnp.broadcast_to(params["bl2"].reshape(1, 1).astype(jnp.float32),
                           (1, 128))

    def bn_pair(name):
        return (params[f"g{name}"].reshape(1, -1).astype(jnp.float32),
                params[f"bt{name}"].reshape(1, -1).astype(jnp.float32))
    g0, bt0 = bn_pair("0")
    g1, bt1 = bn_pair("1")
    g2, bt2 = bn_pair("2")
    g3, bt3 = bn_pair("3")
    g1d, bt1d = bn_pair("1d")

    kernel = functools.partial(_disc_fused_kernel, batch=B, h_in=H, kh=kh)
    vmem = pl.BlockSpec(memory_space=pltpu.MemorySpace.VMEM)

    fm_mat, logit_wide = pl.pallas_call(
        kernel,
        out_shape=(
            jax.ShapeDtypeStruct((l0 * B, 32), jnp.float32),   # fm (time-major)
            jax.ShapeDtypeStruct((B, 128), jnp.float32),       # padded logits
        ),
        in_specs=[vmem] * 20,
        out_specs=(vmem, vmem),
    )(x_tm, w0r, w1r, w2r, w3r, wl1r, wl2h, wl2y, bl2, y,
      g0, bt0, g1, bt1, g2, bt2, g3, bt3, g1d, bt1d)

    # Tiny output transforms in the wrapper (2 and 832 elements).
    fm = fm_mat.reshape(l0, B, 32).transpose(1, 2, 0)[..., None]  # (B,32,l0,1)
    h5 = logit_wide[:, :1]                                        # (B, 1)
    h5_sigmoid = jax.nn.sigmoid(h5)
    return h5_sigmoid, h5, fm


# ------------------------------ params / main --------------------------------

def init_params(key, pitch_range):
    ks = jax.random.split(key, 8)

    def nrm(k, shape, scale=0.05):
        return (scale * jax.random.normal(k, shape)).astype(jnp.float32)

    p = {
        "w0": nrm(ks[0], (32, 1, 4, pitch_range)),  "b0": jnp.zeros((32,), jnp.float32),
        "w1": nrm(ks[1], (64, 32, 4, 1)),           "b1": jnp.zeros((64,), jnp.float32),
        "w2": nrm(ks[2], (128, 64, 4, 1)),          "b2": jnp.zeros((128,), jnp.float32),
        "w3": nrm(ks[3], (256, 128, 4, 1)),         "b3": jnp.zeros((256,), jnp.float32),
        "wl1": nrm(ks[4], (1000, 1024)),            "bl1": jnp.zeros((1000,), jnp.float32),
        "wl2": nrm(ks[5], (1, 1100)),               "bl2": jnp.zeros((1,), jnp.float32),
        "emb": nrm(ks[6], (25, 100), scale=1.0),
    }
    # NOTE: b0..b3 and bl1 are kept for parameter fidelity but are NOT used in
    # the forward pass -- a per-channel bias that feeds directly into a
    # training-mode BatchNorm is exactly cancelled by the mean subtraction.
    for name, c in [("0", 32), ("1", 64), ("2", 128), ("3", 256), ("1d", 1000)]:
        p[f"g{name}"] = jnp.ones((c,), jnp.float32)    # BN gamma (default 1)
        p[f"bt{name}"] = jnp.zeros((c,), jnp.float32)  # BN beta  (default 0)
    return p


if __name__ == "__main__":
    key = jax.random.PRNGKey(0)
    k_x, k_y, k_p = jax.random.split(key, 3)

    batch_size = 2
    pitch_range = 16
    # H must be 16 so 256 channels * 4 time steps == 1024 features for linear1.
    x = jax.random.normal(k_x, (batch_size, 1, 16, pitch_range), dtype=jnp.float32)
    y_idx = jax.random.randint(k_y, (batch_size,), 0, 25)

    params = init_params(k_p, pitch_range)

    fwd = jax.jit(discriminator_forward)
    h5_sigmoid, h5, fm = fwd(x, y_idx, params)
    jax.block_until_ready((h5_sigmoid, h5, fm))

    assert h5_sigmoid.shape == (batch_size, 1)
    assert h5.shape == (batch_size, 1)
    assert fm.shape == (batch_size, 32, 13, 1)
    assert bool(jnp.all(jnp.isfinite(h5)))
    assert bool(jnp.all((h5_sigmoid > 0.0) & (h5_sigmoid < 1.0)))
    print("KERNEL_OK")
</pallas_src>

<mosaic_0001>
module attributes {stable_mosaic.version = 11 : i64} {
  func.func @_disc_fused_kernel(%arg0: memref<32x16xf32, #tpu.memory_space<vmem>>, %arg1: memref<4x16x32xf32, #tpu.memory_space<vmem>>, %arg2: memref<4x32x64xf32, #tpu.memory_space<vmem>>, %arg3: memref<4x64x128xf32, #tpu.memory_space<vmem>>, %arg4: memref<4x128x256xf32, #tpu.memory_space<vmem>>, %arg5: memref<4x256x1000xbf16, #tpu.memory_space<vmem>>, %arg6: memref<1000x128xf32, #tpu.memory_space<vmem>>, %arg7: memref<100x128xf32, #tpu.memory_space<vmem>>, %arg8: memref<1x128xf32, #tpu.memory_space<vmem>>, %arg9: memref<2x100xf32, #tpu.memory_space<vmem>>, %arg10: memref<1x32xf32, #tpu.memory_space<vmem>>, %arg11: memref<1x32xf32, #tpu.memory_space<vmem>>, %arg12: memref<1x64xf32, #tpu.memory_space<vmem>>, %arg13: memref<1x64xf32, #tpu.memory_space<vmem>>, %arg14: memref<1x128xf32, #tpu.memory_space<vmem>>, %arg15: memref<1x128xf32, #tpu.memory_space<vmem>>, %arg16: memref<1x256xf32, #tpu.memory_space<vmem>>, %arg17: memref<1x256xf32, #tpu.memory_space<vmem>>, %arg18: memref<1x1000xf32, #tpu.memory_space<vmem>>, %arg19: memref<1x1000xf32, #tpu.memory_space<vmem>>, %arg20: memref<26x32xf32, #tpu.memory_space<vmem>>, %arg21: memref<2x128xf32, #tpu.memory_space<vmem>>) attributes {dimension_semantics = [], scalar_prefetch = 0 : i64, scratch_operands = 0 : i64, tpu.core_type = #tpu.core_type<tc>} {
    %c0 = arith.constant 0 : index
    %c0_0 = arith.constant 0 : index
    %0 = vector.load %arg0[%c0, %c0_0] : memref<32x16xf32, #tpu.memory_space<vmem>>, vector<32x16xf32>
    %1 = vector.extract_strided_slice %0 {offsets = [0, 0], sizes = [26, 16], strides = [1, 1]} : vector<32x16xf32> to vector<26x16xf32>
    %c0_1 = arith.constant 0 : index
    %c0_2 = arith.constant 0 : index
    %c0_3 = arith.constant 0 : index
    %2 = vector.load %arg1[%c0_1, %c0_2, %c0_3] : memref<4x16x32xf32, #tpu.memory_space<vmem>>, vector<1x16x32xf32>
    %3 = vector.shape_cast %2 : vector<1x16x32xf32> to vector<16x32xf32>
    %cst = arith.constant dense<0.000000e+00> : vector<26x32xf32>
    %4 = tpu.matmul %1, %3, %cst {dimension_numbers = #tpu.dot_dimension_numbers<[1], [0], [0], [1], [0, 0, 1, 1], [], []>} : vector<26x16xf32>, vector<16x32xf32>, vector<26x32xf32> -> vector<26x32xf32>
    %5 = vector.extract_strided_slice %0 {offsets = [2, 0], sizes = [26, 16], strides = [1, 1]} : vector<32x16xf32> to vector<26x16xf32>
    %c1 = arith.constant 1 : index
    %c0_4 = arith.constant 0 : index
    %c0_5 = arith.constant 0 : index
    %6 = vector.load %arg1[%c1, %c0_4, %c0_5] : memref<4x16x32xf32, #tpu.memory_space<vmem>>, vector<1x16x32xf32>
    %7 = vector.shape_cast %6 : vector<1x16x32xf32> to vector<16x32xf32>
    %cst_6 = arith.constant dense<0.000000e+00> : vector<26x32xf32>
    %8 = tpu.matmul %5, %7, %cst_6 {dimension_numbers = #tpu.dot_dimension_numbers<[1], [0], [0], [1], [0, 0, 1, 1], [], []>} : vector<26x16xf32>, vector<16x32xf32>, vector<26x32xf32> -> vector<26x32xf32>
    %9 = arith.addf %4, %8 : vector<26x32xf32>
    %10 = vector.extract_strided_slice %0 {offsets = [4, 0], sizes = [26, 16], strides = [1, 1]} : vector<32x16xf32> to vector<26x16xf32>
    %c2 = arith.constant 2 : index
    %c0_7 = arith.constant 0 : index
    %c0_8 = arith.constant 0 : index
    %11 = vector.load %arg1[%c2, %c0_7, %c0_8] : memref<4x16x32xf32, #tpu.memory_space<vmem>>, vector<1x16x32xf32>
    %12 = vector.shape_cast %11 : vector<1x16x32xf32> to vector<16x32xf32>
    %cst_9 = arith.constant dense<0.000000e+00> : vector<26x32xf32>
    %13 = tpu.matmul %10, %12, %cst_9 {dimension_numbers = #tpu.dot_dimension_numbers<[1], [0], [0], [1], [0, 0, 1, 1], [], []>} : vector<26x16xf32>, vector<16x32xf32>, vector<26x32xf32> -> vector<26x32xf32>
    %14 = arith.addf %9, %13 : vector<26x32xf32>
    %15 = vector.extract_strided_slice %0 {offsets = [6, 0], sizes = [26, 16], strides = [1, 1]} : vector<32x16xf32> to vector<26x16xf32>
    %c3 = arith.constant 3 : index
    %c0_10 = arith.constant 0 : index
    %c0_11 = arith.constant 0 : index
    %16 = vector.load %arg1[%c3, %c0_10, %c0_11] : memref<4x16x32xf32, #tpu.memory_space<vmem>>, vector<1x16x32xf32>
    %17 = vector.shape_cast %16 : vector<1x16x32xf32> to vector<16x32xf32>
    %cst_12 = arith.constant dense<0.000000e+00> : vector<26x32xf32>
    %18 = tpu.matmul %15, %17, %cst_12 {dimension_numbers = #tpu.dot_dimension_numbers<[1], [0], [0], [1], [0, 0, 1, 1], [], []>} : vector<26x16xf32>, vector<16x32xf32>, vector<26x32xf32> -> vector<26x32xf32>
    %19 = arith.addf %14, %18 : vector<26x32xf32>
    %cst_13 = arith.constant dense<0.000000e+00> : vector<32xf32>
    %20 = vector.multi_reduction <add>, %19, %cst_13 [0] : vector<26x32xf32> to vector<32xf32>
    %21 = vector.shape_cast %20 : vector<32xf32> to vector<1x32xf32>
    %cst_14 = arith.constant 2.600000e+01 : f32
    %22 = vector.broadcast %cst_14 : f32 to vector<1x32xf32>
    %23 = arith.divf %21, %22 : vector<1x32xf32>
    %24 = vector.broadcast %23 : vector<1x32xf32> to vector<26x32xf32>
    %25 = arith.subf %19, %24 : vector<26x32xf32>
    %26 = arith.mulf %25, %25 : vector<26x32xf32>
    %cst_15 = arith.constant dense<0.000000e+00> : vector<32xf32>
    %27 = vector.multi_reduction <add>, %26, %cst_15 [0] : vector<26x32xf32> to vector<32xf32>
    %28 = vector.shape_cast %27 : vector<32xf32> to vector<1x32xf32>
    %cst_16 = arith.constant 2.600000e+01 : f32
    %29 = vector.broadcast %cst_16 : f32 to vector<1x32xf32>
    %30 = arith.divf %28, %29 : vector<1x32xf32>
    %31 = vector.broadcast %23 : vector<1x32xf32> to vector<26x32xf32>
    %32 = arith.subf %19, %31 : vector<26x32xf32>
    %cst_17 = arith.constant 9.99999974E-6 : f32
    %33 = vector.broadcast %cst_17 : f32 to vector<1x32xf32>
    %34 = arith.addf %30, %33 : vector<1x32xf32>
    %35 = math.rsqrt %34 : vector<1x32xf32>
    %36 = vector.broadcast %35 : vector<1x32xf32> to vector<26x32xf32>
    %37 = arith.mulf %32, %36 : vector<26x32xf32>
    %c0_18 = arith.constant 0 : index
    %c0_19 = arith.constant 0 : index
    %38 = vector.load %arg10[%c0_18, %c0_19] : memref<1x32xf32, #tpu.memory_space<vmem>>, vector<1x32xf32>
    %39 = vector.broadcast %38 : vector<1x32xf32> to vector<26x32xf32>
    %40 = arith.mulf %37, %39 : vector<26x32xf32>
    %c0_20 = arith.constant 0 : index
    %c0_21 = arith.constant 0 : index
    %41 = vector.load %arg11[%c0_20, %c0_21] : memref<1x32xf32, #tpu.memory_space<vmem>>, vector<1x32xf32>
    %42 = vector.broadcast %41 : vector<1x32xf32> to vector<26x32xf32>
    %43 = arith.addf %40, %42 : vector<26x32xf32>
    %cst_22 = arith.constant 2.000000e-01 : f32
    %44 = vector.broadcast %cst_22 : f32 to vector<26x32xf32>
    %45 = arith.mulf %44, %43 : vector<26x32xf32>
    %46 = arith.maximumf %43, %45 : vector<26x32xf32>
    %c0_23 = arith.constant 0 : index
    %c0_24 = arith.constant 0 : index
    %47 = vector.load %arg20[%c0_23, %c0_24] : memref<26x32xf32, #tpu.memory_space<vmem>>, vector<26x32xf32>
    tpu.vector_store %arg20[%c0_23, %c0_24], %46 {strides = array<i32>} : memref<26x32xf32, #tpu.memory_space<vmem>>, vector<26x32xf32>,
    %48 = vector.extract_strided_slice %46 {offsets = [0, 0], sizes = [20, 32], strides = [1, 1]} : vector<26x32xf32> to vector<20x32xf32>
    %c0_25 = arith.constant 0 : index
    %c0_26 = arith.constant 0 : index
    %c0_27 = arith.constant 0 : index
    %49 = vector.load %arg2[%c0_25, %c0_26, %c0_27] : memref<4x32x64xf32, #tpu.memory_space<vmem>>, vector<1x32x64xf32>
    %50 = vector.shape_cast %49 : vector<1x32x64xf32> to vector<32x64xf32>
    %cst_28 = arith.constant dense<0.000000e+00> : vector<20x64xf32>
    %51 = tpu.matmul %48, %50, %cst_28 {dimension_numbers = #tpu.dot_dimension_numbers<[1], [0], [0], [1], [0, 0, 1, 1], [], []>} : vector<20x32xf32>, vector<32x64xf32>, vector<20x64xf32> -> vector<20x64xf32>
    %52 = vector.extract_strided_slice %46 {offsets = [2, 0], sizes = [20, 32], strides = [1, 1]} : vector<26x32xf32> to vector<20x32xf32>
    %c1_29 = arith.constant 1 : index
    %c0_30 = arith.constant 0 : index
    %c0_31 = arith.constant 0 : index
    %53 = vector.load %arg2[%c1_29, %c0_30, %c0_31] : memref<4x32x64xf32, #tpu.memory_space<vmem>>, vector<1x32x64xf32>
    %54 = vector.shape_cast %53 : vector<1x32x64xf32> to vector<32x64xf32>
    %cst_32 = arith.constant dense<0.000000e+00> : vector<20x64xf32>
    %55 = tpu.matmul %52, %54, %cst_32 {dimension_numbers = #tpu.dot_dimension_numbers<[1], [0], [0], [1], [0, 0, 1, 1], [], []>} : vector<20x32xf32>, vector<32x64xf32>, vector<20x64xf32> -> vector<20x64xf32>
    %56 = arith.addf %51, %55 : vector<20x64xf32>
    %57 = vector.extract_strided_slice %46 {offsets = [4, 0], sizes = [20, 32], strides = [1, 1]} : vector<26x32xf32> to vector<20x32xf32>
    %c2_33 = arith.constant 2 : index
    %c0_34 = arith.constant 0 : index
    %c0_35 = arith.constant 0 : index
    %58 = vector.load %arg2[%c2_33, %c0_34, %c0_35] : memref<4x32x64xf32, #tpu.memory_space<vmem>>, vector<1x32x64xf32>
    %59 = vector.shape_cast %58 : vector<1x32x64xf32> to vector<32x64xf32>
    %cst_36 = arith.constant dense<0.000000e+00> : vector<20x64xf32>
    %60 = tpu.matmul %57, %59, %cst_36 {dimension_numbers = #tpu.dot_dimension_numbers<[1], [0], [0], [1], [0, 0, 1, 1], [], []>} : vector<20x32xf32>, vector<32x64xf32>, vector<20x64xf32> -> vector<20x64xf32>
    %61 = arith.addf %56, %60 : vector<20x64xf32>
    %62 = vector.extract_strided_slice %46 {offsets = [6, 0], sizes = [20, 32], strides = [1, 1]} : vector<26x32xf32> to vector<20x32xf32>
    %c3_37 = arith.constant 3 : index
    %c0_38 = arith.constant 0 : index
    %c0_39 = arith.constant 0 : index
    %63 = vector.load %arg2[%c3_37, %c0_38, %c0_39] : memref<4x32x64xf32, #tpu.memory_space<vmem>>, vector<1x32x64xf32>
    %64 = vector.shape_cast %63 : vector<1x32x64xf32> to vector<32x64xf32>
    %cst_40 = arith.constant dense<0.000000e+00> : vector<20x64xf32>
    %65 = tpu.matmul %62, %64, %cst_40 {dimension_numbers = #tpu.dot_dimension_numbers<[1], [0], [0], [1], [0, 0, 1, 1], [], []>} : vector<20x32xf32>, vector<32x64xf32>, vector<20x64xf32> -> vector<20x64xf32>
    %66 = arith.addf %61, %65 : vector<20x64xf32>
    %cst_41 = arith.constant dense<0.000000e+00> : vector<64xf32>
    %67 = vector.multi_reduction <add>, %66, %cst_41 [0] : vector<20x64xf32> to vector<64xf32>
    %68 = vector.shape_cast %67 : vector<64xf32> to vector<1x64xf32>
    %cst_42 = arith.constant 2.000000e+01 : f32
    %69 = vector.broadcast %cst_42 : f32 to vector<1x64xf32>
    %70 = arith.divf %68, %69 : vector<1x64xf32>
    %71 = vector.broadcast %70 : vector<1x64xf32> to vector<20x64xf32>
    %72 = arith.subf %66, %71 : vector<20x64xf32>
    %73 = arith.mulf %72, %72 : vector<20x64xf32>
    %cst_43 = arith.constant dense<0.000000e+00> : vector<64xf32>
    %74 = vector.multi_reduction <add>, %73, %cst_43 [0] : vector<20x64xf32> to vector<64xf32>
    %75 = vector.shape_cast %74 : vector<64xf32> to vector<1x64xf32>
    %cst_44 = arith.constant 2.000000e+01 : f32
    %76 = vector.broadcast %cst_44 : f32 to vector<1x64xf32>
    %77 = arith.divf %75, %76 : vector<1x64xf32>
    %78 = vector.broadcast %70 : vector<1x64xf32> to vector<20x64xf32>
    %79 = arith.subf %66, %78 : vector<20x64xf32>
    %cst_45 = arith.constant 9.99999974E-6 : f32
    %80 = vector.broadcast %cst_45 : f32 to vector<1x64xf32>
    %81 = arith.addf %77, %80 : vector<1x64xf32>
    %82 = math.rsqrt %81 : vector<1x64xf32>
    %83 = vector.broadcast %82 : vector<1x64xf32> to vector<20x64xf32>
    %84 = arith.mulf %79, %83 : vector<20x64xf32>
    %c0_46 = arith.constant 0 : index
    %c0_47 = arith.constant 0 : index
    %85 = vector.load %arg12[%c0_46, %c0_47] : memref<1x64xf32, #tpu.memory_space<vmem>>, vector<1x64xf32>
    %86 = vector.broadcast %85 : vector<1x64xf32> to vector<20x64xf32>
    %87 = arith.mulf %84, %86 : vector<20x64xf32>
    %c0_48 = arith.constant 0 : index
    %c0_49 = arith.constant 0 : index
    %88 = vector.load %arg13[%c0_48, %c0_49] : memref<1x64xf32, #tpu.memory_space<vmem>>, vector<1x64xf32>
    %89 = vector.broadcast %88 : vector<1x64xf32> to vector<20x64xf32>
    %90 = arith.addf %87, %89 : vector<20x64xf32>
    %cst_50 = arith.constant 2.000000e-01 : f32
    %91 = vector.broadcast %cst_50 : f32 to vector<20x64xf32>
    %92 = arith.mulf %91, %90 : vector<20x64xf32>
    %93 = arith.maximumf %90, %92 : vector<20x64xf32>
    %94 = vector.extract_strided_slice %93 {offsets = [0, 0], sizes = [14, 64], strides = [1, 1]} : vector<20x64xf32> to vector<14x64xf32>
    %c0_51 = arith.constant 0 : index
    %c0_52 = arith.constant 0 : index
    %c0_53 = arith.constant 0 : index
    %95 = vector.load %arg3[%c0_51, %c0_52, %c0_53] : memref<4x64x128xf32, #tpu.memory_space<vmem>>, vector<1x64x128xf32>
    %96 = vector.shape_cast %95 : vector<1x64x128xf32> to vector<64x128xf32>
    %cst_54 = arith.constant dense<0.000000e+00> : vector<14x128xf32>
    %97 = tpu.matmul %94, %96, %cst_54 {dimension_numbers = #tpu.dot_dimension_numbers<[1], [0], [0], [1], [0, 0, 1, 1], [], []>} : vector<14x64xf32>, vector<64x128xf32>, vector<14x128xf32> -> vector<14x128xf32>
    %98 = vector.extract_strided_slice %93 {offsets = [2, 0], sizes = [14, 64], strides = [1, 1]} : vector<20x64xf32> to vector<14x64xf32>
    %c1_55 = arith.constant 1 : index
    %c0_56 = arith.constant 0 : index
    %c0_57 = arith.constant 0 : index
    %99 = vector.load %arg3[%c1_55, %c0_56, %c0_57] : memref<4x64x128xf32, #tpu.memory_space<vmem>>, vector<1x64x128xf32>
    %100 = vector.shape_cast %99 : vector<1x64x128xf32> to vector<64x128xf32>
    %cst_58 = arith.constant dense<0.000000e+00> : vector<14x128xf32>
    %101 = tpu.matmul %98, %100, %cst_58 {dimension_numbers = #tpu.dot_dimension_numbers<[1], [0], [0], [1], [0, 0, 1, 1], [], []>} : vector<14x64xf32>, vector<64x128xf32>, vector<14x128xf32> -> vector<14x128xf32>
    %102 = arith.addf %97, %101 : vector<14x128xf32>
    %103 = vector.extract_strided_slice %93 {offsets = [4, 0], sizes = [14, 64], strides = [1, 1]} : vector<20x64xf32> to vector<14x64xf32>
    %c2_59 = arith.constant 2 : index
    %c0_60 = arith.constant 0 : index
    %c0_61 = arith.constant 0 : index
    %104 = vector.load %arg3[%c2_59, %c0_60, %c0_61] : memref<4x64x128xf32, #tpu.memory_space<vmem>>, vector<1x64x128xf32>
    %105 = vector.shape_cast %104 : vector<1x64x128xf32> to vector<64x128xf32>
    %cst_62 = arith.constant dense<0.000000e+00> : vector<14x128xf32>
    %106 = tpu.matmul %103, %105, %cst_62 {dimension_numbers = #tpu.dot_dimension_numbers<[1], [0], [0], [1], [0, 0, 1, 1], [], []>} : vector<14x64xf32>, vector<64x128xf32>, vector<14x128xf32> -> vector<14x128xf32>
    %107 = arith.addf %102, %106 : vector<14x128xf32>
    %108 = vector.extract_strided_slice %93 {offsets = [6, 0], sizes = [14, 64], strides = [1, 1]} : vector<20x64xf32> to vector<14x64xf32>
    %c3_63 = arith.constant 3 : index
    %c0_64 = arith.constant 0 : index
    %c0_65 = arith.constant 0 : index
    %109 = vector.load %arg3[%c3_63, %c0_64, %c0_65] : memref<4x64x128xf32, #tpu.memory_space<vmem>>, vector<1x64x128xf32>
    %110 = vector.shape_cast %109 : vector<1x64x128xf32> to vector<64x128xf32>
    %cst_66 = arith.constant dense<0.000000e+00> : vector<14x128xf32>
    %111 = tpu.matmul %108, %110, %cst_66 {dimension_numbers = #tpu.dot_dimension_numbers<[1], [0], [0], [1], [0, 0, 1, 1], [], []>} : vector<14x64xf32>, vector<64x128xf32>, vector<14x128xf32> -> vector<14x128xf32>
    %112 = arith.addf %107, %111 : vector<14x128xf32>
    %cst_67 = arith.constant dense<0.000000e+00> : vector<128xf32>
    %113 = vector.multi_reduction <add>, %112, %cst_67 [0] : vector<14x128xf32> to vector<128xf32>
    %114 = vector.shape_cast %113 : vector<128xf32> to vector<1x128xf32>
    %cst_68 = arith.constant 1.400000e+01 : f32
    %115 = vector.broadcast %cst_68 : f32 to vector<1x128xf32>
    %116 = arith.divf %114, %115 : vector<1x128xf32>
    %117 = vector.broadcast %116 : vector<1x128xf32> to vector<14x128xf32>
    %118 = arith.subf %112, %117 : vector<14x128xf32>
    %119 = arith.mulf %118, %118 : vector<14x128xf32>
    %cst_69 = arith.constant dense<0.000000e+00> : vector<128xf32>
    %120 = vector.multi_reduction <add>, %119, %cst_69 [0] : vector<14x128xf32> to vector<128xf32>
    %121 = vector.shape_cast %120 : vector<128xf32> to vector<1x128xf32>
    %cst_70 = arith.constant 1.400000e+01 : f32
    %122 = vector.broadcast %cst_70 : f32 to vector<1x128xf32>
    %123 = arith.divf %121, %122 : vector<1x128xf32>
    %124 = vector.broadcast %116 : vector<1x128xf32> to vector<14x128xf32>
    %125 = arith.subf %112, %124 : vector<14x128xf32>
    %cst_71 = arith.constant 9.99999974E-6 : f32
    %126 = vector.broadcast %cst_71 : f32 to vector<1x128xf32>
    %127 = arith.addf %123, %126 : vector<1x128xf32>
    %128 = math.rsqrt %127 : vector<1x128xf32>
    %129 = vector.broadcast %128 : vector<1x128xf32> to vector<14x128xf32>
    %130 = arith.mulf %125, %129 : vector<14x128xf32>
    %c0_72 = arith.constant 0 : index
    %c0_73 = arith.constant 0 : index
    %131 = vector.load %arg14[%c0_72, %c0_73] : memref<1x128xf32, #tpu.memory_space<vmem>>, vector<1x128xf32>
    %132 = vector.broadcast %131 : vector<1x128xf32> to vector<14x128xf32>
    %133 = arith.mulf %130, %132 : vector<14x128xf32>
    %c0_74 = arith.constant 0 : index
    %c0_75 = arith.constant 0 : index
    %134 = vector.load %arg15[%c0_74, %c0_75] : memref<1x128xf32, #tpu.memory_space<vmem>>, vector<1x128xf32>
    %135 = vector.broadcast %134 : vector<1x128xf32> to vector<14x128xf32>
    %136 = arith.addf %133, %135 : vector<14x128xf32>
    %cst_76 = arith.constant 2.000000e-01 : f32
    %137 = vector.broadcast %cst_76 : f32 to vector<14x128xf32>
    %138 = arith.mulf %137, %136 : vector<14x128xf32>
    %139 = arith.maximumf %136, %138 : vector<14x128xf32>
    %140 = vector.extract_strided_slice %139 {offsets = [0, 0], sizes = [8, 128], strides = [1, 1]} : vector<14x128xf32> to vector<8x128xf32>
    %c0_77 = arith.constant 0 : index
    %c0_78 = arith.constant 0 : index
    %c0_79 = arith.constant 0 : index
    %141 = vector.load %arg4[%c0_77, %c0_78, %c0_79] : memref<4x128x256xf32, #tpu.memory_space<vmem>>, vector<1x128x256xf32>
    %142 = vector.shape_cast %141 : vector<1x128x256xf32> to vector<128x256xf32>
    %cst_80 = arith.constant dense<0.000000e+00> : vector<8x256xf32>
    %143 = tpu.matmul %140, %142, %cst_80 {dimension_numbers = #tpu.dot_dimension_numbers<[1], [0], [0], [1], [0, 0, 1, 1], [], []>} : vector<8x128xf32>, vector<128x256xf32>, vector<8x256xf32> -> vector<8x256xf32>
    %144 = vector.extract_strided_slice %139 {offsets = [2, 0], sizes = [8, 128], strides = [1, 1]} : vector<14x128xf32> to vector<8x128xf32>
    %c1_81 = arith.constant 1 : index
    %c0_82 = arith.constant 0 : index
    %c0_83 = arith.constant 0 : index
    %145 = vector.load %arg4[%c1_81, %c0_82, %c0_83] : memref<4x128x256xf32, #tpu.memory_space<vmem>>, vector<1x128x256xf32>
    %146 = vector.shape_cast %145 : vector<1x128x256xf32> to vector<128x256xf32>
    %cst_84 = arith.constant dense<0.000000e+00> : vector<8x256xf32>
    %147 = tpu.matmul %144, %146, %cst_84 {dimension_numbers = #tpu.dot_dimension_numbers<[1], [0], [0], [1], [0, 0, 1, 1], [], []>} : vector<8x128xf32>, vector<128x256xf32>, vector<8x256xf32> -> vector<8x256xf32>
    %148 = arith.addf %143, %147 : vector<8x256xf32>
    %149 = vector.extract_strided_slice %139 {offsets = [4, 0], sizes = [8, 128], strides = [1, 1]} : vector<14x128xf32> to vector<8x128xf32>
    %c2_85 = arith.constant 2 : index
    %c0_86 = arith.constant 0 : index
    %c0_87 = arith.constant 0 : index
    %150 = vector.load %arg4[%c2_85, %c0_86, %c0_87] : memref<4x128x256xf32, #tpu.memory_space<vmem>>, vector<1x128x256xf32>
    %151 = vector.shape_cast %150 : vector<1x128x256xf32> to vector<128x256xf32>
    %cst_88 = arith.constant dense<0.000000e+00> : vector<8x256xf32>
    %152 = tpu.matmul %149, %151, %cst_88 {dimension_numbers = #tpu.dot_dimension_numbers<[1], [0], [0], [1], [0, 0, 1, 1], [], []>} : vector<8x128xf32>, vector<128x256xf32>, vector<8x256xf32> -> vector<8x256xf32>
    %153 = arith.addf %148, %152 : vector<8x256xf32>
    %154 = vector.extract_strided_slice %139 {offsets = [6, 0], sizes = [8, 128], strides = [1, 1]} : vector<14x128xf32> to vector<8x128xf32>
    %c3_89 = arith.constant 3 : index
    %c0_90 = arith.constant 0 : index
    %c0_91 = arith.constant 0 : index
    %155 = vector.load %arg4[%c3_89, %c0_90, %c0_91] : memref<4x128x256xf32, #tpu.memory_space<vmem>>, vector<1x128x256xf32>
    %156 = vector.shape_cast %155 : vector<1x128x256xf32> to vector<128x256xf32>
    %cst_92 = arith.constant dense<0.000000e+00> : vector<8x256xf32>
    %157 = tpu.matmul %154, %156, %cst_92 {dimension_numbers = #tpu.dot_dimension_numbers<[1], [0], [0], [1], [0, 0, 1, 1], [], []>} : vector<8x128xf32>, vector<128x256xf32>, vector<8x256xf32> -> vector<8x256xf32>
    %158 = arith.addf %153, %157 : vector<8x256xf32>
    %cst_93 = arith.constant dense<0.000000e+00> : vector<256xf32>
    %159 = vector.multi_reduction <add>, %158, %cst_93 [0] : vector<8x256xf32> to vector<256xf32>
    %160 = vector.shape_cast %159 : vector<256xf32> to vector<1x256xf32>
    %cst_94 = arith.constant 8.000000e+00 : f32
    %161 = vector.broadcast %cst_94 : f32 to vector<1x256xf32>
    %162 = arith.divf %160, %161 : vector<1x256xf32>
    %163 = vector.broadcast %162 : vector<1x256xf32> to vector<8x256xf32>
    %164 = arith.subf %158, %163 : vector<8x256xf32>
    %165 = arith.mulf %164, %164 : vector<8x256xf32>
    %cst_95 = arith.constant dense<0.000000e+00> : vector<256xf32>
    %166 = vector.multi_reduction <add>, %165, %cst_95 [0] : vector<8x256xf32> to vector<256xf32>
    %167 = vector.shape_cast %166 : vector<256xf32> to vector<1x256xf32>
    %cst_96 = arith.constant 8.000000e+00 : f32
    %168 = vector.broadcast %cst_96 : f32 to vector<1x256xf32>
    %169 = arith.divf %167, %168 : vector<1x256xf32>
    %170 = vector.broadcast %162 : vector<1x256xf32> to vector<8x256xf32>
    %171 = arith.subf %158, %170 : vector<8x256xf32>
    %cst_97 = arith.constant 9.99999974E-6 : f32
    %172 = vector.broadcast %cst_97 : f32 to vector<1x256xf32>
    %173 = arith.addf %169, %172 : vector<1x256xf32>
    %174 = math.rsqrt %173 : vector<1x256xf32>
    %175 = vector.broadcast %174 : vector<1x256xf32> to vector<8x256xf32>
    %176 = arith.mulf %171, %175 : vector<8x256xf32>
    %c0_98 = arith.constant 0 : index
    %c0_99 = arith.constant 0 : index
    %177 = vector.load %arg16[%c0_98, %c0_99] : memref<1x256xf32, #tpu.memory_space<vmem>>, vector<1x256xf32>
    %178 = vector.broadcast %177 : vector<1x256xf32> to vector<8x256xf32>
    %179 = arith.mulf %176, %178 : vector<8x256xf32>
    %c0_100 = arith.constant 0 : index
    %c0_101 = arith.constant 0 : index
    %180 = vector.load %arg17[%c0_100, %c0_101] : memref<1x256xf32, #tpu.memory_space<vmem>>, vector<1x256xf32>
    %181 = vector.broadcast %180 : vector<1x256xf32> to vector<8x256xf32>
    %182 = arith.addf %179, %181 : vector<8x256xf32>
    %cst_102 = arith.constant 2.000000e-01 : f32
    %183 = vector.broadcast %cst_102 : f32 to vector<8x256xf32>
    %184 = arith.mulf %183, %182 : vector<8x256xf32>
    %185 = arith.maximumf %182, %184 : vector<8x256xf32>
    %186 = vector.extract_strided_slice %185 {offsets = [0, 0], sizes = [2, 256], strides = [1, 1]} : vector<8x256xf32> to vector<2x256xf32>
    %187 = arith.truncf %186 : vector<2x256xf32> to vector<2x256xbf16>
    %c0_103 = arith.constant 0 : index
    %c0_104 = arith.constant 0 : index
    %c0_105 = arith.constant 0 : index
    %188 = vector.load %arg5[%c0_103, %c0_104, %c0_105] : memref<4x256x1000xbf16, #tpu.memory_space<vmem>>, vector<1x256x1000xbf16>
    %189 = vector.shape_cast %188 : vector<1x256x1000xbf16> to vector<256x1000xbf16>
    %cst_106 = arith.constant dense<0.000000e+00> : vector<2x1000xf32>
    %190 = tpu.matmul %187, %189, %cst_106 {dimension_numbers = #tpu.dot_dimension_numbers<[1], [0], [0], [1], [0, 0, 1, 1], [], []>} : vector<2x256xbf16>, vector<256x1000xbf16>, vector<2x1000xf32> -> vector<2x1000xf32>
    %191 = vector.extract_strided_slice %185 {offsets = [2, 0], sizes = [2, 256], strides = [1, 1]} : vector<8x256xf32> to vector<2x256xf32>
    %192 = arith.truncf %191 : vector<2x256xf32> to vector<2x256xbf16>
    %c1_107 = arith.constant 1 : index
    %c0_108 = arith.constant 0 : index
    %c0_109 = arith.constant 0 : index
    %193 = vector.load %arg5[%c1_107, %c0_108, %c0_109] : memref<4x256x1000xbf16, #tpu.memory_space<vmem>>, vector<1x256x1000xbf16>
    %194 = vector.shape_cast %193 : vector<1x256x1000xbf16> to vector<256x1000xbf16>
    %cst_110 = arith.constant dense<0.000000e+00> : vector<2x1000xf32>
    %195 = tpu.matmul %192, %194, %cst_110 {dimension_numbers = #tpu.dot_dimension_numbers<[1], [0], [0], [1], [0, 0, 1, 1], [], []>} : vector<2x256xbf16>, vector<256x1000xbf16>, vector<2x1000xf32> -> vector<2x1000xf32>
    %196 = arith.addf %190, %195 : vector<2x1000xf32>
    %197 = vector.extract_strided_slice %185 {offsets = [4, 0], sizes = [2, 256], strides = [1, 1]} : vector<8x256xf32> to vector<2x256xf32>
    %198 = arith.truncf %197 : vector<2x256xf32> to vector<2x256xbf16>
    %c2_111 = arith.constant 2 : index
    %c0_112 = arith.constant 0 : index
    %c0_113 = arith.constant 0 : index
    %199 = vector.load %arg5[%c2_111, %c0_112, %c0_113] : memref<4x256x1000xbf16, #tpu.memory_space<vmem>>, vector<1x256x1000xbf16>
    %200 = vector.shape_cast %199 : vector<1x256x1000xbf16> to vector<256x1000xbf16>
    %cst_114 = arith.constant dense<0.000000e+00> : vector<2x1000xf32>
    %201 = tpu.matmul %198, %200, %cst_114 {dimension_numbers = #tpu.dot_dimension_numbers<[1], [0], [0], [1], [0, 0, 1, 1], [], []>} : vector<2x256xbf16>, vector<256x1000xbf16>, vector<2x1000xf32> -> vector<2x1000xf32>
    %202 = arith.addf %196, %201 : vector<2x1000xf32>
    %203 = vector.extract_strided_slice %185 {offsets = [6, 0], sizes = [2, 256], strides = [1, 1]} : vector<8x256xf32> to vector<2x256xf32>
    %204 = arith.truncf %203 : vector<2x256xf32> to vector<2x256xbf16>
    %c3_115 = arith.constant 3 : index
    %c0_116 = arith.constant 0 : index
    %c0_117 = arith.constant 0 : index
    %205 = vector.load %arg5[%c3_115, %c0_116, %c0_117] : memref<4x256x1000xbf16, #tpu.memory_space<vmem>>, vector<1x256x1000xbf16>
    %206 = vector.shape_cast %205 : vector<1x256x1000xbf16> to vector<256x1000xbf16>
    %cst_118 = arith.constant dense<0.000000e+00> : vector<2x1000xf32>
    %207 = tpu.matmul %204, %206, %cst_118 {dimension_numbers = #tpu.dot_dimension_numbers<[1], [0], [0], [1], [0, 0, 1, 1], [], []>} : vector<2x256xbf16>, vector<256x1000xbf16>, vector<2x1000xf32> -> vector<2x1000xf32>
    %208 = arith.addf %202, %207 : vector<2x1000xf32>
    %cst_119 = arith.constant dense<0.000000e+00> : vector<1000xf32>
    %209 = vector.multi_reduction <add>, %208, %cst_119 [0] : vector<2x1000xf32> to vector<1000xf32>
    %210 = vector.shape_cast %209 : vector<1000xf32> to vector<1x1000xf32>
    %cst_120 = arith.constant 2.000000e+00 : f32
    %211 = vector.broadcast %cst_120 : f32 to vector<1x1000xf32>
    %212 = arith.divf %210, %211 : vector<1x1000xf32>
    %213 = vector.broadcast %212 : vector<1x1000xf32> to vector<2x1000xf32>
    %214 = arith.subf %208, %213 : vector<2x1000xf32>
    %215 = arith.mulf %214, %214 : vector<2x1000xf32>
    %cst_121 = arith.constant dense<0.000000e+00> : vector<1000xf32>
    %216 = vector.multi_reduction <add>, %215, %cst_121 [0] : vector<2x1000xf32> to vector<1000xf32>
    %217 = vector.shape_cast %216 : vector<1000xf32> to vector<1x1000xf32>
    %cst_122 = arith.constant 2.000000e+00 : f32
    %218 = vector.broadcast %cst_122 : f32 to vector<1x1000xf32>
    %219 = arith.divf %217, %218 : vector<1x1000xf32>
    %220 = vector.broadcast %212 : vector<1x1000xf32> to vector<2x1000xf32>
    %221 = arith.subf %208, %220 : vector<2x1000xf32>
    %cst_123 = arith.constant 9.99999974E-6 : f32
    %222 = vector.broadcast %cst_123 : f32 to vector<1x1000xf32>
    %223 = arith.addf %219, %222 : vector<1x1000xf32>
    %224 = math.rsqrt %223 : vector<1x1000xf32>
    %225 = vector.broadcast %224 : vector<1x1000xf32> to vector<2x1000xf32>
    %226 = arith.mulf %221, %225 : vector<2x1000xf32>
    %c0_124 = arith.constant 0 : index
    %c0_125 = arith.constant 0 : index
    %227 = vector.load %arg18[%c0_124, %c0_125] : memref<1x1000xf32, #tpu.memory_space<vmem>>, vector<1x1000xf32>
    %228 = vector.broadcast %227 : vector<1x1000xf32> to vector<2x1000xf32>
    %229 = arith.mulf %226, %228 : vector<2x1000xf32>
    %c0_126 = arith.constant 0 : index
    %c0_127 = arith.constant 0 : index
    %230 = vector.load %arg19[%c0_126, %c0_127] : memref<1x1000xf32, #tpu.memory_space<vmem>>, vector<1x1000xf32>
    %231 = vector.broadcast %230 : vector<1x1000xf32> to vector<2x1000xf32>
    %232 = arith.addf %229, %231 : vector<2x1000xf32>
    %cst_128 = arith.constant 2.000000e-01 : f32
    %233 = vector.broadcast %cst_128 : f32 to vector<2x1000xf32>
    %234 = arith.mulf %233, %232 : vector<2x1000xf32>
    %235 = arith.maximumf %232, %234 : vector<2x1000xf32>
    %c0_129 = arith.constant 0 : index
    %c0_130 = arith.constant 0 : index
    %236 = vector.load %arg6[%c0_129, %c0_130] : memref<1000x128xf32, #tpu.memory_space<vmem>>, vector<1000x128xf32>
    %cst_131 = arith.constant dense<0.000000e+00> : vector<2x128xf32>
    %237 = tpu.matmul %235, %236, %cst_131 {dimension_numbers = #tpu.dot_dimension_numbers<[1], [0], [0], [1], [0, 0, 1, 1], [], []>} : vector<2x1000xf32>, vector<1000x128xf32>, vector<2x128xf32> -> vector<2x128xf32>
    %c0_132 = arith.constant 0 : index
    %c0_133 = arith.constant 0 : index
    %238 = vector.load %arg9[%c0_132, %c0_133] : memref<2x100xf32, #tpu.memory_space<vmem>>, vector<2x100xf32>
    %c0_134 = arith.constant 0 : index
    %c0_135 = arith.constant 0 : index
    %239 = vector.load %arg7[%c0_134, %c0_135] : memref<100x128xf32, #tpu.memory_space<vmem>>, vector<100x128xf32>
    %cst_136 = arith.constant dense<0.000000e+00> : vector<2x128xf32>
    %240 = tpu.matmul %238, %239, %cst_136 {dimension_numbers = #tpu.dot_dimension_numbers<[1], [0], [0], [1], [0, 0, 1, 1], [], []>} : vector<2x100xf32>, vector<100x128xf32>, vector<2x128xf32> -> vector<2x128xf32>
    %241 = arith.addf %237, %240 : vector<2x128xf32>
    %c0_137 = arith.constant 0 : index
    %c0_138 = arith.constant 0 : index
    %242 = vector.load %arg8[%c0_137, %c0_138] : memref<1x128xf32, #tpu.memory_space<vmem>>, vector<1x128xf32>
    %243 = vector.broadcast %242 : vector<1x128xf32> to vector<2x128xf32>
    %244 = arith.addf %241, %243 : vector<2x128xf32>
    %c0_139 = arith.constant 0 : index
    %c0_140 = arith.constant 0 : index
    %245 = vector.load %arg21[%c0_139, %c0_140] : memref<2x128xf32, #tpu.memory_space<vmem>>, vector<2x128xf32>
    tpu.vector_store %arg21[%c0_139, %c0_140], %244 {strides = array<i32>} : memref<2x128xf32, #tpu.memory_space<vmem>>, vector<2x128xf32>,
    return
  }
}

</mosaic_0001>

<bundles_post_ra>
// kernel: discriminator_forward.1
= control target key start
LH: loop header
LB: loop body
LE: loop exit
PB: predicated region body
PF: predicated region fallthrough
CT: control target
= control target key end

     0   :  { %vm88_vm0 = vcmask 130048   ;;  %vm166_vm1 = vcmask 1043456   ;;  %vm218_vm2 = vcmask 1041408   ;;  %vm80_vm3 = vcmask 1045504   ;;  %s13724_s1 = inlined_call_operand.vmem [shape: f32[4,16,32], index: 1, kind: input, shape index: {}]   ;;  %s13725_s0 = inlined_call_operand.vmem [shape: f32[32,16], index: 0, kind: input, shape index: {}]   ;;  %s13726_s10 = inlined_call_operand.vmem [shape: f32[1,32], index: 10, kind: input, shape index: {}]   ;;  %s13727_s11 = inlined_call_operand.vmem [shape: f32[1,32], index: 11, kind: input, shape index: {}]   ;;  %s13728_s2 = inlined_call_operand.vmem [shape: f32[4,32,64], index: 2, kind: input, shape index: {}]   ;;  %s13729_s20 = inlined_call_operand.vmem [shape: f32[26,32], index: 20, kind: output, shape index: {0}]   ;;  %s13730_s12 = inlined_call_operand.vmem [shape: f32[1,64], index: 12, kind: input, shape index: {}]   ;;  %s13731_s13 = inlined_call_operand.vmem [shape: f32[1,64], index: 13, kind: input, shape index: {}]   ;;  %s13732_s3 = inlined_call_operand.vmem [shape: f32[4,64,128], index: 3, kind: input, shape index: {}]   ;;  %s13733_s14 = inlined_call_operand.vmem [shape: f32[1,128], index: 14, kind: input, shape index: {}]   ;;  %s13734_s15 = inlined_call_operand.vmem [shape: f32[1,128], index: 15, kind: input, shape index: {}]   ;;  %s13735_s4 = inlined_call_operand.vmem [shape: f32[4,128,256], index: 4, kind: input, shape index: {}]   ;;  %s13736_s5 = inlined_call_operand.vmem [shape: bf16[4,256,1000], index: 5, kind: input, shape index: {}]   ;;  %s13737_s16 = inlined_call_operand.vmem [shape: f32[1,256], index: 16, kind: input, shape index: {}]   ;;  %s13738_s17 = inlined_call_operand.vmem [shape: f32[1,256], index: 17, kind: input, shape index: {}]   ;;  %s13739_s6 = inlined_call_operand.vmem [shape: f32[1000,128], index: 6, kind: input, shape index: {}]   ;;  %s13740_s7 = inlined_call_operand.vmem [shape: f32[100,128], index: 7, kind: input, shape index: {}]   ;;  %s13741_s9 = inlined_call_operand.vmem [shape: f32[2,100], index: 9, kind: input, shape index: {}]   ;;  %s13742_s18 = inlined_call_operand.vmem [shape: f32[1,1000], index: 18, kind: input, shape index: {}]   ;;  %s13743_s19 = inlined_call_operand.vmem [shape: f32[1,1000], index: 19, kind: input, shape index: {}]   ;;  %s13744_s8 = inlined_call_operand.vmem [shape: f32[1,128], index: 8, kind: input, shape index: {}]   ;;  %s13745_s21 = inlined_call_operand.vmem [shape: f32[2,128], index: 21, kind: output, shape index: {1}]  }
   0x1   :  { %13750 = sst [smem:[#allocation2_spill]] %s13724_s1  ;;  %v8989_v50 = vmov 26.0   ;;  %vm267_vm4 = vcmask 261120   ;;  %vm273_vm5 = vcmask 254976   ;;  %vm529_vm10 = vcmask 523264  }
   0x2   :  { %13751 = sst [smem:[#allocation3_spill]] %s13725_s0  ;;  %8953 = vrcp.f32 %v8989_v50  ;;  %vm533_vm11 = vcmask 519168  }
   0x3   :  { %13752 = sst [smem:[#allocation4_spill]] %s13726_s10 }
   0x4   :  { %13753 = sst [smem:[#allocation5_spill]] %s13727_s11 }
   0x5   :  { %13754 = sst [smem:[#allocation6_spill]] %s13728_s2 }
   0x6   :  { %13755 = sst [smem:[#allocation7_spill]] %s13729_s20 }
   0x7   :  { %s13756_s26 = sld [smem:[#allocation2_spill]] }
   0x8   :  { %s13757_s1 = sld [smem:[#allocation3_spill]]  ;;  %v8954_v56 = vpop.eup %8953 }
   0x9   :  { %vm287_vm6 = vweird.f32 %v8954_v56  ;;  %s13758_s0 = sld [smem:[#allocation6_spill]] }
   0xa   :  { %s13759_s11 = sld [smem:[#allocation4_spill]] }
   0xb   :  { %s13760_s29 = sld [smem:[#allocation5_spill]] }
   0xc   :  { %s13761_s20 = sld [smem:[#allocation7_spill]] }
   0xd   :  { %v5815_v0 = vld [vmem:[%s13756_s26 + $0x18] sm:$0xff]  ;;  %v5814_v1 = vld [vmem:[%s13756_s26 + $0x10] sm:$0xff]  ;;  %v5825_v4 = vld [vmem:[%s13756_s26 + $0x28] sm:$0xff] }
   0xe   :  { %v70_v2 = vld [vmem:[%s13757_s1 + $0x18] sm:$0xff]  ;;  %8935 = vmatpush.msra.mxu1 %v5815_v0  ;;  %v5824_v5 = vld [vmem:[%s13756_s26 + $0x20] sm:$0xff]  ;;  %111 = vmatpush.msra.mxu0 %v5815_v0  ;;  %v68_v8 = vld [vmem:[%s13757_s1 + $0x8] sm:$0xff] }
   0xf   :  { %v86_v3 = vrot.slane %v70_v2, 2  ;;  %v5831_v6 = vld [vmem:[%s13756_s26 + $0x38] sm:$0xff]  ;;  %196 = vmatpush.msra.mxu2 %v5825_v4  ;;  %v67_v7 = vld [vmem:[%s13757_s1] sm:$0xff]  ;;  %v72_v9 = vld [vmem:[%s13756_s26 + $0x8] sm:$0xff]  ;;  %v168_v11 = vrot.slane %v68_v8, 4  ;;  %v220_v14 = vrot.slane %v68_v8, 6 }
  0x10   :  { %248 = vmatpush.msra.mxu3 %v5831_v6  ;;  %8936 = vmatpush.msra.mxu1 %v5814_v1  ;;  %v167_v10 = vrot.slane %v67_v7, 4  ;;  %v5830_v12 = vld [vmem:[%s13756_s26 + $0x30] sm:$0xff]  ;;  %v219_v13 = vrot.slane %v67_v7, 6  ;;  %v71_v15 = vld [vmem:[%s13756_s26] sm:$0xff]  ;;  %v81_v16 = vrot.slane %v67_v7, 2  ;;  %v82_v17 = vrot.slane %v68_v8, 2 }
  0x11   :  { %112 = vmatpush.msra.mxu0 %v5814_v1  ;;  %5819 = vmatmul.msk.f32.vlgmr.msra.gmra.mxu1 %vm88_vm0, %v86_v3  ;;  %v69_v18 = vld [vmem:[%s13757_s1 + $0x10] sm:$0xff]  ;;  %v172_v28 = vrot.slane %v70_v2, 4  ;;  %v224_v29 = vrot.slane %v70_v2, 6  ;;  %v283_v1 = vmul.f32 26.0, %v8954_v56  ;;  %v5854_v50 = vld [vmem:[%s13758_s0 + $0x68] sm:$0xff] }
  0x12   :  { %197 = vmatpush.msra.mxu2 %v5824_v5  ;;  %v169_v19 = vsel %vm166_vm1, %v167_v10, %v168_v11  ;;  %148 = vmatpush.msrb.mxu1 %v72_v9  ;;  %v221_v20 = vsel %vm218_vm2, %v219_v13, %v220_v14  ;;  %v83_v21 = vsel %vm80_vm3, %v81_v16, %v82_v17  ;;  %v170_v22 = vrot.slane %v69_v18, 4 }
  0x13   :  { %249 = vmatpush.msra.mxu3 %v5830_v12  ;;  %5826 = vmatmul.msk.f32.vlgmr.msra.gmra.mxu2 %vm88_vm0, %v169_v19  ;;  %v222_v23 = vrot.slane %v69_v18, 6  ;;  %v84_v24 = vrot.slane %v69_v18, 2  ;;  %v284_v6 = vsub.f32 1.0, %v283_v1 }
  0x14   :  { %5832 = vmatmul.msk.f32.vlgmr.msra.gmra.mxu3 %vm88_vm0, %v221_v20  ;;  %149 = vmatpush.msrb.mxu1 %v71_v15  ;;  %v171_v25 = vsel %vm166_vm1, %v168_v11, %v170_v22  ;;  %v173_v30 = vsel %vm166_vm1, %v170_v22, %v172_v28 }
  0x15   :  { %5816 = vmatmul.msk.f32.vlgmr.msra.gmra.mxu0 %vm88_vm0, %v83_v21  ;;  %v223_v26 = vsel %vm218_vm2, %v220_v14, %v222_v23  ;;  %v85_v27 = vsel %vm80_vm3, %v82_v17, %v84_v24  ;;  %v225_v31 = vsel %vm218_vm2, %v222_v23, %v224_v29  ;;  %v87_v32 = vsel %vm80_vm3, %v84_v24, %v86_v3 }
  0x16   :  { %v285_v9 = vmul.f32 %v8954_v56, %v284_v6 }
  0x18   :  { %v286_v12 = vadd.f32 %v8954_v56, %v285_v9 }
  0x19   :  { %5820 = vmatmul.msk.f32.vlgmr.msrb.gmra.mxu1 %vm88_vm0, %v67_v7 }
  0x1a   :  { %v288_v15 = vsel %vm287_vm6, %v8954_v56, %v286_v12  ;;  %v5846_v56 = vld [vmem:[%s13758_s0 + $0x40] sm:$0xff] }
  0x1b   :  { %5827 = vmatmul.msk.f32.gmra.mxu2 %vm88_vm0, %v171_v25 }
  0x1c   :  { %5833 = vmatmul.msk.f32.gmra.mxu3 %vm88_vm0, %v223_v26 }
  0x1d   :  { %5817 = vmatmul.msk.f32.gmra.mxu0 %vm88_vm0, %v85_v27 }
  0x21   :  { %5821 = vmatmul.msk.f32.gmra.mxu1 %vm88_vm0, %v68_v8 }
  0x23   :  { %5828 = vmatmul.msk.f32.gmra.mxu2 %vm88_vm0, %v173_v30 }
  0x24   :  { %5834 = vmatmul.msk.f32.gmra.mxu3 %vm88_vm0, %v225_v31 }
  0x25   :  { %5818 = vmatmul.msk.f32.gmra.mxu0 %vm88_vm0, %v87_v32 }
  0x29   :  { %5822 = vmatmul.msk.f32.gmra.mxu1 %vm88_vm0, %v69_v18 }
  0x2b   :  { %5829 = vmatmul.msk.f32.gmra.mxu2 %vm88_vm0, %v172_v28 }
  0x2c   :  { %5835 = vmatmul.msk.f32.gmra.mxu3 %vm88_vm0, %v224_v29 }
  0x31   :  { %5823 = vmatmul.msk.f32.gmra.mxu1 %vm88_vm0, %v70_v2 }
  0x8e   :  { %v123_v33 = vpop.f32.mrf.mxu1 }
  0x92   :  { %v114_v34 = vpop.f32.mrf.mxu0 }
  0x96   :  { %v151_v35 = vpop.f32.mrf.mxu1  ;;  %v199_v36 = vpop.f32.mrf.mxu2 }
  0x97   :  { %v251_v37 = vpop.f32.mrf.mxu3  ;;  %v152_v44 = vadd.f32 %v151_v35, %v114_v34 }
  0x99   :  { %v211_v51 = vadd.f32 %v199_v36, %v152_v44  ;;  %v356_v44 = vld [vmem:[%s13758_s0 + $0x8] sm:$0xff] }
  0x9a   :  { %v117_v38 = vpop.f32.mrf.mxu0 }
  0x9b   :  { %v263_v54 = vadd.f32 %v251_v37, %v211_v51  ;;  %v358_v37 = vld [vmem:[%s13758_s0 + $0x18] sm:$0xff]  ;;  %v5836_v51 = vld [vmem:[%s13758_s0 + $0x20] sm:$0xff] }
  0x9c   :  { %422 = vmatpush.msra.mxu1 %v358_v37 }
  0x9d   :  { %v268_v62 = vsel %vm267_vm4, %v263_v54, 0.0 }
  0x9e   :  { %v154_v39 = vpop.f32.mrf.mxu1  ;;  %v202_v40 = vpop.f32.mrf.mxu2 }
  0x9f   :  { %v254_v41 = vpop.f32.mrf.mxu3  ;;  %v155_v42 = vadd.f32 %v154_v39, %v117_v38  ;;  %v5839_v39 = vld [vmem:[%s13758_s0 + $0x38] sm:$0xff] }
  0xa0   :  { %8937 = vmatpush.msrb.mxu2 %v5839_v39  ;;  %390 = vmatpush.msrb.mxu0 %v5839_v39 }
  0xa1   :  { %v212_v47 = vadd.f32 %v202_v40, %v155_v42  ;;  %v357_v40 = vld [vmem:[%s13758_s0 + $0x10] sm:$0xff] }
  0xa2   :  { %v120_v43 = vpop.f32.mrf.mxu0  ;;  %423 = vmatpush.msra.mxu1 %v357_v40 }
  0xa3   :  { %v264_v53 = vadd.f32 %v254_v41, %v212_v47  ;;  %v5856_v41 = vld [vmem:[%s13758_s0 + $0x78] sm:$0xff]  ;;  %v5837_v47 = vld [vmem:[%s13758_s0 + $0x28] sm:$0xff] }
  0xa4   :  { %512 = vmatpush.msrb.mxu3 %v5856_v41  ;;  %424 = vmatpush.msra.mxu1 %v356_v44 }
  0xa5   :  { %v269_v59 = vsel %vm267_vm4, %v264_v53, 0.0 }
  0xa6   :  { %v157_v45 = vpop.f32.mrf.mxu1  ;;  %v205_v46 = vpop.f32.mrf.mxu2  ;;  %v270_v2 = vadd.f32 %v269_v59, %v268_v62 }
  0xa7   :  { %v158_v48 = vadd.f32 %v157_v45, %v120_v43  ;;  %v257_v49 = vpop.f32.mrf.mxu3  ;;  %v5838_v43 = vld [vmem:[%s13758_s0 + $0x30] sm:$0xff] }
  0xa8   :  { %8938 = vmatpush.msrb.mxu2 %v5838_v43  ;;  %v5855_v45 = vld [vmem:[%s13758_s0 + $0x70] sm:$0xff]  ;;  %391 = vmatpush.msrb.mxu0 %v5838_v43 }
  0xa9   :  { %v213_v52 = vadd.f32 %v205_v46, %v158_v48  ;;  %513 = vmatpush.msrb.mxu3 %v5855_v45  ;;  %v355_v48 = vld [vmem:[%s13758_s0] sm:$0xff] }
  0xaa   :  { %8939 = vmatpush.msrb.mxu2 %v5837_v47  ;;  %425 = vmatpush.msra.mxu1 %v355_v48 }
  0xab   :  { %v265_v55 = vadd.f32 %v257_v49, %v213_v52  ;;  %392 = vmatpush.msrb.mxu0 %v5837_v47  ;;  %514 = vmatpush.msrb.mxu3 %v5854_v50  ;;  %v5853_v52 = vld [vmem:[%s13758_s0 + $0x60] sm:$0xff] }
  0xac   :  { %8940 = vmatpush.msrb.mxu2 %v5836_v51 }
  0xad   :  { %v271_v63 = vsel %vm267_vm4, %v265_v55, 0.0  ;;  %393 = vmatpush.msrb.mxu0 %v5836_v51  ;;  %515 = vmatpush.msrb.mxu3 %v5853_v52 }
  0xae   :  { %v160_v57 = vpop.f32.mrf.mxu1  ;;  %v208_v58 = vpop.f32.mrf.mxu2  ;;  %v272_v4 = vadd.f32 %v271_v63, %v270_v2  ;;  %v8946_v63 = vld [vmem:[%s13759_s11] ss:$0 sm:$0xff] }
  0xaf   :  { %v161_v60 = vadd.f32 %v160_v57, %v123_v33  ;;  %v260_v61 = vpop.f32.mrf.mxu3 }
  0xb1   :  { %v214_v0 = vadd.f32 %v208_v58, %v161_v60 }
  0xb3   :  { %v266_v3 = vadd.f32 %v260_v61, %v214_v0 }
  0xb5   :  { %v274_v5 = vsel %vm273_vm5, %v266_v3, 0.0 }
  0xb6   :  { %v275_v7 = vadd.f32 %v274_v5, %v272_v4  ;;  %v8947_v5 = vld [vmem:[%s13760_s29] ss:$0 sm:$0xff] }
  0xb8   :  { %v276_v8 = vrot.slane %v275_v7, 4 }
  0xba   :  { %v277_v10 = vadd.f32 %v276_v8, %v275_v7 }
  0xbc   :  { %v278_v11 = vrot.slane %v277_v10, 2 }
  0xbe   :  { %v279_v13 = vadd.f32 %v278_v11, %v277_v10 }
  0xc0   :  { %v280_v14 = vrot.slane %v279_v13, 1 }
  0xc2   :  { %v281_v16 = vadd.f32 %v280_v14, %v279_v13 }
  0xc4   :  { %v289_v17 = vmul.f32 %v288_v15, %v281_v16 }
  0xc6   :  { %v9169_v18 = vsub.f32 %v263_v54, %v289_v17  ;;  %v9171_v19 = vsub.f32 %v264_v53, %v289_v17  ;;  %v9173_v20 = vsub.f32 %v265_v55, %v289_v17  ;;  %v9175_v21 = vsub.f32 %v266_v3, %v289_v17  ;;  %v5849_v53 = vld [vmem:[%s13758_s0 + $0x58] sm:$0xff]  ;;  %v5848_v54 = vld [vmem:[%s13758_s0 + $0x50] sm:$0xff]  ;;  %v5847_v55 = vld [vmem:[%s13758_s0 + $0x48] sm:$0xff] }
  0xc7   :  { %464 = vmatpush.msra.mxu2 %v5849_v53 }
  0xc8   :  { %v294_v22 = vmul.f32 %v9169_v18, %v9169_v18  ;;  %v295_v23 = vmul.f32 %v9171_v19, %v9171_v19  ;;  %v296_v24 = vmul.f32 %v9173_v20, %v9173_v20  ;;  %v297_v25 = vmul.f32 %v9175_v21, %v9175_v21 }
  0xc9   :  { %465 = vmatpush.msra.mxu2 %v5848_v54 }
  0xca   :  { %v298_v26 = vsel %vm267_vm4, %v294_v22, 0.0  ;;  %v299_v27 = vsel %vm267_vm4, %v295_v23, 0.0  ;;  %v301_v29 = vsel %vm267_vm4, %v296_v24, 0.0  ;;  %v303_v31 = vsel %vm273_vm5, %v297_v25, 0.0 }
  0xcb   :  { %v300_v28 = vadd.f32 %v299_v27, %v298_v26  ;;  %466 = vmatpush.msra.mxu2 %v5847_v55 }
  0xcd   :  { %v302_v30 = vadd.f32 %v301_v29, %v300_v28  ;;  %467 = vmatpush.msra.mxu2 %v5846_v56 }
  0xcf   :  { %v304_v32 = vadd.f32 %v303_v31, %v302_v30 }
  0xd1   :  { %v305_v33 = vrot.slane %v304_v32, 4 }
  0xd3   :  { %v306_v34 = vadd.f32 %v305_v33, %v304_v32 }
  0xd5   :  { %v307_v35 = vrot.slane %v306_v34, 2 }
  0xd7   :  { %v308_v36 = vadd.f32 %v307_v35, %v306_v34 }
  0xd9   :  { %v309_v38 = vrot.slane %v308_v36, 1 }
  0xdb   :  { %v310_v42 = vadd.f32 %v309_v38, %v308_v36 }
  0xdd   :  { %v311_v46 = vmul.f32 %v310_v42, %v288_v15 }
  0xdf   :  { %v312_v49 = vadd.f32 1e-05, %v311_v46 }
  0xe1   :  { %8955 = vrsqrt.f32 %v312_v49  ;;  %vm319_vm8 = vweird.f32 %v312_v49 }
  0xe7   :  { %v8956_v57 = vpop.eup %8955 }
  0xe8   :  { %v314_v58 = vmul.f32 %v8956_v57, %v312_v49  ;;  %vm320_vm7 = vweird.f32 %v8956_v57  ;;  %v8990_v49 = vmov 20.0  }
  0xe9   :  { %vm321_vm9 = vmor %vm319_vm8, %vm320_vm7  ;;  %8957 = vrcp.f32 %v8990_v49  ;;  %v5863_v49 = vld [vmem:[%s13732_s3 + $0x58] sm:$0xff] }
  0xea   :  { %v315_v59 = vmul.f32 %v8956_v57, %v314_v58 }
  0xec   :  { %v316_v60 = vmul.f32 0.5, %v315_v59 }
  0xee   :  { %v317_v61 = vsub.f32 1.5, %v316_v60 }
  0xef   :  { %v8958_v55 = vpop.eup %8957 }
  0xf0   :  { %v318_v62 = vmul.f32 %v8956_v57, %v317_v61  ;;  %v543_v61 = vmul.f32 20.0, %v8958_v55  ;;  %vm547_vm12 = vweird.f32 %v8958_v55 }
  0xf2   :  { %v322_v0 = vsel %vm321_vm9, %v8956_v57, %v318_v62 }
  0xf3   :  { %v323_v1 = vmul.f32 %v322_v0, %v9169_v18  ;;  %v324_v2 = vmul.f32 %v322_v0, %v9171_v19  ;;  %v325_v3 = vmul.f32 %v322_v0, %v9173_v20  ;;  %v326_v4 = vmul.f32 %v322_v0, %v9175_v21 }
  0xf5   :  { %v331_v6 = vmul.f32 %v8946_v63, %v323_v1  ;;  %v332_v7 = vmul.f32 %v8946_v63, %v324_v2  ;;  %v333_v8 = vmul.f32 %v8946_v63, %v325_v3  ;;  %v334_v9 = vmul.f32 %v8946_v63, %v326_v4 }
  0xf6   :  { %v544_v3 = vsub.f32 1.0, %v543_v61  ;;  %v5883_v61 = vld [vmem:[%s13732_s3 + $0xc8] sm:$0xff] }
  0xf7   :  { %v340_v10 = vadd.f32 %v8947_v5, %v332_v7  ;;  %v341_v11 = vadd.f32 %v8947_v5, %v333_v8  ;;  %v342_v12 = vadd.f32 %v8947_v5, %v334_v9  ;;  %v339_v13 = vadd.f32 %v8947_v5, %v331_v6 }
  0xf8   :  { %v545_v6 = vmul.f32 %v8958_v55, %v544_v3 }
  0xf9   :  { %v344_v14 = vmul.f32 0.2, %v340_v10  ;;  %v345_v15 = vmul.f32 0.2, %v341_v11  ;;  %v346_v16 = vmul.f32 0.2, %v342_v12 }
  0xfa   :  { %v343_v17 = vmul.f32 0.2, %v339_v13  ;;  %v546_v9 = vadd.f32 %v8958_v55, %v545_v6 }
  0xfb   :  { %v348_v18 = vmax.f32 %v340_v10, %v344_v14  ;;  %v349_v19 = vmax.f32 %v341_v11, %v345_v15  ;;  %v350_v20 = vmax.f32 %v342_v12, %v346_v16 }
  0xfc   :  { %v347_v21 = vmax.f32 %v339_v13, %v343_v17  ;;  %v9285_v12 = vsel %vm547_vm12, %v8958_v55, %v546_v9  ;;  %v5874_v55 = vld [vmem:[%s13732_s3 + $0x90] sm:$0xff] }
  0xfd   :  { %352 = vst.msk [vmem:[%s13761_s20 + $0x8] sm:$0xff] %vm267_vm4, %v348_v18  ;;  %v370_v22 = vrot.slane %v349_v19, 2  ;;  %v368_v23 = vrot.slane %v348_v18, 2  ;;  %v488_v24 = vrot.slane %v348_v18, 6  ;;  %v442_v30 = vrot.slane %v348_v18, 4 }
  0xfe   :  { %353 = vst.msk [vmem:[%s13761_s20 + $0x10] sm:$0xff] %vm267_vm4, %v349_v19  ;;  %5843 = vmatmul.msk.f32.vlgmr.msra.gmra.mxu1 %vm267_vm4, %v347_v21  ;;  %v367_v25 = vrot.slane %v347_v21, 2  ;;  %v487_v26 = vrot.slane %v347_v21, 6  ;;  %v441_v29 = vrot.slane %v347_v21, 4  ;;  %v490_v31 = vrot.slane %v349_v19, 6 }
  0xff   :  { %354 = vst.msk [vmem:[%s13761_s20 + $0x18] sm:$0x3] %vm273_vm5, %v350_v20  ;;  %5842 = vmatmul.msk.f32.vlgmr.msrb.gmra.mxu2 %vm267_vm4, %v370_v22  ;;  %v371_v33 = vsel %vm80_vm3, %v368_v23, %v370_v22  ;;  %v444_v35 = vrot.slane %v349_v19, 4  ;;  %v492_v36 = vrot.slane %v350_v20, 6 }
 0x100   :  { %351 = vst.msk [vmem:[%s13761_s20] sm:$0xff] %vm267_vm4, %v347_v21  ;;  %v369_v27 = vsel %vm80_vm3, %v367_v25, %v368_v23  ;;  %v489_v28 = vsel %vm218_vm2, %v487_v26, %v488_v24  ;;  %v443_v32 = vsel %vm166_vm1, %v441_v29, %v442_v30  ;;  %v491_v34 = vsel %vm218_vm2, %v488_v24, %v490_v31  ;;  %v609_v26 = vld [vmem:[%s13732_s3 + $0x38] sm:$0xff] }
 0x101   :  { %5840 = vmatmul.msk.f32.vlgmr.msrb.gmra.mxu0 %vm267_vm4, %v369_v27  ;;  %5857 = vmatmul.msk.f32.vlgmr.msrb.gmra.mxu3 %vm267_vm4, %v489_v28  ;;  %v445_v37 = vsel %vm166_vm1, %v442_v30, %v444_v35  ;;  %v493_v38 = vsel %vm218_vm2, %v490_v31, %v492_v36  ;;  %v608_v28 = vld [vmem:[%s13732_s3 + $0x30] sm:$0xff]  ;;  %v5867_v30 = vld [vmem:[%s13732_s3 + $0x78] sm:$0xff] }
 0x102   :  { %663 = vmatpush.msrb.mxu1 %v609_v26  ;;  %v5879_v31 = vld [vmem:[%s13732_s3 + $0xb8] sm:$0xff]  ;;  %636 = vmatpush.msra.mxu0 %v5867_v30  ;;  %v5878_v36 = vld [vmem:[%s13732_s3 + $0xb0] sm:$0xff] }
 0x103   :  { %705 = vmatpush.msrb.mxu2 %v5879_v31 }
 0x104   :  { %664 = vmatpush.msrb.mxu1 %v608_v28 }
 0x105   :  { %706 = vmatpush.msrb.mxu2 %v5878_v36 }
 0x106   :  { %5844 = vmatmul.msk.f32.gmra.mxu1 %vm267_vm4, %v348_v18 }
 0x107   :  { %5850 = vmatmul.msk.f32.vlgmr.msra.gmra.mxu2 %vm267_vm4, %v443_v32  ;;  %v5889_v32 = vld [vmem:[%s13732_s3 + $0xf8] sm:$0xff] }
 0x108   :  { %748 = vmatpush.msra.mxu3 %v5889_v32 }
 0x109   :  { %5841 = vmatmul.msk.f32.gmra.mxu0 %vm267_vm4, %v371_v33  ;;  %5858 = vmatmul.msk.f32.gmra.mxu3 %vm267_vm4, %v491_v34  ;;  %v607_v33 = vld [vmem:[%s13732_s3 + $0x28] sm:$0xff] }
 0x10a   :  { %665 = vmatpush.msrb.mxu1 %v607_v33 }
 0x10e   :  { %5845 = vmatmul.msk.f32.gmra.mxu1 %vm267_vm4, %v349_v19 }
 0x10f   :  { %5851 = vmatmul.msk.f32.gmra.mxu2 %vm267_vm4, %v445_v37  ;;  %v5888_v37 = vld [vmem:[%s13732_s3 + $0xf0] sm:$0xff] }
 0x110   :  { %749 = vmatpush.msra.mxu3 %v5888_v37 }
 0x111   :  { %5859 = vmatmul.msk.f32.gmra.mxu3 %vm267_vm4, %v493_v38  ;;  %v606_v38 = vld [vmem:[%s13732_s3 + $0x20] sm:$0xff] }
 0x112   :  { %666 = vmatpush.msrb.mxu1 %v606_v38 }
 0x117   :  { %5852 = vmatmul.msk.f32.gmra.mxu2 %vm267_vm4, %v444_v35  ;;  %v5866_v35 = vld [vmem:[%s13732_s3 + $0x70] sm:$0xff] }
 0x118   :  { %637 = vmatpush.msra.mxu0 %v5866_v35 }
 0x17b   :  { %v427_v39 = vpop.f32.mrf.mxu1 }
 0x17e   :  { %v395_v41 = vpop.f32.mrf.mxu0 }
 0x17f   :  { %v428_v50 = vadd.f32 %v427_v39, %v395_v41  ;;  %v5877_v41 = vld [vmem:[%s13732_s3 + $0xa8] sm:$0xff] }
 0x180   :  { %707 = vmatpush.msrb.mxu2 %v5877_v41  ;;  %v853_v41 = vld [vmem:[%s13735_s4 + $0xf0] sm:$0xff] }
 0x182   :  { %v401_v40 = vpop.f32.mrf.mxu2 }
 0x183   :  { %v430_v44 = vpop.f32.mrf.mxu1 }
 0x184   :  { %v517_v42 = vpop.f32.mrf.mxu3 }
 0x186   :  { %v398_v45 = vpop.f32.mrf.mxu0 }
 0x187   :  { %v431_v46 = vadd.f32 %v430_v44, %v398_v45  ;;  %v5864_v45 = vld [vmem:[%s13732_s3 + $0x60] sm:$0xff] }
 0x18a   :  { %v469_v43 = vpop.f32.mrf.mxu2 }
 0x18b   :  { %v478_v52 = vadd.f32 %v469_v43, %v428_v50  ;;  %v433_v53 = vpop.f32.mrf.mxu1  ;;  %v605_v43 = vld [vmem:[%s13732_s3 + $0x18] sm:$0xff] }
 0x18c   :  { %v520_v47 = vpop.f32.mrf.mxu3  ;;  %v434_v56 = vadd.f32 %v433_v53, %v401_v40  ;;  %v5865_v40 = vld [vmem:[%s13732_s3 + $0x68] sm:$0xff]  ;;  %667 = vmatpush.msrb.mxu1 %v605_v43  ;;  %v5875_v50 = vld [vmem:[%s13732_s3 + $0x98] sm:$0xff]  ;;  %v851_v43 = vld [vmem:[%s13735_s4 + $0xe0] sm:$0xff] }
 0x18d   :  { %v526_v57 = vadd.f32 %v517_v42, %v478_v52  ;;  %v5887_v42 = vld [vmem:[%s13732_s3 + $0xe8] sm:$0xff]  ;;  %638 = vmatpush.msra.mxu0 %v5865_v40  ;;  %v5885_v52 = vld [vmem:[%s13732_s3 + $0xd8] sm:$0xff] }
 0x18e   :  { %750 = vmatpush.msra.mxu3 %v5887_v42  ;;  %v603_v53 = vld [vmem:[%s13732_s3 + $0x8] sm:$0xff]  ;;  %v854_v42 = vld [vmem:[%s13735_s4 + $0xf8] sm:$0xff] }
 0x18f   :  { %v530_v63 = vsel %vm529_vm10, %v526_v57, 0.0  ;;  %639 = vmatpush.msra.mxu0 %v5864_v45 }
 0x191   :  { %640 = vmatpush.msra.mxu0 %v5863_v49 }
 0x192   :  { %v472_v48 = vpop.f32.mrf.mxu2 }
 0x193   :  { %v479_v51 = vadd.f32 %v472_v48, %v431_v46  ;;  %v5876_v46 = vld [vmem:[%s13732_s3 + $0xa0] sm:$0xff]  ;;  %v604_v48 = vld [vmem:[%s13732_s3 + $0x10] sm:$0xff] }
 0x194   :  { %v523_v62 = vpop.f32.mrf.mxu3  ;;  %708 = vmatpush.msrb.mxu2 %v5876_v46  ;;  %668 = vmatpush.msrb.mxu1 %v604_v48  ;;  %v8991_v46 = vmov 14.0   ;;  %v5923_v48 = vld [vmem:[%s13735_s4 + $0x1f8] sm:$0xff] }
 0x195   :  { %v527_v54 = vadd.f32 %v520_v47, %v479_v51  ;;  %v5886_v47 = vld [vmem:[%s13732_s3 + $0xe0] sm:$0xff] }
 0x196   :  { %751 = vmatpush.msra.mxu3 %v5886_v47  ;;  %709 = vmatpush.msrb.mxu2 %v5875_v50  ;;  %v5922_v47 = vld [vmem:[%s13735_s4 + $0x1f0] sm:$0xff] }
 0x197   :  { %v531_v59 = vsel %vm529_vm10, %v527_v54, 0.0  ;;  %669 = vmatpush.msrb.mxu1 %v603_v53  ;;  %v849_v50 = vld [vmem:[%s13735_s4 + $0xd0] sm:$0xff]  ;;  %v5921_v53 = vld [vmem:[%s13735_s4 + $0x1e8] sm:$0xff] }
 0x198   :  { %v532_v1 = vadd.f32 %v531_v59, %v530_v63  ;;  %752 = vmatpush.msra.mxu3 %v5885_v52  ;;  %v5861_v59 = vld [vmem:[%s13732_s3 + $0x48] sm:$0xff]  ;;  %710 = vmatpush.msrb.mxu2 %v5874_v55  ;;  %v5860_v63 = vld [vmem:[%s13732_s3 + $0x40] sm:$0xff] }
 0x199   :  { %v5920_v52 = vld [vmem:[%s13735_s4 + $0x1e0] sm:$0xff]  ;;  %v848_v55 = vld [vmem:[%s13735_s4 + $0xc8] sm:$0xff] }
 0x19a   :  { %v475_v58 = vpop.f32.mrf.mxu2 }
 0x19b   :  { %v480_v60 = vadd.f32 %v475_v58, %v434_v56  ;;  %v5884_v56 = vld [vmem:[%s13732_s3 + $0xd0] sm:$0xff] }
 0x19c   :  { %753 = vmatpush.msra.mxu3 %v5884_v56 }
 0x19d   :  { %v528_v0 = vadd.f32 %v523_v62, %v480_v60  ;;  %v5873_v60 = vld [vmem:[%s13732_s3 + $0x88] sm:$0xff] }
 0x19e   :  { %711 = vmatpush.msrb.mxu2 %v5873_v60  ;;  %754 = vmatpush.msra.mxu3 %v5883_v61  ;;  %v846_v60 = vld [vmem:[%s13735_s4 + $0xb8] sm:$0xff] }
 0x19f   :  { %v534_v2 = vsel %vm533_vm11, %v528_v0, 0.0 }
 0x1a0   :  { %v535_v4 = vadd.f32 %v534_v2, %v532_v1  ;;  %v5882_v1 = vld [vmem:[%s13732_s3 + $0xc0] sm:$0xff] }
 0x1a1   :  { %755 = vmatpush.msra.mxu3 %v5882_v1  ;;  %v5917_v1 = vld [vmem:[%s13735_s4 + $0x1c8] sm:$0xff] }
 0x1a2   :  { %v536_v5 = vrot.slane %v535_v4, 4 }
 0x1a3   :  { %954 = vmatpush.msrb.mxu3 %v854_v42 }
 0x1a4   :  { %v537_v7 = vadd.f32 %v536_v5, %v535_v4 }
 0x1a6   :  { %v538_v8 = vrot.slane %v537_v7, 2 }
 0x1a8   :  { %v539_v10 = vadd.f32 %v538_v8, %v537_v7  ;;  %v8948_v8 = vld [vmem:[%s13730_s12] ss:$0 sm:$0xff] }
 0x1aa   :  { %v540_v11 = vrot.slane %v539_v10, 1 }
 0x1ac   :  { %v541_v13 = vadd.f32 %v540_v11, %v539_v10 }
 0x1ae   :  { %v549_v14 = vmul.f32 %v9285_v12, %v541_v13  ;;  %v8949_v13 = vld [vmem:[%s13731_s13] ss:$0 sm:$0xff] }
 0x1b0   :  { %v9288_v15 = vsub.f32 %v526_v57, %v549_v14  ;;  %v9290_v16 = vsub.f32 %v527_v54, %v549_v14  ;;  %v9292_v17 = vsub.f32 %v528_v0, %v549_v14  ;;  %v5862_v54 = vld [vmem:[%s13732_s3 + $0x50] sm:$0xff]  ;;  %v602_v57 = vld [vmem:[%s13732_s3] sm:$0xff] }
 0x1b1   :  { %641 = vmatpush.msra.mxu0 %v5862_v54  ;;  %670 = vmatpush.msrb.mxu1 %v602_v57  ;;  %v5872_v0 = vld [vmem:[%s13732_s3 + $0x80] sm:$0xff]  ;;  %v5918_v57 = vld [vmem:[%s13735_s4 + $0x1d0] sm:$0xff] }
 0x1b2   :  { %v553_v18 = vmul.f32 %v9288_v15, %v9288_v15  ;;  %v554_v19 = vmul.f32 %v9290_v16, %v9290_v16  ;;  %v555_v20 = vmul.f32 %v9292_v17, %v9292_v17  ;;  %712 = vmatpush.msrb.mxu2 %v5872_v0  ;;  %v847_v54 = vld [vmem:[%s13735_s4 + $0xc0] sm:$0xff] }
 0x1b3   :  { %642 = vmatpush.msra.mxu0 %v5861_v59  ;;  %914 = vmatpush.msra.mxu1 %v5923_v48  ;;  %v845_v59 = vld [vmem:[%s13735_s4 + $0xb0] sm:$0xff]  ;;  %v5916_v0 = vld [vmem:[%s13735_s4 + $0x1c0] sm:$0xff] }
 0x1b4   :  { %v556_v21 = vsel %vm529_vm10, %v553_v18, 0.0  ;;  %v557_v22 = vsel %vm529_vm10, %v554_v19, 0.0  ;;  %v559_v24 = vsel %vm533_vm11, %v555_v20, 0.0  ;;  %934 = vmatpush.msra.mxu2 %v853_v41  ;;  %v832_v41 = vld [vmem:[%s13735_s4 + $0x48] sm:$0xff] }
 0x1b5   :  { %v558_v23 = vadd.f32 %v557_v22, %v556_v21  ;;  %643 = vmatpush.msra.mxu0 %v5860_v63  ;;  %915 = vmatpush.msra.mxu1 %v5921_v53 }
 0x1b6   :  { %935 = vmatpush.msra.mxu2 %v851_v43  ;;  %v5902_v43 = vld [vmem:[%s13735_s4 + $0x150] sm:$0xff] }
 0x1b7   :  { %v560_v25 = vadd.f32 %v559_v24, %v558_v23  ;;  %894 = vmatpush.msrb.mxu0 %v5922_v47  ;;  %v830_v47 = vld [vmem:[%s13735_s4 + $0x38] sm:$0xff] }
 0x1b8   :  { %936 = vmatpush.msra.mxu2 %v849_v50  ;;  %v5901_v50 = vld [vmem:[%s13735_s4 + $0x148] sm:$0xff] }
 0x1b9   :  { %v561_v27 = vrot.slane %v560_v25, 4  ;;  %895 = vmatpush.msrb.mxu0 %v5920_v52  ;;  %v828_v52 = vld [vmem:[%s13735_s4 + $0x28] sm:$0xff] }
 0x1ba   :  { %937 = vmatpush.msra.mxu2 %v847_v54  ;;  %v5898_v54 = vld [vmem:[%s13735_s4 + $0x130] sm:$0xff] }
 0x1bb   :  { %v562_v29 = vadd.f32 %v561_v27, %v560_v25  ;;  %896 = vmatpush.msrb.mxu0 %v5918_v57  ;;  %v825_v57 = vld [vmem:[%s13735_s4 + $0x10] sm:$0xff] }
 0x1bc   :  { %938 = vmatpush.msra.mxu2 %v845_v59 }
 0x1bd   :  { %v563_v34 = vrot.slane %v562_v29, 2  ;;  %897 = vmatpush.msrb.mxu0 %v5916_v0 }
 0x1bf   :  { %v564_v39 = vadd.f32 %v563_v34, %v562_v29 }
 0x1c1   :  { %v565_v44 = vrot.slane %v564_v39, 1 }
 0x1c3   :  { %v566_v51 = vadd.f32 %v565_v44, %v564_v39  ;;  %v852_v44 = vld [vmem:[%s13735_s4 + $0xe8] sm:$0xff] }
 0x1c4   :  { %955 = vmatpush.msrb.mxu3 %v852_v44  ;;  %v5903_v44 = vld [vmem:[%s13735_s4 + $0x158] sm:$0xff] }
 0x1c5   :  { %v567_v58 = vmul.f32 %v566_v51, %v9285_v12  ;;  %v850_v51 = vld [vmem:[%s13735_s4 + $0xd8] sm:$0xff] }
 0x1c6   :  { %956 = vmatpush.msrb.mxu3 %v850_v51  ;;  %v827_v51 = vld [vmem:[%s13735_s4 + $0x20] sm:$0xff] }
 0x1c7   :  { %v568_v62 = vadd.f32 1e-05, %v567_v58  ;;  %v5919_v58 = vld [vmem:[%s13735_s4 + $0x1d8] sm:$0xff] }
 0x1c8   :  { %957 = vmatpush.msrb.mxu3 %v848_v55  ;;  %916 = vmatpush.msra.mxu1 %v5919_v58  ;;  %v5899_v55 = vld [vmem:[%s13735_s4 + $0x138] sm:$0xff] }
 0x1c9   :  { %8959 = vrsqrt.f32 %v568_v62  ;;  %vm575_vm14 = vweird.f32 %v568_v62  ;;  %v826_v58 = vld [vmem:[%s13735_s4 + $0x18] sm:$0xff] }
 0x1ca   :  { %8961 = vrcp.f32 %v8991_v46  ;;  %958 = vmatpush.msrb.mxu3 %v846_v60  ;;  %917 = vmatpush.msra.mxu1 %v5917_v1  ;;  %v829_v46 = vld [vmem:[%s13735_s4 + $0x30] sm:$0xff]  ;;  %v5896_v60 = vld [vmem:[%s13735_s4 + $0x120] sm:$0xff] }
 0x1cb   :  { %v5894_v1 = vld [vmem:[%s13735_s4 + $0x110] sm:$0xff] }
 0x1cf   :  { %v8960_v2 = vpop.eup %8959 }
 0x1d0   :  { %v570_v3 = vmul.f32 %v8960_v2, %v568_v62  ;;  %vm576_vm13 = vweird.f32 %v8960_v2  ;;  %v9470_v61 = vpop.eup %8961 }
 0x1d1   :  { %vm577_vm15 = vmor %vm575_vm14, %vm576_vm13  ;;  %vm778_vm0 = vweird.f32 %v9470_v61 }
 0x1d2   :  { %v571_v4 = vmul.f32 %v8960_v2, %v570_v3  ;;  %v843_v3 = vld [vmem:[%s13735_s4 + $0xa0] sm:$0xff] }
 0x1d3   :  { %939 = vmatpush.msra.mxu2 %v843_v3  ;;  %v5986_v3 = vld [vmem:[%s13735_s4 + $0x3f0] sm:$0xff] }
 0x1d4   :  { %v572_v5 = vmul.f32 0.5, %v571_v4  ;;  %v844_v4 = vld [vmem:[%s13735_s4 + $0xa8] sm:$0xff] }
 0x1d5   :  { %959 = vmatpush.msrb.mxu3 %v844_v4  ;;  %v5987_v4 = vld [vmem:[%s13735_s4 + $0x3f8] sm:$0xff] }
 0x1d6   :  { %v573_v6 = vsub.f32 1.5, %v572_v5 }
 0x1d8   :  { %v574_v7 = vmul.f32 %v8960_v2, %v573_v6 }
 0x1da   :  { %v578_v9 = vsel %vm577_vm15, %v8960_v2, %v574_v7  ;;  %v5914_v7 = vld [vmem:[%s13735_s4 + $0x1b0] sm:$0xff] }
 0x1db   :  { %v579_v10 = vmul.f32 %v578_v9, %v9288_v15  ;;  %v580_v11 = vmul.f32 %v578_v9, %v9290_v16  ;;  %v581_v12 = vmul.f32 %v578_v9, %v9292_v17  ;;  %898 = vmatpush.msrb.mxu0 %v5914_v7  ;;  %v5892_v7 = vld [vmem:[%s13735_s4 + $0x100] sm:$0xff] }
 0x1dd   :  { %v586_v14 = vmul.f32 %v8948_v8, %v579_v10  ;;  %v587_v18 = vmul.f32 %v8948_v8, %v580_v11  ;;  %v588_v19 = vmul.f32 %v8948_v8, %v581_v12  ;;  %v5915_v8 = vld [vmem:[%s13735_s4 + $0x1b8] sm:$0xff]  ;;  %v774_v10 = vmul.f32 14.0, %v9470_v61  ;;  %v841_v11 = vld [vmem:[%s13735_s4 + $0x90] sm:$0xff] }
 0x1de   :  { %918 = vmatpush.msra.mxu1 %v5915_v8  ;;  %v842_v12 = vld [vmem:[%s13735_s4 + $0x98] sm:$0xff]  ;;  %940 = vmatpush.msra.mxu2 %v841_v11  ;;  %v5893_v8 = vld [vmem:[%s13735_s4 + $0x108] sm:$0xff]  ;;  %v5954_v11 = vld [vmem:[%s13735_s4 + $0x2f0] sm:$0xff] }
 0x1df   :  { %v594_v20 = vadd.f32 %v8949_v13, %v587_v18  ;;  %v593_v21 = vadd.f32 %v8949_v13, %v586_v14  ;;  %v595_v22 = vadd.f32 %v8949_v13, %v588_v19  ;;  %960 = vmatpush.msrb.mxu3 %v842_v12  ;;  %v5912_v14 = vld [vmem:[%s13735_s4 + $0x1a0] sm:$0xff]  ;;  %v5913_v18 = vld [vmem:[%s13735_s4 + $0x1a8] sm:$0xff]  ;;  %v5955_v12 = vld [vmem:[%s13735_s4 + $0x2f8] sm:$0xff] }
 0x1e0   :  { %899 = vmatpush.msrb.mxu0 %v5912_v14  ;;  %919 = vmatpush.msra.mxu1 %v5913_v18  ;;  %v5982_v18 = vld [vmem:[%s13735_s4 + $0x3d0] sm:$0xff] }
 0x1e1   :  { %v597_v23 = vmul.f32 0.2, %v594_v20  ;;  %v596_v24 = vmul.f32 0.2, %v593_v21  ;;  %v598_v27 = vmul.f32 0.2, %v595_v22 }
 0x1e3   :  { %v599_v25 = vmax.f32 %v593_v21, %v596_v24  ;;  %v600_v26 = vmax.f32 %v594_v20, %v597_v23  ;;  %v601_v33 = vmax.f32 %v595_v22, %v598_v27  ;;  %v839_v20 = vld [vmem:[%s13735_s4 + $0x80] sm:$0xff]  ;;  %v840_v21 = vld [vmem:[%s13735_s4 + $0x88] sm:$0xff]  ;;  %v5910_v23 = vld [vmem:[%s13735_s4 + $0x190] sm:$0xff] }
 0x1e4   :  { %941 = vmatpush.msra.mxu2 %v839_v20  ;;  %961 = vmatpush.msrb.mxu3 %v840_v21  ;;  %v5911_v24 = vld [vmem:[%s13735_s4 + $0x198] sm:$0xff]  ;;  %v837_v27 = vld [vmem:[%s13735_s4 + $0x70] sm:$0xff]  ;;  %v5952_v20 = vld [vmem:[%s13735_s4 + $0x2e0] sm:$0xff] }
 0x1e5   :  { %5870 = vmatmul.msk.f32.vlgmr.msrb.gmra.mxu1 %vm529_vm10, %v599_v25  ;;  %v621_v15 = vrot.slane %v599_v25, 2  ;;  %v622_v16 = vrot.slane %v600_v26, 2  ;;  %v688_v17 = vrot.slane %v599_v25, 4  ;;  %v689_v28 = vrot.slane %v600_v26, 4  ;;  %900 = vmatpush.msrb.mxu0 %v5910_v23  ;;  %v5953_v21 = vld [vmem:[%s13735_s4 + $0x2e8] sm:$0xff]  ;;  %v5980_v23 = vld [vmem:[%s13735_s4 + $0x3c0] sm:$0xff] }
 0x1e6   :  { %v731_v29 = vrot.slane %v599_v25, 6  ;;  %v732_v30 = vrot.slane %v600_v26, 6  ;;  %v691_v35 = vrot.slane %v601_v33, 4  ;;  %v734_v36 = vrot.slane %v601_v33, 6  ;;  %920 = vmatpush.msra.mxu1 %v5911_v24  ;;  %942 = vmatpush.msra.mxu2 %v837_v27  ;;  %v5907_v33 = vld [vmem:[%s13735_s4 + $0x178] sm:$0xff]  ;;  %v5981_v24 = vld [vmem:[%s13735_s4 + $0x3c8] sm:$0xff] }
 0x1e7   :  { %v623_v31 = vsel %vm80_vm3, %v621_v15, %v622_v16  ;;  %v690_v32 = vsel %vm166_vm1, %v688_v17, %v689_v28  ;;  %v838_v15 = vld [vmem:[%s13735_s4 + $0x78] sm:$0xff]  ;;  %v5908_v17 = vld [vmem:[%s13735_s4 + $0x180] sm:$0xff] }
 0x1e8   :  { %5868 = vmatmul.msk.f32.vlgmr.msra.gmra.mxu0 %vm529_vm10, %v623_v31  ;;  %5880 = vmatmul.msk.f32.vlgmr.msrb.gmra.mxu2 %vm529_vm10, %v690_v32  ;;  %v733_v34 = vsel %vm218_vm2, %v731_v29, %v732_v30  ;;  %v692_v37 = vsel %vm166_vm1, %v689_v28, %v691_v35  ;;  %v735_v38 = vsel %vm218_vm2, %v732_v30, %v734_v36  ;;  %v5909_v28 = vld [vmem:[%s13735_s4 + $0x188] sm:$0xff]  ;;  %v835_v29 = vld [vmem:[%s13735_s4 + $0x60] sm:$0xff]  ;;  %v5906_v32 = vld [vmem:[%s13735_s4 + $0x170] sm:$0xff] }
 0x1e9   :  { %5890 = vmatmul.msk.f32.vlgmr.msra.gmra.mxu3 %vm529_vm10, %v733_v34  ;;  %901 = vmatpush.msrb.mxu0 %v5908_v17  ;;  %v836_v30 = vld [vmem:[%s13735_s4 + $0x68] sm:$0xff]  ;;  %v833_v35 = vld [vmem:[%s13735_s4 + $0x50] sm:$0xff]  ;;  %v834_v36 = vld [vmem:[%s13735_s4 + $0x58] sm:$0xff] }
 0x1ea   :  { %962 = vmatpush.msrb.mxu3 %v838_v15  ;;  %921 = vmatpush.msra.mxu1 %v5909_v28  ;;  %v5951_v27 = vld [vmem:[%s13735_s4 + $0x2d8] sm:$0xff]  ;;  %v5978_v15 = vld [vmem:[%s13735_s4 + $0x3b0] sm:$0xff]  ;;  %v5948_v28 = vld [vmem:[%s13735_s4 + $0x2c0] sm:$0xff] }
 0x1eb   :  { %943 = vmatpush.msra.mxu2 %v835_v29  ;;  %902 = vmatpush.msrb.mxu0 %v5906_v32  ;;  %v5949_v29 = vld [vmem:[%s13735_s4 + $0x2c8] sm:$0xff] }
 0x1ec   :  { %963 = vmatpush.msrb.mxu3 %v836_v30  ;;  %922 = vmatpush.msra.mxu1 %v5907_v33  ;;  %v5976_v30 = vld [vmem:[%s13735_s4 + $0x3a0] sm:$0xff]  ;;  %v5946_v33 = vld [vmem:[%s13735_s4 + $0x2b0] sm:$0xff] }
 0x1ed   :  { %5871 = vmatmul.msk.f32.gmra.mxu1 %vm529_vm10, %v600_v26  ;;  %v775_v26 = vsub.f32 1.0, %v774_v10  ;;  %944 = vmatpush.msra.mxu2 %v833_v35  ;;  %v5985_v10 = vld [vmem:[%s13735_s4 + $0x3e8] sm:$0xff]  ;;  %v5974_v35 = vld [vmem:[%s13735_s4 + $0x390] sm:$0xff] }
 0x1ee   :  { %964 = vmatpush.msrb.mxu3 %v834_v36  ;;  %v5975_v36 = vld [vmem:[%s13735_s4 + $0x398] sm:$0xff] }
 0x1ef   :  { %v776_v34 = vmul.f32 %v9470_v61, %v775_v26  ;;  %v5950_v26 = vld [vmem:[%s13735_s4 + $0x2d0] sm:$0xff] }
 0x1f0   :  { %5869 = vmatmul.msk.f32.gmra.mxu0 %vm529_vm10, %v622_v16  ;;  %5881 = vmatmul.msk.f32.gmra.mxu2 %vm529_vm10, %v692_v37 }
 0x1f1   :  { %5891 = vmatmul.msk.f32.gmra.mxu3 %vm529_vm10, %v735_v38  ;;  %v5904_v38 = vld [vmem:[%s13735_s4 + $0x160] sm:$0xff] }
 0x1f2   :  { %903 = vmatpush.msrb.mxu0 %v5904_v38  ;;  %965 = vmatpush.msrb.mxu3 %v832_v41  ;;  %v5944_v38 = vld [vmem:[%s13735_s4 + $0x2a0] sm:$0xff]  ;;  %v5973_v41 = vld [vmem:[%s13735_s4 + $0x388] sm:$0xff] }
 0x1f4   :  { %904 = vmatpush.msrb.mxu0 %v5902_v43  ;;  %966 = vmatpush.msrb.mxu3 %v830_v47  ;;  %v5942_v43 = vld [vmem:[%s13735_s4 + $0x290] sm:$0xff] }
 0x1f6   :  { %967 = vmatpush.msrb.mxu3 %v828_v52 }
 0x1f8   :  { %968 = vmatpush.msrb.mxu3 %v826_v58  ;;  %v5936_v58 = vld [vmem:[%s13735_s4 + $0x260] sm:$0xff] }
 0x262   :  { %v672_v40 = vpop.f32.mrf.mxu1 }
 0x265   :  { %v645_v39 = vpop.f32.mrf.mxu0 }
 0x266   :  { %v673_v62 = vadd.f32 %v672_v40, %v645_v39  ;;  %v5905_v39 = vld [vmem:[%s13735_s4 + $0x168] sm:$0xff]  ;;  %v831_v40 = vld [vmem:[%s13735_s4 + $0x40] sm:$0xff] }
 0x267   :  { %923 = vmatpush.msra.mxu1 %v5905_v39  ;;  %945 = vmatpush.msra.mxu2 %v831_v40  ;;  %v5945_v39 = vld [vmem:[%s13735_s4 + $0x2a8] sm:$0xff]  ;;  %v5972_v40 = vld [vmem:[%s13735_s4 + $0x380] sm:$0xff] }
 0x269   :  { %924 = vmatpush.msra.mxu1 %v5903_v44  ;;  %946 = vmatpush.msra.mxu2 %v829_v46  ;;  %v5943_v44 = vld [vmem:[%s13735_s4 + $0x298] sm:$0xff] }
 0x26a   :  { %v675_v63 = vpop.f32.mrf.mxu1  ;;  %v5971_v46 = vld [vmem:[%s13735_s4 + $0x378] sm:$0xff] }
 0x26b   :  { %v714_v45 = vpop.f32.mrf.mxu2  ;;  %925 = vmatpush.msra.mxu1 %v5901_v50  ;;  %947 = vmatpush.msra.mxu2 %v827_v51  ;;  %v5968_v50 = vld [vmem:[%s13735_s4 + $0x360] sm:$0xff]  ;;  %v5969_v51 = vld [vmem:[%s13735_s4 + $0x368] sm:$0xff] }
 0x26c   :  { %v757_v49 = vpop.f32.mrf.mxu3  ;;  %v720_v5 = vadd.f32 %v714_v45, %v673_v62  ;;  %v777_v45 = vadd.f32 %v9470_v61, %v776_v34  ;;  %v823_v62 = vld [vmem:[%s13735_s4] sm:$0xff]  ;;  %v5947_v34 = vld [vmem:[%s13735_s4 + $0x2b8] sm:$0xff] }
 0x26d   :  { %v648_v56 = vpop.f32.mrf.mxu0  ;;  %926 = vmatpush.msra.mxu1 %v5899_v55  ;;  %948 = vmatpush.msra.mxu2 %v825_v57  ;;  %v5966_v55 = vld [vmem:[%s13735_s4 + $0x350] sm:$0xff]  ;;  %v5967_v57 = vld [vmem:[%s13735_s4 + $0x358] sm:$0xff] }
 0x26e   :  { %v676_v2 = vadd.f32 %v675_v63, %v648_v56  ;;  %v9511_v22 = vadd.f32 %v757_v49, %v720_v5  ;;  %v5900_v49 = vld [vmem:[%s13735_s4 + $0x140] sm:$0xff]  ;;  %v9598_v56 = vsel %vm778_vm0, %v9470_v61, %v777_v45  ;;  %v5897_v61 = vld [vmem:[%s13735_s4 + $0x128] sm:$0xff]  ;;  %v5970_v45 = vld [vmem:[%s13735_s4 + $0x370] sm:$0xff] }
 0x26f   :  { %905 = vmatpush.msrb.mxu0 %v5900_v49  ;;  %927 = vmatpush.msra.mxu1 %v5897_v61  ;;  %v824_v63 = vld [vmem:[%s13735_s4 + $0x8] sm:$0xff]  ;;  %v5964_v61 = vld [vmem:[%s13735_s4 + $0x340] sm:$0xff] }
 0x270   :  { %949 = vmatpush.msra.mxu2 %v823_v62  ;;  %969 = vmatpush.msrb.mxu3 %v824_v63  ;;  %v5941_v49 = vld [vmem:[%s13735_s4 + $0x288] sm:$0xff]  ;;  %v5934_v63 = vld [vmem:[%s13735_s4 + $0x250] sm:$0xff] }
 0x271   :  { %906 = vmatpush.msrb.mxu0 %v5898_v54  ;;  %v5939_v54 = vld [vmem:[%s13735_s4 + $0x278] sm:$0xff]  ;;  %v5965_v62 = vld [vmem:[%s13735_s4 + $0x348] sm:$0xff] }
 0x272   :  { %1090 = vmatpush.msrb.mxu2 %v5986_v3  ;;  %1110 = vmatpush.msra.mxu3 %v5987_v4  ;;  %v5932_v3 = vld [vmem:[%s13735_s4 + $0x240] sm:$0xff]  ;;  %v5933_v4 = vld [vmem:[%s13735_s4 + $0x248] sm:$0xff] }
 0x273   :  { %v717_v6 = vpop.f32.mrf.mxu2  ;;  %907 = vmatpush.msrb.mxu0 %v5896_v60 }
 0x274   :  { %v721_v9 = vadd.f32 %v717_v6, %v676_v2  ;;  %v760_v13 = vpop.f32.mrf.mxu3  ;;  %v5895_v2 = vld [vmem:[%s13735_s4 + $0x118] sm:$0xff]  ;;  %1111 = vmatpush.msra.mxu3 %v5985_v10 }
 0x275   :  { %908 = vmatpush.msrb.mxu0 %v5894_v1  ;;  %928 = vmatpush.msra.mxu1 %v5895_v2  ;;  %v5962_v1 = vld [vmem:[%s13735_s4 + $0x330] sm:$0xff]  ;;  %v5963_v2 = vld [vmem:[%s13735_s4 + $0x338] sm:$0xff] }
 0x276   :  { %v9503_v19 = vadd.f32 %v760_v13, %v721_v9  ;;  %v5984_v9 = vld [vmem:[%s13735_s4 + $0x3e0] sm:$0xff]  ;;  %v5931_v10 = vld [vmem:[%s13735_s4 + $0x238] sm:$0xff] }
 0x277   :  { %909 = vmatpush.msrb.mxu0 %v5892_v7  ;;  %929 = vmatpush.msra.mxu1 %v5893_v8  ;;  %v5960_v7 = vld [vmem:[%s13735_s4 + $0x320] sm:$0xff]  ;;  %v5961_v8 = vld [vmem:[%s13735_s4 + $0x328] sm:$0xff] }
 0x278   :  { %v765_v25 = vsel %vm80_vm3, %v9503_v19, 0.0  ;;  %1091 = vmatpush.msrb.mxu2 %v5984_v9  ;;  %v5930_v9 = vld [vmem:[%s13735_s4 + $0x230] sm:$0xff] }
 0x279   :  { %v766_v16 = vadd.f32 %v765_v25, %v9511_v22  ;;  %1011 = vmatpush.msra.mxu0 %v5954_v11  ;;  %1031 = vmatpush.msrb.mxu1 %v5955_v12  ;;  %v5958_v11 = vld [vmem:[%s13735_s4 + $0x310] sm:$0xff]  ;;  %v5959_v12 = vld [vmem:[%s13735_s4 + $0x318] sm:$0xff] }
 0x27a   :  { %1092 = vmatpush.msrb.mxu2 %v5982_v18  ;;  %v5956_v18 = vld [vmem:[%s13735_s4 + $0x300] sm:$0xff] }
 0x27b   :  { %v767_v31 = vrot.slane %v766_v16, 4  ;;  %1012 = vmatpush.msra.mxu0 %v5952_v20  ;;  %1032 = vmatpush.msrb.mxu1 %v5953_v21  ;;  %v5926_v20 = vld [vmem:[%s13735_s4 + $0x210] sm:$0xff]  ;;  %v5927_v21 = vld [vmem:[%s13735_s4 + $0x218] sm:$0xff] }
 0x27c   :  { %1093 = vmatpush.msrb.mxu2 %v5980_v23 }
 0x27d   :  { %v768_v37 = vadd.f32 %v767_v31, %v766_v16  ;;  %v5979_v16 = vld [vmem:[%s13735_s4 + $0x3b8] sm:$0xff]  ;;  %1013 = vmatpush.msra.mxu0 %v5950_v26  ;;  %1033 = vmatpush.msrb.mxu1 %v5951_v27  ;;  %v5977_v31 = vld [vmem:[%s13735_s4 + $0x3a8] sm:$0xff] }
 0x27e   :  { %1094 = vmatpush.msrb.mxu2 %v5978_v15 }
 0x27f   :  { %v769_v42 = vrot.slane %v768_v37, 2  ;;  %1014 = vmatpush.msra.mxu0 %v5948_v28  ;;  %1034 = vmatpush.msrb.mxu1 %v5949_v29 }
 0x280   :  { %1095 = vmatpush.msrb.mxu2 %v5976_v30 }
 0x281   :  { %v770_v48 = vadd.f32 %v769_v42, %v768_v37  ;;  %1015 = vmatpush.msra.mxu0 %v5946_v33  ;;  %1035 = vmatpush.msrb.mxu1 %v5947_v34 }
 0x282   :  { %1096 = vmatpush.msrb.mxu2 %v5974_v35 }
 0x283   :  { %v771_v53 = vrot.slane %v770_v48, 1  ;;  %1016 = vmatpush.msra.mxu0 %v5944_v38  ;;  %1036 = vmatpush.msrb.mxu1 %v5945_v39 }
 0x284   :  { %1097 = vmatpush.msrb.mxu2 %v5972_v40 }
 0x285   :  { %v772_v59 = vadd.f32 %v771_v53, %v770_v48  ;;  %1017 = vmatpush.msra.mxu0 %v5942_v43  ;;  %1037 = vmatpush.msrb.mxu1 %v5943_v44  ;;  %v5940_v48 = vld [vmem:[%s13735_s4 + $0x280] sm:$0xff]  ;;  %v5938_v53 = vld [vmem:[%s13735_s4 + $0x270] sm:$0xff] }
 0x286   :  { %1098 = vmatpush.msrb.mxu2 %v5970_v45 }
 0x287   :  { %v780_v0 = vmul.f32 %v9598_v56, %v772_v59  ;;  %1018 = vmatpush.msra.mxu0 %v5940_v48  ;;  %1038 = vmatpush.msrb.mxu1 %v5941_v49  ;;  %v5937_v59 = vld [vmem:[%s13735_s4 + $0x268] sm:$0xff]  ;;  %v8611_v48 = vld [vmem:[%s13736_s5 + $0x5dc] sm:$0xf0] }
 0x288   :  { %1099 = vmatpush.msrb.mxu2 %v5968_v50  ;;  %v6598_v50 = vld [vmem:[%s13736_s5 + $0x7c0] sm:$0xf] }
 0x289   :  { %v9632_v5 = vsub.f32 %v9511_v22, %v780_v0  ;;  %v9635_v6 = vsub.f32 %v9503_v19, %v780_v0  ;;  %v5983_v19 = vld [vmem:[%s13735_s4 + $0x3d8] sm:$0xff]  ;;  %1019 = vmatpush.msra.mxu0 %v5938_v53  ;;  %1039 = vmatpush.msrb.mxu1 %v5939_v54  ;;  %v6344_v54 = vld [vmem:[%s13736_s5 + $0x5e0] sm:$0xf0] }
 0x28a   :  { %1112 = vmatpush.msra.mxu3 %v5983_v19  ;;  %1100 = vmatpush.msrb.mxu2 %v5966_v55  ;;  %v5957_v19 = vld [vmem:[%s13735_s4 + $0x308] sm:$0xff]  ;;  %v8671_v55 = vld [vmem:[%s13736_s5 + $0x7c4] sm:$0xf] }
 0x28b   :  { %v783_v13 = vmul.f32 %v9632_v5, %v9632_v5  ;;  %v784_v14 = vmul.f32 %v9635_v6, %v9635_v6  ;;  %1020 = vmatpush.msra.mxu0 %v5936_v58  ;;  %1040 = vmatpush.msrb.mxu1 %v5937_v59 }
 0x28c   :  { %1113 = vmatpush.msra.mxu3 %v5981_v24  ;;  %1101 = vmatpush.msrb.mxu2 %v5964_v61  ;;  %v5924_v24 = vld [vmem:[%s13735_s4 + $0x200] sm:$0xff] }
 0x28d   :  { %v785_v22 = vsel %vm80_vm3, %v784_v14, 0.0  ;;  %1021 = vmatpush.msra.mxu0 %v5934_v63  ;;  %v5929_v14 = vld [vmem:[%s13735_s4 + $0x228] sm:$0xff]  ;;  %v8603_v61 = vld [vmem:[%s13736_s5 + $0x59c] sm:$0xf0] }
 0x28e   :  { %v786_v25 = vadd.f32 %v785_v22, %v783_v13  ;;  %1114 = vmatpush.msra.mxu3 %v5979_v16  ;;  %1102 = vmatpush.msrb.mxu2 %v5962_v1  ;;  %v5928_v13 = vld [vmem:[%s13735_s4 + $0x220] sm:$0xff] }
 0x28f   :  { %1022 = vmatpush.msra.mxu0 %v5932_v3  ;;  %v6312_v1 = vld [vmem:[%s13736_s5 + $0x5a0] sm:$0xf0] }
 0x290   :  { %v787_v17 = vrot.slane %v786_v25, 4  ;;  %1115 = vmatpush.msra.mxu3 %v5977_v31  ;;  %1103 = vmatpush.msrb.mxu2 %v5960_v7  ;;  %v8951_v31 = vld [vmem:[%s13734_s15] ss:$0 sm:$0xff]  ;;  %v8663_v7 = vld [vmem:[%s13736_s5 + $0x784] sm:$0xf] }
 0x291   :  { %1023 = vmatpush.msra.mxu0 %v5930_v9 }
 0x292   :  { %v788_v32 = vadd.f32 %v787_v17, %v786_v25  ;;  %1116 = vmatpush.msra.mxu3 %v5975_v36  ;;  %1104 = vmatpush.msrb.mxu2 %v5958_v11  ;;  %v5925_v25 = vld [vmem:[%s13735_s4 + $0x208] sm:$0xff]  ;;  %v8950_v17 = vld [vmem:[%s13733_s14] ss:$0 sm:$0xff] }
 0x293   :  { %1024 = vmatpush.msra.mxu0 %v5928_v13  ;;  %v8595_v11 = vld [vmem:[%s13736_s5 + $0x55c] sm:$0xf0] }
 0x294   :  { %v789_v37 = vrot.slane %v788_v32, 2  ;;  %1117 = vmatpush.msra.mxu3 %v5973_v41  ;;  %1105 = vmatpush.msrb.mxu2 %v5956_v18  ;;  %v8591_v18 = vld [vmem:[%s13736_s5 + $0x544] sm:$0xf] }
 0x295   :  { %1025 = vmatpush.msra.mxu0 %v5926_v20 }
 0x296   :  { %v790_v42 = vadd.f32 %v789_v37, %v788_v32  ;;  %1118 = vmatpush.msra.mxu3 %v5971_v46 }
 0x297   :  { %1026 = vmatpush.msra.mxu0 %v5924_v24  ;;  %v8655_v24 = vld [vmem:[%s13736_s5 + $0x744] sm:$0xf] }
 0x298   :  { %v791_v47 = vrot.slane %v790_v42, 1  ;;  %1119 = vmatpush.msra.mxu3 %v5969_v51  ;;  %v8675_v51 = vld [vmem:[%s13736_s5 + $0x7dc] sm:$0xf0] }
 0x299   :  { %v6599_v53 = vor.u32 %v8675_v51, %v6598_v50  ;;  %v8639_v51 = vld [vmem:[%s13736_s5 + $0x6c4] sm:$0xf] }
 0x29a   :  { %v792_v52 = vadd.f32 %v791_v47, %v790_v42  ;;  %1120 = vmatpush.msra.mxu3 %v5967_v57  ;;  %v6342_v47 = vld [vmem:[%s13736_s5 + $0x5c0] sm:$0xf]  ;;  %v6600_v57 = vld [vmem:[%s13736_s5 + $0x7e0] sm:$0xf0] }
 0x29b   :  { %v6343_v49 = vor.u32 %v8611_v48, %v6342_v47  ;;  %v6603_v59 = vor.u32 %v8671_v55, %v6600_v57 }
 0x29c   :  { %v793_v60 = vmul.f32 %v792_v52, %v9598_v56  ;;  %v5935_v56 = vld [vmem:[%s13735_s4 + $0x258] sm:$0xff]  ;;  %1121 = vmatpush.msra.mxu3 %v5965_v62  ;;  %v8607_v52 = vld [vmem:[%s13736_s5 + $0x5c4] sm:$0xf]  ;;  %v6566_v62 = vld [vmem:[%s13736_s5 + $0x780] sm:$0xf] }
 0x29d   :  { %1041 = vmatpush.msrb.mxu1 %v5935_v56  ;;  %v6347_v58 = vor.u32 %v8607_v52, %v6344_v54  ;;  %v8667_v56 = vld [vmem:[%s13736_s5 + $0x79c] sm:$0xf0]  ;;  %v6472_v52 = vld [vmem:[%s13736_s5 + $0x6e0] sm:$0xf0] }
 0x29e   :  { %v794_v0 = vadd.f32 1e-05, %v793_v60  ;;  %1122 = vmatpush.msra.mxu3 %v5963_v2  ;;  %v6310_v60 = vld [vmem:[%s13736_s5 + $0x580] sm:$0xf]  ;;  %v8992_v2 = vmov 8.0   ;;  %v6567_v3 = vor.u32 %v8667_v56, %v6566_v62  ;;  %v6475_v57 = vor.u32 %v8639_v51, %v6472_v52 }
 0x29f   :  { %1042 = vmatpush.msrb.mxu1 %v5933_v4  ;;  %v6311_v63 = vor.u32 %v8603_v61, %v6310_v60  ;;  %v6438_v60 = vld [vmem:[%s13736_s5 + $0x680] sm:$0xf]  ;;  %v8608_v51 = vld [vmem:[%s13736_s5 + $0x5cc] sm:$0xf] }
 0x2a0   :  { %8963 = vrsqrt.f32 %v794_v0  ;;  %1123 = vmatpush.msra.mxu3 %v5961_v8  ;;  %vm801_vm5 = vweird.f32 %v794_v0  ;;  %v6568_v8 = vld [vmem:[%s13736_s5 + $0x7a0] sm:$0xf0]  ;;  %v8635_v56 = vld [vmem:[%s13736_s5 + $0x69c] sm:$0xf0] }
 0x2a1   :  { %1043 = vmatpush.msrb.mxu1 %v5931_v10  ;;  %8965 = vrcp.f32 %v8992_v2  ;;  %v6571_v9 = vor.u32 %v8663_v7, %v6568_v8  ;;  %v6278_v10 = vld [vmem:[%s13736_s5 + $0x540] sm:$0xf]  ;;  %v8631_v8 = vld [vmem:[%s13736_s5 + $0x684] sm:$0xf] }
 0x2a2   :  { %1124 = vmatpush.msra.mxu3 %v5959_v12  ;;  %v6534_v12 = vld [vmem:[%s13736_s5 + $0x740] sm:$0xf]  ;;  %v6279_v13 = vor.u32 %v8595_v11, %v6278_v10 }
 0x2a3   :  { %1044 = vmatpush.msrb.mxu1 %v5929_v14  ;;  %v8659_v14 = vld [vmem:[%s13736_s5 + $0x75c] sm:$0xf0] }
 0x2a4   :  { %1125 = vmatpush.msra.mxu3 %v5957_v19  ;;  %v6280_v19 = vld [vmem:[%s13736_s5 + $0x560] sm:$0xf0] }
 0x2a5   :  { %1045 = vmatpush.msrb.mxu1 %v5927_v21 }
 0x2a6   :  { %v8964_v22 = vpop.eup %8963 }
 0x2a7   :  { %v796_v23 = vmul.f32 %v8964_v22, %v794_v0  ;;  %1046 = vmatpush.msrb.mxu1 %v5925_v25  ;;  %vm802_vm4 = vweird.f32 %v8964_v22  ;;  %v8599_v0 = vld [vmem:[%s13736_s5 + $0x584] sm:$0xf] }
 0x2a8   :  { %vm803_vm6 = vmor %vm801_vm5, %vm802_vm4  ;;  %v6315_v4 = vor.u32 %v8599_v0, %v6312_v1  ;;  %v6536_v25 = vld [vmem:[%s13736_s5 + $0x760] sm:$0xf0] }
 0x2a9   :  { %v797_v26 = vmul.f32 %v8964_v22, %v796_v23  ;;  %v6283_v23 = vor.u32 %v8591_v18, %v6280_v19  ;;  %v8567_v0 = vld [vmem:[%s13736_s5 + $0x484] sm:$0xf] }
 0x2aa   :  { %v6184_v1 = vld [vmem:[%s13736_s5 + $0x4a0] sm:$0xf0] }
 0x2ab   :  { %v798_v27 = vmul.f32 0.5, %v797_v26  ;;  %v6539_v26 = vor.u32 %v8655_v24, %v6536_v25  ;;  %v6187_v7 = vor.u32 %v8567_v0, %v6184_v1  ;;  %v8668_v0 = vld [vmem:[%s13736_s5 + $0x7a4] sm:$0xf0]  ;;  %v8600_v1 = vld [vmem:[%s13736_s5 + $0x58c] sm:$0xf] }
 0x2ad   :  { %v799_v15 = vsub.f32 1.5, %v798_v27  ;;  %v9918_v27 = vpop.eup %8965 }
 0x2af   :  { %v800_v16 = vmul.f32 %v8964_v22, %v799_v15  ;;  %v6246_v15 = vld [vmem:[%s13736_s5 + $0x500] sm:$0xf] }
 0x2b1   :  { %v804_v28 = vsel %vm803_vm6, %v8964_v22, %v800_v16  ;;  %v6535_v22 = vor.u32 %v8659_v14, %v6534_v12  ;;  %v8587_v16 = vld [vmem:[%s13736_s5 + $0x51c] sm:$0xf0] }
 0x2b2   :  { %v805_v29 = vmul.f32 %v804_v28, %v9632_v5  ;;  %v806_v30 = vmul.f32 %v804_v28, %v9635_v6  ;;  %v8563_v14 = vld [vmem:[%s13736_s5 + $0x45c] sm:$0xf0] }
 0x2b4   :  { %v811_v32 = vmul.f32 %v8950_v17, %v805_v29  ;;  %v812_v33 = vmul.f32 %v8950_v17, %v806_v30  ;;  %v6502_v17 = vld [vmem:[%s13736_s5 + $0x700] sm:$0xf]  ;;  %v6247_v30 = vor.u32 %v8587_v16, %v6246_v15  ;;  %v8623_v15 = vld [vmem:[%s13736_s5 + $0x644] sm:$0xf] }
 0x2b5   :  { %v6408_v16 = vld [vmem:[%s13736_s5 + $0x660] sm:$0xf0] }
 0x2b6   :  { %v817_v34 = vadd.f32 %v8951_v31, %v811_v32  ;;  %v818_v35 = vadd.f32 %v8951_v31, %v812_v33  ;;  %v8651_v31 = vld [vmem:[%s13736_s5 + $0x71c] sm:$0xf0]  ;;  %v8583_v32 = vld [vmem:[%s13736_s5 + $0x504] sm:$0xf] }
 0x2b7   :  { %v6248_v33 = vld [vmem:[%s13736_s5 + $0x520] sm:$0xf0] }
 0x2b8   :  { %v819_v36 = vmul.f32 0.2, %v817_v34  ;;  %v820_v37 = vmul.f32 0.2, %v818_v35 }
 0x2ba   :  { %v822_v38 = vmax.f32 %v818_v35, %v820_v37  ;;  %v821_v39 = vmax.f32 %v817_v34, %v819_v36  ;;  %v6503_v34 = vor.u32 %v8651_v31, %v6502_v17  ;;  %v6251_v35 = vor.u32 %v8583_v32, %v6248_v33  ;;  %v8647_v36 = vld [vmem:[%s13736_s5 + $0x704] sm:$0xf]  ;;  %v6118_v31 = vld [vmem:[%s13736_s5 + $0x400] sm:$0xf] }
 0x2bb   :  { %v6504_v37 = vld [vmem:[%s13736_s5 + $0x720] sm:$0xf0]  ;;  %v8555_v32 = vld [vmem:[%s13736_s5 + $0x41c] sm:$0xf0] }
 0x2bc   :  { %950 = vmatmul.f32.vlgmr.msra.gmra.mxu2 %v821_v39  ;;  %970 = vmatmul.f32.vlgmr.msrb.gmra.mxu3 %v821_v39  ;;  %v890_v40 = vrot.slane %v821_v39, 2  ;;  %v891_v41 = vrot.slane %v822_v38, 2  ;;  %v1086_v6 = vrot.slane %v821_v39, 6  ;;  %v1087_v42 = vrot.slane %v822_v38, 6 }
 0x2bd   :  { %v1007_v43 = vrot.slane %v821_v39, 4  ;;  %v1008_v44 = vrot.slane %v822_v38, 4  ;;  %2146 = vmatpush.bf16.msra.mxu2 %v6347_v58  ;;  %2159 = vmatpush.bf16.msrb.mxu3 %v6603_v59  ;;  %v1145_v38 = vmul.f32 8.0, %v9918_v27  ;;  %v6507_v39 = vor.u32 %v8647_v36, %v6504_v37  ;;  %v6182_v58 = vld [vmem:[%s13736_s5 + $0x480] sm:$0xf] }
 0x2be   :  { %v892_v5 = vsel %vm80_vm3, %v890_v40, %v891_v41  ;;  %v1088_v45 = vsel %vm218_vm2, %v1086_v6, %v1087_v42  ;;  %v6214_v40 = vld [vmem:[%s13736_s5 + $0x4c0] sm:$0xf]  ;;  %v8551_v37 = vld [vmem:[%s13736_s5 + $0x404] sm:$0xf]  ;;  %vm1149_vm3 = vweird.f32 %v9918_v27 }
 0x2bf   :  { %910 = vmatmul.f32.vlgmr.msrb.gmra.mxu0 %v892_v5  ;;  %930 = vmatmul.f32.vlgmr.msra.gmra.mxu1 %v892_v5  ;;  %v1009_v46 = vsel %vm166_vm1, %v1007_v43, %v1008_v44  ;;  %v8579_v41 = vld [vmem:[%s13736_s5 + $0x4dc] sm:$0xf0]  ;;  %v1146_v55 = vsub.f32 1.0, %v1145_v38 }
 0x2c0   :  { %2120 = vmatpush.bf16.msrb.mxu0 %v6343_v49  ;;  %2133 = vmatpush.bf16.msra.mxu1 %v6599_v53  ;;  %v6470_v5 = vld [vmem:[%s13736_s5 + $0x6c0] sm:$0xf]  ;;  %v6215_v43 = vor.u32 %v8579_v41, %v6214_v40  ;;  %v6120_v41 = vld [vmem:[%s13736_s5 + $0x420] sm:$0xf0] }
 0x2c1   :  { %2147 = vmatpush.bf16.msra.mxu2 %v6315_v4  ;;  %2160 = vmatpush.bf16.msrb.mxu3 %v6571_v9  ;;  %v8643_v44 = vld [vmem:[%s13736_s5 + $0x6dc] sm:$0xf0]  ;;  %v6439_v4 = vor.u32 %v8635_v56, %v6438_v60  ;;  %v6440_v9 = vld [vmem:[%s13736_s5 + $0x6a0] sm:$0xf0]  ;;  %v1147_v18 = vmul.f32 %v9918_v27, %v1146_v55  ;;  %v8672_v55 = vld [vmem:[%s13736_s5 + $0x7cc] sm:$0xf] }
 0x2c2   :  { %v6471_v49 = vor.u32 %v8643_v44, %v6470_v5  ;;  %v8571_v59 = vld [vmem:[%s13736_s5 + $0x49c] sm:$0xf0]  ;;  %v6443_v10 = vor.u32 %v8631_v8, %v6440_v9  ;;  %v8615_v5 = vld [vmem:[%s13736_s5 + $0x604] sm:$0xf]  ;;  %v6350_v44 = vld [vmem:[%s13736_s5 + $0x5c8] sm:$0xf] }
 0x2c3   :  { %v1148_v33 = vadd.f32 %v9918_v27, %v1147_v18  ;;  %v8619_v36 = vld [vmem:[%s13736_s5 + $0x61c] sm:$0xf0]  ;;  %v8596_v18 = vld [vmem:[%s13736_s5 + $0x564] sm:$0xf0] }
 0x2c4   :  { %1106 = vmatmul.f32.vlgmr.msrb.gmra.mxu2 %v1088_v45  ;;  %1126 = vmatmul.f32.vlgmr.msra.gmra.mxu3 %v1088_v45  ;;  %v8575_v45 = vld [vmem:[%s13736_s5 + $0x4c4] sm:$0xf] }
 0x2c5   :  { %2121 = vmatpush.bf16.msrb.mxu0 %v6311_v63  ;;  %2134 = vmatpush.bf16.msra.mxu1 %v6567_v3  ;;  %v6183_v63 = vor.u32 %v8571_v59, %v6182_v58  ;;  %v10070_v52 = vsel %vm1149_vm3, %v9918_v27, %v1148_v33 }
 0x2c6   :  { %2148 = vmatpush.bf16.msra.mxu2 %v6283_v23  ;;  %2161 = vmatpush.bf16.msrb.mxu3 %v6539_v26  ;;  %v6152_v26 = vld [vmem:[%s13736_s5 + $0x460] sm:$0xf0] }
 0x2c7   :  { %1027 = vmatmul.f32.vlgmr.msra.gmra.mxu0 %v1009_v46  ;;  %1047 = vmatmul.f32.vlgmr.msrb.gmra.mxu1 %v1009_v46  ;;  %v6216_v46 = vld [vmem:[%s13736_s5 + $0x4e0] sm:$0xf0] }
 0x2c8   :  { %v6219_v50 = vor.u32 %v8575_v45, %v6216_v46  ;;  %v8612_v45 = vld [vmem:[%s13736_s5 + $0x5e4] sm:$0xf0] }
 0x2c9   :  { %2122 = vmatpush.bf16.msrb.mxu0 %v6279_v13  ;;  %2135 = vmatpush.bf16.msra.mxu1 %v6535_v22  ;;  %v6150_v13 = vld [vmem:[%s13736_s5 + $0x440] sm:$0xf]  ;;  %v8559_v22 = vld [vmem:[%s13736_s5 + $0x444] sm:$0xf]  ;;  %v6606_v46 = vld [vmem:[%s13736_s5 + $0x7c8] sm:$0xf] }
 0x2ca   :  { %2149 = vmatpush.bf16.msra.mxu2 %v6251_v35  ;;  %2162 = vmatpush.bf16.msrb.mxu3 %v6507_v39  ;;  %v6151_v19 = vor.u32 %v8563_v14, %v6150_v13  ;;  %v6155_v17 = vor.u32 %v8559_v22, %v6152_v26  ;;  %v6374_v35 = vld [vmem:[%s13736_s5 + $0x600] sm:$0xf]  ;;  %v6286_v14 = vld [vmem:[%s13736_s5 + $0x548] sm:$0xf] }
 0x2cb   :  { %v6375_v40 = vor.u32 %v8619_v36, %v6374_v35  ;;  %v6287_v22 = vor.u32 %v8596_v18, %v6286_v14  ;;  %v8652_v35 = vld [vmem:[%s13736_s5 + $0x724] sm:$0xf0]  ;;  %v8584_v36 = vld [vmem:[%s13736_s5 + $0x50c] sm:$0xf] }
 0x2cc   :  { %v6158_v18 = vld [vmem:[%s13736_s5 + $0x448] sm:$0xf] }
 0x2cd   :  { %2123 = vmatpush.bf16.msrb.mxu0 %v6247_v30  ;;  %2136 = vmatpush.bf16.msra.mxu1 %v6503_v34  ;;  %v6119_v34 = vor.u32 %v8555_v32, %v6118_v31  ;;  %v6510_v31 = vld [vmem:[%s13736_s5 + $0x708] sm:$0xf] }
 0x2ce   :  { %2150 = vmatpush.bf16.msra.mxu2 %v6219_v50  ;;  %2163 = vmatpush.bf16.msrb.mxu3 %v6475_v57  ;;  %v8676_v50 = vld [vmem:[%s13736_s5 + $0x7e4] sm:$0xf0]  ;;  %v6608_v57 = vld [vmem:[%s13736_s5 + $0x7e8] sm:$0xf0] }
 0x2cf   :  { %v6611_v60 = vor.u32 %v8672_v55, %v6608_v57  ;;  %v6224_v55 = vld [vmem:[%s13736_s5 + $0x4e8] sm:$0xf0] }
 0x2d0   :  { %v8640_v57 = vld [vmem:[%s13736_s5 + $0x6cc] sm:$0xf] }
 0x2d1   :  { %2124 = vmatpush.bf16.msrb.mxu0 %v6215_v43  ;;  %2137 = vmatpush.bf16.msra.mxu1 %v6471_v49  ;;  %v6351_v49 = vor.u32 %v8612_v45, %v6350_v44  ;;  %v8580_v44 = vld [vmem:[%s13736_s5 + $0x4e4] sm:$0xf0] }
 0x2d2   :  { %2151 = vmatpush.bf16.msra.mxu2 %v6187_v7  ;;  %2164 = vmatpush.bf16.msrb.mxu3 %v6443_v10  ;;  %v8664_v10 = vld [vmem:[%s13736_s5 + $0x78c] sm:$0xf] }
 0x2d5   :  { %2125 = vmatpush.bf16.msrb.mxu0 %v6183_v63  ;;  %2138 = vmatpush.bf16.msra.mxu1 %v6439_v4  ;;  %v6574_v63 = vld [vmem:[%s13736_s5 + $0x788] sm:$0xf]  ;;  %v6320_v4 = vld [vmem:[%s13736_s5 + $0x5a8] sm:$0xf0] }
 0x2d6   :  { %2152 = vmatpush.bf16.msra.mxu2 %v6155_v17  ;;  %v6575_v9 = vor.u32 %v8668_v0, %v6574_v63  ;;  %v6446_v0 = vld [vmem:[%s13736_s5 + $0x688] sm:$0xf] }
 0x2d9   :  { %2126 = vmatpush.bf16.msrb.mxu0 %v6151_v19  ;;  %v6542_v19 = vld [vmem:[%s13736_s5 + $0x748] sm:$0xf] }
 0x2dd   :  { %2127 = vmatpush.bf16.msrb.mxu0 %v6119_v34 }
 0x2e1   :  { %2172 = vmatpush.bf16.msra.mxu0 %v6351_v49  ;;  %v8644_v49 = vld [vmem:[%s13736_s5 + $0x6e4] sm:$0xf0] }
 0x33c   :  { %v911_v20 = vpop.f32.mrf.mxu0  ;;  %v931_v21 = vpop.f32.mrf.mxu1 }
 0x33f   :  { %v951_v28 = vpop.f32.mrf.mxu2  ;;  %v971_v29 = vpop.f32.mrf.mxu3 }
 0x340   :  { %v952_v6 = vadd.f32 %v951_v28, %v911_v20  ;;  %v972_v42 = vadd.f32 %v971_v29, %v931_v21  ;;  %v6406_v20 = vld [vmem:[%s13736_s5 + $0x640] sm:$0xf]  ;;  %v6411_v28 = vor.u32 %v8623_v15, %v6408_v16  ;;  %v6544_v15 = vld [vmem:[%s13736_s5 + $0x768] sm:$0xf0] }
 0x341   :  { %v8627_v21 = vld [vmem:[%s13736_s5 + $0x65c] sm:$0xf0] }
 0x342   :  { %v6407_v25 = vor.u32 %v8627_v21, %v6406_v20  ;;  %2165 = vmatpush.bf16.msrb.mxu3 %v6411_v28 }
 0x344   :  { %v1028_v47 = vpop.f32.mrf.mxu0  ;;  %v1048_v48 = vpop.f32.mrf.mxu1  ;;  %2139 = vmatpush.bf16.msra.mxu1 %v6407_v25  ;;  %v6288_v25 = vld [vmem:[%s13736_s5 + $0x568] sm:$0xf0] }
 0x345   :  { %v1051_v53 = vadd.f32 %v1028_v47, %v952_v6  ;;  %v1052_v54 = vadd.f32 %v1048_v48, %v972_v42  ;;  %v6376_v6 = vld [vmem:[%s13736_s5 + $0x620] sm:$0xf0]  ;;  %v6123_v42 = vor.u32 %v8551_v37, %v6120_v41  ;;  %v6511_v37 = vor.u32 %v8652_v35, %v6510_v31  ;;  %v8552_v35 = vld [vmem:[%s13736_s5 + $0x40c] sm:$0xf] }
 0x346   :  { %v6379_v43 = vor.u32 %v8615_v5, %v6376_v6 }
 0x347   :  { %v1107_v61 = vpop.f32.mrf.mxu2  ;;  %v1127_v62 = vpop.f32.mrf.mxu3  ;;  %2153 = vmatpush.bf16.msra.mxu2 %v6123_v42 }
 0x348   :  { %v9987_v2 = vadd.f32 %v1107_v61, %v1051_v53  ;;  %v9989_v3 = vadd.f32 %v1127_v62, %v1052_v54  ;;  %2140 = vmatpush.bf16.msra.mxu1 %v6375_v40  ;;  %2166 = vmatpush.bf16.msrb.mxu3 %v6379_v43  ;;  %v6607_v53 = vor.u32 %v8676_v50, %v6606_v46  ;;  %v6352_v54 = vld [vmem:[%s13736_s5 + $0x5e8] sm:$0xf0]  ;;  %v6318_v61 = vld [vmem:[%s13736_s5 + $0x588] sm:$0xf] }
 0x349   :  { %v6355_v27 = vor.u32 %v8608_v51, %v6352_v54  ;;  %v8604_v62 = vld [vmem:[%s13736_s5 + $0x5a4] sm:$0xf0]  ;;  %v6512_v40 = vld [vmem:[%s13736_s5 + $0x728] sm:$0xf0] }
 0x34a   :  { %v1132_v11 = vrot.slane %v9987_v2, 4  ;;  %v1138_v12 = vrot.slane %v9989_v3, 4  ;;  %v6319_v56 = vor.u32 %v8604_v62, %v6318_v61  ;;  %v6222_v43 = vld [vmem:[%s13736_s5 + $0x4c8] sm:$0xf]  ;;  %v8576_v50 = vld [vmem:[%s13736_s5 + $0x4cc] sm:$0xf] }
 0x34b   :  { %2198 = vmatpush.bf16.msrb.mxu2 %v6355_v27  ;;  %v8572_v61 = vld [vmem:[%s13736_s5 + $0x4a4] sm:$0xf0] }
 0x34c   :  { %v1133_v23 = vadd.f32 %v1132_v11, %v9987_v2  ;;  %v1139_v24 = vadd.f32 %v1138_v12, %v9989_v3  ;;  %2185 = vmatpush.bf16.msrb.mxu1 %v6607_v53  ;;  %2211 = vmatpush.bf16.msra.mxu3 %v6611_v60  ;;  %v6576_v11 = vld [vmem:[%s13736_s5 + $0x7a8] sm:$0xf0]  ;;  %v6323_v12 = vor.u32 %v8600_v1, %v6320_v4  ;;  %v6190_v60 = vld [vmem:[%s13736_s5 + $0x488] sm:$0xf] }
 0x34d   :  { %v6579_v13 = vor.u32 %v8664_v10, %v6576_v11  ;;  %2173 = vmatpush.bf16.msra.mxu0 %v6319_v56  ;;  %v6191_v56 = vor.u32 %v8572_v61, %v6190_v60  ;;  %v8636_v1 = vld [vmem:[%s13736_s5 + $0x6a4] sm:$0xf0] }
 0x34e   :  { %v1134_v29 = vrot.slane %v1133_v23, 2  ;;  %v1140_v30 = vrot.slane %v1139_v24, 2  ;;  %v6447_v4 = vor.u32 %v8636_v1, %v6446_v0 }
 0x34f   :  { %2199 = vmatpush.bf16.msrb.mxu2 %v6323_v12 }
 0x350   :  { %v1135_v38 = vadd.f32 %v1134_v29, %v1133_v23  ;;  %v1141_v39 = vadd.f32 %v1140_v30, %v1139_v24  ;;  %v8660_v23 = vld [vmem:[%s13736_s5 + $0x764] sm:$0xf0]  ;;  %v8592_v24 = vld [vmem:[%s13736_s5 + $0x54c] sm:$0xf]  ;;  %2186 = vmatpush.bf16.msrb.mxu1 %v6575_v9  ;;  %2212 = vmatpush.bf16.msra.mxu3 %v6579_v13 }
 0x351   :  { %v6291_v26 = vor.u32 %v8592_v24, %v6288_v25  ;;  %v6254_v29 = vld [vmem:[%s13736_s5 + $0x508] sm:$0xf]  ;;  %2174 = vmatpush.bf16.msra.mxu0 %v6287_v22  ;;  %v8632_v9 = vld [vmem:[%s13736_s5 + $0x68c] sm:$0xf] }
 0x352   :  { %v1136_v47 = vrot.slane %v1135_v38, 1  ;;  %v1142_v48 = vrot.slane %v1141_v39, 1  ;;  %v8588_v30 = vld [vmem:[%s13736_s5 + $0x524] sm:$0xf0]  ;;  %v6448_v13 = vld [vmem:[%s13736_s5 + $0x6a8] sm:$0xf0] }
 0x353   :  { %v6255_v34 = vor.u32 %v8588_v30, %v6254_v29  ;;  %2200 = vmatpush.bf16.msrb.mxu2 %v6291_v26  ;;  %v6451_v14 = vor.u32 %v8632_v9, %v6448_v13  ;;  %v6414_v22 = vld [vmem:[%s13736_s5 + $0x648] sm:$0xf]  ;;  %v8560_v26 = vld [vmem:[%s13736_s5 + $0x44c] sm:$0xf]  ;;  %v8609_v13 = vld [vmem:[%s13736_s5 + $0x5d4] sm:$0xf] }
 0x354   :  { %v1137_v58 = vadd.f32 %v1136_v47, %v1135_v38  ;;  %v1143_v59 = vadd.f32 %v1142_v48, %v1141_v39  ;;  %v6256_v38 = vld [vmem:[%s13736_s5 + $0x528] sm:$0xf0]  ;;  %v6223_v47 = vor.u32 %v8580_v44, %v6222_v43  ;;  %v6478_v48 = vld [vmem:[%s13736_s5 + $0x6c8] sm:$0xf] }
 0x355   :  { %v8648_v39 = vld [vmem:[%s13736_s5 + $0x70c] sm:$0xf]  ;;  %v6259_v6 = vor.u32 %v8584_v36, %v6256_v38  ;;  %2175 = vmatpush.bf16.msra.mxu0 %v6255_v34  ;;  %v6479_v54 = vor.u32 %v8644_v49, %v6478_v48  ;;  %v8620_v34 = vld [vmem:[%s13736_s5 + $0x624] sm:$0xf0] }
 0x356   :  { %v1151_v7 = vmul.f32 %v10070_v52, %v1137_v58  ;;  %v1152_v8 = vmul.f32 %v10070_v52, %v1143_v59  ;;  %v6515_v42 = vor.u32 %v8648_v39, %v6512_v40  ;;  %v6480_v58 = vld [vmem:[%s13736_s5 + $0x6e8] sm:$0xf0]  ;;  %v6227_v59 = vor.u32 %v8576_v50, %v6224_v55  ;;  %v1195_v50 = vld [vmem:[%s13737_s16] sm:$0x3] }
 0x357   :  { %2201 = vmatpush.bf16.msrb.mxu2 %v6259_v6  ;;  %v6483_v27 = vor.u32 %v8640_v57, %v6480_v58  ;;  %v8616_v38 = vld [vmem:[%s13736_s5 + $0x60c] sm:$0xf]  ;;  %v1197_v55 = vperm.slane %v1195_v50, 0 }
 0x358   :  { %v10117_v20 = vsub.f32 %v9987_v2, %v1151_v7  ;;  %v10120_v21 = vsub.f32 %v9989_v3, %v1152_v8  ;;  %v6543_v2 = vor.u32 %v8660_v23, %v6542_v19  ;;  %v8656_v3 = vld [vmem:[%s13736_s5 + $0x74c] sm:$0xf]  ;;  %v8564_v19 = vld [vmem:[%s13736_s5 + $0x464] sm:$0xf0] }
 0x359   :  { %v6547_v28 = vor.u32 %v8656_v3, %v6544_v15  ;;  %2176 = vmatpush.bf16.msra.mxu0 %v6223_v47  ;;  %v8568_v7 = vld [vmem:[%s13736_s5 + $0x48c] sm:$0xf]  ;;  %v6159_v25 = vor.u32 %v8564_v19, %v6158_v18  ;;  %v6360_v18 = vld [vmem:[%s13736_s5 + $0x5f0] sm:$0xf0] }
 0x35a   :  { %v1155_v16 = vmul.f32 %v10117_v20, %v10117_v20  ;;  %v1156_v17 = vmul.f32 %v10120_v21, %v10120_v21  ;;  %2187 = vmatpush.bf16.msrb.mxu1 %v6543_v2  ;;  %v6192_v8 = vld [vmem:[%s13736_s5 + $0x4a8] sm:$0xf0]  ;;  %v8628_v2 = vld [vmem:[%s13736_s5 + $0x664] sm:$0xf0]  ;;  %v8673_v19 = vld [vmem:[%s13736_s5 + $0x7d4] sm:$0xf] }
 0x35b   :  { %2213 = vmatpush.bf16.msra.mxu3 %v6547_v28  ;;  %2202 = vmatpush.bf16.msrb.mxu2 %v6227_v59  ;;  %v6195_v12 = vor.u32 %v8568_v7, %v6192_v8  ;;  %v6160_v3 = vld [vmem:[%s13736_s5 + $0x468] sm:$0xf0]  ;;  %v6415_v15 = vor.u32 %v8628_v2, %v6414_v22  ;;  %v1198_v59 = vperm.slane %v1195_v50, 1  ;;  %v6616_v22 = vld [vmem:[%s13736_s5 + $0x7f0] sm:$0xf0] }
 0x35c   :  { %v1157_v32 = vrot.slane %v1155_v16, 4  ;;  %v1163_v33 = vrot.slane %v1156_v17, 4  ;;  %v6163_v30 = vor.u32 %v8560_v26, %v6160_v3  ;;  %v6384_v39 = vld [vmem:[%s13736_s5 + $0x628] sm:$0xf0]  ;;  %v8605_v3 = vld [vmem:[%s13736_s5 + $0x5ac] sm:$0xf0] }
 0x35d   :  { %2177 = vmatpush.bf16.msra.mxu0 %v6191_v56  ;;  %v8653_v50 = vld [vmem:[%s13736_s5 + $0x72c] sm:$0xf0] }
 0x35e   :  { %v1158_v41 = vadd.f32 %v1157_v32, %v1155_v16  ;;  %v1164_v5 = vadd.f32 %v1163_v33, %v1156_v17  ;;  %2188 = vmatpush.bf16.msrb.mxu1 %v6511_v37  ;;  %v6416_v16 = vld [vmem:[%s13736_s5 + $0x668] sm:$0xf0]  ;;  %v6126_v17 = vld [vmem:[%s13736_s5 + $0x408] sm:$0xf] }
 0x35f   :  { %2214 = vmatpush.bf16.msra.mxu3 %v6515_v42  ;;  %2203 = vmatpush.bf16.msrb.mxu2 %v6195_v12  ;;  %v8556_v32 = vld [vmem:[%s13736_s5 + $0x424] sm:$0xf0]  ;;  %v6128_v37 = vld [vmem:[%s13736_s5 + $0x428] sm:$0xf0]  ;;  %v8677_v12 = vld [vmem:[%s13736_s5 + $0x7ec] sm:$0xf0] }
 0x360   :  { %v1159_v45 = vrot.slane %v1158_v41, 2  ;;  %v1165_v46 = vrot.slane %v1164_v5, 2  ;;  %v6382_v33 = vld [vmem:[%s13736_s5 + $0x608] sm:$0xf]  ;;  %v6127_v36 = vor.u32 %v8556_v32, %v6126_v17  ;;  %v6619_v17 = vor.u32 %v8673_v19, %v6616_v22  ;;  %v6584_v32 = vld [vmem:[%s13736_s5 + $0x7b0] sm:$0xf0] }
 0x361   :  { %2178 = vmatpush.bf16.msra.mxu0 %v6159_v25  ;;  %v6383_v40 = vor.u32 %v8620_v34, %v6382_v33  ;;  %v8633_v19 = vld [vmem:[%s13736_s5 + $0x694] sm:$0xf] }
 0x362   :  { %v1160_v51 = vadd.f32 %v1159_v45, %v1158_v41  ;;  %v1166_v53 = vadd.f32 %v1165_v46, %v1164_v5  ;;  %2189 = vmatpush.bf16.msrb.mxu1 %v6479_v54  ;;  %v6131_v41 = vor.u32 %v8552_v35, %v6128_v37  ;;  %v6387_v5 = vor.u32 %v8616_v38, %v6384_v39  ;;  %v1203_v54 = vld [vmem:[%s13738_s17] sm:$0x3]  ;;  %v6294_v35 = vld [vmem:[%s13736_s5 + $0x550] sm:$0xf]  ;;  %v6456_v22 = vld [vmem:[%s13736_s5 + $0x6b0] sm:$0xf0] }
 0x363   :  { %2215 = vmatpush.bf16.msra.mxu3 %v6483_v27  ;;  %2204 = vmatpush.bf16.msrb.mxu2 %v6163_v30  ;;  %v1205_v60 = vperm.slane %v1203_v54, 0  ;;  %v6328_v30 = vld [vmem:[%s13736_s5 + $0x5b0] sm:$0xf0]  ;;  %v6550_v39 = vld [vmem:[%s13736_s5 + $0x750] sm:$0xf] }
 0x364   :  { %v1161_v62 = vrot.slane %v1160_v51, 1  ;;  %v1167_v63 = vrot.slane %v1166_v53, 1 }
 0x365   :  { %2179 = vmatpush.bf16.msra.mxu0 %v6127_v36  ;;  %v8597_v36 = vld [vmem:[%s13736_s5 + $0x56c] sm:$0xf0] }
 0x366   :  { %v1162_v10 = vadd.f32 %v1161_v62, %v1160_v51  ;;  %v1168_v11 = vadd.f32 %v1167_v63, %v1166_v53  ;;  %2190 = vmatpush.bf16.msrb.mxu1 %v6447_v4  ;;  %v1206_v63 = vperm.slane %v1203_v54, 1  ;;  %v8649_v54 = vld [vmem:[%s13736_s5 + $0x714] sm:$0xf] }
 0x367   :  { %2216 = vmatpush.bf16.msra.mxu3 %v6451_v14  ;;  %2205 = vmatpush.bf16.msrb.mxu2 %v6131_v41  ;;  %v8593_v41 = vld [vmem:[%s13736_s5 + $0x554] sm:$0xf] }
 0x368   :  { %v1169_v23 = vmul.f32 %v1162_v10, %v10070_v52  ;;  %v1170_v24 = vmul.f32 %v1168_v11, %v10070_v52  ;;  %v8624_v52 = vld [vmem:[%s13736_s5 + $0x64c] sm:$0xf]  ;;  %v6358_v10 = vld [vmem:[%s13736_s5 + $0x5d0] sm:$0xf] }
 0x369   :  { %v6419_v31 = vor.u32 %v8624_v52, %v6416_v16  ;;  %v6363_v16 = vor.u32 %v8609_v13, %v6360_v18  ;;  %v8569_v13 = vld [vmem:[%s13736_s5 + $0x494] sm:$0xf] }
 0x36a   :  { %v1171_v28 = vadd.f32 1e-05, %v1169_v23  ;;  %v1172_v29 = vadd.f32 1e-05, %v1170_v24  ;;  %2191 = vmatpush.bf16.msrb.mxu1 %v6415_v15  ;;  %v6326_v24 = vld [vmem:[%s13736_s5 + $0x590] sm:$0xf] }
 0x36b   :  { %2217 = vmatpush.bf16.msra.mxu3 %v6419_v31  ;;  %v6582_v15 = vld [vmem:[%s13736_s5 + $0x790] sm:$0xf]  ;;  %v8665_v31 = vld [vmem:[%s13736_s5 + $0x794] sm:$0xf]  ;;  %v6327_v33 = vor.u32 %v8605_v3, %v6326_v24 }
 0x36c   :  { %8967 = vrsqrt.f32 %v1171_v28  ;;  %vm1179_vm9 = vweird.f32 %v1171_v28  ;;  %vm1189_vm11 = vweird.f32 %v1172_v29  ;;  %v6587_v38 = vor.u32 %v8665_v31, %v6584_v32  ;;  %v6200_v18 = vld [vmem:[%s13736_s5 + $0x4b0] sm:$0xf0]  ;;  %v8565_v3 = vld [vmem:[%s13736_s5 + $0x46c] sm:$0xf0] }
 0x36d   :  { %8969 = vrsqrt.f32 %v1172_v29  ;;  %v8625_v31 = vld [vmem:[%s13736_s5 + $0x654] sm:$0xf] }
 0x36e   :  { %2192 = vmatpush.bf16.msrb.mxu1 %v6383_v40  ;;  %v8661_v40 = vld [vmem:[%s13736_s5 + $0x76c] sm:$0xf0]  ;;  %v6424_v32 = vld [vmem:[%s13736_s5 + $0x670] sm:$0xf0] }
 0x36f   :  { %2218 = vmatpush.bf16.msra.mxu3 %v6387_v5  ;;  %v6296_v5 = vld [vmem:[%s13736_s5 + $0x570] sm:$0xf0] }
 0x372   :  { %v8968_v6 = vpop.eup %8967 }
 0x373   :  { %v8970_v42 = vpop.eup %8969  ;;  %v1174_v43 = vmul.f32 %v8968_v6, %v1171_v28  ;;  %vm1180_vm7 = vweird.f32 %v8968_v6  ;;  %v8669_v28 = vld [vmem:[%s13736_s5 + $0x7ac] sm:$0xf0] }
 0x374   :  { %v1184_v44 = vmul.f32 %v8970_v42, %v1172_v29  ;;  %vm1190_vm8 = vweird.f32 %v8970_v42  ;;  %vm1181_vm10 = vmor %vm1179_vm9, %vm1180_vm7  ;;  %v8601_v29 = vld [vmem:[%s13736_s5 + $0x594] sm:$0xf]  ;;  %v6583_v34 = vor.u32 %v8669_v28, %v6582_v15  ;;  %v6203_v15 = vor.u32 %v8569_v13, %v6200_v18  ;;  %v8629_v28 = vld [vmem:[%s13736_s5 + $0x66c] sm:$0xf0] }
 0x375   :  { %v1175_v45 = vmul.f32 %v8968_v6, %v1174_v43  ;;  %vm1191_vm12 = vmor %vm1189_vm11, %vm1190_vm8  ;;  %v6331_v37 = vor.u32 %v8601_v29, %v6328_v30  ;;  %v6295_v43 = vor.u32 %v8597_v36, %v6294_v35  ;;  %v8561_v29 = vld [vmem:[%s13736_s5 + $0x454] sm:$0xf]  ;;  %v8557_v36 = vld [vmem:[%s13736_s5 + $0x42c] sm:$0xf0] }
 0x376   :  { %v1185_v46 = vmul.f32 %v8970_v42, %v1184_v44  ;;  %v6551_v44 = vor.u32 %v8661_v40, %v6550_v39  ;;  %v6168_v30 = vld [vmem:[%s13736_s5 + $0x470] sm:$0xf0]  ;;  %v6427_v40 = vor.u32 %v8625_v31, %v6424_v32  ;;  %v8594_v13 = vld [vmem:[%s13736_s5 + $0x55c] sm:$0xf] }
 0x377   :  { %v1176_v47 = vmul.f32 0.5, %v1175_v45  ;;  %v6262_v45 = vld [vmem:[%s13736_s5 + $0x510] sm:$0xf]  ;;  %v6171_v39 = vor.u32 %v8561_v29, %v6168_v30  ;;  %v6304_v18 = vld [vmem:[%s13736_s5 + $0x578] sm:$0xf0] }
 0x378   :  { %v1186_v48 = vmul.f32 0.5, %v1185_v46  ;;  %v8589_v46 = vld [vmem:[%s13736_s5 + $0x52c] sm:$0xf0]  ;;  %v8586_v29 = vld [vmem:[%s13736_s5 + $0x51c] sm:$0xf] }
 0x379   :  { %v1177_v49 = vsub.f32 1.5, %v1176_v47  ;;  %v6299_v47 = vor.u32 %v8593_v41, %v6296_v5  ;;  %v8553_v41 = vld [vmem:[%s13736_s5 + $0x414] sm:$0xf]  ;;  %v6272_v30 = vld [vmem:[%s13736_s5 + $0x538] sm:$0xf0] }
 0x37a   :  { %v1187_v51 = vsub.f32 1.5, %v1186_v48  ;;  %v6136_v5 = vld [vmem:[%s13736_s5 + $0x430] sm:$0xf0]  ;;  %v8650_v31 = vld [vmem:[%s13736_s5 + $0x71c] sm:$0xf] }
 0x37b   :  { %v1178_v53 = vmul.f32 %v8968_v6, %v1177_v49  ;;  %v6518_v49 = vld [vmem:[%s13736_s5 + $0x710] sm:$0xf]  ;;  %v6528_v32 = vld [vmem:[%s13736_s5 + $0x738] sm:$0xf0] }
 0x37c   :  { %v1188_v57 = vmul.f32 %v8970_v42, %v1187_v51  ;;  %v8585_v51 = vld [vmem:[%s13736_s5 + $0x514] sm:$0xf] }
 0x37d   :  { %v1182_v58 = vsel %vm1181_vm10, %v8968_v6, %v1178_v53  ;;  %v8657_v6 = vld [vmem:[%s13736_s5 + $0x754] sm:$0xf] }
 0x37e   :  { %v1193_v27 = vmul.f32 %v1182_v58, %v10117_v20  ;;  %v1192_v61 = vsel %vm1191_vm12, %v8970_v42, %v1188_v57  ;;  %v8613_v20 = vld [vmem:[%s13736_s5 + $0x5ec] sm:$0xf0]  ;;  %v6552_v42 = vld [vmem:[%s13736_s5 + $0x770] sm:$0xf0]  ;;  %v6263_v57 = vor.u32 %v8589_v46, %v6262_v45  ;;  %v6519_v58 = vor.u32 %v8653_v50, %v6518_v49  ;;  %v6622_v45 = vld [vmem:[%s13736_s5 + $0x7d8] sm:$0xf] }
 0x37f   :  { %v1194_v62 = vmul.f32 %v1192_v61, %v10120_v21  ;;  %v6614_v21 = vld [vmem:[%s13736_s5 + $0x7d0] sm:$0xf]  ;;  %v6359_v2 = vor.u32 %v8613_v20, %v6358_v10  ;;  %v6555_v48 = vor.u32 %v8657_v6, %v6552_v42  ;;  %v6264_v53 = vld [vmem:[%s13736_s5 + $0x530] sm:$0xf0]  ;;  %v8678_v46 = vld [vmem:[%s13736_s5 + $0x7f4] sm:$0xf0] }
 0x380   :  { %v1201_v56 = vmul.f32 %v1197_v55, %v1193_v27  ;;  %v6615_v26 = vor.u32 %v8677_v12, %v6614_v21  ;;  %v6520_v55 = vld [vmem:[%s13736_s5 + $0x730] sm:$0xf0]  ;;  %v8581_v27 = vld [vmem:[%s13736_s5 + $0x4ec] sm:$0xf0]  ;;  %v6368_v50 = vld [vmem:[%s13736_s5 + $0x5f8] sm:$0xf0] }
 0x381   :  { %v1202_v0 = vmul.f32 %v1198_v59, %v1194_v62  ;;  %v6230_v59 = vld [vmem:[%s13736_s5 + $0x4d0] sm:$0xf]  ;;  %v6523_v61 = vor.u32 %v8649_v54, %v6520_v55  ;;  %v8617_v6 = vld [vmem:[%s13736_s5 + $0x614] sm:$0xf]  ;;  %v6139_v54 = vor.u32 %v8553_v41, %v6136_v5  ;;  %v8578_v41 = vld [vmem:[%s13736_s5 + $0x4dc] sm:$0xf] }
 0x382   :  { %v1209_v1 = vadd.f32 %v1205_v60, %v1201_v56  ;;  %v6267_v60 = vor.u32 %v8585_v51, %v6264_v53  ;;  %v6486_v62 = vld [vmem:[%s13736_s5 + $0x6d0] sm:$0xf]  ;;  %v8577_v56 = vld [vmem:[%s13736_s5 + $0x4d4] sm:$0xf]  ;;  %v8674_v51 = vld [vmem:[%s13736_s5 + $0x7dc] sm:$0xf] }
 0x383   :  { %v1210_v4 = vadd.f32 %v1206_v63, %v1202_v0  ;;  %v8645_v63 = vld [vmem:[%s13736_s5 + $0x6ec] sm:$0xf0]  ;;  %v6232_v0 = vld [vmem:[%s13736_s5 + $0x4f0] sm:$0xf0]  ;;  %v6624_v53 = vld [vmem:[%s13736_s5 + $0x7f8] sm:$0xf0] }
 0x384   :  { %v1211_v7 = vmul.f32 0.2, %v1209_v1  ;;  %v8573_v10 = vld [vmem:[%s13736_s5 + $0x4ac] sm:$0xf0]  ;;  %v6235_v20 = vor.u32 %v8577_v56, %v6232_v0  ;;  %v6392_v42 = vld [vmem:[%s13736_s5 + $0x630] sm:$0xf0] }
 0x385   :  { %v1212_v8 = vmul.f32 0.2, %v1210_v4  ;;  %v6454_v21 = vld [vmem:[%s13736_s5 + $0x690] sm:$0xf]  ;;  %v6395_v55 = vor.u32 %v8617_v6, %v6392_v42  ;;  %v8602_v56 = vld [vmem:[%s13736_s5 + $0x59c] sm:$0xf] }
 0x386   :  { %v1213_v9 = vmax.f32 %v1209_v1, %v1211_v7  ;;  %v8641_v1 = vld [vmem:[%s13736_s5 + $0x6d4] sm:$0xf]  ;;  %v6231_v7 = vor.u32 %v8581_v27, %v6230_v59  ;;  %v8637_v12 = vld [vmem:[%s13736_s5 + $0x6ac] sm:$0xf0]  ;;  %v6334_v59 = vld [vmem:[%s13736_s5 + $0x598] sm:$0xf] }
 0x387   :  { %v1214_v11 = vmax.f32 %v1210_v4, %v1212_v8  ;;  %v6488_v4 = vld [vmem:[%s13736_s5 + $0x6f0] sm:$0xf0]  ;;  %v6487_v8 = vor.u32 %v8645_v63, %v6486_v62  ;;  %v8606_v27 = vld [vmem:[%s13736_s5 + $0x5b4] sm:$0xf0]  ;;  %v6336_v0 = vld [vmem:[%s13736_s5 + $0x5b8] sm:$0xf0] }
 0x388   :  { %v10286_v14 = vpack.c.bf16 %v1213_v9, %v1213_v9  ;;  %v6198_v9 = vld [vmem:[%s13736_s5 + $0x490] sm:$0xf]  ;;  %v6590_v62 = vld [vmem:[%s13736_s5 + $0x798] sm:$0xf]  ;;  %v6240_v5 = vld [vmem:[%s13736_s5 + $0x4f8] sm:$0xf0] }
 0x389   :  { %v10297_v23 = vpack.c.bf16 %v1214_v11, %v1214_v11  ;;  %v6491_v11 = vor.u32 %v8641_v1, %v6488_v4  ;;  %v6199_v24 = vor.u32 %v8573_v10, %v6198_v9  ;;  %v8670_v63 = vld [vmem:[%s13736_s5 + $0x7b4] sm:$0xf0]  ;;  %v8666_v1 = vld [vmem:[%s13736_s5 + $0x79c] sm:$0xf]  ;;  %vm5203_vm12 = vcmask 844800  }
 0x38a   :  { %v10303_v25 = vrot.slane %v10286_v14, 1  ;;  %v6592_v4 = vld [vmem:[%s13736_s5 + $0x7b8] sm:$0xf0]  ;;  %v6302_v9 = vld [vmem:[%s13736_s5 + $0x558] sm:$0xf] }
 0x38b   :  { %v10312_v52 = vrot.slane %v10297_v23, 1  ;;  %v8598_v10 = vld [vmem:[%s13736_s5 + $0x574] sm:$0xf0]  ;;  %v8642_v6 = vld [vmem:[%s13736_s5 + $0x6dc] sm:$0xf] }
 0x38c   :  { %2128 = vmatmul.bf16.vlgmr.msrb.gmra.mxu0 %v10303_v25  ;;  %2154 = vmatmul.bf16.vlgmr.msra.gmra.mxu2 %v10303_v25  ;;  %v6496_v42 = vld [vmem:[%s13736_s5 + $0x6f8] sm:$0xf0] }
 0x38d   :  { %2141 = vmatmul.bf16.vlgmr.msra.gmra.mxu1 %v10312_v52  ;;  %2167 = vmatmul.bf16.vlgmr.msrb.gmra.mxu3 %v10312_v52 }
 0x38e   :  { %2224 = vmatpush.bf16.msrb.mxu0 %v6359_v2  ;;  %2237 = vmatpush.bf16.msra.mxu1 %v6615_v26  ;;  %v6455_v2 = vor.u32 %v8637_v12, %v6454_v21  ;;  %v6166_v26 = vld [vmem:[%s13736_s5 + $0x450] sm:$0xf]  ;;  %v6558_v21 = vld [vmem:[%s13736_s5 + $0x758] sm:$0xf] }
 0x38f   :  { %2250 = vmatpush.bf16.msra.mxu2 %v6363_v16  ;;  %2263 = vmatpush.bf16.msrb.mxu3 %v6619_v17  ;;  %v6459_v16 = vor.u32 %v8633_v19, %v6456_v22  ;;  %v6422_v17 = vld [vmem:[%s13736_s5 + $0x650] sm:$0xf]  ;;  %v8662_v12 = vld [vmem:[%s13736_s5 + $0x774] sm:$0xf0]  ;;  %v8658_v19 = vld [vmem:[%s13736_s5 + $0x75c] sm:$0xf] }
 0x390   :  { %v6423_v35 = vor.u32 %v8629_v28, %v6422_v17  ;;  %v6560_v22 = vld [vmem:[%s13736_s5 + $0x778] sm:$0xf0]  ;;  %v6526_v17 = vld [vmem:[%s13736_s5 + $0x718] sm:$0xf] }
 0x391   :  { %v8654_v28 = vld [vmem:[%s13736_s5 + $0x734] sm:$0xf0] }
 0x392   :  { %2225 = vmatpush.bf16.msrb.mxu0 %v6327_v33  ;;  %2238 = vmatpush.bf16.msra.mxu1 %v6583_v34  ;;  %v6134_v33 = vld [vmem:[%s13736_s5 + $0x410] sm:$0xf]  ;;  %v6167_v34 = vor.u32 %v8565_v3, %v6166_v26  ;;  %v6270_v26 = vld [vmem:[%s13736_s5 + $0x518] sm:$0xf] }
 0x393   :  { %2251 = vmatpush.bf16.msra.mxu2 %v6331_v37  ;;  %2264 = vmatpush.bf16.msrb.mxu3 %v6587_v38  ;;  %v6390_v37 = vld [vmem:[%s13736_s5 + $0x610] sm:$0xf]  ;;  %v8590_v3 = vld [vmem:[%s13736_s5 + $0x534] sm:$0xf0] }
 0x394   :  { %v8621_v38 = vld [vmem:[%s13736_s5 + $0x62c] sm:$0xf0] }
 0x395   :  { %v6391_v49 = vor.u32 %v8621_v38, %v6390_v37  ;;  %v6275_v37 = vor.u32 %v8586_v29, %v6272_v30  ;;  %v6531_v38 = vor.u32 %v8650_v31, %v6528_v32  ;;  %v8543_v29 = vld [vmem:[%s13736_s5 + $0x3c4] sm:$0xf] }
 0x396   :  { %2226 = vmatpush.bf16.msrb.mxu0 %v6295_v43  ;;  %2239 = vmatpush.bf16.msra.mxu1 %v6551_v44  ;;  %v6366_v43 = vld [vmem:[%s13736_s5 + $0x5d8] sm:$0xf]  ;;  %v7112_v30 = vld [vmem:[%s13736_s5 + $0x3e0] sm:$0xf0] }
 0x397   :  { %2252 = vmatpush.bf16.msra.mxu2 %v6299_v47  ;;  %2265 = vmatpush.bf16.msrb.mxu3 %v6555_v48  ;;  %v8614_v44 = vld [vmem:[%s13736_s5 + $0x5f4] sm:$0xf0]  ;;  %v8610_v47 = vld [vmem:[%s13736_s5 + $0x5dc] sm:$0xf]  ;;  %v6135_v48 = vor.u32 %v8557_v36, %v6134_v33  ;;  %v6271_v33 = vor.u32 %v8590_v3, %v6270_v26  ;;  %v7110_v26 = vld [vmem:[%s13736_s5 + $0x3c0] sm:$0xf] }
 0x398   :  { %v8582_v36 = vld [vmem:[%s13736_s5 + $0x4f4] sm:$0xf0]  ;;  %v8547_v3 = vld [vmem:[%s13736_s5 + $0x3dc] sm:$0xf0] }
 0x39a   :  { %2227 = vmatpush.bf16.msrb.mxu0 %v6263_v57  ;;  %2240 = vmatpush.bf16.msra.mxu1 %v6519_v58  ;;  %v6367_v57 = vor.u32 %v8614_v44, %v6366_v43  ;;  %v6623_v58 = vor.u32 %v8678_v46, %v6622_v45  ;;  %v6206_v45 = vld [vmem:[%s13736_s5 + $0x498] sm:$0xf] }
 0x39b   :  { %2253 = vmatpush.bf16.msra.mxu2 %v6267_v60  ;;  %2266 = vmatpush.bf16.msrb.mxu3 %v6523_v61  ;;  %v6371_v60 = vor.u32 %v8610_v47, %v6368_v50  ;;  %v6627_v61 = vor.u32 %v8674_v51, %v6624_v53  ;;  %v8574_v46 = vld [vmem:[%s13736_s5 + $0x4b4] sm:$0xf0]  ;;  %v6243_v47 = vor.u32 %v8578_v41, %v6240_v5  ;;  %v8570_v51 = vld [vmem:[%s13736_s5 + $0x49c] sm:$0xf]  ;;  %v8471_v41 = vld [vmem:[%s13736_s5 + $0x184] sm:$0xf] }
 0x39c   :  { %2180 = vmatmul.bf16.vlgmr.msra.gmra.mxu0 %v10303_v25  ;;  %2206 = vmatmul.bf16.vlgmr.msrb.gmra.mxu2 %v10303_v25  ;;  %v8638_v50 = vld [vmem:[%s13736_s5 + $0x6b4] sm:$0xf0]  ;;  %v6208_v53 = vld [vmem:[%s13736_s5 + $0x4b8] sm:$0xf0]  ;;  %v6824_v5 = vld [vmem:[%s13736_s5 + $0x1a0] sm:$0xf0] }
 0x39d   :  { %2193 = vmatmul.bf16.vlgmr.msrb.gmra.mxu1 %v10312_v52  ;;  %2219 = vmatmul.bf16.vlgmr.msra.gmra.mxu3 %v10312_v52 }
 0x39e   :  { %2228 = vmatpush.bf16.msrb.mxu0 %v6231_v7  ;;  %2241 = vmatpush.bf16.msra.mxu1 %v6487_v8  ;;  %v6335_v7 = vor.u32 %v8606_v27, %v6334_v59  ;;  %v6591_v8 = vor.u32 %v8670_v63, %v6590_v62  ;;  %v6174_v59 = vld [vmem:[%s13736_s5 + $0x458] sm:$0xf] }
 0x39f   :  { %2254 = vmatpush.bf16.msra.mxu2 %v6235_v20  ;;  %2267 = vmatpush.bf16.msrb.mxu3 %v6491_v11  ;;  %v6339_v20 = vor.u32 %v8602_v56, %v6336_v0  ;;  %v6595_v11 = vor.u32 %v8666_v1, %v6592_v4  ;;  %v8566_v27 = vld [vmem:[%s13736_s5 + $0x474] sm:$0xf0]  ;;  %v8562_v56 = vld [vmem:[%s13736_s5 + $0x45c] sm:$0xf] }
 0x3a0   :  { %v6430_v62 = vld [vmem:[%s13736_s5 + $0x658] sm:$0xf]  ;;  %v6176_v0 = vld [vmem:[%s13736_s5 + $0x478] sm:$0xf0] }
 0x3a1   :  { %v8630_v63 = vld [vmem:[%s13736_s5 + $0x674] sm:$0xf0]  ;;  %v8626_v1 = vld [vmem:[%s13736_s5 + $0x65c] sm:$0xf] }
 0x3a2   :  { %2229 = vmatpush.bf16.msrb.mxu0 %v6199_v24  ;;  %2242 = vmatpush.bf16.msra.mxu1 %v6455_v2  ;;  %v6303_v24 = vor.u32 %v8598_v10, %v6302_v9  ;;  %v6559_v2 = vor.u32 %v8662_v12, %v6558_v21  ;;  %v6432_v4 = vld [vmem:[%s13736_s5 + $0x678] sm:$0xf0]  ;;  %v6431_v9 = vor.u32 %v8630_v63, %v6430_v62  ;;  %v8558_v10 = vld [vmem:[%s13736_s5 + $0x434] sm:$0xf0]  ;;  %v8455_v62 = vld [vmem:[%s13736_s5 + $0x104] sm:$0xf] }
 0x3a3   :  { %2255 = vmatpush.bf16.msra.mxu2 %v6203_v15  ;;  %2268 = vmatpush.bf16.msrb.mxu3 %v6459_v16  ;;  %v6307_v15 = vor.u32 %v8594_v13, %v6304_v18  ;;  %v6563_v16 = vor.u32 %v8658_v19, %v6560_v22  ;;  %v6179_v21 = vor.u32 %v8562_v56, %v6176_v0  ;;  %v8554_v13 = vld [vmem:[%s13736_s5 + $0x41c] sm:$0xf]  ;;  %v6760_v63 = vld [vmem:[%s13736_s5 + $0x120] sm:$0xf0] }
 0x3a4   :  { %v6435_v12 = vor.u32 %v8626_v1, %v6432_v4  ;;  %v6144_v18 = vld [vmem:[%s13736_s5 + $0x438] sm:$0xf0]  ;;  %v8519_v56 = vld [vmem:[%s13736_s5 + $0x304] sm:$0xf] }
 0x3a5   :  { %v8618_v19 = vld [vmem:[%s13736_s5 + $0x61c] sm:$0xf]  ;;  %v6147_v31 = vor.u32 %v8554_v13, %v6144_v18  ;;  %v7016_v0 = vld [vmem:[%s13736_s5 + $0x320] sm:$0xf0] }
 0x3a6   :  { %2230 = vmatpush.bf16.msrb.mxu0 %v6167_v34  ;;  %2243 = vmatpush.bf16.msra.mxu1 %v6423_v35  ;;  %v6527_v34 = vor.u32 %v8654_v28, %v6526_v17  ;;  %v6238_v35 = vld [vmem:[%s13736_s5 + $0x4d8] sm:$0xf]  ;;  %v6400_v22 = vld [vmem:[%s13736_s5 + $0x638] sm:$0xf0]  ;;  %v6856_v28 = vld [vmem:[%s13736_s5 + $0x1e0] sm:$0xf0] }
 0x3a7   :  { %2256 = vmatpush.bf16.msra.mxu2 %v6171_v39  ;;  %2269 = vmatpush.bf16.msrb.mxu3 %v6427_v40  ;;  %v6494_v39 = vld [vmem:[%s13736_s5 + $0x6d8] sm:$0xf]  ;;  %v6239_v43 = vor.u32 %v8582_v36, %v6238_v35  ;;  %v6403_v32 = vor.u32 %v8618_v19, %v6400_v22  ;;  %v6822_v35 = vld [vmem:[%s13736_s5 + $0x180] sm:$0xf]  ;;  %v8511_v13 = vld [vmem:[%s13736_s5 + $0x2c4] sm:$0xf] }
 0x3a8   :  { %v8646_v40 = vld [vmem:[%s13736_s5 + $0x6f4] sm:$0xf0]  ;;  %v8475_v36 = vld [vmem:[%s13736_s5 + $0x19c] sm:$0xf0]  ;;  %v6984_v18 = vld [vmem:[%s13736_s5 + $0x2e0] sm:$0xf0] }
 0x3a9   :  { %v6495_v44 = vor.u32 %v8646_v40, %v6494_v39  ;;  %v7078_v39 = vld [vmem:[%s13736_s5 + $0x380] sm:$0xf] }
 0x3aa   :  { %2231 = vmatpush.bf16.msrb.mxu0 %v6135_v48  ;;  %2244 = vmatpush.bf16.msra.mxu1 %v6391_v49  ;;  %v6499_v48 = vor.u32 %v8642_v6, %v6496_v42  ;;  %v6462_v49 = vld [vmem:[%s13736_s5 + $0x698] sm:$0xf]  ;;  %v8539_v40 = vld [vmem:[%s13736_s5 + $0x39c] sm:$0xf0]  ;;  %v8535_v6 = vld [vmem:[%s13736_s5 + $0x384] sm:$0xf] }
 0x3ab   :  { %2257 = vmatpush.bf16.msra.mxu2 %v6139_v54  ;;  %2270 = vmatpush.bf16.msrb.mxu3 %v6395_v55  ;;  %v8634_v54 = vld [vmem:[%s13736_s5 + $0x69c] sm:$0xf]  ;;  %v7080_v42 = vld [vmem:[%s13736_s5 + $0x3a0] sm:$0xf0] }
 0x3ac   :  { %v6464_v55 = vld [vmem:[%s13736_s5 + $0x6b8] sm:$0xf0] }
 0x3ad   :  { %2232 = vmatmul.bf16.vlgmr.msrb.gmra.mxu0 %v10303_v25  ;;  %2245 = vmatmul.bf16.vlgmr.msra.gmra.mxu1 %v10312_v52 }
 0x3ae   :  { %2276 = vmatpush.bf16.msra.mxu0 %v6367_v57  ;;  %2289 = vmatpush.bf16.msrb.mxu1 %v6623_v58  ;;  %v6207_v57 = vor.u32 %v8574_v46, %v6206_v45  ;;  %v6463_v58 = vor.u32 %v8638_v50, %v6462_v49  ;;  %v6790_v45 = vld [vmem:[%s13736_s5 + $0x140] sm:$0xf] }
 0x3af   :  { %2302 = vmatpush.bf16.msrb.mxu2 %v6371_v60  ;;  %2315 = vmatpush.bf16.msra.mxu3 %v6627_v61  ;;  %v6211_v60 = vor.u32 %v8570_v51, %v6208_v53  ;;  %v6467_v61 = vor.u32 %v8634_v54, %v6464_v55  ;;  %v8467_v46 = vld [vmem:[%s13736_s5 + $0x15c] sm:$0xf0]  ;;  %v8463_v51 = vld [vmem:[%s13736_s5 + $0x144] sm:$0xf] }
 0x3b0   :  { %2258 = vmatmul.bf16.vlgmr.msra.gmra.mxu2 %v10303_v25  ;;  %2271 = vmatmul.bf16.vlgmr.msrb.gmra.mxu3 %v10312_v52  ;;  %v7046_v49 = vld [vmem:[%s13736_s5 + $0x340] sm:$0xf]  ;;  %v6792_v53 = vld [vmem:[%s13736_s5 + $0x160] sm:$0xf0] }
 0x3b1   :  { %v8531_v50 = vld [vmem:[%s13736_s5 + $0x35c] sm:$0xf0]  ;;  %v8527_v54 = vld [vmem:[%s13736_s5 + $0x344] sm:$0xf] }
 0x3b2   :  { %2277 = vmatpush.bf16.msra.mxu0 %v6335_v7  ;;  %2290 = vmatpush.bf16.msrb.mxu1 %v6591_v8  ;;  %v6142_v7 = vld [vmem:[%s13736_s5 + $0x418] sm:$0xf]  ;;  %v6175_v8 = vor.u32 %v8566_v27, %v6174_v59  ;;  %v7048_v55 = vld [vmem:[%s13736_s5 + $0x360] sm:$0xf0]  ;;  %v6758_v59 = vld [vmem:[%s13736_s5 + $0x100] sm:$0xf] }
 0x3b3   :  { %2303 = vmatpush.bf16.msrb.mxu2 %v6339_v20  ;;  %2316 = vmatpush.bf16.msra.mxu3 %v6595_v11  ;;  %v6398_v20 = vld [vmem:[%s13736_s5 + $0x618] sm:$0xf]  ;;  %v8459_v27 = vld [vmem:[%s13736_s5 + $0x11c] sm:$0xf0] }
 0x3b4   :  { %v8622_v11 = vld [vmem:[%s13736_s5 + $0x634] sm:$0xf0]  ;;  %v6759_v1 = vor.u32 %v8459_v27, %v6758_v59  ;;  %v8480_v59 = vld [vmem:[%s13736_s5 + $0x1cc] sm:$0xf] }
 0x3b5   :  { %v6399_v17 = vor.u32 %v8622_v11, %v6398_v20  ;;  %v6982_v20 = vld [vmem:[%s13736_s5 + $0x2c0] sm:$0xf] }
 0x3b6   :  { %2278 = vmatpush.bf16.msra.mxu0 %v6303_v24  ;;  %2291 = vmatpush.bf16.msrb.mxu1 %v6559_v2  ;;  %v6854_v24 = vld [vmem:[%s13736_s5 + $0x1c0] sm:$0xf] }
 0x3b7   :  { %2304 = vmatpush.bf16.msrb.mxu2 %v6307_v15  ;;  %2317 = vmatpush.bf16.msra.mxu3 %v6563_v16  ;;  %v8483_v2 = vld [vmem:[%s13736_s5 + $0x1dc] sm:$0xf0]  ;;  %v8479_v15 = vld [vmem:[%s13736_s5 + $0x1c4] sm:$0xf]  ;;  %v6143_v16 = vor.u32 %v8558_v10, %v6142_v7  ;;  %v7019_v10 = vor.u32 %v8519_v56, %v7016_v0 }
 0x3b8   :  { %v6726_v7 = vld [vmem:[%s13736_s5 + $0xc0] sm:$0xf] }
 0x3b9   :  { %v8515_v11 = vld [vmem:[%s13736_s5 + $0x2dc] sm:$0xf0] }
 0x3ba   :  { %2279 = vmatpush.bf16.msra.mxu0 %v6271_v33  ;;  %2292 = vmatpush.bf16.msrb.mxu1 %v6527_v34  ;;  %v6855_v33 = vor.u32 %v8483_v2, %v6854_v24  ;;  %v7111_v34 = vor.u32 %v8547_v3, %v7110_v26  ;;  %v6983_v22 = vor.u32 %v8515_v11, %v6982_v20  ;;  %v6694_v24 = vld [vmem:[%s13736_s5 + $0x80] sm:$0xf]  ;;  %v8472_v20 = vld [vmem:[%s13736_s5 + $0x18c] sm:$0xf] }
 0x3bb   :  { %2305 = vmatpush.bf16.msrb.mxu2 %v6275_v37  ;;  %2318 = vmatpush.bf16.msra.mxu3 %v6531_v38  ;;  %v6859_v37 = vor.u32 %v8479_v15, %v6856_v28  ;;  %v7115_v38 = vor.u32 %v8543_v29, %v7112_v30  ;;  %v8443_v2 = vld [vmem:[%s13736_s5 + $0x9c] sm:$0xf0]  ;;  %v6987_v3 = vor.u32 %v8511_v13, %v6984_v18  ;;  %v6696_v28 = vld [vmem:[%s13736_s5 + $0xa0] sm:$0xf0]  ;;  %v6832_v11 = vld [vmem:[%s13736_s5 + $0x1a8] sm:$0xf0] }
 0x3bc   :  { %v6950_v15 = vld [vmem:[%s13736_s5 + $0x280] sm:$0xf]  ;;  %v8503_v29 = vld [vmem:[%s13736_s5 + $0x284] sm:$0xf] }
 0x3bd   :  { %v6952_v30 = vld [vmem:[%s13736_s5 + $0x2a0] sm:$0xf0] }
 0x3be   :  { %2280 = vmatpush.bf16.msra.mxu0 %v6239_v43  ;;  %2293 = vmatpush.bf16.msrb.mxu1 %v6495_v44  ;;  %v6823_v43 = vor.u32 %v8475_v36, %v6822_v35  ;;  %v7079_v44 = vor.u32 %v8539_v40, %v7078_v39  ;;  %v6955_v36 = vor.u32 %v8503_v29, %v6952_v30  ;;  %v8431_v39 = vld [vmem:[%s13736_s5 + $0x44] sm:$0xf] }
 0x3bf   :  { %2306 = vmatpush.bf16.msrb.mxu2 %v6243_v47  ;;  %2319 = vmatpush.bf16.msra.mxu3 %v6499_v48  ;;  %v6827_v47 = vor.u32 %v8471_v41, %v6824_v5  ;;  %v7083_v48 = vor.u32 %v8535_v6, %v7080_v42  ;;  %v6664_v40 = vld [vmem:[%s13736_s5 + $0x60] sm:$0xf0]  ;;  %v6630_v6 = vld [vmem:[%s13736_s5] sm:$0xf] }
 0x3c0   :  { %v8495_v41 = vld [vmem:[%s13736_s5 + $0x244] sm:$0xf] }
 0x3c1   :  { %v6920_v5 = vld [vmem:[%s13736_s5 + $0x260] sm:$0xf0] }
 0x3c2   :  { %2281 = vmatpush.bf16.msra.mxu0 %v6207_v57  ;;  %2294 = vmatpush.bf16.msrb.mxu1 %v6463_v58  ;;  %v6791_v57 = vor.u32 %v8467_v46, %v6790_v45  ;;  %v7047_v58 = vor.u32 %v8531_v50, %v7046_v49  ;;  %v6886_v45 = vld [vmem:[%s13736_s5 + $0x200] sm:$0xf]  ;;  %v8423_v49 = vld [vmem:[%s13736_s5 + $0x4] sm:$0xf] }
 0x3c3   :  { %2307 = vmatpush.bf16.msrb.mxu2 %v6211_v60  ;;  %2320 = vmatpush.bf16.msra.mxu3 %v6467_v61  ;;  %v6795_v60 = vor.u32 %v8463_v51, %v6792_v53  ;;  %v7051_v61 = vor.u32 %v8527_v54, %v7048_v55  ;;  %v8491_v46 = vld [vmem:[%s13736_s5 + $0x21c] sm:$0xf0]  ;;  %v6632_v50 = vld [vmem:[%s13736_s5 + $0x20] sm:$0xf0]  ;;  %v6862_v54 = vld [vmem:[%s13736_s5 + $0x1c8] sm:$0xf] }
 0x3c4   :  { %v8487_v51 = vld [vmem:[%s13736_s5 + $0x204] sm:$0xf]  ;;  %v8484_v55 = vld [vmem:[%s13736_s5 + $0x1e4] sm:$0xf0] }
 0x3c5   :  { %v6888_v53 = vld [vmem:[%s13736_s5 + $0x220] sm:$0xf0]  ;;  %v6863_v56 = vor.u32 %v8484_v55, %v6862_v54  ;;  %v6702_v54 = vld [vmem:[%s13736_s5 + $0x88] sm:$0xf] }
 0x3c6   :  { %2282 = vmatpush.bf16.msra.mxu0 %v6175_v8  ;;  %2295 = vmatpush.bf16.msrb.mxu1 %v6431_v9  ;;  %v8451_v8 = vld [vmem:[%s13736_s5 + $0xdc] sm:$0xf0]  ;;  %v6763_v9 = vor.u32 %v8455_v62, %v6760_v63  ;;  %v6635_v62 = vor.u32 %v8423_v49, %v6632_v50  ;;  %v6891_v63 = vor.u32 %v8487_v51, %v6888_v53  ;;  %v8512_v49 = vld [vmem:[%s13736_s5 + $0x2cc] sm:$0xf]  ;;  %v8444_v55 = vld [vmem:[%s13736_s5 + $0xa4] sm:$0xf0] }
 0x3c7   :  { %2308 = vmatpush.bf16.msrb.mxu2 %v6179_v21  ;;  %2321 = vmatpush.bf16.msra.mxu3 %v6435_v12  ;;  %v8447_v21 = vld [vmem:[%s13736_s5 + $0xc4] sm:$0xf]  ;;  %v6727_v19 = vor.u32 %v8451_v8, %v6726_v7  ;;  %v6992_v50 = vld [vmem:[%s13736_s5 + $0x2e8] sm:$0xf0] }
 0x3c8   :  { %v6728_v12 = vld [vmem:[%s13736_s5 + $0xe0] sm:$0xf0] }
 0x3c9   :  { %v6731_v26 = vor.u32 %v8447_v21, %v6728_v12  ;;  %v8536_v21 = vld [vmem:[%s13736_s5 + $0x38c] sm:$0xf] }
 0x3ca   :  { %2283 = vmatpush.bf16.msra.mxu0 %v6143_v16  ;;  %2296 = vmatpush.bf16.msrb.mxu1 %v6399_v17  ;;  %v8507_v16 = vld [vmem:[%s13736_s5 + $0x29c] sm:$0xf0]  ;;  %v8439_v17 = vld [vmem:[%s13736_s5 + $0x84] sm:$0xf]  ;;  %v7088_v12 = vld [vmem:[%s13736_s5 + $0x3a8] sm:$0xf0] }
 0x3cb   :  { %2309 = vmatpush.bf16.msrb.mxu2 %v6147_v31  ;;  %2322 = vmatpush.bf16.msra.mxu3 %v6403_v32  ;;  %v6695_v31 = vor.u32 %v8443_v2, %v6694_v24  ;;  %v6951_v32 = vor.u32 %v8507_v16, %v6950_v15  ;;  %v6699_v35 = vor.u32 %v8439_v17, %v6696_v28  ;;  %v8464_v15 = vld [vmem:[%s13736_s5 + $0x14c] sm:$0xf] }
 0x3cc   :  { %v6835_v24 = vor.u32 %v8472_v20, %v6832_v11  ;;  %v7091_v2 = vor.u32 %v8536_v21, %v7088_v12  ;;  %v6800_v16 = vld [vmem:[%s13736_s5 + $0x168] sm:$0xf0]  ;;  %v6638_v21 = vld [vmem:[%s13736_s5 + $0x8] sm:$0xf] }
 0x3cd   :  { %2284 = vmatmul.bf16.vlgmr.msra.gmra.mxu0 %v10303_v25  ;;  %2297 = vmatmul.bf16.vlgmr.msrb.gmra.mxu1 %v10312_v52  ;;  %v8528_v17 = vld [vmem:[%s13736_s5 + $0x34c] sm:$0xf] }
 0x3ce   :  { %2968 = vmatpush.bf16.msrb.mxu0 %v6855_v33  ;;  %2981 = vmatpush.bf16.msra.mxu1 %v7111_v34  ;;  %v6662_v33 = vld [vmem:[%s13736_s5 + $0x40] sm:$0xf]  ;;  %v7056_v28 = vld [vmem:[%s13736_s5 + $0x368] sm:$0xf0] }
 0x3cf   :  { %2994 = vmatpush.bf16.msra.mxu2 %v6859_v37  ;;  %3007 = vmatpush.bf16.msrb.mxu3 %v7115_v38  ;;  %v8435_v34 = vld [vmem:[%s13736_s5 + $0x5c] sm:$0xf0]  ;;  %v8496_v20 = vld [vmem:[%s13736_s5 + $0x24c] sm:$0xf] }
 0x3d0   :  { %2310 = vmatmul.bf16.vlgmr.msrb.gmra.mxu2 %v10303_v25  ;;  %2323 = vmatmul.bf16.vlgmr.msra.gmra.mxu3 %v10312_v52  ;;  %v7014_v25 = vld [vmem:[%s13736_s5 + $0x300] sm:$0xf]  ;;  %v6663_v42 = vor.u32 %v8435_v34, %v6662_v33  ;;  %v6803_v33 = vor.u32 %v8464_v15, %v6800_v16  ;;  %v7059_v34 = vor.u32 %v8528_v17, %v7056_v28  ;;  %v6928_v11 = vld [vmem:[%s13736_s5 + $0x268] sm:$0xf0]  ;;  %v6870_v17 = vld [vmem:[%s13736_s5 + $0x1d0] sm:$0xf] }
 0x3d1   :  { %v8523_v52 = vld [vmem:[%s13736_s5 + $0x31c] sm:$0xf0]  ;;  %v8488_v15 = vld [vmem:[%s13736_s5 + $0x20c] sm:$0xf]  ;;  %v8485_v28 = vld [vmem:[%s13736_s5 + $0x1ec] sm:$0xf0] }
 0x3d2   :  { %2969 = vmatpush.bf16.msrb.mxu0 %v6823_v43  ;;  %2982 = vmatpush.bf16.msra.mxu1 %v7079_v44  ;;  %v7015_v4 = vor.u32 %v8523_v52, %v7014_v25  ;;  %v6918_v37 = vld [vmem:[%s13736_s5 + $0x240] sm:$0xf]  ;;  %v8544_v25 = vld [vmem:[%s13736_s5 + $0x3cc] sm:$0xf] }
 0x3d3   :  { %2995 = vmatpush.bf16.msra.mxu2 %v6827_v47  ;;  %3008 = vmatpush.bf16.msrb.mxu3 %v7083_v48  ;;  %v8499_v38 = vld [vmem:[%s13736_s5 + $0x25c] sm:$0xf0]  ;;  %v6667_v47 = vor.u32 %v8431_v39, %v6664_v40  ;;  %v6923_v48 = vor.u32 %v8495_v41, %v6920_v5  ;;  %v7120_v52 = vld [vmem:[%s13736_s5 + $0x3e8] sm:$0xf0] }
 0x3d4   :  { %v6919_v43 = vor.u32 %v8499_v38, %v6918_v37  ;;  %v8427_v44 = vld [vmem:[%s13736_s5 + $0x1c] sm:$0xf0]  ;;  %v7123_v8 = vor.u32 %v8544_v25, %v7120_v52  ;;  %v8456_v37 = vld [vmem:[%s13736_s5 + $0x10c] sm:$0xf] }
 0x3d5   :  { %v6631_v27 = vor.u32 %v8427_v44, %v6630_v6  ;;  %v6768_v38 = vld [vmem:[%s13736_s5 + $0x128] sm:$0xf0]  ;;  %v6734_v6 = vld [vmem:[%s13736_s5 + $0xc8] sm:$0xf] }
 0x3d6   :  { %2970 = vmatpush.bf16.msrb.mxu0 %v6791_v57  ;;  %2983 = vmatpush.bf16.msra.mxu1 %v7047_v58  ;;  %v7118_v57 = vld [vmem:[%s13736_s5 + $0x3c8] sm:$0xf]  ;;  %v8520_v39 = vld [vmem:[%s13736_s5 + $0x30c] sm:$0xf] }
 0x3d7   :  { %2996 = vmatpush.bf16.msra.mxu2 %v6795_v60  ;;  %3009 = vmatpush.bf16.msrb.mxu3 %v7051_v61  ;;  %v8548_v58 = vld [vmem:[%s13736_s5 + $0x3e4] sm:$0xf0]  ;;  %v6887_v60 = vor.u32 %v8491_v46, %v6886_v45  ;;  %v6864_v61 = vld [vmem:[%s13736_s5 + $0x1e8] sm:$0xf0] }
 0x3d8   :  { %v7119_v0 = vor.u32 %v8548_v58, %v7118_v57  ;;  %v6867_v7 = vor.u32 %v8480_v59, %v6864_v61  ;;  %v7024_v40 = vld [vmem:[%s13736_s5 + $0x328] sm:$0xf0]  ;;  %v6990_v45 = vld [vmem:[%s13736_s5 + $0x2c8] sm:$0xf]  ;;  %v6995_v58 = vor.u32 %v8512_v49, %v6992_v50 }
 0x3d9   :  { %v7027_v44 = vor.u32 %v8520_v39, %v7024_v40  ;;  %v8516_v46 = vld [vmem:[%s13736_s5 + $0x2e4] sm:$0xf0]  ;;  %v6704_v61 = vld [vmem:[%s13736_s5 + $0xa8] sm:$0xf0]  ;;  %v6871_v39 = vor.u32 %v8485_v28, %v6870_v17  ;;  %v6744_v17 = vld [vmem:[%s13736_s5 + $0xf0] sm:$0xf0] }
 0x3da   :  { %2971 = vmatpush.bf16.msrb.mxu0 %v6759_v1  ;;  %2984 = vmatpush.bf16.msra.mxu1 %v7015_v4  ;;  %v6830_v1 = vld [vmem:[%s13736_s5 + $0x188] sm:$0xf]  ;;  %v6991_v53 = vor.u32 %v8516_v46, %v6990_v45  ;;  %v8504_v25 = vld [vmem:[%s13736_s5 + $0x28c] sm:$0xf]  ;;  %v8473_v45 = vld [vmem:[%s13736_s5 + $0x194] sm:$0xf] }
 0x3db   :  { %2997 = vmatpush.bf16.msra.mxu2 %v6763_v9  ;;  %3010 = vmatpush.bf16.msrb.mxu3 %v7019_v10  ;;  %v8476_v4 = vld [vmem:[%s13736_s5 + $0x1a4] sm:$0xf0]  ;;  %v6960_v52 = vld [vmem:[%s13736_s5 + $0x2a8] sm:$0xf0]  ;;  %v6840_v46 = vld [vmem:[%s13736_s5 + $0x1b0] sm:$0xf0] }
 0x3dc   :  { %v7086_v9 = vld [vmem:[%s13736_s5 + $0x388] sm:$0xf]  ;;  %v6831_v13 = vor.u32 %v8476_v4, %v6830_v1  ;;  %v6963_v4 = vor.u32 %v8504_v25, %v6960_v52  ;;  %v6896_v16 = vld [vmem:[%s13736_s5 + $0x228] sm:$0xf0]  ;;  %v8513_v28 = vld [vmem:[%s13736_s5 + $0x2d4] sm:$0xf] }
 0x3dd   :  { %v8540_v10 = vld [vmem:[%s13736_s5 + $0x3a4] sm:$0xf0] }
 0x3de   :  { %2972 = vmatpush.bf16.msrb.mxu0 %v6727_v19  ;;  %2985 = vmatpush.bf16.msra.mxu1 %v6983_v22  ;;  %v7087_v18 = vor.u32 %v8540_v10, %v7086_v9  ;;  %v6798_v19 = vld [vmem:[%s13736_s5 + $0x148] sm:$0xf]  ;;  %v8432_v9 = vld [vmem:[%s13736_s5 + $0x4c] sm:$0xf] }
 0x3df   :  { %2998 = vmatpush.bf16.msra.mxu2 %v6731_v26  ;;  %3011 = vmatpush.bf16.msrb.mxu3 %v6987_v3  ;;  %v8468_v22 = vld [vmem:[%s13736_s5 + $0x164] sm:$0xf0]  ;;  %v6672_v10 = vld [vmem:[%s13736_s5 + $0x68] sm:$0xf0] }
 0x3e0   :  { %v7054_v26 = vld [vmem:[%s13736_s5 + $0x348] sm:$0xf]  ;;  %v6799_v29 = vor.u32 %v8468_v22, %v6798_v19 }
 0x3e1   :  { %v8532_v3 = vld [vmem:[%s13736_s5 + $0x364] sm:$0xf0] }
 0x3e2   :  { %2973 = vmatpush.bf16.msrb.mxu0 %v6695_v31  ;;  %2986 = vmatpush.bf16.msra.mxu1 %v6951_v32  ;;  %v7055_v30 = vor.u32 %v8532_v3, %v7054_v26  ;;  %v6766_v31 = vld [vmem:[%s13736_s5 + $0x108] sm:$0xf]  ;;  %v8424_v26 = vld [vmem:[%s13736_s5 + $0xc] sm:$0xf] }
 0x3e3   :  { %2999 = vmatpush.bf16.msra.mxu2 %v6699_v35  ;;  %3012 = vmatpush.bf16.msrb.mxu3 %v6955_v36  ;;  %v8460_v32 = vld [vmem:[%s13736_s5 + $0x124] sm:$0xf0]  ;;  %v6640_v3 = vld [vmem:[%s13736_s5 + $0x28] sm:$0xf0] }
 0x3e4   :  { %v7022_v35 = vld [vmem:[%s13736_s5 + $0x308] sm:$0xf]  ;;  %v6767_v41 = vor.u32 %v8460_v32, %v6766_v31  ;;  %v8481_v31 = vld [vmem:[%s13736_s5 + $0x1d4] sm:$0xf] }
 0x3e5   :  { %v8524_v36 = vld [vmem:[%s13736_s5 + $0x324] sm:$0xf0] }
 0x3e6   :  { %2974 = vmatpush.bf16.msrb.mxu0 %v6663_v42  ;;  %2987 = vmatpush.bf16.msra.mxu1 %v6919_v43  ;;  %v7023_v5 = vor.u32 %v8524_v36, %v7022_v35  ;;  %v8452_v42 = vld [vmem:[%s13736_s5 + $0xe4] sm:$0xf0]  ;;  %v6771_v43 = vor.u32 %v8456_v37, %v6768_v38  ;;  %v8545_v35 = vld [vmem:[%s13736_s5 + $0x3d4] sm:$0xf]  ;;  %v6643_v37 = vor.u32 %v8424_v26, %v6640_v3  ;;  %v6998_v26 = vld [vmem:[%s13736_s5 + $0x2d0] sm:$0xf] }
 0x3e7   :  { %3000 = vmatpush.bf16.msra.mxu2 %v6667_v47  ;;  %3013 = vmatpush.bf16.msrb.mxu3 %v6923_v48  ;;  %v8448_v47 = vld [vmem:[%s13736_s5 + $0xcc] sm:$0xf]  ;;  %v6735_v51 = vor.u32 %v8452_v42, %v6734_v6  ;;  %v6958_v59 = vld [vmem:[%s13736_s5 + $0x288] sm:$0xf]  ;;  %v7128_v36 = vld [vmem:[%s13736_s5 + $0x3f0] sm:$0xf0]  ;;  %v6899_v38 = vor.u32 %v8488_v15, %v6896_v16 }
 0x3e8   :  { %v6736_v48 = vld [vmem:[%s13736_s5 + $0xe8] sm:$0xf0]  ;;  %v6894_v19 = vld [vmem:[%s13736_s5 + $0x208] sm:$0xf]  ;;  %v7131_v42 = vor.u32 %v8545_v35, %v7128_v36  ;;  %v8517_v3 = vld [vmem:[%s13736_s5 + $0x2ec] sm:$0xf0] }
 0x3e9   :  { %v6739_v57 = vor.u32 %v8448_v47, %v6736_v48  ;;  %v8492_v22 = vld [vmem:[%s13736_s5 + $0x224] sm:$0xf0]  ;;  %v8537_v47 = vld [vmem:[%s13736_s5 + $0x394] sm:$0xf]  ;;  %v6710_v35 = vld [vmem:[%s13736_s5 + $0x90] sm:$0xf] }
 0x3ea   :  { %2975 = vmatpush.bf16.msrb.mxu0 %v6631_v27  ;;  %2988 = vmatpush.bf16.msra.mxu1 %v6887_v60  ;;  %v8508_v27 = vld [vmem:[%s13736_s5 + $0x2a4] sm:$0xf0]  ;;  %v8440_v60 = vld [vmem:[%s13736_s5 + $0x8c] sm:$0xf]  ;;  %v7096_v48 = vld [vmem:[%s13736_s5 + $0x3b0] sm:$0xf0] }
 0x3eb   :  { %3001 = vmatpush.bf16.msra.mxu2 %v6635_v62  ;;  %3014 = vmatpush.bf16.msrb.mxu3 %v6891_v63  ;;  %v6703_v62 = vor.u32 %v8444_v55, %v6702_v54  ;;  %v6959_v63 = vor.u32 %v8508_v27, %v6958_v59  ;;  %v6707_v1 = vor.u32 %v8440_v60, %v6704_v61  ;;  %v8465_v59 = vld [vmem:[%s13736_s5 + $0x154] sm:$0xf]  ;;  %v8445_v36 = vld [vmem:[%s13736_s5 + $0xac] sm:$0xf0] }
 0x3ec   :  { %v6843_v54 = vor.u32 %v8473_v45, %v6840_v46  ;;  %v7099_v55 = vor.u32 %v8537_v47, %v7096_v48  ;;  %v6808_v27 = vld [vmem:[%s13736_s5 + $0x170] sm:$0xf0]  ;;  %v6678_v45 = vld [vmem:[%s13736_s5 + $0x50] sm:$0xf] }
 0x3ed   :  { %2976 = vmatmul.bf16.vlgmr.msrb.gmra.mxu0 %v10286_v14  ;;  %2989 = vmatmul.bf16.vlgmr.msra.gmra.mxu1 %v10297_v23  ;;  %v8529_v60 = vld [vmem:[%s13736_s5 + $0x354] sm:$0xf]  ;;  %v8437_v46 = vld [vmem:[%s13736_s5 + $0x6c] sm:$0xf0] }
 0x3ee   :  { %3020 = vmatpush.bf16.msra.mxu0 %v6863_v56  ;;  %3033 = vmatpush.bf16.msrb.mxu1 %v7119_v0  ;;  %v6670_v56 = vld [vmem:[%s13736_s5 + $0x48] sm:$0xf]  ;;  %v7064_v61 = vld [vmem:[%s13736_s5 + $0x370] sm:$0xf0] }
 0x3ef   :  { %3046 = vmatpush.bf16.msrb.mxu2 %v6867_v7  ;;  %3059 = vmatpush.bf16.msra.mxu3 %v7123_v8  ;;  %v8436_v0 = vld [vmem:[%s13736_s5 + $0x64] sm:$0xf0]  ;;  %v8449_v15 = vld [vmem:[%s13736_s5 + $0xd4] sm:$0xf] }
 0x3f0   :  { %3002 = vmatmul.bf16.vlgmr.msra.gmra.mxu2 %v10286_v14  ;;  %3015 = vmatmul.bf16.vlgmr.msrb.gmra.mxu3 %v10297_v23  ;;  %v6926_v7 = vld [vmem:[%s13736_s5 + $0x248] sm:$0xf]  ;;  %v6671_v12 = vor.u32 %v8436_v0, %v6670_v56  ;;  %v6774_v56 = vld [vmem:[%s13736_s5 + $0x110] sm:$0xf] }
 0x3f1   :  { %v8500_v8 = vld [vmem:[%s13736_s5 + $0x264] sm:$0xf0]  ;;  %v8461_v0 = vld [vmem:[%s13736_s5 + $0x12c] sm:$0xf0] }
 0x3f2   :  { %3021 = vmatpush.bf16.msra.mxu0 %v6831_v13  ;;  %3034 = vmatpush.bf16.msrb.mxu1 %v7087_v18  ;;  %v6927_v13 = vor.u32 %v8500_v8, %v6926_v7  ;;  %v8428_v18 = vld [vmem:[%s13736_s5 + $0x24] sm:$0xf0]  ;;  %v7030_v8 = vld [vmem:[%s13736_s5 + $0x310] sm:$0xf] }
 0x3f3   :  { %3047 = vmatpush.bf16.msrb.mxu2 %v6835_v24  ;;  %3060 = vmatpush.bf16.msra.mxu3 %v7091_v2  ;;  %v6675_v24 = vor.u32 %v8432_v9, %v6672_v10  ;;  %v6931_v2 = vor.u32 %v8496_v20, %v6928_v11  ;;  %v6639_v32 = vor.u32 %v8428_v18, %v6638_v21  ;;  %v8525_v9 = vld [vmem:[%s13736_s5 + $0x32c] sm:$0xf0]  ;;  %v8457_v10 = vld [vmem:[%s13736_s5 + $0x114] sm:$0xf] }
 0x3f4   :  { %v6776_v20 = vld [vmem:[%s13736_s5 + $0x130] sm:$0xf0]  ;;  %v6742_v18 = vld [vmem:[%s13736_s5 + $0xd0] sm:$0xf] }
 0x3f5   :  { %v8521_v11 = vld [vmem:[%s13736_s5 + $0x314] sm:$0xf] }
 0x3f6   :  { %3022 = vmatpush.bf16.msra.mxu0 %v6799_v29  ;;  %3035 = vmatpush.bf16.msrb.mxu1 %v7055_v30  ;;  %v7126_v29 = vld [vmem:[%s13736_s5 + $0x3d0] sm:$0xf]  ;;  %v7032_v21 = vld [vmem:[%s13736_s5 + $0x330] sm:$0xf0] }
 0x3f7   :  { %3048 = vmatpush.bf16.msrb.mxu2 %v6803_v33  ;;  %3061 = vmatpush.bf16.msra.mxu3 %v7059_v34  ;;  %v8549_v30 = vld [vmem:[%s13736_s5 + $0x3ec] sm:$0xf0]  ;;  %v6895_v33 = vor.u32 %v8492_v22, %v6894_v19  ;;  %v6872_v34 = vld [vmem:[%s13736_s5 + $0x1f0] sm:$0xf0]  ;;  %v6779_v22 = vor.u32 %v8457_v10, %v6776_v20  ;;  %v6878_v20 = vld [vmem:[%s13736_s5 + $0x1d8] sm:$0xf] }
 0x3f8   :  { %v7127_v40 = vor.u32 %v8549_v30, %v7126_v29  ;;  %v6875_v6 = vor.u32 %v8481_v31, %v6872_v34  ;;  %v8453_v19 = vld [vmem:[%s13736_s5 + $0xec] sm:$0xf0]  ;;  %v7000_v29 = vld [vmem:[%s13736_s5 + $0x2f0] sm:$0xf0] }
 0x3f9   :  { %v6904_v10 = vld [vmem:[%s13736_s5 + $0x230] sm:$0xf0] }
 0x3fa   :  { %3023 = vmatpush.bf16.msra.mxu0 %v6767_v41  ;;  %3036 = vmatpush.bf16.msrb.mxu1 %v7023_v5  ;;  %v6838_v41 = vld [vmem:[%s13736_s5 + $0x190] sm:$0xf] }
 0x3fb   :  { %3049 = vmatpush.bf16.msrb.mxu2 %v6771_v43  ;;  %3062 = vmatpush.bf16.msra.mxu3 %v7027_v44  ;;  %v8477_v5 = vld [vmem:[%s13736_s5 + $0x1ac] sm:$0xf0] }
 0x3fc   :  { %v7094_v43 = vld [vmem:[%s13736_s5 + $0x390] sm:$0xf]  ;;  %v6839_v49 = vor.u32 %v8477_v5, %v6838_v41  ;;  %v8441_v41 = vld [vmem:[%s13736_s5 + $0x94] sm:$0xf] }
 0x3fd   :  { %v8541_v44 = vld [vmem:[%s13736_s5 + $0x3ac] sm:$0xf0]  ;;  %v6712_v5 = vld [vmem:[%s13736_s5 + $0xb0] sm:$0xf0] }
 0x3fe   :  { %3024 = vmatpush.bf16.msra.mxu0 %v6735_v51  ;;  %3037 = vmatpush.bf16.msrb.mxu1 %v6991_v53  ;;  %v7095_v50 = vor.u32 %v8541_v44, %v7094_v43  ;;  %v6806_v51 = vld [vmem:[%s13736_s5 + $0x150] sm:$0xf]  ;;  %v6711_v43 = vor.u32 %v8445_v36, %v6710_v35  ;;  %v6715_v47 = vor.u32 %v8441_v41, %v6712_v5  ;;  %v7102_v36 = vld [vmem:[%s13736_s5 + $0x398] sm:$0xf]  ;;  %v8538_v41 = vld [vmem:[%s13736_s5 + $0x39c] sm:$0xf] }
 0x3ff   :  { %3050 = vmatpush.bf16.msrb.mxu2 %v6739_v57  ;;  %3063 = vmatpush.bf16.msra.mxu3 %v6995_v58  ;;  %v8469_v53 = vld [vmem:[%s13736_s5 + $0x16c] sm:$0xf0]  ;;  %v7104_v5 = vld [vmem:[%s13736_s5 + $0x3b8] sm:$0xf0] }
 0x400   :  { %v7062_v57 = vld [vmem:[%s13736_s5 + $0x350] sm:$0xf]  ;;  %v6807_v52 = vor.u32 %v8469_v53, %v6806_v51  ;;  %v8433_v53 = vld [vmem:[%s13736_s5 + $0x54] sm:$0xf] }
 0x401   :  { %v8533_v58 = vld [vmem:[%s13736_s5 + $0x36c] sm:$0xf0] }
 0x402   :  { %3025 = vmatpush.bf16.msra.mxu0 %v6703_v62  ;;  %3038 = vmatpush.bf16.msrb.mxu1 %v6959_v63  ;;  %v7063_v62 = vor.u32 %v8533_v58, %v7062_v57  ;;  %v8501_v51 = vld [vmem:[%s13736_s5 + $0x26c] sm:$0xf0]  ;;  %v8497_v57 = vld [vmem:[%s13736_s5 + $0x254] sm:$0xf] }
 0x403   :  { %3051 = vmatpush.bf16.msrb.mxu2 %v6707_v1  ;;  %3064 = vmatpush.bf16.msra.mxu3 %v6963_v4  ;;  %v6811_v1 = vor.u32 %v8465_v59, %v6808_v27  ;;  %v7067_v4 = vor.u32 %v8529_v60, %v7064_v61  ;;  %v6936_v58 = vld [vmem:[%s13736_s5 + $0x270] sm:$0xf0]  ;;  %v6646_v27 = vld [vmem:[%s13736_s5 + $0x10] sm:$0xf]  ;;  %v6679_v60 = vor.u32 %v8437_v46, %v6678_v45 }
 0x404   :  { %v7107_v46 = vor.u32 %v8538_v41, %v7104_v5 }
 0x406   :  { %3026 = vmatpush.bf16.msra.mxu0 %v6671_v12  ;;  %3039 = vmatpush.bf16.msrb.mxu1 %v6927_v13  ;;  %v6775_v12 = vor.u32 %v8461_v0, %v6774_v56  ;;  %v7031_v13 = vor.u32 %v8525_v9, %v7030_v8  ;;  %v6939_v0 = vor.u32 %v8497_v57, %v6936_v58  ;;  %v6648_v8 = vld [vmem:[%s13736_s5 + $0x30] sm:$0xf0] }
 0x407   :  { %3052 = vmatpush.bf16.msrb.mxu2 %v6675_v24  ;;  %3065 = vmatpush.bf16.msra.mxu3 %v6931_v2  ;;  %v7035_v24 = vor.u32 %v8521_v11, %v7032_v21  ;;  %v8489_v9 = vld [vmem:[%s13736_s5 + $0x214] sm:$0xf]  ;;  %v8486_v11 = vld [vmem:[%s13736_s5 + $0x1f4] sm:$0xf0] }
 0x408   :  { %v7134_v21 = vld [vmem:[%s13736_s5 + $0x3d8] sm:$0xf] }
 0x409   :  { %v2129_v25 = vpop.f32.mrf.mxu0 }
 0x40a   :  { %3027 = vmatpush.bf16.msra.mxu0 %v6639_v32  ;;  %3040 = vmatpush.bf16.msrb.mxu1 %v6895_v33  ;;  %v2142_v63 = vpop.f32.mrf.mxu1  ;;  %v6743_v32 = vor.u32 %v8453_v19, %v6742_v18  ;;  %v6999_v33 = vor.u32 %v8517_v3, %v6998_v26  ;;  %v6907_v3 = vor.u32 %v8489_v9, %v6904_v10 }
 0x40b   :  { %3053 = vmatpush.bf16.msrb.mxu2 %v6643_v37  ;;  %3066 = vmatpush.bf16.msra.mxu3 %v6899_v38  ;;  %v11151_v7 = vadd.f32 %v2142_v63, %v2129_v25  ;;  %v6747_v37 = vor.u32 %v8449_v15, %v6744_v17  ;;  %v7003_v38 = vor.u32 %v8513_v28, %v7000_v29  ;;  %v8493_v63 = vld [vmem:[%s13736_s5 + $0x22c] sm:$0xf0]  ;;  %v6846_v29 = vld [vmem:[%s13736_s5 + $0x198] sm:$0xf] }
 0x40d   :  { %3028 = vmatmul.bf16.vlgmr.msra.gmra.mxu0 %v10286_v14  ;;  %3041 = vmatmul.bf16.vlgmr.msrb.gmra.mxu1 %v10297_v23 }
 0x40e   :  { %3072 = vmatpush.bf16.msrb.mxu0 %v6871_v39  ;;  %3085 = vmatpush.bf16.msra.mxu1 %v7127_v40  ;;  %v6966_v39 = vld [vmem:[%s13736_s5 + $0x290] sm:$0xf] }
 0x40f   :  { %3098 = vmatpush.bf16.msra.mxu2 %v6875_v6  ;;  %3111 = vmatpush.bf16.msrb.mxu3 %v7131_v42  ;;  %v2155_v2 = vpop.f32.mrf.mxu2  ;;  %v8509_v40 = vld [vmem:[%s13736_s5 + $0x2ac] sm:$0xf0]  ;;  %v8505_v6 = vld [vmem:[%s13736_s5 + $0x294] sm:$0xf] }
 0x410   :  { %3054 = vmatmul.bf16.vlgmr.msrb.gmra.mxu2 %v10286_v14  ;;  %3067 = vmatmul.bf16.vlgmr.msra.gmra.mxu3 %v10297_v23  ;;  %v2168_v16 = vpop.f32.mrf.mxu3  ;;  %v6968_v42 = vld [vmem:[%s13736_s5 + $0x2b0] sm:$0xf0]  ;;  %v6967_v44 = vor.u32 %v8509_v40, %v6966_v39  ;;  %v6848_v40 = vld [vmem:[%s13736_s5 + $0x1b8] sm:$0xf0] }
 0x411   :  { %v11195_v30 = vadd.f32 %v2168_v16, %v2155_v2  ;;  %v2131_v31 = vpop.f32.mrf.mxu0  ;;  %v6971_v48 = vor.u32 %v8505_v6, %v6968_v42  ;;  %v7136_v2 = vld [vmem:[%s13736_s5 + $0x3f8] sm:$0xf0]  ;;  %v6879_v16 = vor.u32 %v8486_v11, %v6878_v20  ;;  %v6750_v11 = vld [vmem:[%s13736_s5 + $0xd8] sm:$0xf] }
 0x412   :  { %3073 = vmatpush.bf16.msrb.mxu0 %v6839_v49  ;;  %3086 = vmatpush.bf16.msra.mxu1 %v7095_v50  ;;  %v2144_v34 = vpop.f32.mrf.mxu1  ;;  %v6934_v50 = vld [vmem:[%s13736_s5 + $0x250] sm:$0xf]  ;;  %v8478_v31 = vld [vmem:[%s13736_s5 + $0x1b4] sm:$0xf0] }
 0x413   :  { %3099 = vmatpush.bf16.msra.mxu2 %v6843_v54  ;;  %3112 = vmatpush.bf16.msrb.mxu3 %v7099_v55  ;;  %v6680_v55 = vld [vmem:[%s13736_s5 + $0x70] sm:$0xf0]  ;;  %v6935_v61 = vor.u32 %v8501_v51, %v6934_v50  ;;  %v6847_v6 = vor.u32 %v8478_v31, %v6846_v29  ;;  %v6816_v50 = vld [vmem:[%s13736_s5 + $0x178] sm:$0xf0]  ;;  %v6974_v31 = vld [vmem:[%s13736_s5 + $0x298] sm:$0xf] }
 0x414   :  { %v6683_v56 = vor.u32 %v8433_v53, %v6680_v55  ;;  %v8530_v51 = vld [vmem:[%s13736_s5 + $0x35c] sm:$0xf] }
 0x415   :  { %v7072_v53 = vld [vmem:[%s13736_s5 + $0x378] sm:$0xf0] }
 0x416   :  { %3074 = vmatpush.bf16.msrb.mxu0 %v6807_v52  ;;  %3087 = vmatpush.bf16.msra.mxu1 %v7063_v62  ;;  %v8429_v52 = vld [vmem:[%s13736_s5 + $0x2c] sm:$0xf0] }
 0x417   :  { %3100 = vmatpush.bf16.msra.mxu2 %v6811_v1  ;;  %3113 = vmatpush.bf16.msrb.mxu3 %v7067_v4  ;;  %v2157_v49 = vpop.f32.mrf.mxu2  ;;  %v6902_v62 = vld [vmem:[%s13736_s5 + $0x210] sm:$0xf]  ;;  %v8425_v4 = vld [vmem:[%s13736_s5 + $0x14] sm:$0xf]  ;;  %v6647_v18 = vor.u32 %v8429_v52, %v6646_v27  ;;  %v8462_v27 = vld [vmem:[%s13736_s5 + $0x134] sm:$0xf0] }
 0x418   :  { %v2170_v54 = vpop.f32.mrf.mxu3  ;;  %v6903_v19 = vor.u32 %v8493_v63, %v6902_v62  ;;  %v6651_v26 = vor.u32 %v8425_v4, %v6648_v8  ;;  %v8466_v49 = vld [vmem:[%s13736_s5 + $0x15c] sm:$0xf]  ;;  %v8526_v52 = vld [vmem:[%s13736_s5 + $0x334] sm:$0xf0] }
 0x419   :  { %v2181_v59 = vpop.f32.mrf.mxu0  ;;  %v8458_v62 = vld [vmem:[%s13736_s5 + $0x11c] sm:$0xf] }
 0x41a   :  { %3075 = vmatpush.bf16.msrb.mxu0 %v6775_v12  ;;  %3088 = vmatpush.bf16.msra.mxu1 %v7031_v13  ;;  %v2194_v25 = vpop.f32.mrf.mxu1  ;;  %v8550_v12 = vld [vmem:[%s13736_s5 + $0x3f4] sm:$0xf0]  ;;  %v8482_v13 = vld [vmem:[%s13736_s5 + $0x1dc] sm:$0xf] }
 0x41b   :  { %3101 = vmatpush.bf16.msra.mxu2 %v6779_v22  ;;  %3114 = vmatpush.bf16.msrb.mxu3 %v7035_v24  ;;  %v11257_v1 = vadd.f32 %v2194_v25, %v2181_v59  ;;  %v6880_v22 = vld [vmem:[%s13736_s5 + $0x1f8] sm:$0xf0]  ;;  %v7135_v17 = vor.u32 %v8550_v12, %v7134_v21  ;;  %v6782_v59 = vld [vmem:[%s13736_s5 + $0x118] sm:$0xf] }
 0x41c   :  { %v8546_v24 = vld [vmem:[%s13736_s5 + $0x3dc] sm:$0xf]  ;;  %v7038_v25 = vld [vmem:[%s13736_s5 + $0x318] sm:$0xf]  ;;  %v6783_v10 = vor.u32 %v8462_v27, %v6782_v59 }
 0x41d   :  { %v6784_v63 = vld [vmem:[%s13736_s5 + $0x138] sm:$0xf0]  ;;  %v7039_v20 = vor.u32 %v8526_v52, %v7038_v25  ;;  %v8454_v21 = vld [vmem:[%s13736_s5 + $0xf4] sm:$0xf0] }
 0x41e   :  { %3076 = vmatpush.bf16.msrb.mxu0 %v6743_v32  ;;  %3089 = vmatpush.bf16.msra.mxu1 %v6999_v33  ;;  %v6883_v32 = vor.u32 %v8482_v13, %v6880_v22  ;;  %v7139_v33 = vor.u32 %v8546_v24, %v7136_v2  ;;  %v6787_v12 = vor.u32 %v8458_v62, %v6784_v63  ;;  %v8450_v22 = vld [vmem:[%s13736_s5 + $0xdc] sm:$0xf]  ;;  %v6910_v59 = vld [vmem:[%s13736_s5 + $0x218] sm:$0xf] }
 0x41f   :  { %3102 = vmatpush.bf16.msra.mxu2 %v6747_v37  ;;  %3115 = vmatpush.bf16.msrb.mxu3 %v7003_v38  ;;  %v2207_v15 = vpop.f32.mrf.mxu2  ;;  %v8542_v37 = vld [vmem:[%s13736_s5 + $0x3b4] sm:$0xf0]  ;;  %v8474_v38 = vld [vmem:[%s13736_s5 + $0x19c] sm:$0xf] }
 0x420   :  { %v2220_v28 = vpop.f32.mrf.mxu3  ;;  %v7103_v42 = vor.u32 %v8542_v37, %v7102_v36  ;;  %v6851_v45 = vor.u32 %v8474_v38, %v6848_v40  ;;  %v6752_v24 = vld [vmem:[%s13736_s5 + $0xf8] sm:$0xf0]  ;;  %v8494_v27 = vld [vmem:[%s13736_s5 + $0x234] sm:$0xf0] }
 0x421   :  { %v11301_v34 = vadd.f32 %v2220_v28, %v2207_v15  ;;  %v2183_v35 = vpop.f32.mrf.mxu0  ;;  %v8514_v2 = vld [vmem:[%s13736_s5 + $0x2dc] sm:$0xf]  ;;  %v6755_v28 = vor.u32 %v8450_v22, %v6752_v24 }
 0x422   :  { %3077 = vmatpush.bf16.msrb.mxu0 %v6711_v43  ;;  %3090 = vmatpush.bf16.msra.mxu1 %v6967_v44  ;;  %v2196_v39 = vpop.f32.mrf.mxu1  ;;  %v6814_v43 = vld [vmem:[%s13736_s5 + $0x158] sm:$0xf]  ;;  %v6720_v37 = vld [vmem:[%s13736_s5 + $0xb8] sm:$0xf0] }
 0x423   :  { %3103 = vmatpush.bf16.msra.mxu2 %v6715_v47  ;;  %3116 = vmatpush.bf16.msrb.mxu3 %v6971_v48  ;;  %v8470_v44 = vld [vmem:[%s13736_s5 + $0x174] sm:$0xf0]  ;;  %v8506_v38 = vld [vmem:[%s13736_s5 + $0x29c] sm:$0xf] }
 0x424   :  { %v7070_v47 = vld [vmem:[%s13736_s5 + $0x358] sm:$0xf]  ;;  %v6815_v55 = vor.u32 %v8470_v44, %v6814_v43  ;;  %v6976_v39 = vld [vmem:[%s13736_s5 + $0x2b8] sm:$0xf0] }
 0x425   :  { %v8534_v48 = vld [vmem:[%s13736_s5 + $0x374] sm:$0xf0]  ;;  %v8426_v25 = vld [vmem:[%s13736_s5 + $0x1c] sm:$0xf] }
 0x426   :  { %3078 = vmatpush.bf16.msrb.mxu0 %v6679_v60  ;;  %3091 = vmatpush.bf16.msra.mxu1 %v6935_v61  ;;  %v7071_v57 = vor.u32 %v8534_v48, %v7070_v47  ;;  %v6819_v60 = vor.u32 %v8466_v49, %v6816_v50  ;;  %v7075_v61 = vor.u32 %v8530_v51, %v7072_v53  ;;  %v6686_v43 = vld [vmem:[%s13736_s5 + $0x58] sm:$0xf]  ;;  %v8434_v49 = vld [vmem:[%s13736_s5 + $0x5c] sm:$0xf] }
 0x427   :  { %3104 = vmatpush.bf16.msra.mxu2 %v6683_v56  ;;  %3117 = vmatpush.bf16.msrb.mxu3 %v6939_v0  ;;  %v2209_v54 = vpop.f32.mrf.mxu2  ;;  %v8522_v56 = vld [vmem:[%s13736_s5 + $0x31c] sm:$0xf]  ;;  %v8438_v44 = vld [vmem:[%s13736_s5 + $0x74] sm:$0xf0] }
 0x428   :  { %v2222_v58 = vpop.f32.mrf.mxu3  ;;  %v7040_v0 = vld [vmem:[%s13736_s5 + $0x338] sm:$0xf0]  ;;  %v6942_v47 = vld [vmem:[%s13736_s5 + $0x258] sm:$0xf] }
 0x429   :  { %v7043_v13 = vor.u32 %v8522_v56, %v7040_v0  ;;  %v8502_v48 = vld [vmem:[%s13736_s5 + $0x274] sm:$0xf0]  ;;  %v6688_v50 = vld [vmem:[%s13736_s5 + $0x78] sm:$0xf0] }
 0x42a   :  { %3079 = vmatpush.bf16.msrb.mxu0 %v6647_v18  ;;  %3092 = vmatpush.bf16.msra.mxu1 %v6903_v19  ;;  %v2233_v4 = vpop.f32.mrf.mxu0  ;;  %v2246_v8 = vpop.f32.mrf.mxu1  ;;  %v7006_v18 = vld [vmem:[%s13736_s5 + $0x2d8] sm:$0xf]  ;;  %v8498_v51 = vld [vmem:[%s13736_s5 + $0x25c] sm:$0xf] }
 0x42b   :  { %3105 = vmatpush.bf16.msra.mxu2 %v6651_v26  ;;  %3118 = vmatpush.bf16.msrb.mxu3 %v6907_v3  ;;  %v11373_v9 = vadd.f32 %v2246_v8, %v2233_v4  ;;  %v8518_v19 = vld [vmem:[%s13736_s5 + $0x2f4] sm:$0xf0]  ;;  %v7008_v26 = vld [vmem:[%s13736_s5 + $0x2f8] sm:$0xf0]  ;;  %v6751_v3 = vor.u32 %v8454_v21, %v6750_v11  ;;  %v7494_v4 = vld [vmem:[%s13736_s5 + $0x9c0] sm:$0xf] }
 0x42c   :  { %v7007_v15 = vor.u32 %v8518_v19, %v7006_v18  ;;  %v7011_v29 = vor.u32 %v8514_v2, %v7008_v26  ;;  %v6944_v53 = vld [vmem:[%s13736_s5 + $0x278] sm:$0xf0]  ;;  %v6654_v54 = vld [vmem:[%s13736_s5 + $0x18] sm:$0xf]  ;;  %v8739_v8 = vld [vmem:[%s13736_s5 + $0x9dc] sm:$0xf0] }
 0x42d   :  { %3080 = vmatmul.bf16.vlgmr.msrb.gmra.mxu0 %v10286_v14  ;;  %3093 = vmatmul.bf16.vlgmr.msra.gmra.mxu1 %v10297_v23  ;;  %v8430_v58 = vld [vmem:[%s13736_s5 + $0x34] sm:$0xf0]  ;;  %v6656_v52 = vld [vmem:[%s13736_s5 + $0x38] sm:$0xf0]  ;;  %v8735_v11 = vld [vmem:[%s13736_s5 + $0x9c4] sm:$0xf]  ;;  %v7495_v2 = vor.u32 %v8739_v8, %v7494_v4 }
 0x42e   :  { %3124 = vmatpush.bf16.msra.mxu0 %v6879_v16  ;;  %3137 = vmatpush.bf16.msrb.mxu1 %v7135_v17  ;;  %v6718_v16 = vld [vmem:[%s13736_s5 + $0x98] sm:$0xf]  ;;  %v8490_v62 = vld [vmem:[%s13736_s5 + $0x21c] sm:$0xf]  ;;  %v6655_v21 = vor.u32 %v8430_v58, %v6654_v54  ;;  %v8799_v18 = vld [vmem:[%s13736_s5 + $0xbc4] sm:$0xf]  ;;  %v6659_v22 = vor.u32 %v8426_v25, %v6656_v52 }
 0x42f   :  { %3150 = vmatpush.bf16.msrb.mxu2 %v6883_v32  ;;  %3163 = vmatpush.bf16.msra.mxu3 %v7139_v33  ;;  %v8446_v17 = vld [vmem:[%s13736_s5 + $0xb4] sm:$0xf0]  ;;  %v8442_v33 = vld [vmem:[%s13736_s5 + $0x9c] sm:$0xf]  ;;  %v7752_v19 = vld [vmem:[%s13736_s5 + $0xbe0] sm:$0xf0] }
 0x430   :  { %3106 = vmatmul.bf16.vlgmr.msra.gmra.mxu2 %v10286_v14  ;;  %3119 = vmatmul.bf16.vlgmr.msrb.gmra.mxu3 %v10297_v23  ;;  %v8510_v32 = vld [vmem:[%s13736_s5 + $0x2b4] sm:$0xf0]  ;;  %v6912_v0 = vld [vmem:[%s13736_s5 + $0x238] sm:$0xf0]  ;;  %v7654_v54 = vld [vmem:[%s13736_s5 + $0xb00] sm:$0xf] }
 0x431   :  { %v6915_v24 = vor.u32 %v8490_v62, %v6912_v0  ;;  %v7400_v58 = vld [vmem:[%s13736_s5 + $0x920] sm:$0xf0]  ;;  %v7622_v8 = vld [vmem:[%s13736_s5 + $0xac0] sm:$0xf] }
 0x432   :  { %3125 = vmatpush.bf16.msra.mxu0 %v6847_v6  ;;  %3138 = vmatpush.bf16.msrb.mxu1 %v7103_v42  ;;  %v2235_v41 = vpop.f32.mrf.mxu0  ;;  %v2248_v5 = vpop.f32.mrf.mxu1  ;;  %v6719_v6 = vor.u32 %v8446_v17, %v6718_v16  ;;  %v6975_v42 = vor.u32 %v8510_v32, %v6974_v31  ;;  %v7755_v17 = vor.u32 %v8799_v18, %v7752_v19  ;;  %v8727_v31 = vld [vmem:[%s13736_s5 + $0x984] sm:$0xf]  ;;  %v7334_v19 = vld [vmem:[%s13736_s5 + $0x880] sm:$0xf] }
 0x433   :  { %3151 = vmatpush.bf16.msrb.mxu2 %v6851_v45  ;;  %3164 = vmatpush.bf16.msra.mxu3 %v7107_v46  ;;  %v2259_v35 = vpop.f32.mrf.mxu2  ;;  %v2272_v36 = vpop.f32.mrf.mxu3  ;;  %v6723_v45 = vor.u32 %v8442_v33, %v6720_v37  ;;  %v6979_v46 = vor.u32 %v8506_v38, %v6976_v39  ;;  %v7464_v32 = vld [vmem:[%s13736_s5 + $0x9a0] sm:$0xf0]  ;;  %v7430_v38 = vld [vmem:[%s13736_s5 + $0x940] sm:$0xf] }
 0x434   :  { %v11423_v40 = vadd.f32 %v2272_v36, %v2259_v35  ;;  %v8791_v33 = vld [vmem:[%s13736_s5 + $0xb84] sm:$0xf]  ;;  %v8723_v39 = vld [vmem:[%s13736_s5 + $0x95c] sm:$0xf0]  ;;  %v7467_v41 = vor.u32 %v8727_v31, %v7464_v32 }
 0x435   :  { %v7720_v35 = vld [vmem:[%s13736_s5 + $0xba0] sm:$0xf0] }
 0x436   :  { %3126 = vmatpush.bf16.msra.mxu0 %v6815_v55  ;;  %3139 = vmatpush.bf16.msrb.mxu1 %v7071_v57  ;;  %v6687_v55 = vor.u32 %v8438_v44, %v6686_v43  ;;  %v6943_v57 = vor.u32 %v8502_v48, %v6942_v47  ;;  %v7723_v5 = vor.u32 %v8791_v33, %v7720_v35  ;;  %v8719_v43 = vld [vmem:[%s13736_s5 + $0x944] sm:$0xf] }
 0x437   :  { %3152 = vmatpush.bf16.msrb.mxu2 %v6819_v60  ;;  %3165 = vmatpush.bf16.msra.mxu3 %v7075_v61  ;;  %v6691_v60 = vor.u32 %v8434_v49, %v6688_v50  ;;  %v6947_v61 = vor.u32 %v8498_v51, %v6944_v53  ;;  %v7432_v44 = vld [vmem:[%s13736_s5 + $0x960] sm:$0xf0]  ;;  %v7431_v47 = vor.u32 %v8723_v39, %v7430_v38  ;;  %v7398_v49 = vld [vmem:[%s13736_s5 + $0x900] sm:$0xf] }
 0x438   :  { %v8715_v50 = vld [vmem:[%s13736_s5 + $0x91c] sm:$0xf0]  ;;  %v7435_v51 = vor.u32 %v8719_v43, %v7432_v44  ;;  %v7592_v31 = vld [vmem:[%s13736_s5 + $0xaa0] sm:$0xf0] }
 0x439   :  { %v7399_v52 = vor.u32 %v8715_v50, %v7398_v49  ;;  %v7302_v38 = vld [vmem:[%s13736_s5 + $0x840] sm:$0xf]  ;;  %v8687_v43 = vld [vmem:[%s13736_s5 + $0x844] sm:$0xf] }
 0x43a   :  { %3127 = vmatpush.bf16.msra.mxu0 %v6783_v10  ;;  %3140 = vmatpush.bf16.msrb.mxu1 %v7039_v20  ;;  %v7750_v10 = vld [vmem:[%s13736_s5 + $0xbc0] sm:$0xf]  ;;  %v7304_v44 = vld [vmem:[%s13736_s5 + $0x860] sm:$0xf0] }
 0x43b   :  { %3153 = vmatpush.bf16.msrb.mxu2 %v6787_v12  ;;  %3166 = vmatpush.bf16.msra.mxu3 %v7043_v13  ;;  %v2261_v63 = vpop.f32.mrf.mxu2  ;;  %v2274_v56 = vpop.f32.mrf.mxu3  ;;  %v8803_v20 = vld [vmem:[%s13736_s5 + $0xbdc] sm:$0xf0]  ;;  %v6911_v12 = vor.u32 %v8494_v27, %v6910_v59  ;;  %v7496_v13 = vld [vmem:[%s13736_s5 + $0x9e0] sm:$0xf0] }
 0x43c   :  { %v7751_v26 = vor.u32 %v8803_v20, %v7750_v10  ;;  %v7499_v16 = vor.u32 %v8735_v11, %v7496_v13  ;;  %v8775_v59 = vld [vmem:[%s13736_s5 + $0xb04] sm:$0xf]  ;;  %v7366_v63 = vld [vmem:[%s13736_s5 + $0x8c0] sm:$0xf] }
 0x43d   :  { %v7656_v27 = vld [vmem:[%s13736_s5 + $0xb20] sm:$0xf0]  ;;  %v8707_v56 = vld [vmem:[%s13736_s5 + $0x8dc] sm:$0xf0] }
 0x43e   :  { %3128 = vmatpush.bf16.msra.mxu0 %v6751_v3  ;;  %3141 = vmatpush.bf16.msrb.mxu1 %v7007_v15  ;;  %v7462_v3 = vld [vmem:[%s13736_s5 + $0x980] sm:$0xf]  ;;  %v7659_v4 = vor.u32 %v8775_v59, %v7656_v27  ;;  %v8703_v20 = vld [vmem:[%s13736_s5 + $0x8c4] sm:$0xf]  ;;  %v7367_v13 = vor.u32 %v8707_v56, %v7366_v63  ;;  %v7758_v63 = vld [vmem:[%s13736_s5 + $0xbc8] sm:$0xf] }
 0x43f   :  { %3154 = vmatpush.bf16.msrb.mxu2 %v6755_v28  ;;  %3167 = vmatpush.bf16.msra.mxu3 %v7011_v29  ;;  %v8731_v15 = vld [vmem:[%s13736_s5 + $0x99c] sm:$0xf0]  ;;  %v7368_v11 = vld [vmem:[%s13736_s5 + $0x8e0] sm:$0xf0]  ;;  %v8804_v56 = vld [vmem:[%s13736_s5 + $0xbe4] sm:$0xf0] }
 0x440   :  { %v7718_v28 = vld [vmem:[%s13736_s5 + $0xb80] sm:$0xf]  ;;  %v7463_v36 = vor.u32 %v8731_v15, %v7462_v3  ;;  %v8695_v15 = vld [vmem:[%s13736_s5 + $0x884] sm:$0xf] }
 0x441   :  { %v8795_v29 = vld [vmem:[%s13736_s5 + $0xb9c] sm:$0xf0]  ;;  %v8743_v59 = vld [vmem:[%s13736_s5 + $0xa04] sm:$0xf] }
 0x442   :  { %3129 = vmatpush.bf16.msra.mxu0 %v6719_v6  ;;  %3142 = vmatpush.bf16.msrb.mxu1 %v6975_v42  ;;  %v7719_v37 = vor.u32 %v8795_v29, %v7718_v28  ;;  %v7686_v6 = vld [vmem:[%s13736_s5 + $0xb40] sm:$0xf]  ;;  %v7336_v28 = vld [vmem:[%s13736_s5 + $0x8a0] sm:$0xf0] }
 0x443   :  { %3155 = vmatpush.bf16.msrb.mxu2 %v6723_v45  ;;  %3168 = vmatpush.bf16.msra.mxu3 %v6979_v46  ;;  %v8787_v42 = vld [vmem:[%s13736_s5 + $0xb5c] sm:$0xf0]  ;;  %v8783_v45 = vld [vmem:[%s13736_s5 + $0xb44] sm:$0xf] }
 0x444   :  { %v7688_v46 = vld [vmem:[%s13736_s5 + $0xb60] sm:$0xf0]  ;;  %v7687_v48 = vor.u32 %v8787_v42, %v7686_v6  ;;  %v8771_v10 = vld [vmem:[%s13736_s5 + $0xadc] sm:$0xf0] }
 0x445   :  { %v7691_v53 = vor.u32 %v8783_v45, %v7688_v46  ;;  %v7623_v18 = vor.u32 %v8771_v10, %v7622_v8  ;;  %v8763_v3 = vld [vmem:[%s13736_s5 + $0xa9c] sm:$0xf0]  ;;  %v8759_v29 = vld [vmem:[%s13736_s5 + $0xa84] sm:$0xf]  ;;  %v7504_v10 = vld [vmem:[%s13736_s5 + $0x9e8] sm:$0xf0] }
 0x446   :  { %3130 = vmatpush.bf16.msra.mxu0 %v6687_v55  ;;  %3143 = vmatpush.bf16.msrb.mxu1 %v6943_v57  ;;  %v8779_v55 = vld [vmem:[%s13736_s5 + $0xb1c] sm:$0xf0]  ;;  %v8711_v57 = vld [vmem:[%s13736_s5 + $0x904] sm:$0xf] }
 0x447   :  { %3156 = vmatpush.bf16.msrb.mxu2 %v6691_v60  ;;  %3169 = vmatpush.bf16.msra.mxu3 %v6947_v61  ;;  %v7655_v62 = vor.u32 %v8779_v55, %v7654_v54  ;;  %v7403_v0 = vor.u32 %v8711_v57, %v7400_v58  ;;  %v8691_v39 = vld [vmem:[%s13736_s5 + $0x85c] sm:$0xf0]  ;;  %v8751_v45 = vld [vmem:[%s13736_s5 + $0xa44] sm:$0xf]  ;;  %v7307_v54 = vor.u32 %v8687_v43, %v7304_v44  ;;  %v8784_v43 = vld [vmem:[%s13736_s5 + $0xb4c] sm:$0xf] }
 0x448   :  { %v7558_v6 = vld [vmem:[%s13736_s5 + $0xa40] sm:$0xf]  ;;  %v7560_v46 = vld [vmem:[%s13736_s5 + $0xa60] sm:$0xf0]  ;;  %v7696_v44 = vld [vmem:[%s13736_s5 + $0xb68] sm:$0xf0] }
 0x449   :  { %v8755_v42 = vld [vmem:[%s13736_s5 + $0xa5c] sm:$0xf0]  ;;  %v7563_v55 = vor.u32 %v8751_v45, %v7560_v46  ;;  %v8679_v57 = vld [vmem:[%s13736_s5 + $0x804] sm:$0xf] }
 0x44a   :  { %3131 = vmatpush.bf16.msra.mxu0 %v6655_v21  ;;  %3144 = vmatpush.bf16.msrb.mxu1 %v6911_v12  ;;  %v2285_v60 = vpop.f32.mrf.mxu0  ;;  %v2298_v61 = vpop.f32.mrf.mxu1  ;;  %v8767_v21 = vld [vmem:[%s13736_s5 + $0xac4] sm:$0xf]  ;;  %v7559_v49 = vor.u32 %v8755_v42, %v7558_v6  ;;  %v8683_v50 = vld [vmem:[%s13736_s5 + $0x81c] sm:$0xf0]  ;;  %v8720_v6 = vld [vmem:[%s13736_s5 + $0x94c] sm:$0xf] }
 0x44b   :  { %3157 = vmatpush.bf16.msrb.mxu2 %v6659_v22  ;;  %3170 = vmatpush.bf16.msra.mxu3 %v6915_v24  ;;  %v11573_v25 = vadd.f32 %v2298_v61, %v2285_v60  ;;  %v7624_v12 = vld [vmem:[%s13736_s5 + $0xae0] sm:$0xf0]  ;;  %v8699_v22 = vld [vmem:[%s13736_s5 + $0x89c] sm:$0xf0]  ;;  %v7371_v24 = vor.u32 %v8703_v20, %v7368_v11  ;;  %v8800_v20 = vld [vmem:[%s13736_s5 + $0xbcc] sm:$0xf] }
 0x44c   :  { %v7272_v58 = vld [vmem:[%s13736_s5 + $0x820] sm:$0xf0]  ;;  %v7760_v11 = vld [vmem:[%s13736_s5 + $0xbe8] sm:$0xf0] }
 0x44d   :  { %3132 = vmatmul.bf16.vlgmr.msra.gmra.mxu0 %v10286_v14  ;;  %3145 = vmatmul.bf16.vlgmr.msrb.gmra.mxu1 %v10297_v23  ;;  %v7528_v61 = vld [vmem:[%s13736_s5 + $0xa20] sm:$0xf0]  ;;  %v7440_v42 = vld [vmem:[%s13736_s5 + $0x968] sm:$0xf0] }
 0x44e   :  { %3949 = vmatpush.bf16.msrb.mxu0 %v7495_v2  ;;  %3962 = vmatpush.bf16.msra.mxu1 %v7751_v26  ;;  %v7627_v2 = vor.u32 %v8767_v21, %v7624_v12  ;;  %v7590_v26 = vld [vmem:[%s13736_s5 + $0xa80] sm:$0xf]  ;;  %v7275_v21 = vor.u32 %v8679_v57, %v7272_v58  ;;  %v7531_v12 = vor.u32 %v8743_v59, %v7528_v61  ;;  %v8776_v57 = vld [vmem:[%s13736_s5 + $0xb0c] sm:$0xf] }
 0x44f   :  { %3975 = vmatpush.bf16.msra.mxu2 %v7499_v16  ;;  %3988 = vmatpush.bf16.msrb.mxu3 %v7755_v17  ;;  %v7664_v58 = vld [vmem:[%s13736_s5 + $0xb28] sm:$0xf0] }
 0x450   :  { %3158 = vmatmul.bf16.vlgmr.msrb.gmra.mxu2 %v10286_v14  ;;  %3171 = vmatmul.bf16.vlgmr.msra.gmra.mxu3 %v10297_v23 }
 0x452   :  { %3950 = vmatpush.bf16.msrb.mxu0 %v7463_v36  ;;  %3963 = vmatpush.bf16.msra.mxu1 %v7719_v37  ;;  %v2287_v33 = vpop.f32.mrf.mxu0  ;;  %v2300_v35 = vpop.f32.mrf.mxu1  ;;  %v7335_v36 = vor.u32 %v8699_v22, %v7334_v19  ;;  %v7591_v37 = vor.u32 %v8763_v3, %v7590_v26  ;;  %v7470_v19 = vld [vmem:[%s13736_s5 + $0x988] sm:$0xf] }
 0x453   :  { %3976 = vmatpush.bf16.msra.mxu2 %v7467_v41  ;;  %3989 = vmatpush.bf16.msrb.mxu3 %v7723_v5  ;;  %v2311_v16 = vpop.f32.mrf.mxu2  ;;  %v2324_v17 = vpop.f32.mrf.mxu3  ;;  %v7339_v41 = vor.u32 %v8695_v15, %v7336_v28  ;;  %v7595_v5 = vor.u32 %v8759_v29, %v7592_v31  ;;  %v8732_v22 = vld [vmem:[%s13736_s5 + $0x9a4] sm:$0xf0]  ;;  %v8728_v15 = vld [vmem:[%s13736_s5 + $0x98c] sm:$0xf]  ;;  %v11722_v29 = vrot.slane %v10286_v14, 2  ;;  %v11725_v31 = vrot.slane %v10297_v23, 2 }
 0x454   :  { %v11623_v32 = vadd.f32 %v2324_v17, %v2311_v16  ;;  %v7726_v26 = vld [vmem:[%s13736_s5 + $0xb88] sm:$0xf]  ;;  %v7472_v16 = vld [vmem:[%s13736_s5 + $0x9a8] sm:$0xf0]  ;;  %v7471_v33 = vor.u32 %v8732_v22, %v7470_v19 }
 0x455   :  { %v8796_v3 = vld [vmem:[%s13736_s5 + $0xba4] sm:$0xf0]  ;;  %v8792_v17 = vld [vmem:[%s13736_s5 + $0xb8c] sm:$0xf] }
 0x456   :  { %3951 = vmatpush.bf16.msrb.mxu0 %v7431_v47  ;;  %3964 = vmatpush.bf16.msra.mxu1 %v7687_v48  ;;  %v7270_v47 = vld [vmem:[%s13736_s5 + $0x800] sm:$0xf]  ;;  %v7303_v48 = vor.u32 %v8691_v39, %v7302_v38  ;;  %v7728_v28 = vld [vmem:[%s13736_s5 + $0xba8] sm:$0xf0]  ;;  %v7727_v35 = vor.u32 %v8796_v3, %v7726_v26  ;;  %v7475_v38 = vor.u32 %v8728_v15, %v7472_v16 }
 0x457   :  { %3977 = vmatpush.bf16.msra.mxu2 %v7435_v51  ;;  %3990 = vmatpush.bf16.msrb.mxu3 %v7691_v53  ;;  %v7526_v51 = vld [vmem:[%s13736_s5 + $0xa00] sm:$0xf]  ;;  %v7731_v39 = vor.u32 %v8792_v17, %v7728_v28  ;;  %v8696_v26 = vld [vmem:[%s13736_s5 + $0x88c] sm:$0xf] }
 0x458   :  { %v8747_v53 = vld [vmem:[%s13736_s5 + $0xa1c] sm:$0xf0]  ;;  %v7344_v16 = vld [vmem:[%s13736_s5 + $0x8a8] sm:$0xf0] }
 0x459   :  { %v7527_v8 = vor.u32 %v8747_v53, %v7526_v51  ;;  %v7662_v51 = vld [vmem:[%s13736_s5 + $0xb08] sm:$0xf]  ;;  %v8760_v17 = vld [vmem:[%s13736_s5 + $0xa8c] sm:$0xf] }
 0x45a   :  { %3952 = vmatpush.bf16.msrb.mxu0 %v7399_v52  ;;  %3965 = vmatpush.bf16.msra.mxu1 %v7655_v62  ;;  %v7502_v52 = vld [vmem:[%s13736_s5 + $0x9c8] sm:$0xf]  ;;  %v7600_v28 = vld [vmem:[%s13736_s5 + $0xaa8] sm:$0xf0] }
 0x45b   :  { %3978 = vmatpush.bf16.msra.mxu2 %v7403_v0  ;;  %3991 = vmatpush.bf16.msrb.mxu3 %v7659_v4  ;;  %v2313_v27 = vpop.f32.mrf.mxu2  ;;  %v2326_v60 = vpop.f32.mrf.mxu3  ;;  %v8740_v62 = vld [vmem:[%s13736_s5 + $0x9e4] sm:$0xf0]  ;;  %v8736_v0 = vld [vmem:[%s13736_s5 + $0x9cc] sm:$0xf]  ;;  %v7271_v4 = vor.u32 %v8683_v50, %v7270_v47  ;;  %v7699_v50 = vor.u32 %v8784_v43, %v7696_v44 }
 0x45c   :  { %v7406_v47 = vld [vmem:[%s13736_s5 + $0x908] sm:$0xf]  ;;  %v8688_v43 = vld [vmem:[%s13736_s5 + $0x84c] sm:$0xf] }
 0x45d   :  { %v8780_v53 = vld [vmem:[%s13736_s5 + $0xb24] sm:$0xf0]  ;;  %v7312_v44 = vld [vmem:[%s13736_s5 + $0x868] sm:$0xf0] }
 0x45e   :  { %3953 = vmatpush.bf16.msrb.mxu0 %v7367_v13  ;;  %3966 = vmatpush.bf16.msra.mxu1 %v7623_v18  ;;  %v7503_v13 = vor.u32 %v8740_v62, %v7502_v52  ;;  %v7759_v18 = vor.u32 %v8804_v56, %v7758_v63  ;;  %v7663_v61 = vor.u32 %v8780_v53, %v7662_v51  ;;  %v7374_v52 = vld [vmem:[%s13736_s5 + $0x8c8] sm:$0xf] }
 0x45f   :  { %3979 = vmatpush.bf16.msra.mxu2 %v7371_v24  ;;  %3992 = vmatpush.bf16.msrb.mxu3 %v7627_v2  ;;  %v7507_v24 = vor.u32 %v8736_v0, %v7504_v10  ;;  %v7763_v2 = vor.u32 %v8800_v20, %v7760_v11  ;;  %v8708_v62 = vld [vmem:[%s13736_s5 + $0x8e4] sm:$0xf0]  ;;  %v7667_v56 = vor.u32 %v8776_v57, %v7664_v58  ;;  %v7376_v10 = vld [vmem:[%s13736_s5 + $0x8e8] sm:$0xf0] }
 0x460   :  { %v7630_v0 = vld [vmem:[%s13736_s5 + $0xac8] sm:$0xf]  ;;  %v8768_v20 = vld [vmem:[%s13736_s5 + $0xacc] sm:$0xf] }
 0x461   :  { %v7632_v11 = vld [vmem:[%s13736_s5 + $0xae8] sm:$0xf0]  ;;  %v7534_v51 = vld [vmem:[%s13736_s5 + $0xa08] sm:$0xf] }
 0x462   :  { %3954 = vmatpush.bf16.msrb.mxu0 %v7335_v36  ;;  %3967 = vmatpush.bf16.msra.mxu1 %v7591_v37  ;;  %v7438_v36 = vld [vmem:[%s13736_s5 + $0x948] sm:$0xf]  ;;  %v7635_v22 = vor.u32 %v8768_v20, %v7632_v11  ;;  %v8680_v57 = vld [vmem:[%s13736_s5 + $0x80c] sm:$0xf]  ;;  %v7512_v11 = vld [vmem:[%s13736_s5 + $0x9f0] sm:$0xf0] }
 0x463   :  { %3980 = vmatpush.bf16.msra.mxu2 %v7339_v41  ;;  %3993 = vmatpush.bf16.msrb.mxu3 %v7595_v5  ;;  %v8724_v37 = vld [vmem:[%s13736_s5 + $0x964] sm:$0xf0]  ;;  %v7280_v58 = vld [vmem:[%s13736_s5 + $0x828] sm:$0xf0] }
 0x464   :  { %v7694_v41 = vld [vmem:[%s13736_s5 + $0xb48] sm:$0xf]  ;;  %v7439_v45 = vor.u32 %v8724_v37, %v7438_v36 }
 0x465   :  { %v8788_v5 = vld [vmem:[%s13736_s5 + $0xb64] sm:$0xf0] }
 0x466   :  { %3955 = vmatpush.bf16.msrb.mxu0 %v7303_v48  ;;  %3968 = vmatpush.bf16.msra.mxu1 %v7559_v49  ;;  %v7695_v46 = vor.u32 %v8788_v5, %v7694_v41  ;;  %v8716_v48 = vld [vmem:[%s13736_s5 + $0x924] sm:$0xf0]  ;;  %v7443_v49 = vor.u32 %v8720_v6, %v7440_v42  ;;  %v7347_v41 = vor.u32 %v8696_v26, %v7344_v16 }
 0x467   :  { %3981 = vmatpush.bf16.msra.mxu2 %v7307_v54  ;;  %3994 = vmatpush.bf16.msrb.mxu3 %v7563_v55  ;;  %v8712_v54 = vld [vmem:[%s13736_s5 + $0x90c] sm:$0xf]  ;;  %v7407_v60 = vor.u32 %v8716_v48, %v7406_v47  ;;  %v7603_v5 = vor.u32 %v8760_v17, %v7600_v28  ;;  %v7566_v6 = vld [vmem:[%s13736_s5 + $0xa48] sm:$0xf]  ;;  %v7734_v17 = vld [vmem:[%s13736_s5 + $0xb90] sm:$0xf] }
 0x468   :  { %v7408_v55 = vld [vmem:[%s13736_s5 + $0x928] sm:$0xf0]  ;;  %v8756_v42 = vld [vmem:[%s13736_s5 + $0xa64] sm:$0xf0]  ;;  %v8797_v28 = vld [vmem:[%s13736_s5 + $0xbac] sm:$0xf0] }
 0x469   :  { %v7411_v63 = vor.u32 %v8712_v54, %v7408_v55  ;;  %v7278_v47 = vld [vmem:[%s13736_s5 + $0x808] sm:$0xf]  ;;  %v7315_v54 = vor.u32 %v8688_v43, %v7312_v44  ;;  %v7702_v43 = vld [vmem:[%s13736_s5 + $0xb50] sm:$0xf] }
 0x46a   :  { %3956 = vmatpush.bf16.msrb.mxu0 %v7271_v4  ;;  %3969 = vmatpush.bf16.msra.mxu1 %v7527_v8  ;;  %v11779_v59 = vpop.f32.mrf.mxu0  ;;  %v11781_v27 = vpop.f32.mrf.mxu1  ;;  %v8772_v4 = vld [vmem:[%s13736_s5 + $0xae4] sm:$0xf0]  ;;  %v8704_v8 = vld [vmem:[%s13736_s5 + $0x8cc] sm:$0xf]  ;;  %v8789_v44 = vld [vmem:[%s13736_s5 + $0xb6c] sm:$0xf0] }
 0x46b   :  { %3982 = vmatpush.bf16.msra.mxu2 %v7275_v21  ;;  %3995 = vmatpush.bf16.msrb.mxu3 %v7531_v12  ;;  %v7375_v21 = vor.u32 %v8708_v62, %v7374_v52  ;;  %v7631_v12 = vor.u32 %v8772_v4, %v7630_v0  ;;  %v7379_v19 = vor.u32 %v8704_v8, %v7376_v10  ;;  %v8748_v53 = vld [vmem:[%s13736_s5 + $0xa24] sm:$0xf0]  ;;  %v7536_v62 = vld [vmem:[%s13736_s5 + $0xa28] sm:$0xf0]  ;;  %v7766_v0 = vld [vmem:[%s13736_s5 + $0xbd0] sm:$0xf] }
 0x46c   :  { %v8805_v4 = vld [vmem:[%s13736_s5 + $0xbec] sm:$0xf0]  ;;  %v8737_v8 = vld [vmem:[%s13736_s5 + $0x9d4] sm:$0xf]  ;;  %v7535_v20 = vor.u32 %v8748_v53, %v7534_v51 }
 0x46d   :  { %3957 = vmatmul.bf16.vlgmr.msrb.gmra.mxu0 %v11722_v29  ;;  %3970 = vmatmul.bf16.vlgmr.msra.gmra.mxu1 %v11725_v31  ;;  %v7515_v26 = vor.u32 %v8737_v8, %v7512_v11  ;;  %v7414_v51 = vld [vmem:[%s13736_s5 + $0x910] sm:$0xf] }
 0x46e   :  { %4001 = vmatpush.bf16.msra.mxu0 %v7503_v13  ;;  %4014 = vmatpush.bf16.msrb.mxu1 %v7759_v18  ;;  %v7342_v13 = vld [vmem:[%s13736_s5 + $0x888] sm:$0xf]  ;;  %v8717_v53 = vld [vmem:[%s13736_s5 + $0x92c] sm:$0xf0] }
 0x46f   :  { %4027 = vmatpush.bf16.msrb.mxu2 %v7507_v24  ;;  %4040 = vmatpush.bf16.msra.mxu3 %v7763_v2  ;;  %v8700_v18 = vld [vmem:[%s13736_s5 + $0x8a4] sm:$0xf0] }
 0x470   :  { %3983 = vmatmul.bf16.vlgmr.msra.gmra.mxu2 %v11722_v29  ;;  %3996 = vmatmul.bf16.vlgmr.msrb.gmra.mxu3 %v11725_v31  ;;  %v7598_v24 = vld [vmem:[%s13736_s5 + $0xa88] sm:$0xf]  ;;  %v7343_v36 = vor.u32 %v8700_v18, %v7342_v13  ;;  %v7283_v13 = vor.u32 %v8680_v57, %v7280_v58  ;;  %v7670_v57 = vld [vmem:[%s13736_s5 + $0xb10] sm:$0xf] }
 0x471   :  { %v8764_v2 = vld [vmem:[%s13736_s5 + $0xaa4] sm:$0xf0]  ;;  %v8781_v58 = vld [vmem:[%s13736_s5 + $0xb2c] sm:$0xf0] }
 0x472   :  { %4002 = vmatpush.bf16.msra.mxu0 %v7471_v33  ;;  %4015 = vmatpush.bf16.msrb.mxu1 %v7727_v35  ;;  %v2979_v33 = vpop.f32.mrf.mxu0  ;;  %v2992_v35 = vpop.f32.mrf.mxu1  ;;  %v7599_v37 = vor.u32 %v8764_v2, %v7598_v24  ;;  %v7478_v24 = vld [vmem:[%s13736_s5 + $0x990] sm:$0xf]  ;;  %v7671_v8 = vor.u32 %v8781_v58, %v7670_v57  ;;  %v8753_v57 = vld [vmem:[%s13736_s5 + $0xa54] sm:$0xf] }
 0x473   :  { %4028 = vmatpush.bf16.msrb.mxu2 %v7475_v38  ;;  %4041 = vmatpush.bf16.msra.mxu3 %v7731_v39  ;;  %v11822_v3 = vpop.f32.mrf.mxu2  ;;  %v11824_v15 = vpop.f32.mrf.mxu3  ;;  %v7310_v38 = vld [vmem:[%s13736_s5 + $0x848] sm:$0xf]  ;;  %v8733_v2 = vld [vmem:[%s13736_s5 + $0x9ac] sm:$0xf0]  ;;  %v8729_v33 = vld [vmem:[%s13736_s5 + $0x994] sm:$0xf] }
 0x474   :  { %v8692_v39 = vld [vmem:[%s13736_s5 + $0x864] sm:$0xf0]  ;;  %v7480_v35 = vld [vmem:[%s13736_s5 + $0x9b0] sm:$0xf0] }
 0x475   :  { %v7311_v48 = vor.u32 %v8692_v39, %v7310_v38  ;;  %v7479_v38 = vor.u32 %v8733_v2, %v7478_v24  ;;  %v7735_v39 = vor.u32 %v8797_v28, %v7734_v17  ;;  %v7640_v24 = vld [vmem:[%s13736_s5 + $0xaf0] sm:$0xf0]  ;;  %v8701_v17 = vld [vmem:[%s13736_s5 + $0x8ac] sm:$0xf0] }
 0x476   :  { %4003 = vmatpush.bf16.msra.mxu0 %v7439_v45  ;;  %4016 = vmatpush.bf16.msrb.mxu1 %v7695_v46  ;;  %v8752_v45 = vld [vmem:[%s13736_s5 + $0xa4c] sm:$0xf]  ;;  %v7576_v58 = vld [vmem:[%s13736_s5 + $0xa70] sm:$0xf0] }
 0x477   :  { %4029 = vmatpush.bf16.msrb.mxu2 %v7443_v49  ;;  %4042 = vmatpush.bf16.msra.mxu3 %v7699_v50  ;;  %v7568_v46 = vld [vmem:[%s13736_s5 + $0xa68] sm:$0xf0]  ;;  %v7567_v49 = vor.u32 %v8756_v42, %v7566_v6  ;;  %v8684_v50 = vld [vmem:[%s13736_s5 + $0x824] sm:$0xf0]  ;;  %v7483_v6 = vor.u32 %v8729_v33, %v7480_v35  ;;  %v7606_v35 = vld [vmem:[%s13736_s5 + $0xa90] sm:$0xf] }
 0x478   :  { %v7571_v55 = vor.u32 %v8752_v45, %v7568_v46  ;;  %v7279_v10 = vor.u32 %v8684_v50, %v7278_v47  ;;  %v8721_v45 = vld [vmem:[%s13736_s5 + $0x954] sm:$0xf]  ;;  %v7703_v50 = vor.u32 %v8789_v44, %v7702_v43 }
 0x479   :  { %v7448_v46 = vld [vmem:[%s13736_s5 + $0x970] sm:$0xf0] }
 0x47a   :  { %4004 = vmatpush.bf16.msra.mxu0 %v7407_v60  ;;  %4017 = vmatpush.bf16.msrb.mxu1 %v7663_v61  ;;  %v8744_v60 = vld [vmem:[%s13736_s5 + $0xa0c] sm:$0xf]  ;;  %v8785_v47 = vld [vmem:[%s13736_s5 + $0xb54] sm:$0xf] }
 0x47b   :  { %4030 = vmatpush.bf16.msrb.mxu2 %v7411_v63  ;;  %4043 = vmatpush.bf16.msra.mxu3 %v7667_v56  ;;  %v3005_v61 = vpop.f32.mrf.mxu2  ;;  %v3018_v52 = vpop.f32.mrf.mxu3  ;;  %v7510_v63 = vld [vmem:[%s13736_s5 + $0x9d0] sm:$0xf]  ;;  %v7539_v18 = vor.u32 %v8744_v60, %v7536_v62  ;;  %v8713_v60 = vld [vmem:[%s13736_s5 + $0x914] sm:$0xf] }
 0x47c   :  { %v8741_v56 = vld [vmem:[%s13736_s5 + $0x9ec] sm:$0xf0]  ;;  %v7416_v61 = vld [vmem:[%s13736_s5 + $0x930] sm:$0xf0] }
 0x47d   :  { %v8777_v52 = vld [vmem:[%s13736_s5 + $0xb14] sm:$0xf]  ;;  %v7419_v11 = vor.u32 %v8713_v60, %v7416_v61  ;;  %v7286_v60 = vld [vmem:[%s13736_s5 + $0x810] sm:$0xf] }
 0x47e   :  { %4005 = vmatpush.bf16.msra.mxu0 %v7375_v21  ;;  %4018 = vmatpush.bf16.msrb.mxu1 %v7631_v12  ;;  %v8801_v21 = vld [vmem:[%s13736_s5 + $0xbd4] sm:$0xf] }
 0x47f   :  { %4031 = vmatpush.bf16.msrb.mxu2 %v7379_v19  ;;  %4044 = vmatpush.bf16.msra.mxu3 %v7635_v22  ;;  %v7768_v12 = vld [vmem:[%s13736_s5 + $0xbf0] sm:$0xf0]  ;;  %v7511_v19 = vor.u32 %v8741_v56, %v7510_v63  ;;  %v7767_v22 = vor.u32 %v8805_v4, %v7766_v0  ;;  %v7415_v4 = vor.u32 %v8717_v53, %v7414_v51  ;;  %v7574_v51 = vld [vmem:[%s13736_s5 + $0xa50] sm:$0xf] }
 0x480   :  { %v7771_v16 = vor.u32 %v8801_v21, %v7768_v12  ;;  %v7672_v62 = vld [vmem:[%s13736_s5 + $0xb30] sm:$0xf0]  ;;  %v7638_v12 = vld [vmem:[%s13736_s5 + $0xad0] sm:$0xf] }
 0x481   :  { %v7675_v21 = vor.u32 %v8777_v52, %v7672_v62  ;;  %v8757_v53 = vld [vmem:[%s13736_s5 + $0xa6c] sm:$0xf0] }
 0x482   :  { %4006 = vmatpush.bf16.msra.mxu0 %v7343_v36  ;;  %4019 = vmatpush.bf16.msrb.mxu1 %v7599_v37  ;;  %v8793_v36 = vld [vmem:[%s13736_s5 + $0xb94] sm:$0xf]  ;;  %v7575_v52 = vor.u32 %v8757_v53, %v7574_v51  ;;  %v8685_v62 = vld [vmem:[%s13736_s5 + $0x82c] sm:$0xf0] }
 0x483   :  { %4032 = vmatpush.bf16.msrb.mxu2 %v7347_v41  ;;  %4045 = vmatpush.bf16.msra.mxu3 %v7603_v5  ;;  %v7736_v37 = vld [vmem:[%s13736_s5 + $0xbb0] sm:$0xf0]  ;;  %v7446_v41 = vld [vmem:[%s13736_s5 + $0x950] sm:$0xf] }
 0x484   :  { %v8725_v5 = vld [vmem:[%s13736_s5 + $0x96c] sm:$0xf0]  ;;  %v7739_v42 = vor.u32 %v8793_v36, %v7736_v37  ;;  %v8697_v37 = vld [vmem:[%s13736_s5 + $0x894] sm:$0xf] }
 0x485   :  { %v8765_v36 = vld [vmem:[%s13736_s5 + $0xaac] sm:$0xf0] }
 0x486   :  { %4007 = vmatpush.bf16.msra.mxu0 %v7311_v48  ;;  %4020 = vmatpush.bf16.msrb.mxu1 %v7567_v49  ;;  %v7704_v48 = vld [vmem:[%s13736_s5 + $0xb70] sm:$0xf0]  ;;  %v7447_v49 = vor.u32 %v8725_v5, %v7446_v41 }
 0x487   :  { %4033 = vmatpush.bf16.msrb.mxu2 %v7315_v54  ;;  %4046 = vmatpush.bf16.msra.mxu3 %v7571_v55  ;;  %v7451_v54 = vor.u32 %v8721_v45, %v7448_v46  ;;  %v7707_v55 = vor.u32 %v8785_v47, %v7704_v48  ;;  %v7352_v41 = vld [vmem:[%s13736_s5 + $0x8b0] sm:$0xf0]  ;;  %v7607_v46 = vor.u32 %v8765_v36, %v7606_v35  ;;  %v7318_v47 = vld [vmem:[%s13736_s5 + $0x850] sm:$0xf] }
 0x488   :  { %v8761_v5 = vld [vmem:[%s13736_s5 + $0xa94] sm:$0xf]  ;;  %v8693_v48 = vld [vmem:[%s13736_s5 + $0x86c] sm:$0xf0] }
 0x489   :  { %v7319_v61 = vor.u32 %v8693_v48, %v7318_v47 }
 0x48a   :  { %4008 = vmatpush.bf16.msra.mxu0 %v7279_v10  ;;  %4021 = vmatpush.bf16.msrb.mxu1 %v7535_v20  ;;  %v3029_v63 = vpop.f32.mrf.mxu0  ;;  %v3042_v56 = vpop.f32.mrf.mxu1  ;;  %v7382_v10 = vld [vmem:[%s13736_s5 + $0x8d0] sm:$0xf] }
 0x48b   :  { %4034 = vmatpush.bf16.msrb.mxu2 %v7283_v13  ;;  %4047 = vmatpush.bf16.msra.mxu3 %v7539_v18  ;;  %v3030_v0 = vadd.f32 %v3029_v63, %v11257_v1  ;;  %v8709_v20 = vld [vmem:[%s13736_s5 + $0x8ec] sm:$0xf0]  ;;  %v8705_v13 = vld [vmem:[%s13736_s5 + $0x8d4] sm:$0xf] }
 0x48c   :  { %v8773_v1 = vld [vmem:[%s13736_s5 + $0xaec] sm:$0xf0]  ;;  %v7383_v2 = vor.u32 %v8709_v20, %v7382_v10  ;;  %v7288_v10 = vld [vmem:[%s13736_s5 + $0x830] sm:$0xf0] }
 0x48d   :  { %4009 = vmatmul.bf16.vlgmr.msra.gmra.mxu0 %v11722_v29  ;;  %4022 = vmatmul.bf16.vlgmr.msrb.gmra.mxu1 %v11725_v31  ;;  %v11999_v18 = vadd.f32 %v3042_v56, %v3030_v0  ;;  %v7542_v63 = vld [vmem:[%s13736_s5 + $0xa10] sm:$0xf]  ;;  %v8745_v20 = vld [vmem:[%s13736_s5 + $0xa14] sm:$0xf] }
 0x48e   :  { %4053 = vmatpush.bf16.msrb.mxu0 %v7511_v19  ;;  %4066 = vmatpush.bf16.msra.mxu1 %v7767_v22  ;;  %v7384_v19 = vld [vmem:[%s13736_s5 + $0x8f0] sm:$0xf0]  ;;  %v8749_v56 = vld [vmem:[%s13736_s5 + $0xa2c] sm:$0xf0] }
 0x48f   :  { %4079 = vmatpush.bf16.msra.mxu2 %v7515_v26  ;;  %4092 = vmatpush.bf16.msrb.mxu3 %v7771_v16  ;;  %v8769_v22 = vld [vmem:[%s13736_s5 + $0xad4] sm:$0xf]  ;;  %v7639_v26 = vor.u32 %v8773_v1, %v7638_v12  ;;  %v7350_v16 = vld [vmem:[%s13736_s5 + $0x890] sm:$0xf]  ;;  %v7387_v28 = vor.u32 %v8705_v13, %v7384_v19  ;;  %v7518_v1 = vld [vmem:[%s13736_s5 + $0x9d8] sm:$0xf] }
 0x490   :  { %4035 = vmatmul.bf16.vlgmr.msrb.gmra.mxu2 %v11722_v29  ;;  %4048 = vmatmul.bf16.vlgmr.msra.gmra.mxu3 %v11725_v31  ;;  %v7643_v33 = vor.u32 %v8769_v22, %v7640_v24  ;;  %v7351_v45 = vor.u32 %v8701_v17, %v7350_v16  ;;  %v7544_v12 = vld [vmem:[%s13736_s5 + $0xa30] sm:$0xf0]  ;;  %v8742_v13 = vld [vmem:[%s13736_s5 + $0x9f4] sm:$0xf0]  ;;  %v8738_v24 = vld [vmem:[%s13736_s5 + $0x9dc] sm:$0xf] }
 0x491   :  { %v7774_v19 = vld [vmem:[%s13736_s5 + $0xbd8] sm:$0xf]  ;;  %v7520_v16 = vld [vmem:[%s13736_s5 + $0x9f8] sm:$0xf0]  ;;  %v7547_v35 = vor.u32 %v8745_v20, %v7544_v12  ;;  %v7519_v36 = vor.u32 %v8742_v13, %v7518_v1 }
 0x492   :  { %4054 = vmatpush.bf16.msrb.mxu0 %v7479_v38  ;;  %4067 = vmatpush.bf16.msra.mxu1 %v7735_v39  ;;  %v3031_v43 = vpop.f32.mrf.mxu0  ;;  %v3044_v44 = vpop.f32.mrf.mxu1  ;;  %v8806_v22 = vld [vmem:[%s13736_s5 + $0xbf4] sm:$0xf0]  ;;  %v8802_v17 = vld [vmem:[%s13736_s5 + $0xbdc] sm:$0xf] }
 0x493   :  { %4080 = vmatpush.bf16.msra.mxu2 %v7483_v6  ;;  %4093 = vmatpush.bf16.msrb.mxu3 %v7739_v42  ;;  %v3055_v38 = vpop.f32.mrf.mxu2  ;;  %v3068_v39 = vpop.f32.mrf.mxu3  ;;  %v7608_v6 = vld [vmem:[%s13736_s5 + $0xab0] sm:$0xf0]  ;;  %v8730_v43 = vld [vmem:[%s13736_s5 + $0x99c] sm:$0xf] }
 0x494   :  { %v3056_v42 = vadd.f32 %v3055_v38, %v11301_v34  ;;  %v7611_v34 = vor.u32 %v8761_v5, %v7608_v6  ;;  %v7486_v38 = vld [vmem:[%s13736_s5 + $0x998] sm:$0xf]  ;;  %v7488_v44 = vld [vmem:[%s13736_s5 + $0x9b8] sm:$0xf0] }
 0x495   :  { %v7742_v6 = vld [vmem:[%s13736_s5 + $0xb98] sm:$0xf]  ;;  %v7491_v51 = vor.u32 %v8730_v43, %v7488_v44  ;;  %v8714_v20 = vld [vmem:[%s13736_s5 + $0x91c] sm:$0xf] }
 0x496   :  { %4055 = vmatpush.bf16.msrb.mxu0 %v7447_v49  ;;  %4068 = vmatpush.bf16.msra.mxu1 %v7703_v50  ;;  %v12041_v49 = vadd.f32 %v3068_v39, %v3056_v42  ;;  %v7355_v50 = vor.u32 %v8697_v37, %v7352_v41  ;;  %v7775_v37 = vor.u32 %v8806_v22, %v7774_v19  ;;  %v8734_v39 = vld [vmem:[%s13736_s5 + $0x9b4] sm:$0xf0]  ;;  %v7680_v12 = vld [vmem:[%s13736_s5 + $0xb38] sm:$0xf0] }
 0x497   :  { %4081 = vmatpush.bf16.msra.mxu2 %v7451_v54  ;;  %4094 = vmatpush.bf16.msrb.mxu3 %v7707_v55  ;;  %v8689_v54 = vld [vmem:[%s13736_s5 + $0x854] sm:$0xf]  ;;  %v7523_v41 = vor.u32 %v8738_v24, %v7520_v16  ;;  %v8798_v42 = vld [vmem:[%s13736_s5 + $0xbb4] sm:$0xf0]  ;;  %v7487_v47 = vor.u32 %v8734_v39, %v7486_v38  ;;  %v7648_v38 = vld [vmem:[%s13736_s5 + $0xaf8] sm:$0xf0] }
 0x498   :  { %v7320_v55 = vld [vmem:[%s13736_s5 + $0x870] sm:$0xf0]  ;;  %v7743_v48 = vor.u32 %v8798_v42, %v7742_v6  ;;  %v8702_v6 = vld [vmem:[%s13736_s5 + $0x8b4] sm:$0xf0] }
 0x499   :  { %v7323_v0 = vor.u32 %v8689_v54, %v7320_v55  ;;  %v7710_v54 = vld [vmem:[%s13736_s5 + $0xb58] sm:$0xf] }
 0x49a   :  { %4056 = vmatpush.bf16.msrb.mxu0 %v7415_v4  ;;  %4069 = vmatpush.bf16.msra.mxu1 %v7671_v8  ;;  %v7579_v4 = vor.u32 %v8753_v57, %v7576_v58  ;;  %v8681_v8 = vld [vmem:[%s13736_s5 + $0x814] sm:$0xf]  ;;  %v8790_v55 = vld [vmem:[%s13736_s5 + $0xb74] sm:$0xf0]  ;;  %v8722_v57 = vld [vmem:[%s13736_s5 + $0x95c] sm:$0xf] }
 0x49b   :  { %4082 = vmatpush.bf16.msra.mxu2 %v7419_v11  ;;  %4095 = vmatpush.bf16.msrb.mxu3 %v7675_v21  ;;  %v3057_v11 = vpop.f32.mrf.mxu2  ;;  %v3070_v21 = vpop.f32.mrf.mxu3  ;;  %v7456_v58 = vld [vmem:[%s13736_s5 + $0x978] sm:$0xf0]  ;;  %v7614_v44 = vld [vmem:[%s13736_s5 + $0xa98] sm:$0xf] }
 0x49c   :  { %v7424_v11 = vld [vmem:[%s13736_s5 + $0x938] sm:$0xf0] }
 0x49d   :  { %v8778_v21 = vld [vmem:[%s13736_s5 + $0xb1c] sm:$0xf]  ;;  %v7427_v16 = vor.u32 %v8714_v20, %v7424_v11  ;;  %v7294_v20 = vld [vmem:[%s13736_s5 + $0x818] sm:$0xf] }
 0x49e   :  { %4057 = vmatpush.bf16.msrb.mxu0 %v7383_v2  ;;  %4070 = vmatpush.bf16.msra.mxu1 %v7639_v26  ;;  %v7287_v2 = vor.u32 %v8685_v62, %v7286_v60  ;;  %v7543_v26 = vor.u32 %v8749_v56, %v7542_v63  ;;  %v8786_v60 = vld [vmem:[%s13736_s5 + $0xb5c] sm:$0xf]  ;;  %v7711_v62 = vor.u32 %v8790_v55, %v7710_v54  ;;  %v7422_v63 = vld [vmem:[%s13736_s5 + $0x918] sm:$0xf] }
 0x49f   :  { %4083 = vmatpush.bf16.msra.mxu2 %v7387_v28  ;;  %4096 = vmatpush.bf16.msrb.mxu3 %v7643_v33  ;;  %v7776_v28 = vld [vmem:[%s13736_s5 + $0xbf8] sm:$0xf0]  ;;  %v7291_v33 = vor.u32 %v8681_v8, %v7288_v10  ;;  %v8718_v56 = vld [vmem:[%s13736_s5 + $0x934] sm:$0xf0] }
 0x4a0   :  { %v7779_v5 = vor.u32 %v8802_v17, %v7776_v28  ;;  %v7678_v8 = vld [vmem:[%s13736_s5 + $0xb18] sm:$0xf]  ;;  %v7423_v22 = vor.u32 %v8718_v56, %v7422_v63  ;;  %v7683_v17 = vor.u32 %v8778_v21, %v7680_v12 }
 0x4a1   :  { %v8782_v10 = vld [vmem:[%s13736_s5 + $0xb34] sm:$0xf0] }
 0x4a2   :  { %4058 = vmatpush.bf16.msrb.mxu0 %v7351_v45  ;;  %4071 = vmatpush.bf16.msra.mxu1 %v7607_v46  ;;  %v8794_v45 = vld [vmem:[%s13736_s5 + $0xb9c] sm:$0xf]  ;;  %v7679_v24 = vor.u32 %v8782_v10, %v7678_v8  ;;  %v7646_v28 = vld [vmem:[%s13736_s5 + $0xad8] sm:$0xf] }
 0x4a3   :  { %4084 = vmatpush.bf16.msra.mxu2 %v7355_v50  ;;  %4097 = vmatpush.bf16.msrb.mxu3 %v7611_v34  ;;  %v7744_v46 = vld [vmem:[%s13736_s5 + $0xbb8] sm:$0xf0]  ;;  %v7454_v50 = vld [vmem:[%s13736_s5 + $0x958] sm:$0xf] }
 0x4a4   :  { %v8726_v34 = vld [vmem:[%s13736_s5 + $0x974] sm:$0xf0]  ;;  %v7747_v53 = vor.u32 %v8794_v45, %v7744_v46  ;;  %v8698_v46 = vld [vmem:[%s13736_s5 + $0x89c] sm:$0xf] }
 0x4a5   :  { %v8766_v45 = vld [vmem:[%s13736_s5 + $0xab4] sm:$0xf0]  ;;  %v8754_v8 = vld [vmem:[%s13736_s5 + $0xa5c] sm:$0xf] }
 0x4a6   :  { %4059 = vmatpush.bf16.msrb.mxu0 %v7319_v61  ;;  %4072 = vmatpush.bf16.msra.mxu1 %v7575_v52  ;;  %v7712_v61 = vld [vmem:[%s13736_s5 + $0xb78] sm:$0xf0]  ;;  %v7455_v52 = vor.u32 %v8726_v34, %v7454_v50  ;;  %v7582_v63 = vld [vmem:[%s13736_s5 + $0xa58] sm:$0xf] }
 0x4a7   :  { %4085 = vmatpush.bf16.msra.mxu2 %v7323_v0  ;;  %4098 = vmatpush.bf16.msrb.mxu3 %v7579_v4  ;;  %v7459_v0 = vor.u32 %v8722_v57, %v7456_v58  ;;  %v7715_v4 = vor.u32 %v8786_v60, %v7712_v61  ;;  %v7360_v50 = vld [vmem:[%s13736_s5 + $0x8b8] sm:$0xf0]  ;;  %v7615_v58 = vor.u32 %v8766_v45, %v7614_v44  ;;  %v7326_v60 = vld [vmem:[%s13736_s5 + $0x858] sm:$0xf] }
 0x4a8   :  { %v8762_v34 = vld [vmem:[%s13736_s5 + $0xa9c] sm:$0xf]  ;;  %v8694_v61 = vld [vmem:[%s13736_s5 + $0x874] sm:$0xf0] }
 0x4a9   :  { %v8758_v56 = vld [vmem:[%s13736_s5 + $0xa74] sm:$0xf0]  ;;  %v7584_v10 = vld [vmem:[%s13736_s5 + $0xa78] sm:$0xf0]  ;;  %v7327_v11 = vor.u32 %v8694_v61, %v7326_v60 }
 0x4aa   :  { %4060 = vmatpush.bf16.msrb.mxu0 %v7287_v2  ;;  %4073 = vmatpush.bf16.msra.mxu1 %v7543_v26  ;;  %v3081_v1 = vpop.f32.mrf.mxu0  ;;  %v3094_v13 = vpop.f32.mrf.mxu1  ;;  %v7390_v2 = vld [vmem:[%s13736_s5 + $0x8d8] sm:$0xf]  ;;  %v7583_v21 = vor.u32 %v8758_v56, %v7582_v63 }
 0x4ab   :  { %4086 = vmatpush.bf16.msra.mxu2 %v7291_v33  ;;  %4099 = vmatpush.bf16.msrb.mxu3 %v7547_v35  ;;  %v3082_v19 = vadd.f32 %v3081_v1, %v11373_v9  ;;  %v8710_v26 = vld [vmem:[%s13736_s5 + $0x8f4] sm:$0xf0]  ;;  %v8706_v33 = vld [vmem:[%s13736_s5 + $0x8dc] sm:$0xf] }
 0x4ac   :  { %v8774_v9 = vld [vmem:[%s13736_s5 + $0xaf4] sm:$0xf0]  ;;  %v7391_v39 = vor.u32 %v8710_v26, %v7390_v2  ;;  %v7296_v2 = vld [vmem:[%s13736_s5 + $0x838] sm:$0xf0] }
 0x4ad   :  { %4061 = vmatmul.bf16.vlgmr.msrb.gmra.mxu0 %v11722_v29  ;;  %4074 = vmatmul.bf16.vlgmr.msra.gmra.mxu1 %v11725_v31  ;;  %v12201_v35 = vadd.f32 %v3094_v13, %v3082_v19  ;;  %v8686_v12 = vld [vmem:[%s13736_s5 + $0x834] sm:$0xf0]  ;;  %v8746_v26 = vld [vmem:[%s13736_s5 + $0xa1c] sm:$0xf] }
 0x4ae   :  { %4105 = vmatpush.bf16.msra.mxu0 %v7519_v36  ;;  %4118 = vmatpush.bf16.msrb.mxu1 %v7775_v37  ;;  %v7392_v36 = vld [vmem:[%s13736_s5 + $0x8f8] sm:$0xf0]  ;;  %v7550_v1 = vld [vmem:[%s13736_s5 + $0xa18] sm:$0xf] }
 0x4af   :  { %4131 = vmatpush.bf16.msrb.mxu2 %v7523_v41  ;;  %4144 = vmatpush.bf16.msra.mxu3 %v7779_v5  ;;  %v8770_v37 = vld [vmem:[%s13736_s5 + $0xadc] sm:$0xf]  ;;  %v7647_v41 = vor.u32 %v8774_v9, %v7646_v28  ;;  %v7358_v5 = vld [vmem:[%s13736_s5 + $0x898] sm:$0xf]  ;;  %v7395_v42 = vor.u32 %v8706_v33, %v7392_v36  ;;  %v8134_v9 = vld [vmem:[%s13736_s5 + $0xdc0] sm:$0xf] }
 0x4b0   :  { %4087 = vmatmul.bf16.vlgmr.msra.gmra.mxu2 %v11722_v29  ;;  %4100 = vmatmul.bf16.vlgmr.msrb.gmra.mxu3 %v11725_v31  ;;  %v7651_v43 = vor.u32 %v8770_v37, %v7648_v38  ;;  %v7359_v57 = vor.u32 %v8702_v6, %v7358_v5  ;;  %v8750_v13 = vld [vmem:[%s13736_s5 + $0xa34] sm:$0xf0]  ;;  %v7552_v28 = vld [vmem:[%s13736_s5 + $0xa38] sm:$0xf0]  ;;  %v8867_v33 = vld [vmem:[%s13736_s5 + $0xddc] sm:$0xf0] }
 0x4b1   :  { %v8390_v36 = vld [vmem:[%s13736_s5 + $0xfc0] sm:$0xf]  ;;  %v8863_v38 = vld [vmem:[%s13736_s5 + $0xdc4] sm:$0xf]  ;;  %v7555_v44 = vor.u32 %v8746_v26, %v7552_v28  ;;  %v8135_v45 = vor.u32 %v8867_v33, %v8134_v9 }
 0x4b2   :  { %4106 = vmatpush.bf16.msra.mxu0 %v7487_v47  ;;  %4119 = vmatpush.bf16.msrb.mxu1 %v7743_v48  ;;  %v3083_v54 = vpop.f32.mrf.mxu0  ;;  %v3096_v55 = vpop.f32.mrf.mxu1  ;;  %v8931_v37 = vld [vmem:[%s13736_s5 + $0xfdc] sm:$0xf0]  ;;  %v8136_v5 = vld [vmem:[%s13736_s5 + $0xde0] sm:$0xf0] }
 0x4b3   :  { %4132 = vmatpush.bf16.msrb.mxu2 %v7491_v51  ;;  %4145 = vmatpush.bf16.msra.mxu3 %v7747_v53  ;;  %v3107_v47 = vpop.f32.mrf.mxu2  ;;  %v3120_v48 = vpop.f32.mrf.mxu3  ;;  %v7616_v51 = vld [vmem:[%s13736_s5 + $0xab8] sm:$0xf0]  ;;  %v8927_v6 = vld [vmem:[%s13736_s5 + $0xfc4] sm:$0xf] }
 0x4b4   :  { %v3108_v53 = vadd.f32 %v3107_v47, %v11423_v40  ;;  %v7619_v40 = vor.u32 %v8762_v34, %v7616_v51  ;;  %v8102_v47 = vld [vmem:[%s13736_s5 + $0xd80] sm:$0xf]  ;;  %v8855_v54 = vld [vmem:[%s13736_s5 + $0xd84] sm:$0xf] }
 0x4b5   :  { %v8358_v51 = vld [vmem:[%s13736_s5 + $0xf80] sm:$0xf]  ;;  %v8104_v55 = vld [vmem:[%s13736_s5 + $0xda0] sm:$0xf0] }
 0x4b6   :  { %4107 = vmatpush.bf16.msra.mxu0 %v7455_v52  ;;  %4120 = vmatpush.bf16.msrb.mxu1 %v7711_v62  ;;  %v12243_v52 = vadd.f32 %v3120_v48, %v3108_v53  ;;  %v7363_v62 = vor.u32 %v8698_v46, %v7360_v50  ;;  %v8391_v46 = vor.u32 %v8931_v37, %v8390_v36  ;;  %v8859_v48 = vld [vmem:[%s13736_s5 + $0xd9c] sm:$0xf0]  ;;  %v8903_v26 = vld [vmem:[%s13736_s5 + $0xf04] sm:$0xf] }
 0x4b7   :  { %4133 = vmatpush.bf16.msrb.mxu2 %v7459_v0  ;;  %4146 = vmatpush.bf16.msra.mxu3 %v7715_v4  ;;  %v8690_v0 = vld [vmem:[%s13736_s5 + $0x85c] sm:$0xf]  ;;  %v8139_v50 = vor.u32 %v8863_v38, %v8136_v5  ;;  %v8923_v53 = vld [vmem:[%s13736_s5 + $0xf9c] sm:$0xf0]  ;;  %v8103_v60 = vor.u32 %v8859_v48, %v8102_v47  ;;  %v8107_v63 = vor.u32 %v8855_v54, %v8104_v55  ;;  %v8823_v55 = vld [vmem:[%s13736_s5 + $0xc84] sm:$0xf] }
 0x4b8   :  { %v7328_v4 = vld [vmem:[%s13736_s5 + $0x878] sm:$0xf0]  ;;  %v8359_v61 = vor.u32 %v8923_v53, %v8358_v51  ;;  %v8006_v37 = vld [vmem:[%s13736_s5 + $0xcc0] sm:$0xf] }
 0x4b9   :  { %v7331_v19 = vor.u32 %v8690_v0, %v7328_v4  ;;  %v8326_v0 = vld [vmem:[%s13736_s5 + $0xf40] sm:$0xf] }
 0x4ba   :  { %4108 = vmatpush.bf16.msra.mxu0 %v7423_v22  ;;  %4121 = vmatpush.bf16.msrb.mxu1 %v7679_v24  ;;  %v7587_v22 = vor.u32 %v8754_v8, %v7584_v10  ;;  %v8682_v24 = vld [vmem:[%s13736_s5 + $0x81c] sm:$0xf]  ;;  %v8915_v4 = vld [vmem:[%s13736_s5 + $0xf5c] sm:$0xf0]  ;;  %v8847_v8 = vld [vmem:[%s13736_s5 + $0xd44] sm:$0xf] }
 0x4bb   :  { %4134 = vmatpush.bf16.msrb.mxu2 %v7427_v16  ;;  %4147 = vmatpush.bf16.msra.mxu3 %v7683_v17  ;;  %v3109_v16 = vpop.f32.mrf.mxu2  ;;  %v3122_v17 = vpop.f32.mrf.mxu3  ;;  %v8072_v10 = vld [vmem:[%s13736_s5 + $0xd60] sm:$0xf0]  ;;  %v8835_v38 = vld [vmem:[%s13736_s5 + $0xcdc] sm:$0xf0] }
 0x4bc   :  { %v8296_v16 = vld [vmem:[%s13736_s5 + $0xf20] sm:$0xf0]  ;;  %v8262_v5 = vld [vmem:[%s13736_s5 + $0xec0] sm:$0xf] }
 0x4bd   :  { %v7974_v48 = vld [vmem:[%s13736_s5 + $0xc80] sm:$0xf] }
 0x4be   :  { %4109 = vmatpush.bf16.msra.mxu0 %v7391_v39  ;;  %4122 = vmatpush.bf16.msrb.mxu1 %v7647_v41  ;;  %v7295_v39 = vor.u32 %v8686_v12, %v7294_v20  ;;  %v7551_v41 = vor.u32 %v8750_v13, %v7550_v1  ;;  %v8911_v20 = vld [vmem:[%s13736_s5 + $0xf44] sm:$0xf]  ;;  %v8327_v12 = vor.u32 %v8915_v4, %v8326_v0  ;;  %v8038_v1 = vld [vmem:[%s13736_s5 + $0xd00] sm:$0xf] }
 0x4bf   :  { %4135 = vmatpush.bf16.msrb.mxu2 %v7395_v42  ;;  %4148 = vmatpush.bf16.msra.mxu3 %v7651_v43  ;;  %v8392_v42 = vld [vmem:[%s13736_s5 + $0xfe0] sm:$0xf0]  ;;  %v7299_v43 = vor.u32 %v8682_v24, %v7296_v2  ;;  %v8843_v13 = vld [vmem:[%s13736_s5 + $0xd1c] sm:$0xf0] }
 0x4c0   :  { %v8395_v34 = vor.u32 %v8927_v6, %v8392_v42  ;;  %v8839_v24 = vld [vmem:[%s13736_s5 + $0xd04] sm:$0xf]  ;;  %v8039_v33 = vor.u32 %v8843_v13, %v8038_v1  ;;  %v8230_v53 = vld [vmem:[%s13736_s5 + $0xe80] sm:$0xf] }
 0x4c1   :  { %v8040_v2 = vld [vmem:[%s13736_s5 + $0xd20] sm:$0xf0]  ;;  %v8891_v54 = vld [vmem:[%s13736_s5 + $0xe9c] sm:$0xf0] }
 0x4c2   :  { %4110 = vmatpush.bf16.msra.mxu0 %v7359_v57  ;;  %4123 = vmatpush.bf16.msrb.mxu1 %v7615_v58  ;;  %v8919_v57 = vld [vmem:[%s13736_s5 + $0xf84] sm:$0xf]  ;;  %v8231_v4 = vor.u32 %v8891_v54, %v8230_v53  ;;  %v8110_v54 = vld [vmem:[%s13736_s5 + $0xd88] sm:$0xf] }
 0x4c3   :  { %4136 = vmatpush.bf16.msrb.mxu2 %v7363_v62  ;;  %4149 = vmatpush.bf16.msra.mxu3 %v7619_v40  ;;  %v8360_v58 = vld [vmem:[%s13736_s5 + $0xfa0] sm:$0xf0]  ;;  %v8070_v62 = vld [vmem:[%s13736_s5 + $0xd40] sm:$0xf] }
 0x4c4   :  { %v8851_v40 = vld [vmem:[%s13736_s5 + $0xd5c] sm:$0xf0]  ;;  %v8363_v56 = vor.u32 %v8919_v57, %v8360_v58  ;;  %v8831_v6 = vld [vmem:[%s13736_s5 + $0xcc4] sm:$0xf] }
 0x4c5   :  { %v8815_v1 = vld [vmem:[%s13736_s5 + $0xc44] sm:$0xf] }
 0x4c6   :  { %4111 = vmatpush.bf16.msra.mxu0 %v7327_v11  ;;  %4124 = vmatpush.bf16.msrb.mxu1 %v7583_v21  ;;  %v8328_v11 = vld [vmem:[%s13736_s5 + $0xf60] sm:$0xf0]  ;;  %v8071_v21 = vor.u32 %v8851_v40, %v8070_v62 }
 0x4c7   :  { %4137 = vmatpush.bf16.msrb.mxu2 %v7331_v19  ;;  %4150 = vmatpush.bf16.msra.mxu3 %v7587_v22  ;;  %v8075_v19 = vor.u32 %v8847_v8, %v8072_v10  ;;  %v8331_v22 = vor.u32 %v8911_v20, %v8328_v11  ;;  %v8232_v62 = vld [vmem:[%s13736_s5 + $0xea0] sm:$0xf0]  ;;  %v7942_v8 = vld [vmem:[%s13736_s5 + $0xc40] sm:$0xf] }
 0x4c8   :  { %v8819_v10 = vld [vmem:[%s13736_s5 + $0xc5c] sm:$0xf0]  ;;  %v7944_v13 = vld [vmem:[%s13736_s5 + $0xc60] sm:$0xf0] }
 0x4ca   :  { %4112 = vmatpush.bf16.msra.mxu0 %v7295_v39  ;;  %4125 = vmatpush.bf16.msrb.mxu1 %v7551_v41  ;;  %v3133_v17 = vpop.f32.mrf.mxu0  ;;  %v3146_v28 = vpop.f32.mrf.mxu1  ;;  %v8043_v39 = vor.u32 %v8839_v24, %v8040_v2  ;;  %v8299_v41 = vor.u32 %v8903_v26, %v8296_v16  ;;  %v8811_v2 = vld [vmem:[%s13736_s5 + $0xc1c] sm:$0xf0] }
 0x4cb   :  { %4138 = vmatpush.bf16.msrb.mxu2 %v7299_v43  ;;  %4151 = vmatpush.bf16.msra.mxu3 %v7555_v44  ;;  %v3134_v9 = vadd.f32 %v3133_v17, %v11573_v25  ;;  %v8899_v25 = vld [vmem:[%s13736_s5 + $0xedc] sm:$0xf0]  ;;  %v8008_v43 = vld [vmem:[%s13736_s5 + $0xce0] sm:$0xf0]  ;;  %v7947_v17 = vor.u32 %v8815_v1, %v7944_v13  ;;  %v8848_v1 = vld [vmem:[%s13736_s5 + $0xd4c] sm:$0xf] }
 0x4cc   :  { %v8895_v44 = vld [vmem:[%s13736_s5 + $0xec4] sm:$0xf]  ;;  %v8263_v47 = vor.u32 %v8899_v25, %v8262_v5  ;;  %v8166_v26 = vld [vmem:[%s13736_s5 + $0xe00] sm:$0xf]  ;;  %v8868_v5 = vld [vmem:[%s13736_s5 + $0xde4] sm:$0xf0] }
 0x4cd   :  { %4113 = vmatmul.bf16.vlgmr.msra.gmra.mxu0 %v11722_v29  ;;  %4126 = vmatmul.bf16.vlgmr.msrb.gmra.mxu1 %v11725_v31  ;;  %v12403_v42 = vadd.f32 %v3146_v28, %v3134_v9  ;;  %v8875_v16 = vld [vmem:[%s13736_s5 + $0xe1c] sm:$0xf0]  ;;  %v8807_v9 = vld [vmem:[%s13736_s5 + $0xc04] sm:$0xf]  ;;  %v8398_v25 = vld [vmem:[%s13736_s5 + $0xfc8] sm:$0xf] }
 0x4ce   :  { %4938 = vmatpush.bf16.msrb.mxu0 %v8135_v45  ;;  %4951 = vmatpush.bf16.msra.mxu1 %v8391_v46  ;;  %v8264_v45 = vld [vmem:[%s13736_s5 + $0xee0] sm:$0xf0]  ;;  %v8007_v46 = vor.u32 %v8835_v38, %v8006_v37  ;;  %v8080_v13 = vld [vmem:[%s13736_s5 + $0xd68] sm:$0xf0] }
 0x4cf   :  { %4964 = vmatpush.bf16.msra.mxu2 %v8139_v50  ;;  %4977 = vmatpush.bf16.msrb.mxu3 %v8395_v34  ;;  %v8827_v50 = vld [vmem:[%s13736_s5 + $0xc9c] sm:$0xf0]  ;;  %v8011_v34 = vor.u32 %v8831_v6, %v8008_v43  ;;  %v8267_v51 = vor.u32 %v8895_v44, %v8264_v45  ;;  %v8932_v6 = vld [vmem:[%s13736_s5 + $0xfe4] sm:$0xf0]  ;;  %v8864_v43 = vld [vmem:[%s13736_s5 + $0xdcc] sm:$0xf]  ;;  %v8167_v45 = vor.u32 %v8875_v16, %v8166_v26 }
 0x4d0   :  { %4139 = vmatmul.bf16.vlgmr.msrb.gmra.mxu2 %v11722_v29  ;;  %4152 = vmatmul.bf16.vlgmr.msra.gmra.mxu3 %v11725_v31  ;;  %v8294_v29 = vld [vmem:[%s13736_s5 + $0xf00] sm:$0xf]  ;;  %v7975_v0 = vor.u32 %v8827_v50, %v7974_v48  ;;  %v8400_v48 = vld [vmem:[%s13736_s5 + $0xfe8] sm:$0xf0]  ;;  %v8399_v53 = vor.u32 %v8932_v6, %v8398_v25  ;;  %v8844_v26 = vld [vmem:[%s13736_s5 + $0xd24] sm:$0xf0]  ;;  %v8083_v16 = vor.u32 %v8848_v1, %v8080_v13 }
 0x4d1   :  { %v8907_v31 = vld [vmem:[%s13736_s5 + $0xf1c] sm:$0xf0]  ;;  %v8014_v6 = vld [vmem:[%s13736_s5 + $0xcc8] sm:$0xf] }
 0x4d2   :  { %4939 = vmatpush.bf16.msrb.mxu0 %v8103_v60  ;;  %4952 = vmatpush.bf16.msra.mxu1 %v8359_v61  ;;  %v8295_v36 = vor.u32 %v8907_v31, %v8294_v29  ;;  %v7976_v60 = vld [vmem:[%s13736_s5 + $0xca0] sm:$0xf0]  ;;  %v7910_v29 = vld [vmem:[%s13736_s5 + $0xc00] sm:$0xf]  ;;  %v7943_v31 = vor.u32 %v8819_v10, %v7942_v8  ;;  %v7950_v1 = vld [vmem:[%s13736_s5 + $0xc48] sm:$0xf] }
 0x4d3   :  { %4965 = vmatpush.bf16.msra.mxu2 %v8107_v63  ;;  %4978 = vmatpush.bf16.msrb.mxu3 %v8363_v56  ;;  %v3159_v57 = vpop.f32.mrf.mxu2  ;;  %v3172_v58 = vpop.f32.mrf.mxu3  ;;  %v8887_v61 = vld [vmem:[%s13736_s5 + $0xe84] sm:$0xf]  ;;  %v7979_v11 = vor.u32 %v8823_v55, %v7976_v60  ;;  %v7911_v44 = vor.u32 %v8811_v2, %v7910_v29  ;;  %v8860_v55 = vld [vmem:[%s13736_s5 + $0xda4] sm:$0xf0]  ;;  %v2978_v29 = vadd.f32 %v11779_v59, %v11151_v7 }
 0x4d4   :  { %v3160_v40 = vadd.f32 %v3159_v57, %v11623_v32  ;;  %v3135_v63 = vpop.f32.mrf.mxu0  ;;  %v3148_v56 = vpop.f32.mrf.mxu1  ;;  %v8235_v32 = vor.u32 %v8887_v61, %v8232_v62  ;;  %v8366_v60 = vld [vmem:[%s13736_s5 + $0xf88] sm:$0xf]  ;;  %v8856_v62 = vld [vmem:[%s13736_s5 + $0xd8c] sm:$0xf]  ;;  %v8111_v8 = vor.u32 %v8860_v55, %v8110_v54 }
 0x4d5   :  { %v8924_v61 = vld [vmem:[%s13736_s5 + $0xfa4] sm:$0xf0]  ;;  %v8920_v63 = vld [vmem:[%s13736_s5 + $0xf8c] sm:$0xf] }
 0x4d6   :  { %4940 = vmatpush.bf16.msrb.mxu0 %v8071_v21  ;;  %4953 = vmatpush.bf16.msra.mxu1 %v8327_v12  ;;  %v12445_v20 = vadd.f32 %v3172_v58, %v3160_v40  ;;  %v8198_v21 = vld [vmem:[%s13736_s5 + $0xe40] sm:$0xf]  ;;  %v8112_v40 = vld [vmem:[%s13736_s5 + $0xda8] sm:$0xf0]  ;;  %v8367_v10 = vor.u32 %v8924_v61, %v8366_v60  ;;  %v8046_v2 = vld [vmem:[%s13736_s5 + $0xd08] sm:$0xf] }
 0x4d7   :  { %4966 = vmatpush.bf16.msra.mxu2 %v8075_v19  ;;  %4979 = vmatpush.bf16.msrb.mxu3 %v8331_v22  ;;  %v8883_v12 = vld [vmem:[%s13736_s5 + $0xe5c] sm:$0xf0]  ;;  %v8879_v19 = vld [vmem:[%s13736_s5 + $0xe44] sm:$0xf]  ;;  %v8368_v56 = vld [vmem:[%s13736_s5 + $0xfa8] sm:$0xf0] }
 0x4d8   :  { %v8200_v22 = vld [vmem:[%s13736_s5 + $0xe60] sm:$0xf0]  ;;  %v8199_v24 = vor.u32 %v8883_v12, %v8198_v21  ;;  %v8115_v21 = vor.u32 %v8856_v62, %v8112_v40  ;;  %v8371_v12 = vor.u32 %v8920_v63, %v8368_v56  ;;  %v8302_v59 = vld [vmem:[%s13736_s5 + $0xf08] sm:$0xf]  ;;  %v8824_v62 = vld [vmem:[%s13736_s5 + $0xc8c] sm:$0xf] }
 0x4d9   :  { %v8203_v28 = vor.u32 %v8879_v19, %v8200_v22  ;;  %v8912_v19 = vld [vmem:[%s13736_s5 + $0xf4c] sm:$0xf]  ;;  %v8820_v13 = vld [vmem:[%s13736_s5 + $0xc64] sm:$0xf0] }
 0x4da   :  { %4941 = vmatpush.bf16.msrb.mxu0 %v8039_v33  ;;  %4954 = vmatpush.bf16.msra.mxu1 %v8295_v36  ;;  %v7912_v33 = vld [vmem:[%s13736_s5 + $0xc20] sm:$0xf0]  ;;  %v8336_v22 = vld [vmem:[%s13736_s5 + $0xf68] sm:$0xf0] }
 0x4db   :  { %4967 = vmatpush.bf16.msra.mxu2 %v8043_v39  ;;  %4980 = vmatpush.bf16.msrb.mxu3 %v8299_v41  ;;  %v8871_v36 = vld [vmem:[%s13736_s5 + $0xe04] sm:$0xf]  ;;  %v3161_v37 = vpop.f32.mrf.mxu2  ;;  %v3174_v38 = vpop.f32.mrf.mxu3  ;;  %v8142_v41 = vld [vmem:[%s13736_s5 + $0xdc8] sm:$0xf]  ;;  %v7915_v50 = vor.u32 %v8807_v9, %v7912_v33  ;;  %v8339_v7 = vor.u32 %v8912_v19, %v8336_v22  ;;  %v8048_v9 = vld [vmem:[%s13736_s5 + $0xd28] sm:$0xf0] }
 0x4dc   :  { %v8168_v39 = vld [vmem:[%s13736_s5 + $0xe20] sm:$0xf0]  ;;  %v8904_v33 = vld [vmem:[%s13736_s5 + $0xf0c] sm:$0xf]  ;;  %v2991_v37 = vadd.f32 %v11781_v27, %v2978_v29  ;;  %v8270_v27 = vld [vmem:[%s13736_s5 + $0xec8] sm:$0xf] }
 0x4dd   :  { %v7984_v56 = vld [vmem:[%s13736_s5 + $0xca8] sm:$0xf0]  ;;  %v8206_v29 = vld [vmem:[%s13736_s5 + $0xe48] sm:$0xf] }
 0x4de   :  { %4942 = vmatpush.bf16.msrb.mxu0 %v8007_v46  ;;  %4955 = vmatpush.bf16.msra.mxu1 %v8263_v47  ;;  %v8144_v46 = vld [vmem:[%s13736_s5 + $0xde8] sm:$0xf0] }
 0x4df   :  { %4968 = vmatpush.bf16.msra.mxu2 %v8011_v34  ;;  %4981 = vmatpush.bf16.msrb.mxu3 %v8267_v51  ;;  %v8928_v47 = vld [vmem:[%s13736_s5 + $0xfcc] sm:$0xf]  ;;  %v8171_v34 = vor.u32 %v8871_v36, %v8168_v39  ;;  %v8143_v51 = vor.u32 %v8868_v5, %v8142_v41  ;;  %v8147_v57 = vor.u32 %v8864_v43, %v8144_v46  ;;  %v8836_v43 = vld [vmem:[%s13736_s5 + $0xce4] sm:$0xf0] }
 0x4e0   :  { %v8403_v58 = vor.u32 %v8928_v47, %v8400_v48  ;;  %v8304_v36 = vld [vmem:[%s13736_s5 + $0xf28] sm:$0xf0]  ;;  %v8047_v5 = vor.u32 %v8844_v26, %v8046_v2  ;;  %v8900_v46 = vld [vmem:[%s13736_s5 + $0xee4] sm:$0xf0]  ;;  %v8015_v54 = vor.u32 %v8836_v43, %v8014_v6  ;;  %v8150_v43 = vld [vmem:[%s13736_s5 + $0xdd0] sm:$0xf] }
 0x4e1   :  { %v8832_v47 = vld [vmem:[%s13736_s5 + $0xccc] sm:$0xf]  ;;  %v8271_v55 = vor.u32 %v8900_v46, %v8270_v27  ;;  %v8933_v27 = vld [vmem:[%s13736_s5 + $0xfec] sm:$0xf0]  ;;  %v8865_v46 = vld [vmem:[%s13736_s5 + $0xdd4] sm:$0xf] }
 0x4e2   :  { %4943 = vmatpush.bf16.msrb.mxu0 %v7975_v0  ;;  %4956 = vmatpush.bf16.msra.mxu1 %v8231_v4  ;;  %v12538_v0 = vrot.slane %v10286_v14, 3  ;;  %v12541_v4 = vrot.slane %v10297_v23, 3  ;;  %v8334_v14 = vld [vmem:[%s13736_s5 + $0xf48] sm:$0xf]  ;;  %v7952_v2 = vld [vmem:[%s13736_s5 + $0xc68] sm:$0xf0] }
 0x4e3   :  { %4969 = vmatpush.bf16.msra.mxu2 %v7979_v11  ;;  %4982 = vmatpush.bf16.msrb.mxu3 %v8235_v32  ;;  %v8078_v11 = vld [vmem:[%s13736_s5 + $0xd48] sm:$0xf]  ;;  %v8880_v26 = vld [vmem:[%s13736_s5 + $0xe4c] sm:$0xf] }
 0x4e4   :  { %v8852_v32 = vld [vmem:[%s13736_s5 + $0xd64] sm:$0xf0]  ;;  %v8176_v6 = vld [vmem:[%s13736_s5 + $0xe28] sm:$0xf0] }
 0x4e5   :  { %v8916_v23 = vld [vmem:[%s13736_s5 + $0xf64] sm:$0xf0] }
 0x4e6   :  { %4944 = vmatpush.bf16.msrb.mxu0 %v7943_v31  ;;  %4957 = vmatpush.bf16.msra.mxu1 %v8199_v24  ;;  %v8079_v31 = vor.u32 %v8852_v32, %v8078_v11  ;;  %v8335_v24 = vor.u32 %v8916_v23, %v8334_v14 }
 0x4e7   :  { %4970 = vmatpush.bf16.msra.mxu2 %v7947_v17  ;;  %4983 = vmatpush.bf16.msrb.mxu3 %v8203_v28  ;;  %v8908_v17 = vld [vmem:[%s13736_s5 + $0xf24] sm:$0xf0]  ;;  %v8840_v28 = vld [vmem:[%s13736_s5 + $0xd0c] sm:$0xf] }
 0x4e8   :  { %v8303_v25 = vor.u32 %v8908_v17, %v8302_v59  ;;  %v7951_v59 = vor.u32 %v8820_v13, %v7950_v1  ;;  %v8342_v1 = vld [vmem:[%s13736_s5 + $0xf50] sm:$0xf] }
 0x4e9   :  { %v8917_v13 = vld [vmem:[%s13736_s5 + $0xf6c] sm:$0xf0] }
 0x4ea   :  { %4945 = vmatpush.bf16.msrb.mxu0 %v7911_v44  ;;  %4958 = vmatpush.bf16.msra.mxu1 %v8167_v45  ;;  %v3958_v38 = vpop.f32.mrf.mxu0  ;;  %v3971_v39 = vpop.f32.mrf.mxu1  ;;  %v8051_v44 = vor.u32 %v8840_v28, %v8048_v9  ;;  %v8307_v45 = vor.u32 %v8904_v33, %v8304_v36  ;;  %v8812_v28 = vld [vmem:[%s13736_s5 + $0xc24] sm:$0xf0] }
 0x4eb   :  { %4971 = vmatpush.bf16.msra.mxu2 %v7915_v50  ;;  %4984 = vmatpush.bf16.msrb.mxu3 %v8171_v34  ;;  %v3972_v41 = vadd.f32 %v3971_v39, %v3958_v38  ;;  %v8016_v50 = vld [vmem:[%s13736_s5 + $0xce8] sm:$0xf0]  ;;  %v8174_v9 = vld [vmem:[%s13736_s5 + $0xe08] sm:$0xf] }
 0x4ec   :  { %v8896_v34 = vld [vmem:[%s13736_s5 + $0xecc] sm:$0xf]  ;;  %v8019_v60 = vor.u32 %v8832_v47, %v8016_v50  ;;  %v8876_v33 = vld [vmem:[%s13736_s5 + $0xe24] sm:$0xf0] }
 0x4ed   :  { %4946 = vmatmul.bf16.vlgmr.msrb.gmra.mxu0 %v12538_v0  ;;  %4959 = vmatmul.bf16.vlgmr.msra.gmra.mxu1 %v12541_v4  ;;  %v12613_v48 = vadd.f32 %v3972_v41, %v2991_v37  ;;  %v8808_v38 = vld [vmem:[%s13736_s5 + $0xc0c] sm:$0xf]  ;;  %v8175_v50 = vor.u32 %v8876_v33, %v8174_v9  ;;  %v8841_v9 = vld [vmem:[%s13736_s5 + $0xd14] sm:$0xf] }
 0x4ee   :  { %4990 = vmatpush.bf16.msra.mxu0 %v8143_v51  ;;  %5003 = vmatpush.bf16.msrb.mxu1 %v8399_v53  ;;  %v8272_v51 = vld [vmem:[%s13736_s5 + $0xee8] sm:$0xf0]  ;;  %v3004_v53 = vadd.f32 %v11822_v3, %v11195_v30  ;;  %v8238_v30 = vld [vmem:[%s13736_s5 + $0xe88] sm:$0xf]  ;;  %v8056_v33 = vld [vmem:[%s13736_s5 + $0xd30] sm:$0xf0] }
 0x4ef   :  { %5016 = vmatpush.bf16.msrb.mxu2 %v8147_v57  ;;  %5029 = vmatpush.bf16.msra.mxu3 %v8403_v58  ;;  %v7982_v57 = vld [vmem:[%s13736_s5 + $0xc88] sm:$0xf]  ;;  %v8275_v61 = vor.u32 %v8896_v34, %v8272_v51  ;;  %v7920_v39 = vld [vmem:[%s13736_s5 + $0xc28] sm:$0xf0]  ;;  %v8152_v34 = vld [vmem:[%s13736_s5 + $0xdf0] sm:$0xf0] }
 0x4f0   :  { %4972 = vmatmul.bf16.vlgmr.msra.gmra.mxu2 %v12538_v0  ;;  %4985 = vmatmul.bf16.vlgmr.msrb.gmra.mxu3 %v12541_v4  ;;  %v8828_v58 = vld [vmem:[%s13736_s5 + $0xca4] sm:$0xf0]  ;;  %v3017_v11 = vadd.f32 %v11824_v15, %v3004_v53  ;;  %v7987_v15 = vor.u32 %v8824_v62, %v7984_v56  ;;  %v8872_v41 = vld [vmem:[%s13736_s5 + $0xe0c] sm:$0xf]  ;;  %v8929_v51 = vld [vmem:[%s13736_s5 + $0xfd4] sm:$0xf] }
 0x4f1   :  { %v8892_v3 = vld [vmem:[%s13736_s5 + $0xea4] sm:$0xf0]  ;;  %v7983_v14 = vor.u32 %v8828_v58, %v7982_v57  ;;  %v8408_v53 = vld [vmem:[%s13736_s5 + $0xff0] sm:$0xf0]  ;;  %v8374_v62 = vld [vmem:[%s13736_s5 + $0xf90] sm:$0xf] }
 0x4f2   :  { %4991 = vmatpush.bf16.msra.mxu0 %v8111_v8  ;;  %5004 = vmatpush.bf16.msrb.mxu1 %v8367_v10  ;;  %v8888_v8 = vld [vmem:[%s13736_s5 + $0xe8c] sm:$0xf]  ;;  %v8239_v23 = vor.u32 %v8892_v3, %v8238_v30  ;;  %v8155_v30 = vor.u32 %v8865_v46, %v8152_v34  ;;  %v8411_v3 = vor.u32 %v8929_v51, %v8408_v53  ;;  %v8120_v56 = vld [vmem:[%s13736_s5 + $0xdb0] sm:$0xf0]  ;;  %v8901_v46 = vld [vmem:[%s13736_s5 + $0xeec] sm:$0xf0] }
 0x4f3   :  { %5017 = vmatpush.bf16.msrb.mxu2 %v8115_v21  ;;  %5030 = vmatpush.bf16.msra.mxu3 %v8371_v12  ;;  %v3984_v40 = vpop.f32.mrf.mxu2  ;;  %v3997_v63 = vpop.f32.mrf.mxu3  ;;  %v8240_v10 = vld [vmem:[%s13736_s5 + $0xea8] sm:$0xf0]  ;;  %v8024_v34 = vld [vmem:[%s13736_s5 + $0xcf0] sm:$0xf0] }
 0x4f4   :  { %v3998_v32 = vadd.f32 %v3997_v63, %v3984_v40  ;;  %v3960_v21 = vpop.f32.mrf.mxu0  ;;  %v3973_v12 = vpop.f32.mrf.mxu1  ;;  %v8243_v22 = vor.u32 %v8888_v8, %v8240_v10  ;;  %v8925_v40 = vld [vmem:[%s13736_s5 + $0xfac] sm:$0xf0]  ;;  %v8857_v63 = vld [vmem:[%s13736_s5 + $0xd94] sm:$0xf] }
 0x4f5   :  { %v8921_v8 = vld [vmem:[%s13736_s5 + $0xf94] sm:$0xf]  ;;  %v8086_v21 = vld [vmem:[%s13736_s5 + $0xd50] sm:$0xf] }
 0x4f6   :  { %4992 = vmatpush.bf16.msra.mxu0 %v8079_v31  ;;  %5005 = vmatpush.bf16.msrb.mxu1 %v8335_v24  ;;  %v12657_v19 = vadd.f32 %v3998_v32, %v3017_v11  ;;  %v8884_v31 = vld [vmem:[%s13736_s5 + $0xe64] sm:$0xf0]  ;;  %v8816_v24 = vld [vmem:[%s13736_s5 + $0xc4c] sm:$0xf]  ;;  %v8376_v10 = vld [vmem:[%s13736_s5 + $0xfb0] sm:$0xf0]  ;;  %v8375_v32 = vor.u32 %v8925_v40, %v8374_v62 }
 0x4f7   :  { %5018 = vmatpush.bf16.msrb.mxu2 %v8083_v16  ;;  %5031 = vmatpush.bf16.msra.mxu3 %v8339_v7  ;;  %v8208_v16 = vld [vmem:[%s13736_s5 + $0xe68] sm:$0xf0]  ;;  %v7918_v7 = vld [vmem:[%s13736_s5 + $0xc08] sm:$0xf]  ;;  %v8207_v17 = vor.u32 %v8884_v31, %v8206_v29  ;;  %v7955_v36 = vor.u32 %v8816_v24, %v7952_v2  ;;  %v8853_v12 = vld [vmem:[%s13736_s5 + $0xd6c] sm:$0xf0]  ;;  %v8343_v2 = vor.u32 %v8917_v13, %v8342_v1 }
 0x4f8   :  { %v8211_v37 = vor.u32 %v8880_v26, %v8208_v16  ;;  %v7919_v47 = vor.u32 %v8812_v28, %v7918_v7  ;;  %v8913_v29 = vld [vmem:[%s13736_s5 + $0xf54] sm:$0xf]  ;;  %v8087_v24 = vor.u32 %v8853_v12, %v8086_v21  ;;  %v8054_v26 = vld [vmem:[%s13736_s5 + $0xd10] sm:$0xf] }
 0x4f9   :  { %v8344_v31 = vld [vmem:[%s13736_s5 + $0xf70] sm:$0xf0]  ;;  %v8845_v16 = vld [vmem:[%s13736_s5 + $0xd2c] sm:$0xf0] }
 0x4fa   :  { %4993 = vmatpush.bf16.msra.mxu0 %v8047_v5  ;;  %5006 = vmatpush.bf16.msrb.mxu1 %v8303_v25  ;;  %v8909_v28 = vld [vmem:[%s13736_s5 + $0xf2c] sm:$0xf0]  ;;  %v8897_v51 = vld [vmem:[%s13736_s5 + $0xed4] sm:$0xf] }
 0x4fb   :  { %5019 = vmatpush.bf16.msrb.mxu2 %v8051_v44  ;;  %5032 = vmatpush.bf16.msra.mxu3 %v8307_v45  ;;  %v3986_v5 = vpop.f32.mrf.mxu2  ;;  %v3999_v25 = vpop.f32.mrf.mxu3  ;;  %v8869_v44 = vld [vmem:[%s13736_s5 + $0xdec] sm:$0xf0]  ;;  %v8280_v53 = vld [vmem:[%s13736_s5 + $0xef0] sm:$0xf0] }
 0x4fc   :  { %v8406_v45 = vld [vmem:[%s13736_s5 + $0xfd0] sm:$0xf]  ;;  %v8151_v57 = vor.u32 %v8869_v44, %v8150_v43  ;;  %v8055_v5 = vor.u32 %v8845_v16, %v8054_v26  ;;  %v8059_v44 = vor.u32 %v8841_v9, %v8056_v33 }
 0x4fd   :  { %v8407_v58 = vor.u32 %v8933_v27, %v8406_v45  ;;  %v8837_v43 = vld [vmem:[%s13736_s5 + $0xcec] sm:$0xf0] }
 0x4fe   :  { %4994 = vmatpush.bf16.msra.mxu0 %v8015_v54  ;;  %5007 = vmatpush.bf16.msrb.mxu1 %v8271_v55  ;;  %v7923_v54 = vor.u32 %v8808_v38, %v7920_v39  ;;  %v8179_v55 = vor.u32 %v8872_v41, %v8176_v6  ;;  %v8022_v6 = vld [vmem:[%s13736_s5 + $0xcd0] sm:$0xf] }
 0x4ff   :  { %5020 = vmatpush.bf16.msrb.mxu2 %v8019_v60  ;;  %5033 = vmatpush.bf16.msra.mxu3 %v8275_v61  ;;  %v8118_v60 = vld [vmem:[%s13736_s5 + $0xd90] sm:$0xf] }
 0x500   :  { %v8861_v61 = vld [vmem:[%s13736_s5 + $0xdac] sm:$0xf0] }
 0x501   :  { %v8119_v11 = vor.u32 %v8861_v61, %v8118_v60  ;;  %v8278_v27 = vld [vmem:[%s13736_s5 + $0xed0] sm:$0xf]  ;;  %v8283_v60 = vor.u32 %v8897_v51, %v8280_v53  ;;  %v8416_v51 = vld [vmem:[%s13736_s5 + $0xff8] sm:$0xf0] }
 0x502   :  { %4995 = vmatpush.bf16.msra.mxu0 %v7983_v14  ;;  %5008 = vmatpush.bf16.msrb.mxu1 %v8239_v23  ;;  %v8123_v14 = vor.u32 %v8857_v63, %v8120_v56  ;;  %v8379_v23 = vor.u32 %v8921_v8, %v8376_v10  ;;  %v8246_v61 = vld [vmem:[%s13736_s5 + $0xe90] sm:$0xf]  ;;  %v7992_v63 = vld [vmem:[%s13736_s5 + $0xcb0] sm:$0xf0] }
 0x503   :  { %5021 = vmatpush.bf16.msrb.mxu2 %v7987_v15  ;;  %5034 = vmatpush.bf16.msra.mxu3 %v8243_v22  ;;  %v8849_v15 = vld [vmem:[%s13736_s5 + $0xd54] sm:$0xf]  ;;  %v7926_v26 = vld [vmem:[%s13736_s5 + $0xc10] sm:$0xf] }
 0x504   :  { %v8088_v22 = vld [vmem:[%s13736_s5 + $0xd70] sm:$0xf0] }
 0x505   :  { %v8091_v7 = vor.u32 %v8849_v15, %v8088_v22  ;;  %v8889_v56 = vld [vmem:[%s13736_s5 + $0xe94] sm:$0xf]  ;;  %v8214_v22 = vld [vmem:[%s13736_s5 + $0xe50] sm:$0xf] }
 0x506   :  { %4996 = vmatpush.bf16.msra.mxu0 %v7951_v59  ;;  %5009 = vmatpush.bf16.msrb.mxu1 %v8207_v17  ;;  %v8347_v59 = vor.u32 %v8913_v29, %v8344_v31  ;;  %v8310_v17 = vld [vmem:[%s13736_s5 + $0xf10] sm:$0xf]  ;;  %v8248_v8 = vld [vmem:[%s13736_s5 + $0xeb0] sm:$0xf0] }
 0x507   :  { %5022 = vmatpush.bf16.msrb.mxu2 %v7955_v36  ;;  %5035 = vmatpush.bf16.msra.mxu3 %v8211_v37  ;;  %v8905_v36 = vld [vmem:[%s13736_s5 + $0xf14] sm:$0xf]  ;;  %v8311_v25 = vor.u32 %v8909_v28, %v8310_v17  ;;  %v8251_v15 = vor.u32 %v8889_v56, %v8248_v8  ;;  %v8885_v29 = vld [vmem:[%s13736_s5 + $0xe6c] sm:$0xf0]  ;;  %v8384_v56 = vld [vmem:[%s13736_s5 + $0xfb8] sm:$0xf0] }
 0x508   :  { %v8312_v37 = vld [vmem:[%s13736_s5 + $0xf30] sm:$0xf0]  ;;  %v8182_v17 = vld [vmem:[%s13736_s5 + $0xe10] sm:$0xf] }
 0x509   :  { %v8315_v45 = vor.u32 %v8905_v36, %v8312_v37  ;;  %v8817_v31 = vld [vmem:[%s13736_s5 + $0xc54] sm:$0xf]  ;;  %v8877_v28 = vld [vmem:[%s13736_s5 + $0xe2c] sm:$0xf0] }
 0x50a   :  { %4997 = vmatpush.bf16.msra.mxu0 %v7919_v47  ;;  %5010 = vmatpush.bf16.msrb.mxu1 %v8175_v50  ;;  %v4010_v38 = vpop.f32.mrf.mxu0  ;;  %v4023_v39 = vpop.f32.mrf.mxu1  ;;  %v8833_v47 = vld [vmem:[%s13736_s5 + $0xcd4] sm:$0xf] }
 0x50b   :  { %5023 = vmatpush.bf16.msrb.mxu2 %v7923_v54  ;;  %5036 = vmatpush.bf16.msra.mxu3 %v8179_v55  ;;  %v4024_v41 = vadd.f32 %v4023_v39, %v4010_v38  ;;  %v8023_v54 = vor.u32 %v8837_v43, %v8022_v6  ;;  %v8279_v55 = vor.u32 %v8901_v46, %v8278_v27  ;;  %v8809_v36 = vld [vmem:[%s13736_s5 + $0xc14] sm:$0xf]  ;;  %v8870_v6 = vld [vmem:[%s13736_s5 + $0xdf4] sm:$0xf0] }
 0x50c   :  { %v7928_v37 = vld [vmem:[%s13736_s5 + $0xc30] sm:$0xf0]  ;;  %v8414_v43 = vld [vmem:[%s13736_s5 + $0xfd8] sm:$0xf]  ;;  %v8183_v46 = vor.u32 %v8877_v28, %v8182_v17  ;;  %v8842_v17 = vld [vmem:[%s13736_s5 + $0xd1c] sm:$0xf] }
 0x50d   :  { %4998 = vmatmul.bf16.vlgmr.msra.gmra.mxu0 %v12538_v0  ;;  %5011 = vmatmul.bf16.vlgmr.msrb.gmra.mxu1 %v12541_v4  ;;  %v12817_v50 = vadd.f32 %v4024_v41, %v11999_v18  ;;  %v7990_v18 = vld [vmem:[%s13736_s5 + $0xc90] sm:$0xf]  ;;  %v8873_v38 = vld [vmem:[%s13736_s5 + $0xe14] sm:$0xf]  ;;  %v7931_v53 = vor.u32 %v8809_v36, %v7928_v37  ;;  %v8064_v28 = vld [vmem:[%s13736_s5 + $0xd38] sm:$0xf0] }
 0x50e   :  { %5042 = vmatpush.bf16.msrb.mxu0 %v8151_v57  ;;  %5055 = vmatpush.bf16.msra.mxu1 %v8407_v58  ;;  %v8829_v57 = vld [vmem:[%s13736_s5 + $0xcac] sm:$0xf0]  ;;  %v8027_v58 = vor.u32 %v8833_v47, %v8024_v34  ;;  %v8160_v47 = vld [vmem:[%s13736_s5 + $0xdf8] sm:$0xf0] }
 0x50f   :  { %5068 = vmatpush.bf16.msra.mxu2 %v8155_v30  ;;  %5081 = vmatpush.bf16.msrb.mxu3 %v8411_v3  ;;  %v8893_v30 = vld [vmem:[%s13736_s5 + $0xeac] sm:$0xf0]  ;;  %v8825_v3 = vld [vmem:[%s13736_s5 + $0xc94] sm:$0xf]  ;;  %v7991_v21 = vor.u32 %v8829_v57, %v7990_v18  ;;  %v8930_v34 = vld [vmem:[%s13736_s5 + $0xfdc] sm:$0xf] }
 0x510   :  { %5024 = vmatmul.bf16.vlgmr.msrb.gmra.mxu2 %v12538_v0  ;;  %5037 = vmatmul.bf16.vlgmr.msra.gmra.mxu3 %v12541_v4  ;;  %v8247_v12 = vor.u32 %v8893_v30, %v8246_v61  ;;  %v7995_v13 = vor.u32 %v8825_v3, %v7992_v63  ;;  %v8126_v57 = vld [vmem:[%s13736_s5 + $0xd98] sm:$0xf]  ;;  %v8419_v61 = vor.u32 %v8930_v34, %v8416_v51  ;;  %v8922_v63 = vld [vmem:[%s13736_s5 + $0xf9c] sm:$0xf] }
 0x511   :  { %v8382_v30 = vld [vmem:[%s13736_s5 + $0xf98] sm:$0xf]  ;;  %v8898_v34 = vld [vmem:[%s13736_s5 + $0xedc] sm:$0xf] }
 0x512   :  { %5043 = vmatpush.bf16.msrb.mxu0 %v8119_v11  ;;  %5056 = vmatpush.bf16.msra.mxu1 %v8375_v32  ;;  %v4012_v11 = vpop.f32.mrf.mxu0  ;;  %v4025_v32 = vpop.f32.mrf.mxu1  ;;  %v8926_v3 = vld [vmem:[%s13736_s5 + $0xfb4] sm:$0xf0]  ;;  %v8288_v51 = vld [vmem:[%s13736_s5 + $0xef8] sm:$0xf0] }
 0x513   :  { %5069 = vmatpush.bf16.msra.mxu2 %v8123_v14  ;;  %5082 = vmatpush.bf16.msrb.mxu3 %v8379_v23  ;;  %v4036_v62 = vpop.f32.mrf.mxu2  ;;  %v4049_v40 = vpop.f32.mrf.mxu3  ;;  %v7958_v14 = vld [vmem:[%s13736_s5 + $0xc50] sm:$0xf]  ;;  %v8094_v11 = vld [vmem:[%s13736_s5 + $0xd58] sm:$0xf] }
 0x514   :  { %v4050_v10 = vadd.f32 %v4049_v40, %v4036_v62  ;;  %v8821_v23 = vld [vmem:[%s13736_s5 + $0xc6c] sm:$0xf0]  ;;  %v8858_v62 = vld [vmem:[%s13736_s5 + $0xd9c] sm:$0xf]  ;;  %v8854_v32 = vld [vmem:[%s13736_s5 + $0xd74] sm:$0xf0] }
 0x515   :  { %v7959_v16 = vor.u32 %v8821_v23, %v7958_v14  ;;  %v8128_v40 = vld [vmem:[%s13736_s5 + $0xdb8] sm:$0xf0]  ;;  %v8350_v14 = vld [vmem:[%s13736_s5 + $0xf58] sm:$0xf] }
 0x516   :  { %5044 = vmatpush.bf16.msrb.mxu0 %v8087_v24  ;;  %5057 = vmatpush.bf16.msra.mxu1 %v8343_v2  ;;  %v12859_v1 = vadd.f32 %v4050_v10, %v12041_v49  ;;  %v7960_v24 = vld [vmem:[%s13736_s5 + $0xc70] sm:$0xf0]  ;;  %v8383_v10 = vor.u32 %v8926_v3, %v8382_v30  ;;  %v8918_v23 = vld [vmem:[%s13736_s5 + $0xf74] sm:$0xf0] }
 0x517   :  { %5070 = vmatpush.bf16.msra.mxu2 %v8091_v7  ;;  %5083 = vmatpush.bf16.msrb.mxu3 %v8347_v59  ;;  %v8881_v49 = vld [vmem:[%s13736_s5 + $0xe54] sm:$0xf]  ;;  %v8215_v7 = vor.u32 %v8885_v29, %v8214_v22  ;;  %v8813_v59 = vld [vmem:[%s13736_s5 + $0xc2c] sm:$0xf0]  ;;  %v7963_v9 = vor.u32 %v8817_v31, %v7960_v24  ;;  %v8914_v22 = vld [vmem:[%s13736_s5 + $0xf5c] sm:$0xf]  ;;  %v8095_v31 = vor.u32 %v8854_v32, %v8094_v11 }
 0x518   :  { %v8216_v2 = vld [vmem:[%s13736_s5 + $0xe70] sm:$0xf0]  ;;  %v7927_v27 = vor.u32 %v8813_v59, %v7926_v26  ;;  %v8352_v29 = vld [vmem:[%s13736_s5 + $0xf78] sm:$0xf0]  ;;  %v8351_v24 = vor.u32 %v8918_v23, %v8350_v14  ;;  %v8910_v59 = vld [vmem:[%s13736_s5 + $0xf34] sm:$0xf0] }
 0x519   :  { %v8219_v33 = vor.u32 %v8881_v49, %v8216_v2  ;;  %v8062_v49 = vld [vmem:[%s13736_s5 + $0xd18] sm:$0xf] }
 0x51a   :  { %5045 = vmatpush.bf16.msrb.mxu0 %v8055_v5  ;;  %5058 = vmatpush.bf16.msra.mxu1 %v8311_v25  ;;  %v8184_v5 = vld [vmem:[%s13736_s5 + $0xe30] sm:$0xf0]  ;;  %v8158_v25 = vld [vmem:[%s13736_s5 + $0xdd8] sm:$0xf] }
 0x51b   :  { %5071 = vmatpush.bf16.msra.mxu2 %v8059_v44  ;;  %5084 = vmatpush.bf16.msrb.mxu3 %v8315_v45  ;;  %v4038_v39 = vpop.f32.mrf.mxu2  ;;  %v4051_v41 = vpop.f32.mrf.mxu3  ;;  %v8934_v44 = vld [vmem:[%s13736_s5 + $0xff4] sm:$0xf0]  ;;  %v8866_v45 = vld [vmem:[%s13736_s5 + $0xddc] sm:$0xf] }
 0x51c   :  { %v8415_v18 = vor.u32 %v8934_v44, %v8414_v43  ;;  %v8846_v2 = vld [vmem:[%s13736_s5 + $0xd34] sm:$0xf0] }
 0x51d   :  { %v8063_v39 = vor.u32 %v8846_v2, %v8062_v49  ;;  %v8286_v44 = vld [vmem:[%s13736_s5 + $0xed8] sm:$0xf] }
 0x51e   :  { %5046 = vmatpush.bf16.msrb.mxu0 %v8023_v54  ;;  %5059 = vmatpush.bf16.msra.mxu1 %v8279_v55  ;;  %v8187_v54 = vor.u32 %v8873_v38, %v8184_v5  ;;  %v8159_v55 = vor.u32 %v8870_v6, %v8158_v25  ;;  %v8030_v5 = vld [vmem:[%s13736_s5 + $0xcd8] sm:$0xf]  ;;  %v8067_v6 = vor.u32 %v8842_v17, %v8064_v28 }
 0x51f   :  { %5072 = vmatpush.bf16.msra.mxu2 %v8027_v58  ;;  %5085 = vmatpush.bf16.msrb.mxu3 %v8283_v60  ;;  %v8862_v58 = vld [vmem:[%s13736_s5 + $0xdb4] sm:$0xf0]  ;;  %v8163_v60 = vor.u32 %v8866_v45, %v8160_v47  ;;  %v8032_v47 = vld [vmem:[%s13736_s5 + $0xcf8] sm:$0xf0] }
 0x520   :  { %v8127_v8 = vor.u32 %v8862_v58, %v8126_v57  ;;  %v8838_v25 = vld [vmem:[%s13736_s5 + $0xcf4] sm:$0xf0]  ;;  %v8291_v57 = vor.u32 %v8898_v34, %v8288_v51 }
 0x521   :  { %v8902_v45 = vld [vmem:[%s13736_s5 + $0xef4] sm:$0xf0] }
 0x522   :  { %5047 = vmatpush.bf16.msrb.mxu0 %v7991_v21  ;;  %5060 = vmatpush.bf16.msra.mxu1 %v8247_v12  ;;  %v8131_v21 = vor.u32 %v8858_v62, %v8128_v40  ;;  %v8387_v12 = vor.u32 %v8922_v63, %v8384_v56  ;;  %v8254_v58 = vld [vmem:[%s13736_s5 + $0xe98] sm:$0xf]  ;;  %v8000_v62 = vld [vmem:[%s13736_s5 + $0xcb8] sm:$0xf0] }
 0x523   :  { %5073 = vmatpush.bf16.msra.mxu2 %v7995_v13  ;;  %5086 = vmatpush.bf16.msrb.mxu3 %v8251_v15  ;;  %v8850_v13 = vld [vmem:[%s13736_s5 + $0xd5c] sm:$0xf]  ;;  %v8190_v17 = vld [vmem:[%s13736_s5 + $0xe18] sm:$0xf] }
 0x524   :  { %v8096_v15 = vld [vmem:[%s13736_s5 + $0xd78] sm:$0xf0]  ;;  %v8878_v28 = vld [vmem:[%s13736_s5 + $0xe34] sm:$0xf0] }
 0x525   :  { %v8099_v26 = vor.u32 %v8850_v13, %v8096_v15  ;;  %v8890_v40 = vld [vmem:[%s13736_s5 + $0xe9c] sm:$0xf]  ;;  %v8222_v15 = vld [vmem:[%s13736_s5 + $0xe58] sm:$0xf] }
 0x526   :  { %5048 = vmatpush.bf16.msrb.mxu0 %v7959_v16  ;;  %5061 = vmatpush.bf16.msra.mxu1 %v8215_v7  ;;  %v8355_v16 = vor.u32 %v8914_v22, %v8352_v29  ;;  %v8318_v7 = vld [vmem:[%s13736_s5 + $0xf18] sm:$0xf]  ;;  %v8256_v63 = vld [vmem:[%s13736_s5 + $0xeb8] sm:$0xf0] }
 0x527   :  { %5074 = vmatpush.bf16.msra.mxu2 %v7963_v9  ;;  %5087 = vmatpush.bf16.msrb.mxu3 %v8219_v33  ;;  %v8906_v9 = vld [vmem:[%s13736_s5 + $0xf1c] sm:$0xf]  ;;  %v8319_v41 = vor.u32 %v8910_v59, %v8318_v7  ;;  %v8259_v13 = vor.u32 %v8890_v40, %v8256_v63  ;;  %v8886_v22 = vld [vmem:[%s13736_s5 + $0xe74] sm:$0xf0] }
 0x528   :  { %v8320_v33 = vld [vmem:[%s13736_s5 + $0xf38] sm:$0xf0]  ;;  %v8223_v2 = vor.u32 %v8886_v22, %v8222_v15  ;;  %v5483_v22 = vld [vmem:[%s13739_s6 + $0x68] sm:$0xff] }
 0x529   :  { %v8323_v43 = vor.u32 %v8906_v9, %v8320_v33  ;;  %v8818_v29 = vld [vmem:[%s13736_s5 + $0xc5c] sm:$0xf] }
 0x52a   :  { %5049 = vmatpush.bf16.msrb.mxu0 %v7927_v27  ;;  %5062 = vmatpush.bf16.msra.mxu1 %v8183_v46  ;;  %v4062_v36 = vpop.f32.mrf.mxu0  ;;  %v4075_v37 = vpop.f32.mrf.mxu1  ;;  %v8834_v27 = vld [vmem:[%s13736_s5 + $0xcdc] sm:$0xf] }
 0x52b   :  { %5075 = vmatpush.bf16.msra.mxu2 %v7931_v53  ;;  %5088 = vmatpush.bf16.msrb.mxu3 %v8187_v54  ;;  %v4076_v38 = vadd.f32 %v4075_v37, %v4062_v36  ;;  %v8031_v53 = vor.u32 %v8838_v25, %v8030_v5  ;;  %v8287_v54 = vor.u32 %v8902_v45, %v8286_v44  ;;  %v8810_v9 = vld [vmem:[%s13736_s5 + $0xc1c] sm:$0xf] }
 0x52c   :  { %v7936_v37 = vld [vmem:[%s13736_s5 + $0xc38] sm:$0xf0]  ;;  %v8191_v5 = vor.u32 %v8878_v28, %v8190_v17  ;;  %v5500_v28 = vld [vmem:[%s13739_s6 + $0xf0] sm:$0xff] }
 0x52d   :  { %5050 = vmatmul.bf16.vlgmr.msrb.gmra.mxu0 %v12538_v0  ;;  %5063 = vmatmul.bf16.vlgmr.msra.gmra.mxu1 %v12541_v4  ;;  %v13019_v46 = vadd.f32 %v4076_v38, %v12201_v35  ;;  %v7998_v35 = vld [vmem:[%s13736_s5 + $0xc98] sm:$0xf]  ;;  %v8874_v38 = vld [vmem:[%s13736_s5 + $0xe1c] sm:$0xf]  ;;  %v7939_v25 = vor.u32 %v8810_v9, %v7936_v37  ;;  %v5480_v37 = vld [vmem:[%s13739_s6 + $0x50] sm:$0xff] }
 0x52e   :  { %5094 = vmatpush.bf16.msra.mxu0 %v8159_v55  ;;  %5107 = vmatpush.bf16.msrb.mxu1 %v8415_v18  ;;  %v8830_v55 = vld [vmem:[%s13736_s5 + $0xcb4] sm:$0xf0]  ;;  %v8035_v18 = vor.u32 %v8834_v27, %v8032_v47 }
 0x52f   :  { %5120 = vmatpush.bf16.msrb.mxu2 %v8163_v60  ;;  %5133 = vmatpush.bf16.msra.mxu3 %v8419_v61  ;;  %v8894_v60 = vld [vmem:[%s13736_s5 + $0xeb4] sm:$0xf0]  ;;  %v8826_v61 = vld [vmem:[%s13736_s5 + $0xc9c] sm:$0xf]  ;;  %v7999_v11 = vor.u32 %v8830_v55, %v7998_v35 }
 0x530   :  { %5076 = vmatmul.bf16.vlgmr.msra.gmra.mxu2 %v12538_v0  ;;  %5089 = vmatmul.bf16.vlgmr.msrb.gmra.mxu3 %v12541_v4  ;;  %v8255_v32 = vor.u32 %v8894_v60, %v8254_v58  ;;  %v8003_v23 = vor.u32 %v8826_v61, %v8000_v62  ;;  %v5481_v17 = vld [vmem:[%s13739_s6 + $0x58] sm:$0xff] }
 0x532   :  { %5095 = vmatpush.bf16.msra.mxu0 %v8127_v8  ;;  %5108 = vmatpush.bf16.msrb.mxu1 %v8383_v10  ;;  %v4064_v8 = vpop.f32.mrf.mxu0  ;;  %v4077_v10 = vpop.f32.mrf.mxu1 }
 0x533   :  { %5121 = vmatpush.bf16.msrb.mxu2 %v8131_v21  ;;  %5134 = vmatpush.bf16.msra.mxu3 %v8387_v12  ;;  %v4088_v30 = vpop.f32.mrf.mxu2  ;;  %v4101_v3 = vpop.f32.mrf.mxu3  ;;  %v7966_v21 = vld [vmem:[%s13736_s5 + $0xc58] sm:$0xf] }
 0x534   :  { %v4102_v56 = vadd.f32 %v4101_v3, %v4088_v30  ;;  %v8822_v12 = vld [vmem:[%s13736_s5 + $0xc74] sm:$0xf0] }
 0x535   :  { %v7967_v49 = vor.u32 %v8822_v12, %v7966_v21 }
 0x536   :  { %5096 = vmatpush.bf16.msra.mxu0 %v8095_v31  ;;  %5109 = vmatpush.bf16.msrb.mxu1 %v8351_v24  ;;  %v13061_v14 = vadd.f32 %v4102_v56, %v12243_v52  ;;  %v7968_v31 = vld [vmem:[%s13736_s5 + $0xc78] sm:$0xf0] }
 0x537   :  { %5122 = vmatpush.bf16.msrb.mxu2 %v8099_v26  ;;  %5135 = vmatpush.bf16.msra.mxu3 %v8355_v16  ;;  %v8882_v52 = vld [vmem:[%s13736_s5 + $0xe5c] sm:$0xf]  ;;  %v7934_v26 = vld [vmem:[%s13736_s5 + $0xc18] sm:$0xf]  ;;  %v7971_v7 = vor.u32 %v8818_v29, %v7968_v31 }
 0x538   :  { %v8224_v24 = vld [vmem:[%s13736_s5 + $0xe78] sm:$0xf0]  ;;  %v8814_v16 = vld [vmem:[%s13736_s5 + $0xc34] sm:$0xf0] }
 0x539   :  { %v8227_v59 = vor.u32 %v8882_v52, %v8224_v24  ;;  %v5482_v52 = vld [vmem:[%s13739_s6 + $0x60] sm:$0xff]  ;;  %v5501_v24 = vld [vmem:[%s13739_s6 + $0xf8] sm:$0xff] }
 0x53a   :  { %5097 = vmatpush.bf16.msra.mxu0 %v8063_v39  ;;  %5110 = vmatpush.bf16.msrb.mxu1 %v8319_v41  ;;  %v8192_v39 = vld [vmem:[%s13736_s5 + $0xe38] sm:$0xf0]  ;;  %v7935_v41 = vor.u32 %v8814_v16, %v7934_v26 }
 0x53b   :  { %5123 = vmatpush.bf16.msrb.mxu2 %v8067_v6  ;;  %5136 = vmatpush.bf16.msra.mxu3 %v8323_v43  ;;  %v4090_v33 = vpop.f32.mrf.mxu2  ;;  %v4103_v36 = vpop.f32.mrf.mxu3  ;;  %v8195_v6 = vor.u32 %v8874_v38, %v8192_v39  ;;  %v5499_v38 = vld [vmem:[%s13739_s6 + $0xe8] sm:$0xff] }
 0x53c   :  { %v5606_v36 = vld [vmem:[%s13740_s7 + $0x50] sm:$0xff] }
 0x53e   :  { %5098 = vmatpush.bf16.msra.mxu0 %v8031_v53  ;;  %5111 = vmatpush.bf16.msrb.mxu1 %v8287_v54 }
 0x53f   :  { %5124 = vmatpush.bf16.msrb.mxu2 %v8035_v18  ;;  %5137 = vmatpush.bf16.msra.mxu3 %v8291_v57  ;;  %v8993_v57 = vmov 2.0  }
 0x540   :  { %8971 = vrcp.f32 %v8993_v57 }
 0x542   :  { %5099 = vmatpush.bf16.msra.mxu0 %v7999_v11  ;;  %5112 = vmatpush.bf16.msrb.mxu1 %v8255_v32  ;;  %v5485_v32 = vld [vmem:[%s13739_s6 + $0x78] sm:$0xff] }
 0x543   :  { %5125 = vmatpush.bf16.msrb.mxu2 %v8003_v23  ;;  %5138 = vmatpush.bf16.msra.mxu3 %v8259_v13 }
 0x546   :  { %5100 = vmatpush.bf16.msra.mxu0 %v7967_v49  ;;  %5113 = vmatpush.bf16.msrb.mxu1 %v8223_v2 }
 0x547   :  { %5126 = vmatpush.bf16.msrb.mxu2 %v7971_v7  ;;  %5139 = vmatpush.bf16.msra.mxu3 %v8227_v59  ;;  %v5607_v59 = vld [vmem:[%s13740_s7 + $0x58] sm:$0xff] }
 0x54a   :  { %5101 = vmatpush.bf16.msra.mxu0 %v7935_v41  ;;  %5114 = vmatpush.bf16.msrb.mxu1 %v8191_v5  ;;  %v4114_v43 = vpop.f32.mrf.mxu0  ;;  %v4127_v44 = vpop.f32.mrf.mxu1  ;;  %v5605_v5 = vld [vmem:[%s13740_s7 + $0x48] sm:$0xff] }
 0x54b   :  { %5127 = vmatpush.bf16.msrb.mxu2 %v7939_v25  ;;  %5140 = vmatpush.bf16.msra.mxu3 %v8195_v6  ;;  %v4128_v45 = vadd.f32 %v4127_v44, %v4114_v43  ;;  %v5479_v25 = vld [vmem:[%s13739_s6 + $0x48] sm:$0xff]  ;;  %v5498_v6 = vld [vmem:[%s13739_s6 + $0xe0] sm:$0xff] }
 0x54d   :  { %5102 = vmatmul.bf16.vlgmr.msra.gmra.mxu0 %v12538_v0  ;;  %5115 = vmatmul.bf16.vlgmr.msrb.gmra.mxu1 %v12541_v4  ;;  %v13110_v27 = vadd.f32 %v4128_v45, %v12403_v42  ;;  %v5604_v45 = vld [vmem:[%s13740_s7 + $0x40] sm:$0xff] }
 0x54e   :  { %5128 = vmatmul.bf16.vlgmr.msrb.gmra.mxu2 %v12538_v0  ;;  %5141 = vmatmul.bf16.vlgmr.msra.gmra.mxu3 %v12541_v4  ;;  %v8972_v0 = vpop.eup %8971 }
 0x54f   :  { %v5212_v4 = vmul.f32 2.0, %v8972_v0  ;;  %5640 = vmatpush.msra.mxu1 %v5485_v32  ;;  %vm5216_vm13 = vweird.f32 %v8972_v0  ;;  %5660 = vmatpush.msra.mxu2 %v5501_v24  ;;  %v5598_v24 = vld [vmem:[%s13740_s7 + $0x10] sm:$0xff] }
 0x551   :  { %v5213_v30 = vsub.f32 1.0, %v5212_v4  ;;  %5661 = vmatpush.msra.mxu2 %v5500_v28  ;;  %v5602_v4 = vld [vmem:[%s13740_s7 + $0x30] sm:$0xff]  ;;  %v5597_v28 = vld [vmem:[%s13740_s7 + $0x8] sm:$0xff] }
 0x552   :  { %v4116_v53 = vpop.f32.mrf.mxu0  ;;  %v4129_v54 = vpop.f32.mrf.mxu1 }
 0x553   :  { %v4140_v47 = vpop.f32.mrf.mxu2  ;;  %v4153_v34 = vpop.f32.mrf.mxu3  ;;  %v5214_v40 = vmul.f32 %v8972_v0, %v5213_v30  ;;  %5662 = vmatpush.msra.mxu2 %v5499_v38  ;;  %v5603_v54 = vld [vmem:[%s13740_s7 + $0x38] sm:$0xff]  ;;  %v5601_v30 = vld [vmem:[%s13740_s7 + $0x28] sm:$0xff] }
 0x554   :  { %v4154_v51 = vadd.f32 %v4153_v34, %v4140_v47  ;;  %v5478_v47 = vld [vmem:[%s13739_s6 + $0x40] sm:$0xff]  ;;  %v5497_v34 = vld [vmem:[%s13739_s6 + $0xd8] sm:$0xff] }
 0x555   :  { %v5215_v23 = vadd.f32 %v8972_v0, %v5214_v40  ;;  %5663 = vmatpush.msra.mxu2 %v5498_v6 }
 0x556   :  { %v13113_v35 = vadd.f32 %v4154_v51, %v12445_v20 }
 0x557   :  { %v13140_v49 = vsel %vm5216_vm13, %v8972_v0, %v5215_v23  ;;  %5664 = vmatpush.msra.mxu2 %v5497_v34  ;;  %v5599_v23 = vld [vmem:[%s13740_s7 + $0x18] sm:$0xff] }
 0x55b   :  { %v4142_v55 = vpop.f32.mrf.mxu2  ;;  %v4155_v18 = vpop.f32.mrf.mxu3 }
 0x55c   :  { %v5477_v55 = vld [vmem:[%s13739_s6 + $0x38] sm:$0xff]  ;;  %v5496_v18 = vld [vmem:[%s13739_s6 + $0xd0] sm:$0xff] }
 0x55d   :  { %5665 = vmatpush.msra.mxu2 %v5496_v18 }
 0x56a   :  { %v4947_v58 = vpop.f32.mrf.mxu0  ;;  %v4960_v60 = vpop.f32.mrf.mxu1 }
 0x56b   :  { %v4961_v61 = vadd.f32 %v4960_v60, %v4947_v58  ;;  %v5476_v58 = vld [vmem:[%s13739_s6 + $0x30] sm:$0xff]  ;;  %v5495_v60 = vld [vmem:[%s13739_s6 + $0xc8] sm:$0xff] }
 0x56c   :  { %5666 = vmatpush.msra.mxu2 %v5495_v60 }
 0x56d   :  { %v5146_v42 = vadd.f32 %v4961_v61, %v12613_v48  ;;  %v5484_v48 = vld [vmem:[%s13739_s6 + $0x70] sm:$0xff] }
 0x56e   :  { %5641 = vmatpush.msra.mxu1 %v5484_v48 }
 0x56f   :  { %v5154_v3 = vsel %vm218_vm2, %v5146_v42, 0.0 }
 0x570   :  { %v5155_v62 = vrot.slane %v5154_v3, 4  ;;  %5642 = vmatpush.msra.mxu1 %v5483_v22 }
 0x572   :  { %v5156_v20 = vadd.f32 %v5155_v62, %v5154_v3  ;;  %v4949_v10 = vpop.f32.mrf.mxu0  ;;  %v4962_v11 = vpop.f32.mrf.mxu1  ;;  %5643 = vmatpush.msra.mxu1 %v5482_v52  ;;  %v5475_v3 = vld [vmem:[%s13739_s6 + $0x28] sm:$0xff]  ;;  %v5494_v62 = vld [vmem:[%s13739_s6 + $0xc0] sm:$0xff] }
 0x573   :  { %v4973_v63 = vpop.f32.mrf.mxu2  ;;  %v4986_v56 = vpop.f32.mrf.mxu3  ;;  %5667 = vmatpush.msra.mxu2 %v5494_v62  ;;  %v5474_v10 = vld [vmem:[%s13739_s6 + $0x20] sm:$0xff]  ;;  %v5493_v11 = vld [vmem:[%s13739_s6 + $0xb8] sm:$0xff] }
 0x574   :  { %v4987_v8 = vadd.f32 %v4986_v56, %v4973_v63  ;;  %v5157_v21 = vrot.slane %v5156_v20, 2  ;;  %5644 = vmatpush.msra.mxu1 %v5481_v17 }
 0x575   :  { %5668 = vmatpush.msra.mxu2 %v5493_v11  ;;  %v5532_v11 = vld [vmem:[%s13739_s6 + $0x1f0] sm:$0xff] }
 0x576   :  { %v13121_v12 = vadd.f32 %v4987_v8, %v12657_v19  ;;  %v5158_v13 = vadd.f32 %v5157_v21, %v5156_v20  ;;  %v5608_v19 = vld [vmem:[%s13740_s7 + $0x60] sm:$0xf]  ;;  %5645 = vmatpush.msra.mxu1 %v5480_v37 }
 0x577   :  { %8420 = vmatpush.msk.msrb.mxu0 %vm166_vm1, %v5608_v19  ;;  %v5600_v8 = vld [vmem:[%s13740_s7 + $0x20] sm:$0xff]  ;;  %vm5609_vm1 = vcmask 818176  }
 0x578   :  { %v5161_v15 = vsel %vm218_vm2, %v13121_v12, 0.0  ;;  %v5159_v31 = vrot.slane %v5158_v13, 1  ;;  %5646 = vmatpush.msra.mxu1 %v5479_v25  ;;  %v5517_v25 = vld [vmem:[%s13739_s6 + $0x178] sm:$0xff] }
 0x579   :  { %v5162_v29 = vrot.slane %v5161_v15, 4  ;;  %5620 = vmatpush.msrb.mxu0 %v5607_v59  ;;  %5680 = vmatpush.msrb.mxu3 %v5517_v25  ;;  %v5508_v25 = vld [vmem:[%s13739_s6 + $0x130] sm:$0xff] }
 0x57a   :  { %v5160_v7 = vadd.f32 %v5159_v31, %v5158_v13  ;;  %5647 = vmatpush.msra.mxu1 %v5478_v47  ;;  %v5473_v13 = vld [vmem:[%s13739_s6 + $0x18] sm:$0xff] }
 0x57b   :  { %v5163_v2 = vadd.f32 %v5162_v29, %v5161_v15  ;;  %v4975_v26 = vpop.f32.mrf.mxu2  ;;  %v4988_v16 = vpop.f32.mrf.mxu3  ;;  %5621 = vmatpush.msrb.mxu0 %v5606_v36  ;;  %v5492_v15 = vld [vmem:[%s13739_s6 + $0xb0] sm:$0xff] }
 0x57c   :  { %v5218_v33 = vmul.f32 %v13140_v49, %v5160_v7  ;;  %5648 = vmatpush.msra.mxu1 %v5477_v55  ;;  %5669 = vmatpush.msra.mxu2 %v5492_v15 }
 0x57d   :  { %v5164_v9 = vrot.slane %v5163_v2, 2  ;;  %5622 = vmatpush.msrb.mxu0 %v5605_v5 }
 0x57e   :  { %v13162_v41 = vsub.f32 %v5146_v42, %v5218_v33  ;;  %5649 = vmatpush.msra.mxu1 %v5476_v58  ;;  %v5490_v33 = vld [vmem:[%s13739_s6 + $0xa0] sm:$0xff]  ;;  %v5487_v58 = vld [vmem:[%s13739_s6 + $0x88] sm:$0xff] }
 0x57f   :  { %v5165_v39 = vadd.f32 %v5164_v9, %v5163_v2  ;;  %5623 = vmatpush.msrb.mxu0 %v5604_v45  ;;  %v5472_v2 = vld [vmem:[%s13739_s6 + $0x10] sm:$0xff]  ;;  %v5471_v9 = vld [vmem:[%s13739_s6 + $0x8] sm:$0xff]  ;;  %v5489_v45 = vld [vmem:[%s13739_s6 + $0x98] sm:$0xff] }
 0x580   :  { %v5234_v44 = vmul.f32 %v13162_v41, %v13162_v41  ;;  %5650 = vmatpush.msra.mxu1 %v5475_v3  ;;  %v5533_v3 = vld [vmem:[%s13739_s6 + $0x1f8] sm:$0xff] }
 0x581   :  { %v5166_v43 = vrot.slane %v5165_v39, 1  ;;  %5624 = vmatpush.msrb.mxu0 %v5603_v54  ;;  %v5516_v54 = vld [vmem:[%s13739_s6 + $0x170] sm:$0xff] }
 0x582   :  { %v5242_v53 = vsel %vm218_vm2, %v5234_v44, 0.0  ;;  %5651 = vmatpush.msra.mxu1 %v5474_v10  ;;  %v5470_v44 = vld [vmem:[%s13739_s6] sm:$0xff]  ;;  %5681 = vmatpush.msrb.mxu3 %v5516_v54  ;;  %v5513_v10 = vld [vmem:[%s13739_s6 + $0x158] sm:$0xff] }
 0x583   :  { %v5167_v51 = vadd.f32 %v5166_v43, %v5165_v39  ;;  %v5243_v57 = vrot.slane %v5242_v53, 4  ;;  %5625 = vmatpush.msrb.mxu0 %v5602_v4  ;;  %v5596_v43 = vld [vmem:[%s13740_s7] sm:$0xff] }
 0x584   :  { %5652 = vmatpush.msra.mxu1 %v5473_v13  ;;  %v5526_v54 = vld [vmem:[%s13739_s6 + $0x1c0] sm:$0xff] }
 0x585   :  { %v5219_v0 = vmul.f32 %v13140_v49, %v5167_v51  ;;  %v5244_v61 = vadd.f32 %v5243_v57, %v5242_v53  ;;  %5626 = vmatpush.msrb.mxu0 %v5601_v30  ;;  %v5595_v53 = vld [vmem:[%s13741_s9] sm:$0x3] }
 0x586   :  { %5653 = vmatpush.msra.mxu1 %v5472_v2  ;;  %v5514_v30 = vld [vmem:[%s13739_s6 + $0x160] sm:$0xff] }
 0x587   :  { %v13205_v42 = vsub.f32 %v13121_v12, %v5219_v0  ;;  %v5245_v40 = vrot.slane %v5244_v61, 2  ;;  %5627 = vmatpush.msrb.mxu0 %v5600_v8  ;;  %v5515_v0 = vld [vmem:[%s13739_s6 + $0x168] sm:$0xff] }
 0x588   :  { %5654 = vmatpush.msra.mxu1 %v5471_v9  ;;  %5682 = vmatpush.msrb.mxu3 %v5515_v0  ;;  %v5528_v9 = vld [vmem:[%s13739_s6 + $0x1d0] sm:$0xff] }
 0x589   :  { %v5235_v63 = vmul.f32 %v13205_v42, %v13205_v42  ;;  %v5246_v32 = vadd.f32 %v5245_v40, %v5244_v61  ;;  %5628 = vmatpush.msrb.mxu0 %v5599_v23  ;;  %v5531_v23 = vld [vmem:[%s13739_s6 + $0x1e8] sm:$0xff] }
 0x58a   :  { %v4999_v56 = vpop.f32.mrf.mxu0  ;;  %v5012_v20 = vpop.f32.mrf.mxu1  ;;  %5655 = vmatpush.msra.mxu1 %v5470_v44  ;;  %5683 = vmatpush.msrb.mxu3 %v5514_v30 }
 0x58b   :  { %v5249_v21 = vsel %vm218_vm2, %v5235_v63, 0.0  ;;  %v5013_v12 = vadd.f32 %v5012_v20, %v4999_v56  ;;  %v5247_v22 = vrot.slane %v5246_v32, 1  ;;  %5629 = vmatpush.msrb.mxu0 %v5598_v24  ;;  %v5486_v56 = vld [vmem:[%s13739_s6 + $0x80] sm:$0xff] }
 0x58c   :  { %v5250_v48 = vrot.slane %v5249_v21, 4  ;;  %5684 = vmatpush.msrb.mxu3 %v5513_v10 }
 0x58d   :  { %v13238_v29 = vadd.f32 %v5013_v12, %v12817_v50  ;;  %v5248_v19 = vadd.f32 %v5247_v22, %v5246_v32  ;;  %v5491_v50 = vld [vmem:[%s13739_s6 + $0xa8] sm:$0xff]  ;;  %5630 = vmatpush.msrb.mxu0 %v5597_v28  ;;  %v5509_v28 = vld [vmem:[%s13739_s6 + $0x138] sm:$0xff] }
 0x58e   :  { %v5251_v31 = vadd.f32 %v5250_v48, %v5249_v21  ;;  %5670 = vmatpush.msra.mxu2 %v5491_v50  ;;  %v5512_v48 = vld [vmem:[%s13739_s6 + $0x150] sm:$0xff]  ;;  %v5510_v50 = vld [vmem:[%s13739_s6 + $0x140] sm:$0xff] }
 0x58f   :  { %v5168_v52 = vsel %vm218_vm2, %v13238_v29, 0.0  ;;  %v5298_v7 = vmul.f32 %v5248_v19, %v13140_v49  ;;  %5631 = vmatpush.msrb.mxu0 %v5596_v43  ;;  %5685 = vmatpush.msrb.mxu3 %v5512_v48  ;;  %v5530_v19 = vld [vmem:[%s13739_s6 + $0x1e0] sm:$0xff]  ;;  %v5527_v43 = vld [vmem:[%s13739_s6 + $0x1c8] sm:$0xff] }
 0x590   :  { %v5252_v26 = vrot.slane %v5251_v31, 2  ;;  %v5169_v16 = vrot.slane %v5168_v52, 4  ;;  %5671 = vmatpush.msra.mxu2 %v5490_v33  ;;  %8421 = vmatmul.msk.f32.vlgmr.msrb.gmra.mxu0 %vm5609_vm1, %v5595_v53  ;;  %v5507_v53 = vld [vmem:[%s13739_s6 + $0x128] sm:$0xff] }
 0x591   :  { %v13264_v6 = vadd.f32 1e-05, %v5298_v7  ;;  %5700 = vmatpush.msra.mxu0 %v5533_v3 }
 0x592   :  { %v5253_v36 = vadd.f32 %v5252_v26, %v5251_v31  ;;  %v5170_v37 = vadd.f32 %v5169_v16, %v5168_v52  ;;  %v5001_v39 = vpop.f32.mrf.mxu0  ;;  %v5014_v5 = vpop.f32.mrf.mxu1  ;;  %5672 = vmatpush.msra.mxu2 %v5489_v45  ;;  %v5511_v31 = vld [vmem:[%s13739_s6 + $0x148] sm:$0xff]  ;;  %v5529_v26 = vld [vmem:[%s13739_s6 + $0x1d8] sm:$0xff] }
 0x593   :  { %v5025_v59 = vpop.f32.mrf.mxu2  ;;  %v5038_v17 = vpop.f32.mrf.mxu3  ;;  %8973 = vrsqrt.f32 %v13264_v6  ;;  %5701 = vmatpush.msra.mxu0 %v5532_v11  ;;  %5686 = vmatpush.msrb.mxu3 %v5511_v31  ;;  %vm5320_vm15 = vweird.f32 %v13264_v6  ;;  %v13361_v39 = vld [vmem:[%s13743_s19] sm:$0xff] }
 0x594   :  { %v5039_v38 = vadd.f32 %v5038_v17, %v5025_v59  ;;  %v5254_v47 = vrot.slane %v5253_v36, 1  ;;  %v5171_v34 = vrot.slane %v5170_v37, 2  ;;  %v13345_v17 = vld [vmem:[%s13742_s18] sm:$0xff] }
 0x595   :  { %5702 = vmatpush.msra.mxu0 %v5531_v23  ;;  %5687 = vmatpush.msrb.mxu3 %v5510_v50  ;;  %v5404_v44 = vperm.slane %v13345_v17, 0 }
 0x596   :  { %v13276_v51 = vadd.f32 %v5039_v38, %v12859_v1  ;;  %v5488_v1 = vld [vmem:[%s13739_s6 + $0x90] sm:$0xff]  ;;  %v5255_v55 = vadd.f32 %v5254_v47, %v5253_v36  ;;  %v5172_v18 = vadd.f32 %v5171_v34, %v5170_v37 }
 0x597   :  { %5673 = vmatpush.msra.mxu2 %v5488_v1  ;;  %5703 = vmatpush.msra.mxu0 %v5530_v19 }
 0x598   :  { %v5175_v57 = vsel %vm218_vm2, %v13276_v51, 0.0  ;;  %v5299_v60 = vmul.f32 %v5255_v55, %v13140_v49  ;;  %v5173_v61 = vrot.slane %v5172_v18, 1  ;;  %5688 = vmatpush.msrb.mxu3 %v5509_v28  ;;  %v5430_v55 = vperm.slane %v13361_v39, 0 }
 0x599   :  { %v5176_v4 = vrot.slane %v5175_v57, 4  ;;  %5674 = vmatpush.msra.mxu2 %v5487_v58  ;;  %v8974_v32 = vpop.eup %8973  ;;  %5704 = vmatpush.msra.mxu0 %v5529_v26  ;;  %v5506_v58 = vld [vmem:[%s13739_s6 + $0x120] sm:$0xff] }
 0x59a   :  { %v13306_v20 = vadd.f32 1e-05, %v5299_v60  ;;  %v5174_v8 = vadd.f32 %v5173_v61, %v5172_v18  ;;  %v5315_v12 = vmul.f32 %v8974_v32, %v13264_v6  ;;  %vm5321_vm14 = vweird.f32 %v8974_v32  ;;  %5689 = vmatpush.msrb.mxu3 %v5508_v25 }
 0x59b   :  { %v5177_v62 = vadd.f32 %v5176_v4, %v5175_v57  ;;  %v5027_v40 = vpop.f32.mrf.mxu2  ;;  %v5040_v63 = vpop.f32.mrf.mxu3  ;;  %5675 = vmatpush.msra.mxu2 %v5486_v56  ;;  %5705 = vmatpush.msra.mxu0 %v5528_v9  ;;  %vm5322_vm0 = vmor %vm5320_vm15, %vm5321_vm14  ;;  %v5524_v56 = vld [vmem:[%s13739_s6 + $0x1b0] sm:$0xff] }
 0x59c   :  { %8975 = vrsqrt.f32 %v13306_v20  ;;  %v5220_v13 = vmul.f32 %v13140_v49, %v5174_v8  ;;  %v5316_v22 = vmul.f32 %v8974_v32, %v5315_v12  ;;  %5690 = vmatpush.msrb.mxu3 %v5507_v53  ;;  %v5505_v63 = vld [vmem:[%s13739_s6 + $0x118] sm:$0xff]  ;;  %vm5330_vm5 = vweird.f32 %v13306_v20  ;;  %v5520_v53 = vld [vmem:[%s13739_s6 + $0x190] sm:$0xff] }
 0x59d   :  { %v5178_v21 = vrot.slane %v5177_v62, 2  ;;  %5706 = vmatpush.msra.mxu0 %v5527_v43 }
 0x59e   :  { %v13330_v52 = vsub.f32 %v13238_v29, %v5220_v13  ;;  %v5317_v2 = vmul.f32 0.5, %v5316_v22  ;;  %5691 = vmatpush.msrb.mxu3 %v5506_v58  ;;  %v5431_v22 = vperm.slane %v13361_v39, 1  ;;  %v5546_v58 = vld [vmem:[%s13739_s6 + $0x260] sm:$0xff] }
 0x59f   :  { %v5179_v15 = vadd.f32 %v5178_v21, %v5177_v62  ;;  %5707 = vmatpush.msra.mxu0 %v5526_v54 }
 0x5a0   :  { %v5236_v16 = vmul.f32 %v13330_v52, %v13330_v52  ;;  %v5318_v29 = vsub.f32 1.5, %v5317_v2  ;;  %5692 = vmatpush.msrb.mxu3 %v5505_v63  ;;  %v5545_v63 = vld [vmem:[%s13739_s6 + $0x258] sm:$0xff] }
 0x5a1   :  { %v5180_v24 = vrot.slane %v5179_v15, 1 }
 0x5a2   :  { %v13340_v59 = vpop.eup %8975  ;;  %v5256_v36 = vsel %vm218_vm2, %v5236_v16, 0.0  ;;  %v5319_v38 = vmul.f32 %v8974_v32, %v5318_v29  ;;  %v5503_v16 = vld [vmem:[%s13739_s6 + $0x108] sm:$0xff] }
 0x5a3   :  { %v5181_v7 = vadd.f32 %v5180_v24, %v5179_v15  ;;  %v5325_v33 = vmul.f32 %v13340_v59, %v13306_v20  ;;  %v5257_v5 = vrot.slane %v5256_v36, 4  ;;  %vm5331_vm4 = vweird.f32 %v13340_v59  ;;  %v5523_v20 = vld [vmem:[%s13739_s6 + $0x1a8] sm:$0xff] }
 0x5a4   :  { %v5323_v47 = vsel %vm5322_vm0, %v8974_v32, %v5319_v38  ;;  %vm5332_vm6 = vmor %vm5330_vm5, %vm5331_vm4  ;;  %v5405_v32 = vperm.slane %v13345_v17, 1  ;;  %v5502_v38 = vld [vmem:[%s13739_s6 + $0x100] sm:$0xff] }
 0x5a5   :  { %v5221_v37 = vmul.f32 %v13140_v49, %v5181_v7  ;;  %v5326_v6 = vmul.f32 %v13340_v59, %v5325_v33  ;;  %v5258_v34 = vadd.f32 %v5257_v5, %v5256_v36  ;;  %v5394_v1 = vmul.f32 %v5323_v47, %v13162_v41  ;;  %v5525_v41 = vld [vmem:[%s13739_s6 + $0x1b8] sm:$0xff]  ;;  %v5522_v7 = vld [vmem:[%s13739_s6 + $0x1a0] sm:$0xff]  ;;  %v5548_v47 = vld [vmem:[%s13739_s6 + $0x270] sm:$0xff] }
 0x5a6   :  { %5708 = vmatpush.msra.mxu0 %v5525_v41  ;;  %v5549_v36 = vld [vmem:[%s13739_s6 + $0x278] sm:$0xff] }
 0x5a7   :  { %v13373_v45 = vsub.f32 %v13276_v51, %v5221_v37  ;;  %v5327_v18 = vmul.f32 0.5, %v5326_v6  ;;  %v5259_v57 = vrot.slane %v5258_v34, 2  ;;  %v5420_v60 = vmul.f32 %v5404_v44, %v5394_v1  ;;  %v5521_v5 = vld [vmem:[%s13739_s6 + $0x198] sm:$0xff]  ;;  %5720 = vmatpush.msrb.mxu1 %v5549_v36  ;;  %v5559_v36 = vld [vmem:[%s13739_s6 + $0x2c8] sm:$0xff] }
 0x5a8   :  { %5709 = vmatpush.msra.mxu0 %v5524_v56  ;;  %v5565_v41 = vld [vmem:[%s13739_s6 + $0x2f8] sm:$0xff]  ;;  %v5564_v56 = vld [vmem:[%s13739_s6 + $0x2f0] sm:$0xff] }
 0x5a9   :  { %v5237_v51 = vmul.f32 %v13373_v45, %v13373_v45  ;;  %v5328_v61 = vsub.f32 1.5, %v5327_v18  ;;  %v5260_v62 = vadd.f32 %v5259_v57, %v5258_v34  ;;  %v5446_v8 = vadd.f32 %v5430_v55, %v5420_v60  ;;  %5721 = vmatpush.msrb.mxu1 %v5548_v47  ;;  %5740 = vmatpush.msrb.mxu2 %v5565_v41  ;;  %v5539_v47 = vld [vmem:[%s13739_s6 + $0x228] sm:$0xff] }
 0x5aa   :  { %v5051_v0 = vpop.f32.mrf.mxu0  ;;  %v5064_v4 = vpop.f32.mrf.mxu1  ;;  %5710 = vmatpush.msra.mxu0 %v5523_v20  ;;  %v5562_v20 = vld [vmem:[%s13739_s6 + $0x2e0] sm:$0xff] }
 0x5ab   :  { %v5263_v30 = vsel %vm218_vm2, %v5237_v51, 0.0  ;;  %v5065_v3 = vadd.f32 %v5064_v4, %v5051_v0  ;;  %v5329_v10 = vmul.f32 %v13340_v59, %v5328_v61  ;;  %v5261_v21 = vrot.slane %v5260_v62, 1  ;;  %v5519_v51 = vld [vmem:[%s13739_s6 + $0x188] sm:$0xff]  ;;  %5741 = vmatpush.msrb.mxu2 %v5564_v56 }
 0x5ac   :  { %v5264_v40 = vrot.slane %v5263_v30, 4  ;;  %v5454_v48 = vmul.f32 0.2, %v5446_v8  ;;  %5711 = vmatpush.msra.mxu0 %v5522_v7  ;;  %v5560_v7 = vld [vmem:[%s13739_s6 + $0x2d0] sm:$0xff]  ;;  %v5407_v56 = vperm.slane %v13345_v17, 3 }
 0x5ad   :  { %v13402_v11 = vadd.f32 %v5065_v3, %v13019_v46  ;;  %v5333_v23 = vsel %vm5332_vm6, %v13340_v59, %v5329_v10  ;;  %v5504_v46 = vld [vmem:[%s13739_s6 + $0x110] sm:$0xff]  ;;  %v5262_v31 = vadd.f32 %v5261_v21, %v5260_v62  ;;  %v5518_v3 = vld [vmem:[%s13739_s6 + $0x180] sm:$0xff] }
 0x5ae   :  { %v5265_v12 = vadd.f32 %v5264_v40, %v5263_v30  ;;  %v5395_v15 = vmul.f32 %v5333_v23, %v13205_v42  ;;  %5693 = vmatpush.msrb.mxu3 %v5504_v46  ;;  %v5462_v26 = vmax.f32 %v5446_v8, %v5454_v48  ;;  %5712 = vmatpush.msra.mxu0 %v5521_v5  ;;  %v5544_v21 = vld [vmem:[%s13739_s6 + $0x250] sm:$0xff]  ;;  %v5543_v46 = vld [vmem:[%s13739_s6 + $0x248] sm:$0xff]  ;;  %v5406_v5 = vperm.slane %v13345_v17, 2 }
 0x5af   :  { %v5182_v13 = vsel %vm218_vm2, %v13402_v11, 0.0  ;;  %v5300_v42 = vmul.f32 %v5262_v31, %v13140_v49 }
 0x5b0   :  { %v5266_v19 = vrot.slane %v5265_v12, 2  ;;  %v5183_v24 = vrot.slane %v5182_v13, 4  ;;  %v5421_v59 = vmul.f32 %v5405_v32, %v5395_v15  ;;  %5694 = vmatpush.msrb.mxu3 %v5503_v16  ;;  %5656 = vmatmul.f32.vlgmr.msra.gmra.mxu1 %v5462_v26  ;;  %v5541_v16 = vld [vmem:[%s13739_s6 + $0x238] sm:$0xff] }
 0x5b1   :  { %v13434_v43 = vadd.f32 1e-05, %v5300_v42  ;;  %5713 = vmatpush.msra.mxu0 %v5520_v53 }
 0x5b2   :  { %v5267_v29 = vadd.f32 %v5266_v19, %v5265_v12  ;;  %v5053_v9 = vpop.f32.mrf.mxu0  ;;  %v5066_v33 = vpop.f32.mrf.mxu1  ;;  %v5184_v37 = vadd.f32 %v5183_v24, %v5182_v13  ;;  %v5447_v25 = vadd.f32 %v5431_v22, %v5421_v59  ;;  %5695 = vmatpush.msrb.mxu3 %v5502_v38  ;;  %v5563_v12 = vld [vmem:[%s13739_s6 + $0x2e8] sm:$0xff]  ;;  %v5542_v19 = vld [vmem:[%s13739_s6 + $0x240] sm:$0xff]  ;;  %v5561_v24 = vld [vmem:[%s13739_s6 + $0x2d8] sm:$0xff] }
 0x5b3   :  { %v5077_v2 = vpop.f32.mrf.mxu2  ;;  %v5090_v50 = vpop.f32.mrf.mxu3  ;;  %8977 = vrsqrt.f32 %v13434_v43  ;;  %5714 = vmatpush.msra.mxu0 %v5519_v51  ;;  %5742 = vmatpush.msrb.mxu2 %v5563_v12  ;;  %v5540_v33 = vld [vmem:[%s13739_s6 + $0x230] sm:$0xff]  ;;  %vm5340_vm7 = vweird.f32 %v13434_v43  ;;  %v5538_v51 = vld [vmem:[%s13739_s6 + $0x220] sm:$0xff] }
 0x5b4   :  { %v5091_v28 = vadd.f32 %v5090_v50, %v5077_v2  ;;  %v5268_v44 = vrot.slane %v5267_v29, 1  ;;  %v5185_v34 = vrot.slane %v5184_v37, 2  ;;  %v5455_v54 = vmul.f32 0.2, %v5447_v25 }
 0x5b5   :  { %5715 = vmatpush.msra.mxu0 %v5518_v3  ;;  %5743 = vmatpush.msrb.mxu2 %v5562_v20 }
 0x5b6   :  { %v13437_v6 = vadd.f32 %v5091_v28, %v13061_v14  ;;  %v5269_v1 = vadd.f32 %v5268_v44, %v5267_v29  ;;  %v5547_v14 = vld [vmem:[%s13739_s6 + $0x268] sm:$0xff]  ;;  %v5186_v55 = vadd.f32 %v5185_v34, %v5184_v37  ;;  %v5463_v4 = vmax.f32 %v5447_v25, %v5455_v54  ;;  %v5558_v34 = vld [vmem:[%s13739_s6 + $0x2c0] sm:$0xff] }
 0x5b7   :  { %5722 = vmatpush.msrb.mxu1 %v5547_v14  ;;  %5744 = vmatpush.msrb.mxu2 %v5561_v24 }
 0x5b8   :  { %v5189_v18 = vsel %vm218_vm2, %v13437_v6, 0.0  ;;  %v5301_v57 = vmul.f32 %v5269_v1, %v13140_v49  ;;  %v5187_v60 = vrot.slane %v5186_v55, 1  ;;  %5676 = vmatmul.f32.vlgmr.msra.gmra.mxu2 %v5463_v4 }
 0x5b9   :  { %v5190_v0 = vrot.slane %v5189_v18, 4  ;;  %5723 = vmatpush.msrb.mxu1 %v5546_v58  ;;  %v8978_v10 = vpop.eup %8977  ;;  %5745 = vmatpush.msrb.mxu2 %v5560_v7 }
 0x5ba   :  { %v13464_v62 = vadd.f32 1e-05, %v5301_v57  ;;  %v5188_v8 = vadd.f32 %v5187_v60, %v5186_v55  ;;  %v5335_v48 = vmul.f32 %v8978_v10, %v13434_v43  ;;  %vm5341_vm3 = vweird.f32 %v8978_v10  ;;  %v5557_v57 = vld [vmem:[%s13739_s6 + $0x2b8] sm:$0xff] }
 0x5bb   :  { %v5079_v61 = vpop.f32.mrf.mxu2  ;;  %v5092_v30 = vpop.f32.mrf.mxu3  ;;  %v5191_v40 = vadd.f32 %v5190_v0, %v5189_v18  ;;  %5724 = vmatpush.msrb.mxu1 %v5545_v63  ;;  %5746 = vmatpush.msrb.mxu2 %v5559_v36  ;;  %vm5342_vm8 = vmor %vm5340_vm7, %vm5341_vm3  ;;  %v5432_v55 = vperm.slane %v13361_v39, 2  ;;  %v5537_v60 = vld [vmem:[%s13739_s6 + $0x218] sm:$0xff] }
 0x5bc   :  { %8979 = vrsqrt.f32 %v13464_v62  ;;  %v5222_v23 = vmul.f32 %v13140_v49, %v5188_v8  ;;  %v5336_v15 = vmul.f32 %v8978_v10, %v5335_v48  ;;  %v5556_v61 = vld [vmem:[%s13739_s6 + $0x2b0] sm:$0xff]  ;;  %vm5350_vm10 = vweird.f32 %v13464_v62 }
 0x5bd   :  { %v5192_v32 = vrot.slane %v5191_v40, 2  ;;  %5725 = vmatpush.msrb.mxu1 %v5544_v21  ;;  %5747 = vmatpush.msrb.mxu2 %v5558_v34 }
 0x5be   :  { %v13488_v22 = vsub.f32 %v13402_v11, %v5222_v23  ;;  %v5337_v2 = vmul.f32 0.5, %v5336_v15 }
 0x5bf   :  { %v5193_v13 = vadd.f32 %v5192_v32, %v5191_v40  ;;  %5726 = vmatpush.msrb.mxu1 %v5543_v46  ;;  %5748 = vmatpush.msrb.mxu2 %v5557_v57  ;;  %v5433_v32 = vperm.slane %v13361_v39, 3  ;;  %v5550_v57 = vld [vmem:[%s13739_s6 + $0x280] sm:$0xff] }
 0x5c0   :  { %v5238_v50 = vmul.f32 %v13488_v22, %v13488_v22  ;;  %v5338_v59 = vsub.f32 1.5, %v5337_v2 }
 0x5c1   :  { %v5194_v31 = vrot.slane %v5193_v13, 1  ;;  %5727 = vmatpush.msrb.mxu1 %v5542_v19  ;;  %5749 = vmatpush.msrb.mxu2 %v5556_v61  ;;  %v5554_v19 = vld [vmem:[%s13739_s6 + $0x2a0] sm:$0xff]  ;;  %v5576_v61 = vld [vmem:[%s13739_s6 + $0x350] sm:$0xff] }
 0x5c2   :  { %v13498_v26 = vpop.eup %8979  ;;  %v5270_v29 = vsel %vm218_vm2, %v5238_v50, 0.0  ;;  %v5339_v37 = vmul.f32 %v8978_v10, %v5338_v59 }
 0x5c3   :  { %v5195_v11 = vadd.f32 %v5194_v31, %v5193_v13  ;;  %v5345_v42 = vmul.f32 %v13498_v26, %v13464_v62  ;;  %v5271_v28 = vrot.slane %v5270_v29, 4  ;;  %5728 = vmatpush.msrb.mxu1 %v5541_v16  ;;  %vm5351_vm9 = vweird.f32 %v13498_v26  ;;  %v5555_v62 = vld [vmem:[%s13739_s6 + $0x2a8] sm:$0xff] }
 0x5c4   :  { %v5343_v43 = vsel %vm5342_vm8, %v8978_v10, %v5339_v37  ;;  %vm5352_vm11 = vmor %vm5350_vm10, %vm5351_vm9  ;;  %v5536_v10 = vld [vmem:[%s13739_s6 + $0x210] sm:$0xff]  ;;  %5750 = vmatpush.msrb.mxu2 %v5555_v62  ;;  %v5535_v31 = vld [vmem:[%s13739_s6 + $0x208] sm:$0xff]  ;;  %vm5636_vm9 = vcmask 850944  }
 0x5c5   :  { %v5223_v9 = vmul.f32 %v13140_v49, %v5195_v11  ;;  %v5346_v38 = vmul.f32 %v13498_v26, %v5345_v42  ;;  %v5272_v25 = vadd.f32 %v5271_v28, %v5270_v29  ;;  %5729 = vmatpush.msrb.mxu1 %v5540_v33  ;;  %v5396_v14 = vmul.f32 %v5343_v43, %v13330_v52  ;;  %v5534_v42 = vld [vmem:[%s13739_s6 + $0x200] sm:$0xff]  ;;  %v5553_v29 = vld [vmem:[%s13739_s6 + $0x298] sm:$0xff]  ;;  %v5580_v33 = vld [vmem:[%s13739_s6 + $0x370] sm:$0xff] }
 0x5c6   :  { %5751 = vmatpush.msrb.mxu2 %v5554_v19 }
 0x5c7   :  { %v13520_v44 = vsub.f32 %v13437_v6, %v5223_v9  ;;  %v5347_v53 = vmul.f32 0.5, %v5346_v38  ;;  %v5273_v6 = vrot.slane %v5272_v25, 2  ;;  %5730 = vmatpush.msrb.mxu1 %v5539_v47  ;;  %v5422_v52 = vmul.f32 %v5406_v5, %v5396_v14  ;;  %v5552_v5 = vld [vmem:[%s13739_s6 + $0x290] sm:$0xff]  ;;  %v5579_v47 = vld [vmem:[%s13739_s6 + $0x368] sm:$0xff]  ;;  %v5578_v14 = vld [vmem:[%s13739_s6 + $0x360] sm:$0xff] }
 0x5c8   :  { %5752 = vmatpush.msrb.mxu2 %v5553_v29 }
 0x5c9   :  { %v5239_v18 = vmul.f32 %v13520_v44, %v13520_v44  ;;  %v5348_v0 = vsub.f32 1.5, %v5347_v53  ;;  %v5274_v58 = vadd.f32 %v5273_v6, %v5272_v25  ;;  %5731 = vmatpush.msrb.mxu1 %v5538_v51  ;;  %v5448_v63 = vadd.f32 %v5432_v55, %v5422_v52  ;;  %v5551_v53 = vld [vmem:[%s13739_s6 + $0x288] sm:$0xff]  ;;  %v5577_v52 = vld [vmem:[%s13739_s6 + $0x358] sm:$0xff] }
 0x5ca   :  { %v5103_v54 = vpop.f32.mrf.mxu0  ;;  %v5116_v1 = vpop.f32.mrf.mxu1  ;;  %5753 = vmatpush.msrb.mxu2 %v5552_v5  ;;  %v5434_v5 = vperm.slane %v13361_v39, 4 }
 0x5cb   :  { %v5117_v4 = vadd.f32 %v5116_v1, %v5103_v54  ;;  %v5277_v41 = vsel %vm218_vm2, %v5239_v18, 0.0  ;;  %v5349_v30 = vmul.f32 %v13498_v26, %v5348_v0  ;;  %v5275_v8 = vrot.slane %v5274_v58, 1  ;;  %5732 = vmatpush.msrb.mxu1 %v5537_v60 }
 0x5cc   :  { %v5278_v3 = vrot.slane %v5277_v41, 4  ;;  %v5456_v48 = vmul.f32 0.2, %v5448_v63  ;;  %5754 = vmatpush.msrb.mxu2 %v5551_v53 }
 0x5cd   :  { %v13549_v40 = vadd.f32 %v5117_v4, %v13110_v27  ;;  %v5353_v27 = vsel %vm5352_vm11, %v13498_v26, %v5349_v30  ;;  %v5276_v13 = vadd.f32 %v5275_v8, %v5274_v58  ;;  %5733 = vmatpush.msrb.mxu1 %v5536_v10  ;;  %v5594_v8 = vld [vmem:[%s13739_s6 + $0x3e0] sm:$0xff] }
 0x5ce   :  { %v5279_v21 = vadd.f32 %v5278_v3, %v5277_v41  ;;  %v5397_v23 = vmul.f32 %v5353_v27, %v13373_v45  ;;  %v5581_v45 = vld [vmem:[%s13739_s6 + $0x378] sm:$0xff]  ;;  %v5464_v59 = vmax.f32 %v5448_v63, %v5456_v48  ;;  %5755 = vmatpush.msrb.mxu2 %v5550_v57  ;;  %5783 = vmatpush.msrb.mxu0 %v5594_v8 }
 0x5cf   :  { %v5196_v12 = vsel %vm218_vm2, %v13549_v40, 0.0  ;;  %v5302_v16 = vmul.f32 %v5276_v13, %v13140_v49  ;;  %5734 = vmatpush.msrb.mxu1 %v5535_v31  ;;  %5760 = vmatpush.msra.mxu3 %v5581_v45  ;;  %v5592_v13 = vld [vmem:[%s13739_s6 + $0x3d0] sm:$0xff] }
 0x5d0   :  { %v5197_v46 = vrot.slane %v5196_v12, 4  ;;  %v5280_v24 = vrot.slane %v5279_v21, 2  ;;  %v5423_v11 = vmul.f32 %v5407_v56, %v5397_v23  ;;  %5696 = vmatmul.f32.vlgmr.msrb.gmra.mxu3 %v5464_v59  ;;  %v5575_v56 = vld [vmem:[%s13739_s6 + $0x348] sm:$0xff]  ;;  %v5408_v59 = vperm.slane %v13345_v17, 4 }
 0x5d1   :  { %v5129_v20 = vpop.f32.mrf.mxu2  ;;  %v5142_v15 = vpop.f32.mrf.mxu3  ;;  %v13587_v37 = vadd.f32 1e-05, %v5302_v16  ;;  %5735 = vmatpush.msrb.mxu1 %v5534_v42  ;;  %5761 = vmatpush.msra.mxu3 %v5580_v33  ;;  %v5571_v16 = vld [vmem:[%s13739_s6 + $0x328] sm:$0xff] }
 0x5d2   :  { %v5143_v2 = vadd.f32 %v5142_v15, %v5129_v20  ;;  %v5105_v50 = vpop.f32.mrf.mxu0  ;;  %v5118_v26 = vpop.f32.mrf.mxu1  ;;  %v5198_v7 = vadd.f32 %v5197_v46, %v5196_v12  ;;  %v5281_v28 = vadd.f32 %v5280_v24, %v5279_v21  ;;  %v5449_v36 = vadd.f32 %v5433_v32, %v5423_v11  ;;  %v5574_v32 = vld [vmem:[%s13739_s6 + $0x340] sm:$0xff]  ;;  %v5593_v21 = vld [vmem:[%s13739_s6 + $0x3d8] sm:$0xff]  ;;  %v5572_v24 = vld [vmem:[%s13739_s6 + $0x330] sm:$0xff] }
 0x5d3   :  { %8981 = vrsqrt.f32 %v13587_v37  ;;  %5762 = vmatpush.msra.mxu3 %v5579_v47  ;;  %5784 = vmatpush.msrb.mxu0 %v5593_v21  ;;  %v5569_v47 = vld [vmem:[%s13739_s6 + $0x318] sm:$0xff] }
 0x5d4   :  { %v13582_v9 = vadd.f32 %v5143_v2, %v13113_v35  ;;  %v5199_v38 = vrot.slane %v5198_v7, 2  ;;  %v5282_v25 = vrot.slane %v5281_v28, 1  ;;  %v5457_v34 = vmul.f32 0.2, %v5449_v36  ;;  %v5591_v2 = vld [vmem:[%s13739_s6 + $0x3c8] sm:$0xff] }
 0x5d5   :  { %5763 = vmatpush.msra.mxu3 %v5578_v14  ;;  %5785 = vmatpush.msrb.mxu0 %v5592_v13  ;;  %v5568_v14 = vld [vmem:[%s13739_s6 + $0x310] sm:$0xff]  ;;  %v5582_v13 = vld [vmem:[%s13739_s6 + $0x380] sm:$0xff] }
 0x5d6   :  { %v5204_v35 = vsel %vm5203_vm12, %v13582_v9, 0.0  ;;  %v5200_v43 = vadd.f32 %v5199_v38, %v5198_v7  ;;  %v5283_v54 = vadd.f32 %v5282_v25, %v5281_v28  ;;  %v5465_v51 = vmax.f32 %v5449_v36, %v5457_v34  ;;  %v5590_v7 = vld [vmem:[%s13739_s6 + $0x3c0] sm:$0xff]  ;;  %v5588_v34 = vld [vmem:[%s13739_s6 + $0x3b0] sm:$0xff] }
 0x5d7   :  { %v5205_v1 = vrot.slane %v5204_v35, 4  ;;  %5764 = vmatpush.msra.mxu3 %v5577_v52  ;;  %5786 = vmatpush.msrb.mxu0 %v5591_v2  ;;  %v5570_v36 = vld [vmem:[%s13739_s6 + $0x320] sm:$0xff] }
 0x5d8   :  { %v5201_v55 = vrot.slane %v5200_v43, 1  ;;  %v5303_v0 = vmul.f32 %v5283_v54, %v13140_v49  ;;  %5716 = vmatmul.f32.vlgmr.msra.gmra.mxu0 %v5465_v51  ;;  %v5409_v51 = vperm.slane %v13345_v17, 5  ;;  %v5586_v52 = vld [vmem:[%s13739_s6 + $0x3a0] sm:$0xff] }
 0x5d9   :  { %v5131_v6 = vpop.f32.mrf.mxu2  ;;  %v5144_v18 = vpop.f32.mrf.mxu3  ;;  %v5206_v4 = vadd.f32 %v5205_v1, %v5204_v35  ;;  %5765 = vmatpush.msra.mxu3 %v5576_v61  ;;  %5787 = vmatpush.msrb.mxu0 %v5590_v7  ;;  %v5435_v61 = vperm.slane %v13361_v39, 5 }
 0x5da   :  { %v5202_v58 = vadd.f32 %v5201_v55, %v5200_v43  ;;  %v13611_v41 = vadd.f32 1e-05, %v5303_v0  ;;  %v8982_v30 = vpop.eup %8981  ;;  %v5587_v55 = vld [vmem:[%s13739_s6 + $0x3a8] sm:$0xff] }
 0x5db   :  { %v5207_v60 = vrot.slane %v5206_v4, 2  ;;  %v5355_v63 = vmul.f32 %v8982_v30, %v13587_v37  ;;  %5766 = vmatpush.msra.mxu3 %v5575_v56  ;;  %vm5361_vm13 = vweird.f32 %v8982_v30  ;;  %v5585_v56 = vld [vmem:[%s13739_s6 + $0x398] sm:$0xff] }
 0x5dc   :  { %v5224_v3 = vmul.f32 %v13140_v49, %v5202_v58  ;;  %8983 = vrsqrt.f32 %v13611_v41  ;;  %vm5370_vm15 = vweird.f32 %v13611_v41 }
 0x5dd   :  { %v5208_v62 = vadd.f32 %v5207_v60, %v5206_v4  ;;  %v5356_v27 = vmul.f32 %v8982_v30, %v5355_v63  ;;  %5767 = vmatpush.msra.mxu3 %v5574_v32  ;;  %v5567_v4 = vld [vmem:[%s13739_s6 + $0x308] sm:$0xff]  ;;  %v5566_v63 = vld [vmem:[%s13739_s6 + $0x300] sm:$0xff] }
 0x5de   :  { %v13626_v10 = vsub.f32 %v13549_v40, %v5224_v3  ;;  %v5573_v40 = vld [vmem:[%s13739_s6 + $0x338] sm:$0xff] }
 0x5df   :  { %v5209_v48 = vrot.slane %v5208_v62, 1  ;;  %v5357_v23 = vmul.f32 0.5, %v5356_v27  ;;  %5768 = vmatpush.msra.mxu3 %v5573_v40 }
 0x5e0   :  { %v5240_v12 = vmul.f32 %v13626_v10, %v13626_v10 }
 0x5e1   :  { %v5210_v20 = vadd.f32 %v5209_v48, %v5208_v62  ;;  %v5358_v31 = vsub.f32 1.5, %v5357_v23  ;;  %5769 = vmatpush.msra.mxu3 %v5572_v24  ;;  %v5583_v48 = vld [vmem:[%s13739_s6 + $0x388] sm:$0xff] }
 0x5e2   :  { %v5284_v46 = vsel %vm218_vm2, %v5240_v12, 0.0  ;;  %v8984_v15 = vpop.eup %8983  ;;  %vm5360_vm2 = vweird.f32 %v13587_v37  ;;  %v5589_v37 = vld [vmem:[%s13739_s6 + $0x3b8] sm:$0xff] }
 0x5e3   :  { %v5285_v19 = vrot.slane %v5284_v46, 4  ;;  %v5365_v50 = vmul.f32 %v8984_v15, %v13611_v41  ;;  %v5225_v26 = vmul.f32 %v13140_v49, %v5210_v20  ;;  %v5359_v45 = vmul.f32 %v8982_v30, %v5358_v31  ;;  %vm5362_vm1 = vmor %vm5360_vm2, %vm5361_vm13  ;;  %5770 = vmatpush.msra.mxu3 %v5571_v16  ;;  %5788 = vmatpush.msrb.mxu0 %v5589_v37 }
 0x5e4   :  { %vm5371_vm14 = vweird.f32 %v8984_v15  ;;  %v5410_v16 = vperm.slane %v13345_v17, 6 }
 0x5e5   :  { %v5286_v11 = vadd.f32 %v5285_v19, %v5284_v46  ;;  %v5366_v42 = vmul.f32 %v8984_v15, %v5365_v50  ;;  %v13660_v29 = vsub.f32 %v13582_v9, %v5225_v26  ;;  %v5363_v28 = vsel %vm5362_vm1, %v8982_v30, %v5359_v45  ;;  %5771 = vmatpush.msra.mxu3 %v5570_v36  ;;  %vm5372_vm0 = vmor %vm5370_vm15, %vm5371_vm14 }
 0x5e6   :  { %v5398_v38 = vmul.f32 %v5363_v28, %v13488_v22  ;;  %5789 = vmatpush.msrb.mxu0 %v5588_v34 }
 0x5e7   :  { %v5287_v33 = vrot.slane %v5286_v11, 2  ;;  %v5367_v25 = vmul.f32 0.5, %v5366_v42  ;;  %v5241_v9 = vmul.f32 %v13660_v29, %v13660_v29  ;;  %5772 = vmatpush.msra.mxu3 %v5569_v47  ;;  %v5436_v42 = vperm.slane %v13361_v39, 6 }
 0x5e8   :  { %v5424_v43 = vmul.f32 %v5408_v59, %v5398_v38  ;;  %5790 = vmatpush.msrb.mxu0 %v5587_v55  ;;  %v5437_v47 = vperm.slane %v13361_v39, 7 }
 0x5e9   :  { %v5288_v35 = vadd.f32 %v5287_v33, %v5286_v11  ;;  %v5368_v53 = vsub.f32 1.5, %v5367_v25  ;;  %v5291_v22 = vsel %vm5203_vm12, %v5241_v9, 0.0  ;;  %5773 = vmatpush.msra.mxu3 %v5568_v14  ;;  %v5411_v25 = vperm.slane %v13345_v17, 7 }
 0x5ea   :  { %v5292_v1 = vrot.slane %v5291_v22, 4  ;;  %v5450_v6 = vadd.f32 %v5434_v5, %v5424_v43  ;;  %5791 = vmatpush.msrb.mxu0 %v5586_v52 }
 0x5eb   :  { %v5289_v54 = vrot.slane %v5288_v35, 1  ;;  %v5369_v18 = vmul.f32 %v8984_v15, %v5368_v53  ;;  %5774 = vmatpush.msra.mxu3 %v5567_v4 }
 0x5ec   :  { %v5293_v0 = vadd.f32 %v5292_v1, %v5291_v22  ;;  %v5458_v58 = vmul.f32 0.2, %v5450_v6  ;;  %5792 = vmatpush.msrb.mxu0 %v5585_v56 }
 0x5ed   :  { %v5290_v57 = vadd.f32 %v5289_v54, %v5288_v35  ;;  %v5373_v60 = vsel %vm5372_vm0, %v8984_v15, %v5369_v18  ;;  %5775 = vmatpush.msra.mxu3 %v5566_v63 }
 0x5ee   :  { %v5399_v41 = vmul.f32 %v5373_v60, %v13520_v44  ;;  %v5294_v3 = vrot.slane %v5293_v0, 2  ;;  %v5466_v8 = vmax.f32 %v5450_v6, %v5458_v58  ;;  %v5584_v44 = vld [vmem:[%s13739_s6 + $0x390] sm:$0xff]  ;;  %v8952_v60 = vld [vmem:[%s13744_s8] ss:$0 sm:$0xff] }
 0x5ef   :  { %v5304_v30 = vmul.f32 %v5290_v57, %v13140_v49  ;;  %5793 = vmatpush.msrb.mxu0 %v5584_v44 }
 0x5f0   :  { %v5425_v62 = vmul.f32 %v5409_v51, %v5399_v41  ;;  %v5295_v32 = vadd.f32 %v5294_v3, %v5293_v0  ;;  %5736 = vmatmul.f32.vlgmr.msrb.gmra.mxu1 %v5466_v8 }
 0x5f1   :  { %v5312_v27 = vadd.f32 1e-05, %v5304_v30  ;;  %5794 = vmatpush.msrb.mxu0 %v5583_v48 }
 0x5f2   :  { %v5451_v21 = vadd.f32 %v5435_v61, %v5425_v62  ;;  %v5296_v12 = vrot.slane %v5295_v32, 1 }
 0x5f3   :  { %8985 = vrsqrt.f32 %v5312_v27  ;;  %5795 = vmatpush.msrb.mxu0 %v5582_v13  ;;  %vm5380_vm5 = vweird.f32 %v5312_v27 }
 0x5f4   :  { %v5459_v23 = vmul.f32 0.2, %v5451_v21  ;;  %v5297_v40 = vadd.f32 %v5296_v12, %v5295_v32 }
 0x5f6   :  { %v5305_v46 = vmul.f32 %v5297_v40, %v13140_v49  ;;  %v5467_v20 = vmax.f32 %v5451_v21, %v5459_v23 }
 0x5f8   :  { %v5313_v31 = vadd.f32 1e-05, %v5305_v46  ;;  %5756 = vmatmul.f32.vlgmr.msrb.gmra.mxu2 %v5467_v20 }
 0x5f9   :  { %v8986_v15 = vpop.eup %8985 }
 0x5fa   :  { %v5375_v19 = vmul.f32 %v8986_v15, %v5312_v27  ;;  %8987 = vrsqrt.f32 %v5313_v31  ;;  %vm5381_vm4 = vweird.f32 %v8986_v15  ;;  %vm5390_vm7 = vweird.f32 %v5313_v31 }
 0x5fb   :  { %vm5382_vm6 = vmor %vm5380_vm5, %vm5381_vm4 }
 0x5fc   :  { %v5376_v24 = vmul.f32 %v8986_v15, %v5375_v19 }
 0x5fe   :  { %v5377_v2 = vmul.f32 0.5, %v5376_v24 }
 0x600   :  { %v5378_v50 = vsub.f32 1.5, %v5377_v2  ;;  %v8988_v26 = vpop.eup %8987 }
 0x601   :  { %v5385_v11 = vmul.f32 %v8988_v26, %v5313_v31  ;;  %vm5391_vm3 = vweird.f32 %v8988_v26 }
 0x602   :  { %v5379_v45 = vmul.f32 %v8986_v15, %v5378_v50  ;;  %vm5392_vm8 = vmor %vm5390_vm7, %vm5391_vm3 }
 0x603   :  { %v5386_v59 = vmul.f32 %v8988_v26, %v5385_v11 }
 0x604   :  { %v5383_v7 = vsel %vm5382_vm6, %v8986_v15, %v5379_v45 }
 0x605   :  { %v5400_v49 = vmul.f32 %v5383_v7, %v13626_v10  ;;  %v5387_v28 = vmul.f32 0.5, %v5386_v59 }
 0x607   :  { %v5426_v33 = vmul.f32 %v5410_v16, %v5400_v49  ;;  %v5388_v36 = vsub.f32 1.5, %v5387_v28 }
 0x609   :  { %v5452_v37 = vadd.f32 %v5436_v42, %v5426_v33  ;;  %v5389_v38 = vmul.f32 %v8988_v26, %v5388_v36 }
 0x60b   :  { %v5460_v5 = vmul.f32 0.2, %v5452_v37  ;;  %v5393_v9 = vsel %vm5392_vm8, %v8988_v26, %v5389_v38 }
 0x60c   :  { %v5401_v35 = vmul.f32 %v5393_v9, %v13660_v29 }
 0x60d   :  { %v5468_v34 = vmax.f32 %v5452_v37, %v5460_v5  ;;  %v5633_v54 = vpop.f32.mrf.mxu0 }
 0x60e   :  { %v5427_v10 = vmul.f32 %v5411_v25, %v5401_v35 }
 0x60f   :  { %5776 = vmatmul.f32.vlgmr.msra.gmra.mxu3 %v5468_v34 }
 0x610   :  { %v5453_v43 = vadd.f32 %v5437_v47, %v5427_v10 }
 0x612   :  { %v5461_v53 = vmul.f32 0.2, %v5453_v43 }
 0x614   :  { %v5469_v22 = vmax.f32 %v5453_v43, %v5461_v53 }
 0x616   :  { %8422 = vmatmul.msk.f32.vlgmr.msrb.gmra.mxu0 %vm5636_vm9, %v5469_v22 }
 0x62d   :  { %v5657_v1 = vpop.f32.mrf.mxu1 }
 0x62e   :  { %v5658_v55 = vadd.f32 %v5657_v1, %v5633_v54 }
 0x63b   :  { %v5677_v14 = vpop.f32.mrf.mxu2 }
 0x63c   :  { %v5678_v18 = vadd.f32 %v5677_v14, %v5658_v55 }
 0x653   :  { %v5697_v6 = vpop.f32.mrf.mxu3 }
 0x654   :  { %v5698_v17 = vadd.f32 %v5697_v6, %v5678_v18 }
 0x655   :  { %v5717_v51 = vpop.f32.mrf.mxu0 }
 0x656   :  { %v5718_v29 = vadd.f32 %v5717_v51, %v5698_v17 }
 0x66d   :  { %v5737_v57 = vpop.f32.mrf.mxu1 }
 0x66e   :  { %v5738_v39 = vadd.f32 %v5737_v57, %v5718_v29 }
 0x67b   :  { %v5757_v0 = vpop.f32.mrf.mxu2 }
 0x67c   :  { %v5758_v4 = vadd.f32 %v5757_v0, %v5738_v39 }
 0x692   :  { %v5777_v52 = vpop.f32.mrf.mxu3 }
 0x693   :  { %v5778_v58 = vadd.f32 %v5777_v52, %v5758_v4  ;;  %v5797_v41 = vpop.f32.mrf.mxu0 }
 0x695   :  { %v5798_v61 = vadd.f32 %v5797_v41, %v5778_v58 }
 0x697   :  { %v5804_v30 = vadd.f32 %v8952_v60, %v5798_v61 }
 0x699   :  { %5805 = vst [vmem:[%s13745_s21] sm:$0x3] %v5804_v30 }

</bundles_post_ra>
